<compile_context>
chip_gen: v6e
topology: v6e:2x2x1
jax: 0.10.0
libtpu: 0.0.40
codegen_flags: <defaults>
</compile_context>

<pallas_src>
import functools

import jax
import jax.numpy as jnp
from jax.experimental import pallas as pl
from jax.experimental.pallas import tpu as pltpu


# -----------------------------------------------------------------------------
# Pallas kernel: tiled matmul + bias + ReLU + per-channel stats
# -----------------------------------------------------------------------------
def _conv_bn_stats_kernel(p_ref, w_ref, b_ref, y_ref, s_ref, *,
                          m_valid, need_mask):
    """grid = (M_tiles, C_tiles, K_tiles); K (last axis) is the reduction.

    The f32 output block y_ref is the accumulator (its block index is constant
    across K).  Finalize adds bias, applies ReLU in place and writes rows 0/1
    of s_ref with per-channel sum / sum-of-squares of the post-ReLU tile
    (padded rows masked out).
    """
    k = pl.program_id(2)

    @pl.when(k == 0)
    def _():
        y_ref[...] = jnp.zeros_like(y_ref)

    y_ref[...] += jnp.dot(p_ref[...], w_ref[...],
                          preferred_element_type=jnp.float32)

    @pl.when(k == pl.num_programs(2) - 1)
    def _():
        y = jnp.maximum(y_ref[...] + b_ref[...], 0.0)   # bias + ReLU (f32)
        y_ref[...] = y
        if need_mask:
            tm = y.shape[0]
            row = (pl.program_id(0) * tm
                   + jax.lax.broadcasted_iota(jnp.int32, (tm, 1), 0))
            y = jnp.where(row < m_valid, y, 0.0)
        s_ref[0:1, :] = jnp.sum(y, axis=0, keepdims=True)
        s_ref[1:2, :] = jnp.sum(y * y, axis=0, keepdims=True)
        # rows 2..7 of the stats tile are never read.


# -----------------------------------------------------------------------------
# Wrapper around pallas_call
# -----------------------------------------------------------------------------
def _round_up(x, m):
    return (x + m - 1) // m * m


def conv_matmul_stats(patches, w, b):
    """patches [M, K] (bf16) @ w [K, C] + b, ReLU, per-channel sum/sumsq.

    Returns (y [Mp, Cp] f32, stats [8*Mt, Cp] f32, Mt, Cp).
    """
    M, K = patches.shape
    C = w.shape[1]

    # Tile sizes: 256-wide K/C tiles when the extent allows (v6e/v7x MXU is
    # 256x256); M tiled at <=512 rows so blocks stay far below VMEM limits.
    KT = 256 if _round_up(K, 128) >= 256 else 128
    CT = 256 if _round_up(C, 128) >= 256 else 128
    TM_MAX = 512
    TM = _round_up(M, 8) if M <= TM_MAX else TM_MAX
    Kp = _round_up(K, KT)
    Cp = _round_up(C, CT)
    Mp = _round_up(M, TM)

    patches = patches.astype(jnp.bfloat16)
    if Kp != K or Mp != M:
        patches = jnp.pad(patches, ((0, Mp - M), (0, Kp - K)))
    w = w.astype(jnp.bfloat16)
    if Kp != K or Cp != C:
        w = jnp.pad(w, ((0, Kp - K), (0, Cp - C)))
        b = jnp.pad(b, (0, Cp - C))
    b2 = b.reshape(1, Cp).astype(jnp.float32)

    Mt, Ct, Kt = Mp // TM, Cp // CT, Kp // KT
    need_mask = (Mp != M)

    y, stats = pl.pallas_call(
        functools.partial(_conv_bn_stats_kernel,
                          m_valid=M, need_mask=need_mask),
        out_shape=(jax.ShapeDtypeStruct((Mp, Cp), jnp.float32),
                   jax.ShapeDtypeStruct((8 * Mt, Cp), jnp.float32)),
        grid_spec=pltpu.PrefetchScalarGridSpec(
            num_scalar_prefetch=0,
            grid=(Mt, Ct, Kt),
            in_specs=[
                pl.BlockSpec((TM, KT), lambda m, c, k: (m, k)),
                pl.BlockSpec((KT, CT), lambda m, c, k: (k, c)),
                pl.BlockSpec((1, CT), lambda m, c, k: (0, c)),
            ],
            out_specs=[
                pl.BlockSpec((TM, CT), lambda m, c, k: (m, c)),
                pl.BlockSpec((8, CT), lambda m, c, k: (m, c)),
            ],
        ),
        compiler_params=pltpu.CompilerParams(
            dimension_semantics=("parallel", "parallel", "arbitrary"),
            vmem_limit_bytes=48 * 1024 * 1024),
    )(patches, w, b2)
    return y, stats, Mt, Cp


# -----------------------------------------------------------------------------
# im2col glue (plain JAX, pure data movement)
# -----------------------------------------------------------------------------
def im2col(x, kh, kw, stride, pad):
    """x: [N, H, W, C] -> patches [N*Ho*Wo, kh*kw*C] (kh-major, kw, C-minor)."""
    N, H, W, C = x.shape
    Ho = (H + 2 * pad - kh) // stride + 1
    Wo = (W + 2 * pad - kw) // stride + 1
    xp = jnp.pad(x, ((0, 0), (pad, pad), (pad, pad), (0, 0)))
    cols = []
    for i in range(kh):
        for j in range(kw):
            cols.append(xp[:, i:i + stride * Ho:stride,
                           j:j + stride * Wo:stride, :])
    p = jnp.stack(cols, axis=3)  # [N, Ho, Wo, kh*kw, C]
    return p.reshape(N * Ho * Wo, kh * kw * C), Ho, Wo


# -----------------------------------------------------------------------------
# Encoder definition (architecture from the PyTorch module)
# -----------------------------------------------------------------------------
# (cin, cout, k, stride, pad)
ENC_CFG = [
    (1, 48, 5, 2, 2),        # down1
    (48, 128, 3, 1, 1),      # flat1
    (128, 128, 3, 1, 1),     # flat2
    (128, 128, 3, 2, 1),     # down2
    (128, 256, 3, 1, 1),     # flat3
    (256, 256, 3, 1, 1),     # flat4
    (256, 256, 3, 2, 1),     # down3
    (256, 512, 3, 1, 1),     # flat5
    (512, 1024, 3, 1, 1),    # flat6
    (1024, 1024, 3, 1, 1),   # flat7
    (1024, 1024, 3, 1, 1),   # flat8
    (1024, 1024, 3, 1, 1),   # flat9
    (1024, 512, 3, 1, 1),    # flat10
    (512, 256, 3, 1, 1),     # flat11
]


def make_params(key):
    """Deterministic init, mimicking PyTorch Conv2d default U(-1/sqrt(fan_in),.)."""
    params = []
    for (cin, cout, k, _s, _p) in ENC_CFG:
        key, kw_, kb_ = jax.random.split(key, 3)
        fan_in = cin * k * k
        bound = 1.0 / jnp.sqrt(float(fan_in))
        # torch layout [Cout, Cin, kh, kw] -> [kh, kw, Cin, Cout] -> [K, Cout]
        w_t = jax.random.uniform(kw_, (cout, cin, k, k), jnp.float32,
                                 -bound, bound)
        w_mm = jnp.transpose(w_t, (2, 3, 1, 0)).reshape(k * k * cin, cout)
        b = jax.random.uniform(kb_, (cout,), jnp.float32, -bound, bound)
        params.append({
            "w": w_mm, "b": b,
            "gamma": jnp.ones((cout,), jnp.float32),   # BatchNorm2d defaults
            "beta": jnp.zeros((cout,), jnp.float32),
        })
    return params


@jax.jit
def encoder_forward(x_nchw, params):
    # NCHW -> NHWC; inter-layer activations stored in bf16.
    x = jnp.transpose(x_nchw, (0, 2, 3, 1)).astype(jnp.bfloat16)
    n_layers = len(ENC_CFG)
    for idx, (cfg, p) in enumerate(zip(ENC_CFG, params)):
        cin, cout, k, s, pad = cfg
        N = x.shape[0]
        patches, Ho, Wo = im2col(x, k, k, s, pad)
        M = patches.shape[0]

        # Conv + bias + ReLU + per-channel stats (Pallas kernel).
        y, stats, Mt, Cp = conv_matmul_stats(patches, p["w"], p["b"])

        # Training-mode BatchNorm over the post-ReLU activations (f32 math).
        st = stats.reshape(Mt, 8, Cp)
        ssum = jnp.sum(st[:, 0, :cout], axis=0)
        ssq = jnp.sum(st[:, 1, :cout], axis=0)
        mean = ssum / M
        var = jnp.maximum(ssq / M - mean * mean, 0.0)      # biased variance
        a = p["gamma"] * jax.lax.rsqrt(var + 1e-5)
        bshift = p["beta"] - mean * a

        # BN affine as plain JAX: XLA fuses it with the next layer's im2col
        # gather, avoiding a dedicated elementwise pallas_call round trip.
        out_dtype = jnp.float32 if idx == n_layers - 1 else jnp.bfloat16
        yv = y[:M, :cout]
        x = (yv * a + bshift).astype(out_dtype).reshape(N, Ho, Wo, cout)
    return jnp.transpose(x, (0, 3, 1, 2))  # back to NCHW


# -----------------------------------------------------------------------------
if __name__ == "__main__":
    key = jax.random.PRNGKey(0)
    kx, kp = jax.random.split(key)
    # Small input consistent with the module: 1-channel image, NCHW.
    x = jax.random.normal(kx, (2, 1, 16, 16), jnp.float32)
    params = make_params(kp)

    out = encoder_forward(x, params)
    out = jax.block_until_ready(out)

    # 16x16 -> 8x8 (down1) -> 4x4 (down2) -> 2x2 (down3); final channels 256.
    assert out.shape == (2, 256, 2, 2), out.shape
    assert bool(jnp.all(jnp.isfinite(out)))
    print("KERNEL_OK")
</pallas_src>

<mosaic_0001>
module attributes {stable_mosaic.version = 11 : i64} {
  func.func @_conv_bn_stats_kernel(%arg0: i32, %arg1: i32, %arg2: i32, %arg3: memref<128x128xbf16, #tpu.memory_space<vmem>>, %arg4: memref<128x128xbf16, #tpu.memory_space<vmem>>, %arg5: memref<1x128xf32, #tpu.memory_space<vmem>>, %arg6: memref<128x128xf32, #tpu.memory_space<vmem>>, %arg7: memref<8x128xf32, #tpu.memory_space<vmem>>) attributes {dimension_semantics = [#tpu.dimension_semantics<parallel>, #tpu.dimension_semantics<parallel>, #tpu.dimension_semantics<arbitrary>], iteration_bounds = array<i64: 1, 1, 1>, scalar_prefetch = 0 : i64, scratch_operands = 0 : i64, tpu.core_type = #tpu.core_type<tc>, window_params = [{transform_indices = @transform_0, window_bounds = array<i64: 128, 128>}, {transform_indices = @transform_1, window_bounds = array<i64: 128, 128>}, {transform_indices = @transform_2, window_bounds = array<i64: 1, 128>}, {transform_indices = @transform_3, window_bounds = array<i64: 128, 128>}, {transform_indices = @transform_4, window_bounds = array<i64: 8, 128>}]} {
    %c0_i32 = arith.constant 0 : i32
    %0 = arith.cmpi eq, %arg2, %c0_i32 : i32
    %1 = arith.extui %0 : i1 to i32
    %c0_i32_0 = arith.constant 0 : i32
    %2 = arith.cmpi ne, %1, %c0_i32_0 : i32
    scf.if %2 {
      %cst_10 = arith.constant 0.000000e+00 : f32
      %12 = vector.broadcast %cst_10 : f32 to vector<128x128xf32>
      %c0_11 = arith.constant 0 : index
      %c0_12 = arith.constant 0 : index
      %13 = vector.load %arg6[%c0_11, %c0_12] : memref<128x128xf32, #tpu.memory_space<vmem>>, vector<128x128xf32>
      tpu.vector_store %arg6[%c0_11, %c0_12], %12 {strides = array<i32>} : memref<128x128xf32, #tpu.memory_space<vmem>>, vector<128x128xf32>,
    } else {
    }
    %c0 = arith.constant 0 : index
    %c0_1 = arith.constant 0 : index
    %3 = vector.load %arg6[%c0, %c0_1] : memref<128x128xf32, #tpu.memory_space<vmem>>, vector<128x128xf32>
    %c0_2 = arith.constant 0 : index
    %c0_3 = arith.constant 0 : index
    %4 = vector.load %arg3[%c0_2, %c0_3] : memref<128x128xbf16, #tpu.memory_space<vmem>>, vector<128x128xbf16>
    %c0_4 = arith.constant 0 : index
    %c0_5 = arith.constant 0 : index
    %5 = vector.load %arg4[%c0_4, %c0_5] : memref<128x128xbf16, #tpu.memory_space<vmem>>, vector<128x128xbf16>
    %cst = arith.constant dense<0.000000e+00> : vector<128x128xf32>
    %6 = tpu.matmul %4, %5, %cst {dimension_numbers = #tpu.dot_dimension_numbers<[1], [0], [0], [1], [0, 0, 1, 1], [], []>} : vector<128x128xbf16>, vector<128x128xbf16>, vector<128x128xf32> -> vector<128x128xf32>
    %7 = arith.addf %3, %6 : vector<128x128xf32>
    %c0_6 = arith.constant 0 : index
    %c0_7 = arith.constant 0 : index
    %8 = vector.load %arg6[%c0_6, %c0_7] : memref<128x128xf32, #tpu.memory_space<vmem>>, vector<128x128xf32>
    tpu.vector_store %arg6[%c0_6, %c0_7], %7 {strides = array<i32>} : memref<128x128xf32, #tpu.memory_space<vmem>>, vector<128x128xf32>,
    %c0_i32_8 = arith.constant 0 : i32
    %9 = arith.cmpi eq, %arg2, %c0_i32_8 : i32
    %10 = arith.extui %9 : i1 to i32
    %c0_i32_9 = arith.constant 0 : i32
    %11 = arith.cmpi ne, %10, %c0_i32_9 : i32
    scf.if %11 {
      %c0_10 = arith.constant 0 : index
      %c0_11 = arith.constant 0 : index
      %12 = vector.load %arg6[%c0_10, %c0_11] : memref<128x128xf32, #tpu.memory_space<vmem>>, vector<128x128xf32>
      %c0_12 = arith.constant 0 : index
      %c0_13 = arith.constant 0 : index
      %13 = vector.load %arg5[%c0_12, %c0_13] : memref<1x128xf32, #tpu.memory_space<vmem>>, vector<1x128xf32>
      %14 = vector.broadcast %13 : vector<1x128xf32> to vector<128x128xf32>
      %15 = arith.addf %12, %14 : vector<128x128xf32>
      %cst_14 = arith.constant 0.000000e+00 : f32
      %16 = vector.broadcast %cst_14 : f32 to vector<128x128xf32>
      %17 = arith.maximumf %15, %16 : vector<128x128xf32>
      %c0_15 = arith.constant 0 : index
      %c0_16 = arith.constant 0 : index
      %18 = vector.load %arg6[%c0_15, %c0_16] : memref<128x128xf32, #tpu.memory_space<vmem>>, vector<128x128xf32>
      tpu.vector_store %arg6[%c0_15, %c0_16], %17 {strides = array<i32>} : memref<128x128xf32, #tpu.memory_space<vmem>>, vector<128x128xf32>,
      %cst_17 = arith.constant dense<0.000000e+00> : vector<128xf32>
      %19 = vector.multi_reduction <add>, %17, %cst_17 [0] : vector<128x128xf32> to vector<128xf32>
      %20 = vector.shape_cast %19 : vector<128xf32> to vector<1x128xf32>
      %c0_18 = arith.constant 0 : index
      %c0_19 = arith.constant 0 : index
      %21 = vector.load %arg7[%c0_18, %c0_19] : memref<8x128xf32, #tpu.memory_space<vmem>>, vector<1x128xf32>
      tpu.vector_store %arg7[%c0_18, %c0_19], %20 {strides = array<i32>} : memref<8x128xf32, #tpu.memory_space<vmem>>, vector<1x128xf32>,
      %22 = arith.mulf %17, %17 : vector<128x128xf32>
      %cst_20 = arith.constant dense<0.000000e+00> : vector<128xf32>
      %23 = vector.multi_reduction <add>, %22, %cst_20 [0] : vector<128x128xf32> to vector<128xf32>
      %24 = vector.shape_cast %23 : vector<128xf32> to vector<1x128xf32>
      %c1 = arith.constant 1 : index
      %c0_21 = arith.constant 0 : index
      %25 = vector.load %arg7[%c1, %c0_21] : memref<8x128xf32, #tpu.memory_space<vmem>>, vector<1x128xf32>
      tpu.vector_store %arg7[%c1, %c0_21], %24 {strides = array<i32>} : memref<8x128xf32, #tpu.memory_space<vmem>>, vector<1x128xf32>,
    } else {
    }
    return
  }
  func.func @transform_0(%arg0: i32, %arg1: i32, %arg2: i32) -> (i32, i32) {
    %c0_i32 = arith.constant 0 : i32
    return %arg0, %arg2 : i32, i32
  }
  func.func @transform_1(%arg0: i32, %arg1: i32, %arg2: i32) -> (i32, i32) {
    %c0_i32 = arith.constant 0 : i32
    return %arg2, %arg1 : i32, i32
  }
  func.func @transform_2(%arg0: i32, %arg1: i32, %arg2: i32) -> (i32, i32) {
    %c0_i32 = arith.constant 0 : i32
    %c0_i32_0 = arith.constant 0 : i32
    return %c0_i32, %arg1 : i32, i32
  }
  func.func @transform_3(%arg0: i32, %arg1: i32, %arg2: i32) -> (i32, i32) {
    %c0_i32 = arith.constant 0 : i32
    return %arg0, %arg1 : i32, i32
  }
  func.func @transform_4(%arg0: i32, %arg1: i32, %arg2: i32) -> (i32, i32) {
    %c0_i32 = arith.constant 0 : i32
    return %arg0, %arg1 : i32, i32
  }
}

module attributes {stable_mosaic.version = 11 : i64} {
  func.func @_conv_bn_stats_kernel(%arg0: i32, %arg1: i32, %arg2: i32, %arg3: memref<128x256xbf16, #tpu.memory_space<vmem>>, %arg4: memref<256x128xbf16, #tpu.memory_space<vmem>>, %arg5: memref<1x128xf32, #tpu.memory_space<vmem>>, %arg6: memref<128x128xf32, #tpu.memory_space<vmem>>, %arg7: memref<8x128xf32, #tpu.memory_space<vmem>>) attributes {dimension_semantics = [#tpu.dimension_semantics<parallel>, #tpu.dimension_semantics<parallel>, #tpu.dimension_semantics<arbitrary>], iteration_bounds = array<i64: 1, 1, 2>, scalar_prefetch = 0 : i64, scratch_operands = 0 : i64, tpu.core_type = #tpu.core_type<tc>, window_params = [{transform_indices = @transform_0, window_bounds = array<i64: 128, 256>}, {transform_indices = @transform_1, window_bounds = array<i64: 256, 128>}, {transform_indices = @transform_2, window_bounds = array<i64: 1, 128>}, {transform_indices = @transform_3, window_bounds = array<i64: 128, 128>}, {transform_indices = @transform_4, window_bounds = array<i64: 8, 128>}]} {
    %c0_i32 = arith.constant 0 : i32
    %0 = arith.cmpi eq, %arg2, %c0_i32 : i32
    %1 = arith.extui %0 : i1 to i32
    %c0_i32_0 = arith.constant 0 : i32
    %2 = arith.cmpi ne, %1, %c0_i32_0 : i32
    scf.if %2 {
      %cst_9 = arith.constant 0.000000e+00 : f32
      %12 = vector.broadcast %cst_9 : f32 to vector<128x128xf32>
      %c0_10 = arith.constant 0 : index
      %c0_11 = arith.constant 0 : index
      %13 = vector.load %arg6[%c0_10, %c0_11] : memref<128x128xf32, #tpu.memory_space<vmem>>, vector<128x128xf32>
      tpu.vector_store %arg6[%c0_10, %c0_11], %12 {strides = array<i32>} : memref<128x128xf32, #tpu.memory_space<vmem>>, vector<128x128xf32>,
    } else {
    }
    %c0 = arith.constant 0 : index
    %c0_1 = arith.constant 0 : index
    %3 = vector.load %arg6[%c0, %c0_1] : memref<128x128xf32, #tpu.memory_space<vmem>>, vector<128x128xf32>
    %c0_2 = arith.constant 0 : index
    %c0_3 = arith.constant 0 : index
    %4 = vector.load %arg3[%c0_2, %c0_3] : memref<128x256xbf16, #tpu.memory_space<vmem>>, vector<128x256xbf16>
    %c0_4 = arith.constant 0 : index
    %c0_5 = arith.constant 0 : index
    %5 = vector.load %arg4[%c0_4, %c0_5] : memref<256x128xbf16, #tpu.memory_space<vmem>>, vector<256x128xbf16>
    %cst = arith.constant dense<0.000000e+00> : vector<128x128xf32>
    %6 = tpu.matmul %4, %5, %cst {dimension_numbers = #tpu.dot_dimension_numbers<[1], [0], [0], [1], [0, 0, 1, 1], [], []>} : vector<128x256xbf16>, vector<256x128xbf16>, vector<128x128xf32> -> vector<128x128xf32>
    %7 = arith.addf %3, %6 : vector<128x128xf32>
    %c0_6 = arith.constant 0 : index
    %c0_7 = arith.constant 0 : index
    %8 = vector.load %arg6[%c0_6, %c0_7] : memref<128x128xf32, #tpu.memory_space<vmem>>, vector<128x128xf32>
    tpu.vector_store %arg6[%c0_6, %c0_7], %7 {strides = array<i32>} : memref<128x128xf32, #tpu.memory_space<vmem>>, vector<128x128xf32>,
    %c1_i32 = arith.constant 1 : i32
    %9 = arith.cmpi eq, %arg2, %c1_i32 : i32
    %10 = arith.extui %9 : i1 to i32
    %c0_i32_8 = arith.constant 0 : i32
    %11 = arith.cmpi ne, %10, %c0_i32_8 : i32
    scf.if %11 {
      %c0_9 = arith.constant 0 : index
      %c0_10 = arith.constant 0 : index
      %12 = vector.load %arg6[%c0_9, %c0_10] : memref<128x128xf32, #tpu.memory_space<vmem>>, vector<128x128xf32>
      %c0_11 = arith.constant 0 : index
      %c0_12 = arith.constant 0 : index
      %13 = vector.load %arg5[%c0_11, %c0_12] : memref<1x128xf32, #tpu.memory_space<vmem>>, vector<1x128xf32>
      %14 = vector.broadcast %13 : vector<1x128xf32> to vector<128x128xf32>
      %15 = arith.addf %12, %14 : vector<128x128xf32>
      %cst_13 = arith.constant 0.000000e+00 : f32
      %16 = vector.broadcast %cst_13 : f32 to vector<128x128xf32>
      %17 = arith.maximumf %15, %16 : vector<128x128xf32>
      %c0_14 = arith.constant 0 : index
      %c0_15 = arith.constant 0 : index
      %18 = vector.load %arg6[%c0_14, %c0_15] : memref<128x128xf32, #tpu.memory_space<vmem>>, vector<128x128xf32>
      tpu.vector_store %arg6[%c0_14, %c0_15], %17 {strides = array<i32>} : memref<128x128xf32, #tpu.memory_space<vmem>>, vector<128x128xf32>,
      %cst_16 = arith.constant dense<0.000000e+00> : vector<128xf32>
      %19 = vector.multi_reduction <add>, %17, %cst_16 [0] : vector<128x128xf32> to vector<128xf32>
      %20 = vector.shape_cast %19 : vector<128xf32> to vector<1x128xf32>
      %c0_17 = arith.constant 0 : index
      %c0_18 = arith.constant 0 : index
      %21 = vector.load %arg7[%c0_17, %c0_18] : memref<8x128xf32, #tpu.memory_space<vmem>>, vector<1x128xf32>
      tpu.vector_store %arg7[%c0_17, %c0_18], %20 {strides = array<i32>} : memref<8x128xf32, #tpu.memory_space<vmem>>, vector<1x128xf32>,
      %22 = arith.mulf %17, %17 : vector<128x128xf32>
      %cst_19 = arith.constant dense<0.000000e+00> : vector<128xf32>
      %23 = vector.multi_reduction <add>, %22, %cst_19 [0] : vector<128x128xf32> to vector<128xf32>
      %24 = vector.shape_cast %23 : vector<128xf32> to vector<1x128xf32>
      %c1 = arith.constant 1 : index
      %c0_20 = arith.constant 0 : index
      %25 = vector.load %arg7[%c1, %c0_20] : memref<8x128xf32, #tpu.memory_space<vmem>>, vector<1x128xf32>
      tpu.vector_store %arg7[%c1, %c0_20], %24 {strides = array<i32>} : memref<8x128xf32, #tpu.memory_space<vmem>>, vector<1x128xf32>,
    } else {
    }
    return
  }
  func.func @transform_0(%arg0: i32, %arg1: i32, %arg2: i32) -> (i32, i32) {
    %c0_i32 = arith.constant 0 : i32
    return %arg0, %arg2 : i32, i32
  }
  func.func @transform_1(%arg0: i32, %arg1: i32, %arg2: i32) -> (i32, i32) {
    %c0_i32 = arith.constant 0 : i32
    return %arg2, %arg1 : i32, i32
  }
  func.func @transform_2(%arg0: i32, %arg1: i32, %arg2: i32) -> (i32, i32) {
    %c0_i32 = arith.constant 0 : i32
    %c0_i32_0 = arith.constant 0 : i32
    return %c0_i32, %arg1 : i32, i32
  }
  func.func @transform_3(%arg0: i32, %arg1: i32, %arg2: i32) -> (i32, i32) {
    %c0_i32 = arith.constant 0 : i32
    return %arg0, %arg1 : i32, i32
  }
  func.func @transform_4(%arg0: i32, %arg1: i32, %arg2: i32) -> (i32, i32) {
    %c0_i32 = arith.constant 0 : i32
    return %arg0, %arg1 : i32, i32
  }
}

module attributes {stable_mosaic.version = 11 : i64} {
  func.func @_conv_bn_stats_kernel(%arg0: i32, %arg1: i32, %arg2: i32, %arg3: memref<128x256xbf16, #tpu.memory_space<vmem>>, %arg4: memref<256x128xbf16, #tpu.memory_space<vmem>>, %arg5: memref<1x128xf32, #tpu.memory_space<vmem>>, %arg6: memref<128x128xf32, #tpu.memory_space<vmem>>, %arg7: memref<8x128xf32, #tpu.memory_space<vmem>>) attributes {dimension_semantics = [#tpu.dimension_semantics<parallel>, #tpu.dimension_semantics<parallel>, #tpu.dimension_semantics<arbitrary>], iteration_bounds = array<i64: 1, 1, 5>, scalar_prefetch = 0 : i64, scratch_operands = 0 : i64, tpu.core_type = #tpu.core_type<tc>, window_params = [{transform_indices = @transform_0, window_bounds = array<i64: 128, 256>}, {transform_indices = @transform_1, window_bounds = array<i64: 256, 128>}, {transform_indices = @transform_2, window_bounds = array<i64: 1, 128>}, {transform_indices = @transform_3, window_bounds = array<i64: 128, 128>}, {transform_indices = @transform_4, window_bounds = array<i64: 8, 128>}]} {
    %c0_i32 = arith.constant 0 : i32
    %0 = arith.cmpi eq, %arg2, %c0_i32 : i32
    %1 = arith.extui %0 : i1 to i32
    %c0_i32_0 = arith.constant 0 : i32
    %2 = arith.cmpi ne, %1, %c0_i32_0 : i32
    scf.if %2 {
      %cst_9 = arith.constant 0.000000e+00 : f32
      %12 = vector.broadcast %cst_9 : f32 to vector<128x128xf32>
      %c0_10 = arith.constant 0 : index
      %c0_11 = arith.constant 0 : index
      %13 = vector.load %arg6[%c0_10, %c0_11] : memref<128x128xf32, #tpu.memory_space<vmem>>, vector<128x128xf32>
      tpu.vector_store %arg6[%c0_10, %c0_11], %12 {strides = array<i32>} : memref<128x128xf32, #tpu.memory_space<vmem>>, vector<128x128xf32>,
    } else {
    }
    %c0 = arith.constant 0 : index
    %c0_1 = arith.constant 0 : index
    %3 = vector.load %arg6[%c0, %c0_1] : memref<128x128xf32, #tpu.memory_space<vmem>>, vector<128x128xf32>
    %c0_2 = arith.constant 0 : index
    %c0_3 = arith.constant 0 : index
    %4 = vector.load %arg3[%c0_2, %c0_3] : memref<128x256xbf16, #tpu.memory_space<vmem>>, vector<128x256xbf16>
    %c0_4 = arith.constant 0 : index
    %c0_5 = arith.constant 0 : index
    %5 = vector.load %arg4[%c0_4, %c0_5] : memref<256x128xbf16, #tpu.memory_space<vmem>>, vector<256x128xbf16>
    %cst = arith.constant dense<0.000000e+00> : vector<128x128xf32>
    %6 = tpu.matmul %4, %5, %cst {dimension_numbers = #tpu.dot_dimension_numbers<[1], [0], [0], [1], [0, 0, 1, 1], [], []>} : vector<128x256xbf16>, vector<256x128xbf16>, vector<128x128xf32> -> vector<128x128xf32>
    %7 = arith.addf %3, %6 : vector<128x128xf32>
    %c0_6 = arith.constant 0 : index
    %c0_7 = arith.constant 0 : index
    %8 = vector.load %arg6[%c0_6, %c0_7] : memref<128x128xf32, #tpu.memory_space<vmem>>, vector<128x128xf32>
    tpu.vector_store %arg6[%c0_6, %c0_7], %7 {strides = array<i32>} : memref<128x128xf32, #tpu.memory_space<vmem>>, vector<128x128xf32>,
    %c4_i32 = arith.constant 4 : i32
    %9 = arith.cmpi eq, %arg2, %c4_i32 : i32
    %10 = arith.extui %9 : i1 to i32
    %c0_i32_8 = arith.constant 0 : i32
    %11 = arith.cmpi ne, %10, %c0_i32_8 : i32
    scf.if %11 {
      %c0_9 = arith.constant 0 : index
      %c0_10 = arith.constant 0 : index
      %12 = vector.load %arg6[%c0_9, %c0_10] : memref<128x128xf32, #tpu.memory_space<vmem>>, vector<128x128xf32>
      %c0_11 = arith.constant 0 : index
      %c0_12 = arith.constant 0 : index
      %13 = vector.load %arg5[%c0_11, %c0_12] : memref<1x128xf32, #tpu.memory_space<vmem>>, vector<1x128xf32>
      %14 = vector.broadcast %13 : vector<1x128xf32> to vector<128x128xf32>
      %15 = arith.addf %12, %14 : vector<128x128xf32>
      %cst_13 = arith.constant 0.000000e+00 : f32
      %16 = vector.broadcast %cst_13 : f32 to vector<128x128xf32>
      %17 = arith.maximumf %15, %16 : vector<128x128xf32>
      %c0_14 = arith.constant 0 : index
      %c0_15 = arith.constant 0 : index
      %18 = vector.load %arg6[%c0_14, %c0_15] : memref<128x128xf32, #tpu.memory_space<vmem>>, vector<128x128xf32>
      tpu.vector_store %arg6[%c0_14, %c0_15], %17 {strides = array<i32>} : memref<128x128xf32, #tpu.memory_space<vmem>>, vector<128x128xf32>,
      %cst_16 = arith.constant dense<0.000000e+00> : vector<128xf32>
      %19 = vector.multi_reduction <add>, %17, %cst_16 [0] : vector<128x128xf32> to vector<128xf32>
      %20 = vector.shape_cast %19 : vector<128xf32> to vector<1x128xf32>
      %c0_17 = arith.constant 0 : index
      %c0_18 = arith.constant 0 : index
      %21 = vector.load %arg7[%c0_17, %c0_18] : memref<8x128xf32, #tpu.memory_space<vmem>>, vector<1x128xf32>
      tpu.vector_store %arg7[%c0_17, %c0_18], %20 {strides = array<i32>} : memref<8x128xf32, #tpu.memory_space<vmem>>, vector<1x128xf32>,
      %22 = arith.mulf %17, %17 : vector<128x128xf32>
      %cst_19 = arith.constant dense<0.000000e+00> : vector<128xf32>
      %23 = vector.multi_reduction <add>, %22, %cst_19 [0] : vector<128x128xf32> to vector<128xf32>
      %24 = vector.shape_cast %23 : vector<128xf32> to vector<1x128xf32>
      %c1 = arith.constant 1 : index
      %c0_20 = arith.constant 0 : index
      %25 = vector.load %arg7[%c1, %c0_20] : memref<8x128xf32, #tpu.memory_space<vmem>>, vector<1x128xf32>
      tpu.vector_store %arg7[%c1, %c0_20], %24 {strides = array<i32>} : memref<8x128xf32, #tpu.memory_space<vmem>>, vector<1x128xf32>,
    } else {
    }
    return
  }
  func.func @transform_0(%arg0: i32, %arg1: i32, %arg2: i32) -> (i32, i32) {
    %c0_i32 = arith.constant 0 : i32
    return %arg0, %arg2 : i32, i32
  }
  func.func @transform_1(%arg0: i32, %arg1: i32, %arg2: i32) -> (i32, i32) {
    %c0_i32 = arith.constant 0 : i32
    return %arg2, %arg1 : i32, i32
  }
  func.func @transform_2(%arg0: i32, %arg1: i32, %arg2: i32) -> (i32, i32) {
    %c0_i32 = arith.constant 0 : i32
    %c0_i32_0 = arith.constant 0 : i32
    return %c0_i32, %arg1 : i32, i32
  }
  func.func @transform_3(%arg0: i32, %arg1: i32, %arg2: i32) -> (i32, i32) {
    %c0_i32 = arith.constant 0 : i32
    return %arg0, %arg1 : i32, i32
  }
  func.func @transform_4(%arg0: i32, %arg1: i32, %arg2: i32) -> (i32, i32) {
    %c0_i32 = arith.constant 0 : i32
    return %arg0, %arg1 : i32, i32
  }
}

module attributes {stable_mosaic.version = 11 : i64} {
  func.func @_conv_bn_stats_kernel(%arg0: i32, %arg1: i32, %arg2: i32, %arg3: memref<32x256xbf16, #tpu.memory_space<vmem>>, %arg4: memref<256x128xbf16, #tpu.memory_space<vmem>>, %arg5: memref<1x128xf32, #tpu.memory_space<vmem>>, %arg6: memref<32x128xf32, #tpu.memory_space<vmem>>, %arg7: memref<8x128xf32, #tpu.memory_space<vmem>>) attributes {dimension_semantics = [#tpu.dimension_semantics<parallel>, #tpu.dimension_semantics<parallel>, #tpu.dimension_semantics<arbitrary>], iteration_bounds = array<i64: 1, 1, 5>, scalar_prefetch = 0 : i64, scratch_operands = 0 : i64, tpu.core_type = #tpu.core_type<tc>, window_params = [{transform_indices = @transform_0, window_bounds = array<i64: 32, 256>}, {transform_indices = @transform_1, window_bounds = array<i64: 256, 128>}, {transform_indices = @transform_2, window_bounds = array<i64: 1, 128>}, {transform_indices = @transform_3, window_bounds = array<i64: 32, 128>}, {transform_indices = @transform_4, window_bounds = array<i64: 8, 128>}]} {
    %c0_i32 = arith.constant 0 : i32
    %0 = arith.cmpi eq, %arg2, %c0_i32 : i32
    %1 = arith.extui %0 : i1 to i32
    %c0_i32_0 = arith.constant 0 : i32
    %2 = arith.cmpi ne, %1, %c0_i32_0 : i32
    scf.if %2 {
      %cst_9 = arith.constant 0.000000e+00 : f32
      %12 = vector.broadcast %cst_9 : f32 to vector<32x128xf32>
      %c0_10 = arith.constant 0 : index
      %c0_11 = arith.constant 0 : index
      %13 = vector.load %arg6[%c0_10, %c0_11] : memref<32x128xf32, #tpu.memory_space<vmem>>, vector<32x128xf32>
      tpu.vector_store %arg6[%c0_10, %c0_11], %12 {strides = array<i32>} : memref<32x128xf32, #tpu.memory_space<vmem>>, vector<32x128xf32>,
    } else {
    }
    %c0 = arith.constant 0 : index
    %c0_1 = arith.constant 0 : index
    %3 = vector.load %arg6[%c0, %c0_1] : memref<32x128xf32, #tpu.memory_space<vmem>>, vector<32x128xf32>
    %c0_2 = arith.constant 0 : index
    %c0_3 = arith.constant 0 : index
    %4 = vector.load %arg3[%c0_2, %c0_3] : memref<32x256xbf16, #tpu.memory_space<vmem>>, vector<32x256xbf16>
    %c0_4 = arith.constant 0 : index
    %c0_5 = arith.constant 0 : index
    %5 = vector.load %arg4[%c0_4, %c0_5] : memref<256x128xbf16, #tpu.memory_space<vmem>>, vector<256x128xbf16>
    %cst = arith.constant dense<0.000000e+00> : vector<32x128xf32>
    %6 = tpu.matmul %4, %5, %cst {dimension_numbers = #tpu.dot_dimension_numbers<[1], [0], [0], [1], [0, 0, 1, 1], [], []>} : vector<32x256xbf16>, vector<256x128xbf16>, vector<32x128xf32> -> vector<32x128xf32>
    %7 = arith.addf %3, %6 : vector<32x128xf32>
    %c0_6 = arith.constant 0 : index
    %c0_7 = arith.constant 0 : index
    %8 = vector.load %arg6[%c0_6, %c0_7] : memref<32x128xf32, #tpu.memory_space<vmem>>, vector<32x128xf32>
    tpu.vector_store %arg6[%c0_6, %c0_7], %7 {strides = array<i32>} : memref<32x128xf32, #tpu.memory_space<vmem>>, vector<32x128xf32>,
    %c4_i32 = arith.constant 4 : i32
    %9 = arith.cmpi eq, %arg2, %c4_i32 : i32
    %10 = arith.extui %9 : i1 to i32
    %c0_i32_8 = arith.constant 0 : i32
    %11 = arith.cmpi ne, %10, %c0_i32_8 : i32
    scf.if %11 {
      %c0_9 = arith.constant 0 : index
      %c0_10 = arith.constant 0 : index
      %12 = vector.load %arg6[%c0_9, %c0_10] : memref<32x128xf32, #tpu.memory_space<vmem>>, vector<32x128xf32>
      %c0_11 = arith.constant 0 : index
      %c0_12 = arith.constant 0 : index
      %13 = vector.load %arg5[%c0_11, %c0_12] : memref<1x128xf32, #tpu.memory_space<vmem>>, vector<1x128xf32>
      %14 = vector.broadcast %13 : vector<1x128xf32> to vector<32x128xf32>
      %15 = arith.addf %12, %14 : vector<32x128xf32>
      %cst_13 = arith.constant 0.000000e+00 : f32
      %16 = vector.broadcast %cst_13 : f32 to vector<32x128xf32>
      %17 = arith.maximumf %15, %16 : vector<32x128xf32>
      %c0_14 = arith.constant 0 : index
      %c0_15 = arith.constant 0 : index
      %18 = vector.load %arg6[%c0_14, %c0_15] : memref<32x128xf32, #tpu.memory_space<vmem>>, vector<32x128xf32>
      tpu.vector_store %arg6[%c0_14, %c0_15], %17 {strides = array<i32>} : memref<32x128xf32, #tpu.memory_space<vmem>>, vector<32x128xf32>,
      %cst_16 = arith.constant dense<0.000000e+00> : vector<128xf32>
      %19 = vector.multi_reduction <add>, %17, %cst_16 [0] : vector<32x128xf32> to vector<128xf32>
      %20 = vector.shape_cast %19 : vector<128xf32> to vector<1x128xf32>
      %c0_17 = arith.constant 0 : index
      %c0_18 = arith.constant 0 : index
      %21 = vector.load %arg7[%c0_17, %c0_18] : memref<8x128xf32, #tpu.memory_space<vmem>>, vector<1x128xf32>
      tpu.vector_store %arg7[%c0_17, %c0_18], %20 {strides = array<i32>} : memref<8x128xf32, #tpu.memory_space<vmem>>, vector<1x128xf32>,
      %22 = arith.mulf %17, %17 : vector<32x128xf32>
      %cst_19 = arith.constant dense<0.000000e+00> : vector<128xf32>
      %23 = vector.multi_reduction <add>, %22, %cst_19 [0] : vector<32x128xf32> to vector<128xf32>
      %24 = vector.shape_cast %23 : vector<128xf32> to vector<1x128xf32>
      %c1 = arith.constant 1 : index
      %c0_20 = arith.constant 0 : index
      %25 = vector.load %arg7[%c1, %c0_20] : memref<8x128xf32, #tpu.memory_space<vmem>>, vector<1x128xf32>
      tpu.vector_store %arg7[%c1, %c0_20], %24 {strides = array<i32>} : memref<8x128xf32, #tpu.memory_space<vmem>>, vector<1x128xf32>,
    } else {
    }
    return
  }
  func.func @transform_0(%arg0: i32, %arg1: i32, %arg2: i32) -> (i32, i32) {
    %c0_i32 = arith.constant 0 : i32
    return %arg0, %arg2 : i32, i32
  }
  func.func @transform_1(%arg0: i32, %arg1: i32, %arg2: i32) -> (i32, i32) {
    %c0_i32 = arith.constant 0 : i32
    return %arg2, %arg1 : i32, i32
  }
  func.func @transform_2(%arg0: i32, %arg1: i32, %arg2: i32) -> (i32, i32) {
    %c0_i32 = arith.constant 0 : i32
    %c0_i32_0 = arith.constant 0 : i32
    return %c0_i32, %arg1 : i32, i32
  }
  func.func @transform_3(%arg0: i32, %arg1: i32, %arg2: i32) -> (i32, i32) {
    %c0_i32 = arith.constant 0 : i32
    return %arg0, %arg1 : i32, i32
  }
  func.func @transform_4(%arg0: i32, %arg1: i32, %arg2: i32) -> (i32, i32) {
    %c0_i32 = arith.constant 0 : i32
    return %arg0, %arg1 : i32, i32
  }
}

module attributes {stable_mosaic.version = 11 : i64} {
  func.func @_conv_bn_stats_kernel(%arg0: i32, %arg1: i32, %arg2: i32, %arg3: memref<32x256xbf16, #tpu.memory_space<vmem>>, %arg4: memref<256x256xbf16, #tpu.memory_space<vmem>>, %arg5: memref<1x256xf32, #tpu.memory_space<vmem>>, %arg6: memref<32x256xf32, #tpu.memory_space<vmem>>, %arg7: memref<8x256xf32, #tpu.memory_space<vmem>>) attributes {dimension_semantics = [#tpu.dimension_semantics<parallel>, #tpu.dimension_semantics<parallel>, #tpu.dimension_semantics<arbitrary>], iteration_bounds = array<i64: 1, 1, 5>, scalar_prefetch = 0 : i64, scratch_operands = 0 : i64, tpu.core_type = #tpu.core_type<tc>, window_params = [{transform_indices = @transform_0, window_bounds = array<i64: 32, 256>}, {transform_indices = @transform_1, window_bounds = array<i64: 256, 256>}, {transform_indices = @transform_2, window_bounds = array<i64: 1, 256>}, {transform_indices = @transform_3, window_bounds = array<i64: 32, 256>}, {transform_indices = @transform_4, window_bounds = array<i64: 8, 256>}]} {
    %c0_i32 = arith.constant 0 : i32
    %0 = arith.cmpi eq, %arg2, %c0_i32 : i32
    %1 = arith.extui %0 : i1 to i32
    %c0_i32_0 = arith.constant 0 : i32
    %2 = arith.cmpi ne, %1, %c0_i32_0 : i32
    scf.if %2 {
      %cst_9 = arith.constant 0.000000e+00 : f32
      %12 = vector.broadcast %cst_9 : f32 to vector<32x256xf32>
      %c0_10 = arith.constant 0 : index
      %c0_11 = arith.constant 0 : index
      %13 = vector.load %arg6[%c0_10, %c0_11] : memref<32x256xf32, #tpu.memory_space<vmem>>, vector<32x256xf32>
      tpu.vector_store %arg6[%c0_10, %c0_11], %12 {strides = array<i32>} : memref<32x256xf32, #tpu.memory_space<vmem>>, vector<32x256xf32>,
    } else {
    }
    %c0 = arith.constant 0 : index
    %c0_1 = arith.constant 0 : index
    %3 = vector.load %arg6[%c0, %c0_1] : memref<32x256xf32, #tpu.memory_space<vmem>>, vector<32x256xf32>
    %c0_2 = arith.constant 0 : index
    %c0_3 = arith.constant 0 : index
    %4 = vector.load %arg3[%c0_2, %c0_3] : memref<32x256xbf16, #tpu.memory_space<vmem>>, vector<32x256xbf16>
    %c0_4 = arith.constant 0 : index
    %c0_5 = arith.constant 0 : index
    %5 = vector.load %arg4[%c0_4, %c0_5] : memref<256x256xbf16, #tpu.memory_space<vmem>>, vector<256x256xbf16>
    %cst = arith.constant dense<0.000000e+00> : vector<32x256xf32>
    %6 = tpu.matmul %4, %5, %cst {dimension_numbers = #tpu.dot_dimension_numbers<[1], [0], [0], [1], [0, 0, 1, 1], [], []>} : vector<32x256xbf16>, vector<256x256xbf16>, vector<32x256xf32> -> vector<32x256xf32>
    %7 = arith.addf %3, %6 : vector<32x256xf32>
    %c0_6 = arith.constant 0 : index
    %c0_7 = arith.constant 0 : index
    %8 = vector.load %arg6[%c0_6, %c0_7] : memref<32x256xf32, #tpu.memory_space<vmem>>, vector<32x256xf32>
    tpu.vector_store %arg6[%c0_6, %c0_7], %7 {strides = array<i32>} : memref<32x256xf32, #tpu.memory_space<vmem>>, vector<32x256xf32>,
    %c4_i32 = arith.constant 4 : i32
    %9 = arith.cmpi eq, %arg2, %c4_i32 : i32
    %10 = arith.extui %9 : i1 to i32
    %c0_i32_8 = arith.constant 0 : i32
    %11 = arith.cmpi ne, %10, %c0_i32_8 : i32
    scf.if %11 {
      %c0_9 = arith.constant 0 : index
      %c0_10 = arith.constant 0 : index
      %12 = vector.load %arg6[%c0_9, %c0_10] : memref<32x256xf32, #tpu.memory_space<vmem>>, vector<32x256xf32>
      %c0_11 = arith.constant 0 : index
      %c0_12 = arith.constant 0 : index
      %13 = vector.load %arg5[%c0_11, %c0_12] : memref<1x256xf32, #tpu.memory_space<vmem>>, vector<1x256xf32>
      %14 = vector.broadcast %13 : vector<1x256xf32> to vector<32x256xf32>
      %15 = arith.addf %12, %14 : vector<32x256xf32>
      %cst_13 = arith.constant 0.000000e+00 : f32
      %16 = vector.broadcast %cst_13 : f32 to vector<32x256xf32>
      %17 = arith.maximumf %15, %16 : vector<32x256xf32>
      %c0_14 = arith.constant 0 : index
      %c0_15 = arith.constant 0 : index
      %18 = vector.load %arg6[%c0_14, %c0_15] : memref<32x256xf32, #tpu.memory_space<vmem>>, vector<32x256xf32>
      tpu.vector_store %arg6[%c0_14, %c0_15], %17 {strides = array<i32>} : memref<32x256xf32, #tpu.memory_space<vmem>>, vector<32x256xf32>,
      %cst_16 = arith.constant dense<0.000000e+00> : vector<256xf32>
      %19 = vector.multi_reduction <add>, %17, %cst_16 [0] : vector<32x256xf32> to vector<256xf32>
      %20 = vector.shape_cast %19 : vector<256xf32> to vector<1x256xf32>
      %c0_17 = arith.constant 0 : index
      %c0_18 = arith.constant 0 : index
      %21 = vector.load %arg7[%c0_17, %c0_18] : memref<8x256xf32, #tpu.memory_space<vmem>>, vector<1x256xf32>
      tpu.vector_store %arg7[%c0_17, %c0_18], %20 {strides = array<i32>} : memref<8x256xf32, #tpu.memory_space<vmem>>, vector<1x256xf32>,
      %22 = arith.mulf %17, %17 : vector<32x256xf32>
      %cst_19 = arith.constant dense<0.000000e+00> : vector<256xf32>
      %23 = vector.multi_reduction <add>, %22, %cst_19 [0] : vector<32x256xf32> to vector<256xf32>
      %24 = vector.shape_cast %23 : vector<256xf32> to vector<1x256xf32>
      %c1 = arith.constant 1 : index
      %c0_20 = arith.constant 0 : index
      %25 = vector.load %arg7[%c1, %c0_20] : memref<8x256xf32, #tpu.memory_space<vmem>>, vector<1x256xf32>
      tpu.vector_store %arg7[%c1, %c0_20], %24 {strides = array<i32>} : memref<8x256xf32, #tpu.memory_space<vmem>>, vector<1x256xf32>,
    } else {
    }
    return
  }
  func.func @transform_0(%arg0: i32, %arg1: i32, %arg2: i32) -> (i32, i32) {
    %c0_i32 = arith.constant 0 : i32
    return %arg0, %arg2 : i32, i32
  }
  func.func @transform_1(%arg0: i32, %arg1: i32, %arg2: i32) -> (i32, i32) {
    %c0_i32 = arith.constant 0 : i32
    return %arg2, %arg1 : i32, i32
  }
  func.func @transform_2(%arg0: i32, %arg1: i32, %arg2: i32) -> (i32, i32) {
    %c0_i32 = arith.constant 0 : i32
    %c0_i32_0 = arith.constant 0 : i32
    return %c0_i32, %arg1 : i32, i32
  }
  func.func @transform_3(%arg0: i32, %arg1: i32, %arg2: i32) -> (i32, i32) {
    %c0_i32 = arith.constant 0 : i32
    return %arg0, %arg1 : i32, i32
  }
  func.func @transform_4(%arg0: i32, %arg1: i32, %arg2: i32) -> (i32, i32) {
    %c0_i32 = arith.constant 0 : i32
    return %arg0, %arg1 : i32, i32
  }
}

module attributes {stable_mosaic.version = 11 : i64} {
  func.func @_conv_bn_stats_kernel(%arg0: i32, %arg1: i32, %arg2: i32, %arg3: memref<32x256xbf16, #tpu.memory_space<vmem>>, %arg4: memref<256x256xbf16, #tpu.memory_space<vmem>>, %arg5: memref<1x256xf32, #tpu.memory_space<vmem>>, %arg6: memref<32x256xf32, #tpu.memory_space<vmem>>, %arg7: memref<8x256xf32, #tpu.memory_space<vmem>>) attributes {dimension_semantics = [#tpu.dimension_semantics<parallel>, #tpu.dimension_semantics<parallel>, #tpu.dimension_semantics<arbitrary>], iteration_bounds = array<i64: 1, 1, 9>, scalar_prefetch = 0 : i64, scratch_operands = 0 : i64, tpu.core_type = #tpu.core_type<tc>, window_params = [{transform_indices = @transform_0, window_bounds = array<i64: 32, 256>}, {transform_indices = @transform_1, window_bounds = array<i64: 256, 256>}, {transform_indices = @transform_2, window_bounds = array<i64: 1, 256>}, {transform_indices = @transform_3, window_bounds = array<i64: 32, 256>}, {transform_indices = @transform_4, window_bounds = array<i64: 8, 256>}]} {
    %c0_i32 = arith.constant 0 : i32
    %0 = arith.cmpi eq, %arg2, %c0_i32 : i32
    %1 = arith.extui %0 : i1 to i32
    %c0_i32_0 = arith.constant 0 : i32
    %2 = arith.cmpi ne, %1, %c0_i32_0 : i32
    scf.if %2 {
      %cst_9 = arith.constant 0.000000e+00 : f32
      %12 = vector.broadcast %cst_9 : f32 to vector<32x256xf32>
      %c0_10 = arith.constant 0 : index
      %c0_11 = arith.constant 0 : index
      %13 = vector.load %arg6[%c0_10, %c0_11] : memref<32x256xf32, #tpu.memory_space<vmem>>, vector<32x256xf32>
      tpu.vector_store %arg6[%c0_10, %c0_11], %12 {strides = array<i32>} : memref<32x256xf32, #tpu.memory_space<vmem>>, vector<32x256xf32>,
    } else {
    }
    %c0 = arith.constant 0 : index
    %c0_1 = arith.constant 0 : index
    %3 = vector.load %arg6[%c0, %c0_1] : memref<32x256xf32, #tpu.memory_space<vmem>>, vector<32x256xf32>
    %c0_2 = arith.constant 0 : index
    %c0_3 = arith.constant 0 : index
    %4 = vector.load %arg3[%c0_2, %c0_3] : memref<32x256xbf16, #tpu.memory_space<vmem>>, vector<32x256xbf16>
    %c0_4 = arith.constant 0 : index
    %c0_5 = arith.constant 0 : index
    %5 = vector.load %arg4[%c0_4, %c0_5] : memref<256x256xbf16, #tpu.memory_space<vmem>>, vector<256x256xbf16>
    %cst = arith.constant dense<0.000000e+00> : vector<32x256xf32>
    %6 = tpu.matmul %4, %5, %cst {dimension_numbers = #tpu.dot_dimension_numbers<[1], [0], [0], [1], [0, 0, 1, 1], [], []>} : vector<32x256xbf16>, vector<256x256xbf16>, vector<32x256xf32> -> vector<32x256xf32>
    %7 = arith.addf %3, %6 : vector<32x256xf32>
    %c0_6 = arith.constant 0 : index
    %c0_7 = arith.constant 0 : index
    %8 = vector.load %arg6[%c0_6, %c0_7] : memref<32x256xf32, #tpu.memory_space<vmem>>, vector<32x256xf32>
    tpu.vector_store %arg6[%c0_6, %c0_7], %7 {strides = array<i32>} : memref<32x256xf32, #tpu.memory_space<vmem>>, vector<32x256xf32>,
    %c8_i32 = arith.constant 8 : i32
    %9 = arith.cmpi eq, %arg2, %c8_i32 : i32
    %10 = arith.extui %9 : i1 to i32
    %c0_i32_8 = arith.constant 0 : i32
    %11 = arith.cmpi ne, %10, %c0_i32_8 : i32
    scf.if %11 {
      %c0_9 = arith.constant 0 : index
      %c0_10 = arith.constant 0 : index
      %12 = vector.load %arg6[%c0_9, %c0_10] : memref<32x256xf32, #tpu.memory_space<vmem>>, vector<32x256xf32>
      %c0_11 = arith.constant 0 : index
      %c0_12 = arith.constant 0 : index
      %13 = vector.load %arg5[%c0_11, %c0_12] : memref<1x256xf32, #tpu.memory_space<vmem>>, vector<1x256xf32>
      %14 = vector.broadcast %13 : vector<1x256xf32> to vector<32x256xf32>
      %15 = arith.addf %12, %14 : vector<32x256xf32>
      %cst_13 = arith.constant 0.000000e+00 : f32
      %16 = vector.broadcast %cst_13 : f32 to vector<32x256xf32>
      %17 = arith.maximumf %15, %16 : vector<32x256xf32>
      %c0_14 = arith.constant 0 : index
      %c0_15 = arith.constant 0 : index
      %18 = vector.load %arg6[%c0_14, %c0_15] : memref<32x256xf32, #tpu.memory_space<vmem>>, vector<32x256xf32>
      tpu.vector_store %arg6[%c0_14, %c0_15], %17 {strides = array<i32>} : memref<32x256xf32, #tpu.memory_space<vmem>>, vector<32x256xf32>,
      %cst_16 = arith.constant dense<0.000000e+00> : vector<256xf32>
      %19 = vector.multi_reduction <add>, %17, %cst_16 [0] : vector<32x256xf32> to vector<256xf32>
      %20 = vector.shape_cast %19 : vector<256xf32> to vector<1x256xf32>
      %c0_17 = arith.constant 0 : index
      %c0_18 = arith.constant 0 : index
      %21 = vector.load %arg7[%c0_17, %c0_18] : memref<8x256xf32, #tpu.memory_space<vmem>>, vector<1x256xf32>
      tpu.vector_store %arg7[%c0_17, %c0_18], %20 {strides = array<i32>} : memref<8x256xf32, #tpu.memory_space<vmem>>, vector<1x256xf32>,
      %22 = arith.mulf %17, %17 : vector<32x256xf32>
      %cst_19 = arith.constant dense<0.000000e+00> : vector<256xf32>
      %23 = vector.multi_reduction <add>, %22, %cst_19 [0] : vector<32x256xf32> to vector<256xf32>
      %24 = vector.shape_cast %23 : vector<256xf32> to vector<1x256xf32>
      %c1 = arith.constant 1 : index
      %c0_20 = arith.constant 0 : index
      %25 = vector.load %arg7[%c1, %c0_20] : memref<8x256xf32, #tpu.memory_space<vmem>>, vector<1x256xf32>
      tpu.vector_store %arg7[%c1, %c0_20], %24 {strides = array<i32>} : memref<8x256xf32, #tpu.memory_space<vmem>>, vector<1x256xf32>,
    } else {
    }
    return
  }
  func.func @transform_0(%arg0: i32, %arg1: i32, %arg2: i32) -> (i32, i32) {
    %c0_i32 = arith.constant 0 : i32
    return %arg0, %arg2 : i32, i32
  }
  func.func @transform_1(%arg0: i32, %arg1: i32, %arg2: i32) -> (i32, i32) {
    %c0_i32 = arith.constant 0 : i32
    return %arg2, %arg1 : i32, i32
  }
  func.func @transform_2(%arg0: i32, %arg1: i32, %arg2: i32) -> (i32, i32) {
    %c0_i32 = arith.constant 0 : i32
    %c0_i32_0 = arith.constant 0 : i32
    return %c0_i32, %arg1 : i32, i32
  }
  func.func @transform_3(%arg0: i32, %arg1: i32, %arg2: i32) -> (i32, i32) {
    %c0_i32 = arith.constant 0 : i32
    return %arg0, %arg1 : i32, i32
  }
  func.func @transform_4(%arg0: i32, %arg1: i32, %arg2: i32) -> (i32, i32) {
    %c0_i32 = arith.constant 0 : i32
    return %arg0, %arg1 : i32, i32
  }
}

module attributes {stable_mosaic.version = 11 : i64} {
  func.func @_conv_bn_stats_kernel(%arg0: i32, %arg1: i32, %arg2: i32, %arg3: memref<8x256xbf16, #tpu.memory_space<vmem>>, %arg4: memref<256x256xbf16, #tpu.memory_space<vmem>>, %arg5: memref<1x256xf32, #tpu.memory_space<vmem>>, %arg6: memref<8x256xf32, #tpu.memory_space<vmem>>, %arg7: memref<8x256xf32, #tpu.memory_space<vmem>>) attributes {dimension_semantics = [#tpu.dimension_semantics<parallel>, #tpu.dimension_semantics<parallel>, #tpu.dimension_semantics<arbitrary>], iteration_bounds = array<i64: 1, 1, 9>, scalar_prefetch = 0 : i64, scratch_operands = 0 : i64, tpu.core_type = #tpu.core_type<tc>, window_params = [{transform_indices = @transform_0, window_bounds = array<i64: 8, 256>}, {transform_indices = @transform_1, window_bounds = array<i64: 256, 256>}, {transform_indices = @transform_2, window_bounds = array<i64: 1, 256>}, {transform_indices = @transform_3, window_bounds = array<i64: 8, 256>}, {transform_indices = @transform_4, window_bounds = array<i64: 8, 256>}]} {
    %c0_i32 = arith.constant 0 : i32
    %0 = arith.cmpi eq, %arg2, %c0_i32 : i32
    %1 = arith.extui %0 : i1 to i32
    %c0_i32_0 = arith.constant 0 : i32
    %2 = arith.cmpi ne, %1, %c0_i32_0 : i32
    scf.if %2 {
      %cst_9 = arith.constant 0.000000e+00 : f32
      %12 = vector.broadcast %cst_9 : f32 to vector<8x256xf32>
      %c0_10 = arith.constant 0 : index
      %c0_11 = arith.constant 0 : index
      %13 = vector.load %arg6[%c0_10, %c0_11] : memref<8x256xf32, #tpu.memory_space<vmem>>, vector<8x256xf32>
      tpu.vector_store %arg6[%c0_10, %c0_11], %12 {strides = array<i32>} : memref<8x256xf32, #tpu.memory_space<vmem>>, vector<8x256xf32>,
    } else {
    }
    %c0 = arith.constant 0 : index
    %c0_1 = arith.constant 0 : index
    %3 = vector.load %arg6[%c0, %c0_1] : memref<8x256xf32, #tpu.memory_space<vmem>>, vector<8x256xf32>
    %c0_2 = arith.constant 0 : index
    %c0_3 = arith.constant 0 : index
    %4 = vector.load %arg3[%c0_2, %c0_3] : memref<8x256xbf16, #tpu.memory_space<vmem>>, vector<8x256xbf16>
    %c0_4 = arith.constant 0 : index
    %c0_5 = arith.constant 0 : index
    %5 = vector.load %arg4[%c0_4, %c0_5] : memref<256x256xbf16, #tpu.memory_space<vmem>>, vector<256x256xbf16>
    %cst = arith.constant dense<0.000000e+00> : vector<8x256xf32>
    %6 = tpu.matmul %4, %5, %cst {dimension_numbers = #tpu.dot_dimension_numbers<[1], [0], [0], [1], [0, 0, 1, 1], [], []>} : vector<8x256xbf16>, vector<256x256xbf16>, vector<8x256xf32> -> vector<8x256xf32>
    %7 = arith.addf %3, %6 : vector<8x256xf32>
    %c0_6 = arith.constant 0 : index
    %c0_7 = arith.constant 0 : index
    %8 = vector.load %arg6[%c0_6, %c0_7] : memref<8x256xf32, #tpu.memory_space<vmem>>, vector<8x256xf32>
    tpu.vector_store %arg6[%c0_6, %c0_7], %7 {strides = array<i32>} : memref<8x256xf32, #tpu.memory_space<vmem>>, vector<8x256xf32>,
    %c8_i32 = arith.constant 8 : i32
    %9 = arith.cmpi eq, %arg2, %c8_i32 : i32
    %10 = arith.extui %9 : i1 to i32
    %c0_i32_8 = arith.constant 0 : i32
    %11 = arith.cmpi ne, %10, %c0_i32_8 : i32
    scf.if %11 {
      %c0_9 = arith.constant 0 : index
      %c0_10 = arith.constant 0 : index
      %12 = vector.load %arg6[%c0_9, %c0_10] : memref<8x256xf32, #tpu.memory_space<vmem>>, vector<8x256xf32>
      %c0_11 = arith.constant 0 : index
      %c0_12 = arith.constant 0 : index
      %13 = vector.load %arg5[%c0_11, %c0_12] : memref<1x256xf32, #tpu.memory_space<vmem>>, vector<1x256xf32>
      %14 = vector.broadcast %13 : vector<1x256xf32> to vector<8x256xf32>
      %15 = arith.addf %12, %14 : vector<8x256xf32>
      %cst_13 = arith.constant 0.000000e+00 : f32
      %16 = vector.broadcast %cst_13 : f32 to vector<8x256xf32>
      %17 = arith.maximumf %15, %16 : vector<8x256xf32>
      %c0_14 = arith.constant 0 : index
      %c0_15 = arith.constant 0 : index
      %18 = vector.load %arg6[%c0_14, %c0_15] : memref<8x256xf32, #tpu.memory_space<vmem>>, vector<8x256xf32>
      tpu.vector_store %arg6[%c0_14, %c0_15], %17 {strides = array<i32>} : memref<8x256xf32, #tpu.memory_space<vmem>>, vector<8x256xf32>,
      %cst_16 = arith.constant dense<0.000000e+00> : vector<256xf32>
      %19 = vector.multi_reduction <add>, %17, %cst_16 [0] : vector<8x256xf32> to vector<256xf32>
      %20 = vector.shape_cast %19 : vector<256xf32> to vector<1x256xf32>
      %c0_17 = arith.constant 0 : index
      %c0_18 = arith.constant 0 : index
      %21 = vector.load %arg7[%c0_17, %c0_18] : memref<8x256xf32, #tpu.memory_space<vmem>>, vector<1x256xf32>
      tpu.vector_store %arg7[%c0_17, %c0_18], %20 {strides = array<i32>} : memref<8x256xf32, #tpu.memory_space<vmem>>, vector<1x256xf32>,
      %22 = arith.mulf %17, %17 : vector<8x256xf32>
      %cst_19 = arith.constant dense<0.000000e+00> : vector<256xf32>
      %23 = vector.multi_reduction <add>, %22, %cst_19 [0] : vector<8x256xf32> to vector<256xf32>
      %24 = vector.shape_cast %23 : vector<256xf32> to vector<1x256xf32>
      %c1 = arith.constant 1 : index
      %c0_20 = arith.constant 0 : index
      %25 = vector.load %arg7[%c1, %c0_20] : memref<8x256xf32, #tpu.memory_space<vmem>>, vector<1x256xf32>
      tpu.vector_store %arg7[%c1, %c0_20], %24 {strides = array<i32>} : memref<8x256xf32, #tpu.memory_space<vmem>>, vector<1x256xf32>,
    } else {
    }
    return
  }
  func.func @transform_0(%arg0: i32, %arg1: i32, %arg2: i32) -> (i32, i32) {
    %c0_i32 = arith.constant 0 : i32
    return %arg0, %arg2 : i32, i32
  }
  func.func @transform_1(%arg0: i32, %arg1: i32, %arg2: i32) -> (i32, i32) {
    %c0_i32 = arith.constant 0 : i32
    return %arg2, %arg1 : i32, i32
  }
  func.func @transform_2(%arg0: i32, %arg1: i32, %arg2: i32) -> (i32, i32) {
    %c0_i32 = arith.constant 0 : i32
    %c0_i32_0 = arith.constant 0 : i32
    return %c0_i32, %arg1 : i32, i32
  }
  func.func @transform_3(%arg0: i32, %arg1: i32, %arg2: i32) -> (i32, i32) {
    %c0_i32 = arith.constant 0 : i32
    return %arg0, %arg1 : i32, i32
  }
  func.func @transform_4(%arg0: i32, %arg1: i32, %arg2: i32) -> (i32, i32) {
    %c0_i32 = arith.constant 0 : i32
    return %arg0, %arg1 : i32, i32
  }
}

module attributes {stable_mosaic.version = 11 : i64} {
  func.func @_conv_bn_stats_kernel(%arg0: i32, %arg1: i32, %arg2: i32, %arg3: memref<8x256xbf16, #tpu.memory_space<vmem>>, %arg4: memref<256x256xbf16, #tpu.memory_space<vmem>>, %arg5: memref<1x256xf32, #tpu.memory_space<vmem>>, %arg6: memref<8x256xf32, #tpu.memory_space<vmem>>, %arg7: memref<8x256xf32, #tpu.memory_space<vmem>>) attributes {dimension_semantics = [#tpu.dimension_semantics<parallel>, #tpu.dimension_semantics<parallel>, #tpu.dimension_semantics<arbitrary>], iteration_bounds = array<i64: 1, 2, 9>, scalar_prefetch = 0 : i64, scratch_operands = 0 : i64, tpu.core_type = #tpu.core_type<tc>, window_params = [{transform_indices = @transform_0, window_bounds = array<i64: 8, 256>}, {transform_indices = @transform_1, window_bounds = array<i64: 256, 256>}, {transform_indices = @transform_2, window_bounds = array<i64: 1, 256>}, {transform_indices = @transform_3, window_bounds = array<i64: 8, 256>}, {transform_indices = @transform_4, window_bounds = array<i64: 8, 256>}]} {
    %c0_i32 = arith.constant 0 : i32
    %0 = arith.cmpi eq, %arg2, %c0_i32 : i32
    %1 = arith.extui %0 : i1 to i32
    %c0_i32_0 = arith.constant 0 : i32
    %2 = arith.cmpi ne, %1, %c0_i32_0 : i32
    scf.if %2 {
      %cst_9 = arith.constant 0.000000e+00 : f32
      %12 = vector.broadcast %cst_9 : f32 to vector<8x256xf32>
      %c0_10 = arith.constant 0 : index
      %c0_11 = arith.constant 0 : index
      %13 = vector.load %arg6[%c0_10, %c0_11] : memref<8x256xf32, #tpu.memory_space<vmem>>, vector<8x256xf32>
      tpu.vector_store %arg6[%c0_10, %c0_11], %12 {strides = array<i32>} : memref<8x256xf32, #tpu.memory_space<vmem>>, vector<8x256xf32>,
    } else {
    }
    %c0 = arith.constant 0 : index
    %c0_1 = arith.constant 0 : index
    %3 = vector.load %arg6[%c0, %c0_1] : memref<8x256xf32, #tpu.memory_space<vmem>>, vector<8x256xf32>
    %c0_2 = arith.constant 0 : index
    %c0_3 = arith.constant 0 : index
    %4 = vector.load %arg3[%c0_2, %c0_3] : memref<8x256xbf16, #tpu.memory_space<vmem>>, vector<8x256xbf16>
    %c0_4 = arith.constant 0 : index
    %c0_5 = arith.constant 0 : index
    %5 = vector.load %arg4[%c0_4, %c0_5] : memref<256x256xbf16, #tpu.memory_space<vmem>>, vector<256x256xbf16>
    %cst = arith.constant dense<0.000000e+00> : vector<8x256xf32>
    %6 = tpu.matmul %4, %5, %cst {dimension_numbers = #tpu.dot_dimension_numbers<[1], [0], [0], [1], [0, 0, 1, 1], [], []>} : vector<8x256xbf16>, vector<256x256xbf16>, vector<8x256xf32> -> vector<8x256xf32>
    %7 = arith.addf %3, %6 : vector<8x256xf32>
    %c0_6 = arith.constant 0 : index
    %c0_7 = arith.constant 0 : index
    %8 = vector.load %arg6[%c0_6, %c0_7] : memref<8x256xf32, #tpu.memory_space<vmem>>, vector<8x256xf32>
    tpu.vector_store %arg6[%c0_6, %c0_7], %7 {strides = array<i32>} : memref<8x256xf32, #tpu.memory_space<vmem>>, vector<8x256xf32>,
    %c8_i32 = arith.constant 8 : i32
    %9 = arith.cmpi eq, %arg2, %c8_i32 : i32
    %10 = arith.extui %9 : i1 to i32
    %c0_i32_8 = arith.constant 0 : i32
    %11 = arith.cmpi ne, %10, %c0_i32_8 : i32
    scf.if %11 {
      %c0_9 = arith.constant 0 : index
      %c0_10 = arith.constant 0 : index
      %12 = vector.load %arg6[%c0_9, %c0_10] : memref<8x256xf32, #tpu.memory_space<vmem>>, vector<8x256xf32>
      %c0_11 = arith.constant 0 : index
      %c0_12 = arith.constant 0 : index
      %13 = vector.load %arg5[%c0_11, %c0_12] : memref<1x256xf32, #tpu.memory_space<vmem>>, vector<1x256xf32>
      %14 = vector.broadcast %13 : vector<1x256xf32> to vector<8x256xf32>
      %15 = arith.addf %12, %14 : vector<8x256xf32>
      %cst_13 = arith.constant 0.000000e+00 : f32
      %16 = vector.broadcast %cst_13 : f32 to vector<8x256xf32>
      %17 = arith.maximumf %15, %16 : vector<8x256xf32>
      %c0_14 = arith.constant 0 : index
      %c0_15 = arith.constant 0 : index
      %18 = vector.load %arg6[%c0_14, %c0_15] : memref<8x256xf32, #tpu.memory_space<vmem>>, vector<8x256xf32>
      tpu.vector_store %arg6[%c0_14, %c0_15], %17 {strides = array<i32>} : memref<8x256xf32, #tpu.memory_space<vmem>>, vector<8x256xf32>,
      %cst_16 = arith.constant dense<0.000000e+00> : vector<256xf32>
      %19 = vector.multi_reduction <add>, %17, %cst_16 [0] : vector<8x256xf32> to vector<256xf32>
      %20 = vector.shape_cast %19 : vector<256xf32> to vector<1x256xf32>
      %c0_17 = arith.constant 0 : index
      %c0_18 = arith.constant 0 : index
      %21 = vector.load %arg7[%c0_17, %c0_18] : memref<8x256xf32, #tpu.memory_space<vmem>>, vector<1x256xf32>
      tpu.vector_store %arg7[%c0_17, %c0_18], %20 {strides = array<i32>} : memref<8x256xf32, #tpu.memory_space<vmem>>, vector<1x256xf32>,
      %22 = arith.mulf %17, %17 : vector<8x256xf32>
      %cst_19 = arith.constant dense<0.000000e+00> : vector<256xf32>
      %23 = vector.multi_reduction <add>, %22, %cst_19 [0] : vector<8x256xf32> to vector<256xf32>
      %24 = vector.shape_cast %23 : vector<256xf32> to vector<1x256xf32>
      %c1 = arith.constant 1 : index
      %c0_20 = arith.constant 0 : index
      %25 = vector.load %arg7[%c1, %c0_20] : memref<8x256xf32, #tpu.memory_space<vmem>>, vector<1x256xf32>
      tpu.vector_store %arg7[%c1, %c0_20], %24 {strides = array<i32>} : memref<8x256xf32, #tpu.memory_space<vmem>>, vector<1x256xf32>,
    } else {
    }
    return
  }
  func.func @transform_0(%arg0: i32, %arg1: i32, %arg2: i32) -> (i32, i32) {
    %c0_i32 = arith.constant 0 : i32
    return %arg0, %arg2 : i32, i32
  }
  func.func @transform_1(%arg0: i32, %arg1: i32, %arg2: i32) -> (i32, i32) {
    %c0_i32 = arith.constant 0 : i32
    return %arg2, %arg1 : i32, i32
  }
  func.func @transform_2(%arg0: i32, %arg1: i32, %arg2: i32) -> (i32, i32) {
    %c0_i32 = arith.constant 0 : i32
    %c0_i32_0 = arith.constant 0 : i32
    return %c0_i32, %arg1 : i32, i32
  }
  func.func @transform_3(%arg0: i32, %arg1: i32, %arg2: i32) -> (i32, i32) {
    %c0_i32 = arith.constant 0 : i32
    return %arg0, %arg1 : i32, i32
  }
  func.func @transform_4(%arg0: i32, %arg1: i32, %arg2: i32) -> (i32, i32) {
    %c0_i32 = arith.constant 0 : i32
    return %arg0, %arg1 : i32, i32
  }
}

module attributes {stable_mosaic.version = 11 : i64} {
  func.func @_conv_bn_stats_kernel(%arg0: i32, %arg1: i32, %arg2: i32, %arg3: memref<8x256xbf16, #tpu.memory_space<vmem>>, %arg4: memref<256x256xbf16, #tpu.memory_space<vmem>>, %arg5: memref<1x256xf32, #tpu.memory_space<vmem>>, %arg6: memref<8x256xf32, #tpu.memory_space<vmem>>, %arg7: memref<8x256xf32, #tpu.memory_space<vmem>>) attributes {dimension_semantics = [#tpu.dimension_semantics<parallel>, #tpu.dimension_semantics<parallel>, #tpu.dimension_semantics<arbitrary>], iteration_bounds = array<i64: 1, 4, 18>, scalar_prefetch = 0 : i64, scratch_operands = 0 : i64, tpu.core_type = #tpu.core_type<tc>, window_params = [{transform_indices = @transform_0, window_bounds = array<i64: 8, 256>}, {transform_indices = @transform_1, window_bounds = array<i64: 256, 256>}, {transform_indices = @transform_2, window_bounds = array<i64: 1, 256>}, {transform_indices = @transform_3, window_bounds = array<i64: 8, 256>}, {transform_indices = @transform_4, window_bounds = array<i64: 8, 256>}]} {
    %c0_i32 = arith.constant 0 : i32
    %0 = arith.cmpi eq, %arg2, %c0_i32 : i32
    %1 = arith.extui %0 : i1 to i32
    %c0_i32_0 = arith.constant 0 : i32
    %2 = arith.cmpi ne, %1, %c0_i32_0 : i32
    scf.if %2 {
      %cst_9 = arith.constant 0.000000e+00 : f32
      %12 = vector.broadcast %cst_9 : f32 to vector<8x256xf32>
      %c0_10 = arith.constant 0 : index
      %c0_11 = arith.constant 0 : index
      %13 = vector.load %arg6[%c0_10, %c0_11] : memref<8x256xf32, #tpu.memory_space<vmem>>, vector<8x256xf32>
      tpu.vector_store %arg6[%c0_10, %c0_11], %12 {strides = array<i32>} : memref<8x256xf32, #tpu.memory_space<vmem>>, vector<8x256xf32>,
    } else {
    }
    %c0 = arith.constant 0 : index
    %c0_1 = arith.constant 0 : index
    %3 = vector.load %arg6[%c0, %c0_1] : memref<8x256xf32, #tpu.memory_space<vmem>>, vector<8x256xf32>
    %c0_2 = arith.constant 0 : index
    %c0_3 = arith.constant 0 : index
    %4 = vector.load %arg3[%c0_2, %c0_3] : memref<8x256xbf16, #tpu.memory_space<vmem>>, vector<8x256xbf16>
    %c0_4 = arith.constant 0 : index
    %c0_5 = arith.constant 0 : index
    %5 = vector.load %arg4[%c0_4, %c0_5] : memref<256x256xbf16, #tpu.memory_space<vmem>>, vector<256x256xbf16>
    %cst = arith.constant dense<0.000000e+00> : vector<8x256xf32>
    %6 = tpu.matmul %4, %5, %cst {dimension_numbers = #tpu.dot_dimension_numbers<[1], [0], [0], [1], [0, 0, 1, 1], [], []>} : vector<8x256xbf16>, vector<256x256xbf16>, vector<8x256xf32> -> vector<8x256xf32>
    %7 = arith.addf %3, %6 : vector<8x256xf32>
    %c0_6 = arith.constant 0 : index
    %c0_7 = arith.constant 0 : index
    %8 = vector.load %arg6[%c0_6, %c0_7] : memref<8x256xf32, #tpu.memory_space<vmem>>, vector<8x256xf32>
    tpu.vector_store %arg6[%c0_6, %c0_7], %7 {strides = array<i32>} : memref<8x256xf32, #tpu.memory_space<vmem>>, vector<8x256xf32>,
    %c17_i32 = arith.constant 17 : i32
    %9 = arith.cmpi eq, %arg2, %c17_i32 : i32
    %10 = arith.extui %9 : i1 to i32
    %c0_i32_8 = arith.constant 0 : i32
    %11 = arith.cmpi ne, %10, %c0_i32_8 : i32
    scf.if %11 {
      %c0_9 = arith.constant 0 : index
      %c0_10 = arith.constant 0 : index
      %12 = vector.load %arg6[%c0_9, %c0_10] : memref<8x256xf32, #tpu.memory_space<vmem>>, vector<8x256xf32>
      %c0_11 = arith.constant 0 : index
      %c0_12 = arith.constant 0 : index
      %13 = vector.load %arg5[%c0_11, %c0_12] : memref<1x256xf32, #tpu.memory_space<vmem>>, vector<1x256xf32>
      %14 = vector.broadcast %13 : vector<1x256xf32> to vector<8x256xf32>
      %15 = arith.addf %12, %14 : vector<8x256xf32>
      %cst_13 = arith.constant 0.000000e+00 : f32
      %16 = vector.broadcast %cst_13 : f32 to vector<8x256xf32>
      %17 = arith.maximumf %15, %16 : vector<8x256xf32>
      %c0_14 = arith.constant 0 : index
      %c0_15 = arith.constant 0 : index
      %18 = vector.load %arg6[%c0_14, %c0_15] : memref<8x256xf32, #tpu.memory_space<vmem>>, vector<8x256xf32>
      tpu.vector_store %arg6[%c0_14, %c0_15], %17 {strides = array<i32>} : memref<8x256xf32, #tpu.memory_space<vmem>>, vector<8x256xf32>,
      %cst_16 = arith.constant dense<0.000000e+00> : vector<256xf32>
      %19 = vector.multi_reduction <add>, %17, %cst_16 [0] : vector<8x256xf32> to vector<256xf32>
      %20 = vector.shape_cast %19 : vector<256xf32> to vector<1x256xf32>
      %c0_17 = arith.constant 0 : index
      %c0_18 = arith.constant 0 : index
      %21 = vector.load %arg7[%c0_17, %c0_18] : memref<8x256xf32, #tpu.memory_space<vmem>>, vector<1x256xf32>
      tpu.vector_store %arg7[%c0_17, %c0_18], %20 {strides = array<i32>} : memref<8x256xf32, #tpu.memory_space<vmem>>, vector<1x256xf32>,
      %22 = arith.mulf %17, %17 : vector<8x256xf32>
      %cst_19 = arith.constant dense<0.000000e+00> : vector<256xf32>
      %23 = vector.multi_reduction <add>, %22, %cst_19 [0] : vector<8x256xf32> to vector<256xf32>
      %24 = vector.shape_cast %23 : vector<256xf32> to vector<1x256xf32>
      %c1 = arith.constant 1 : index
      %c0_20 = arith.constant 0 : index
      %25 = vector.load %arg7[%c1, %c0_20] : memref<8x256xf32, #tpu.memory_space<vmem>>, vector<1x256xf32>
      tpu.vector_store %arg7[%c1, %c0_20], %24 {strides = array<i32>} : memref<8x256xf32, #tpu.memory_space<vmem>>, vector<1x256xf32>,
    } else {
    }
    return
  }
  func.func @transform_0(%arg0: i32, %arg1: i32, %arg2: i32) -> (i32, i32) {
    %c0_i32 = arith.constant 0 : i32
    return %arg0, %arg2 : i32, i32
  }
  func.func @transform_1(%arg0: i32, %arg1: i32, %arg2: i32) -> (i32, i32) {
    %c0_i32 = arith.constant 0 : i32
    return %arg2, %arg1 : i32, i32
  }
  func.func @transform_2(%arg0: i32, %arg1: i32, %arg2: i32) -> (i32, i32) {
    %c0_i32 = arith.constant 0 : i32
    %c0_i32_0 = arith.constant 0 : i32
    return %c0_i32, %arg1 : i32, i32
  }
  func.func @transform_3(%arg0: i32, %arg1: i32, %arg2: i32) -> (i32, i32) {
    %c0_i32 = arith.constant 0 : i32
    return %arg0, %arg1 : i32, i32
  }
  func.func @transform_4(%arg0: i32, %arg1: i32, %arg2: i32) -> (i32, i32) {
    %c0_i32 = arith.constant 0 : i32
    return %arg0, %arg1 : i32, i32
  }
}

module attributes {stable_mosaic.version = 11 : i64} {
  func.func @_conv_bn_stats_kernel(%arg0: i32, %arg1: i32, %arg2: i32, %arg3: memref<8x256xbf16, #tpu.memory_space<vmem>>, %arg4: memref<256x256xbf16, #tpu.memory_space<vmem>>, %arg5: memref<1x256xf32, #tpu.memory_space<vmem>>, %arg6: memref<8x256xf32, #tpu.memory_space<vmem>>, %arg7: memref<8x256xf32, #tpu.memory_space<vmem>>) attributes {dimension_semantics = [#tpu.dimension_semantics<parallel>, #tpu.dimension_semantics<parallel>, #tpu.dimension_semantics<arbitrary>], iteration_bounds = array<i64: 1, 4, 36>, scalar_prefetch = 0 : i64, scratch_operands = 0 : i64, tpu.core_type = #tpu.core_type<tc>, window_params = [{transform_indices = @transform_0, window_bounds = array<i64: 8, 256>}, {transform_indices = @transform_1, window_bounds = array<i64: 256, 256>}, {transform_indices = @transform_2, window_bounds = array<i64: 1, 256>}, {transform_indices = @transform_3, window_bounds = array<i64: 8, 256>}, {transform_indices = @transform_4, window_bounds = array<i64: 8, 256>}]} {
    %c0_i32 = arith.constant 0 : i32
    %0 = arith.cmpi eq, %arg2, %c0_i32 : i32
    %1 = arith.extui %0 : i1 to i32
    %c0_i32_0 = arith.constant 0 : i32
    %2 = arith.cmpi ne, %1, %c0_i32_0 : i32
    scf.if %2 {
      %cst_9 = arith.constant 0.000000e+00 : f32
      %12 = vector.broadcast %cst_9 : f32 to vector<8x256xf32>
      %c0_10 = arith.constant 0 : index
      %c0_11 = arith.constant 0 : index
      %13 = vector.load %arg6[%c0_10, %c0_11] : memref<8x256xf32, #tpu.memory_space<vmem>>, vector<8x256xf32>
      tpu.vector_store %arg6[%c0_10, %c0_11], %12 {strides = array<i32>} : memref<8x256xf32, #tpu.memory_space<vmem>>, vector<8x256xf32>,
    } else {
    }
    %c0 = arith.constant 0 : index
    %c0_1 = arith.constant 0 : index
    %3 = vector.load %arg6[%c0, %c0_1] : memref<8x256xf32, #tpu.memory_space<vmem>>, vector<8x256xf32>
    %c0_2 = arith.constant 0 : index
    %c0_3 = arith.constant 0 : index
    %4 = vector.load %arg3[%c0_2, %c0_3] : memref<8x256xbf16, #tpu.memory_space<vmem>>, vector<8x256xbf16>
    %c0_4 = arith.constant 0 : index
    %c0_5 = arith.constant 0 : index
    %5 = vector.load %arg4[%c0_4, %c0_5] : memref<256x256xbf16, #tpu.memory_space<vmem>>, vector<256x256xbf16>
    %cst = arith.constant dense<0.000000e+00> : vector<8x256xf32>
    %6 = tpu.matmul %4, %5, %cst {dimension_numbers = #tpu.dot_dimension_numbers<[1], [0], [0], [1], [0, 0, 1, 1], [], []>} : vector<8x256xbf16>, vector<256x256xbf16>, vector<8x256xf32> -> vector<8x256xf32>
    %7 = arith.addf %3, %6 : vector<8x256xf32>
    %c0_6 = arith.constant 0 : index
    %c0_7 = arith.constant 0 : index
    %8 = vector.load %arg6[%c0_6, %c0_7] : memref<8x256xf32, #tpu.memory_space<vmem>>, vector<8x256xf32>
    tpu.vector_store %arg6[%c0_6, %c0_7], %7 {strides = array<i32>} : memref<8x256xf32, #tpu.memory_space<vmem>>, vector<8x256xf32>,
    %c35_i32 = arith.constant 35 : i32
    %9 = arith.cmpi eq, %arg2, %c35_i32 : i32
    %10 = arith.extui %9 : i1 to i32
    %c0_i32_8 = arith.constant 0 : i32
    %11 = arith.cmpi ne, %10, %c0_i32_8 : i32
    scf.if %11 {
      %c0_9 = arith.constant 0 : index
      %c0_10 = arith.constant 0 : index
      %12 = vector.load %arg6[%c0_9, %c0_10] : memref<8x256xf32, #tpu.memory_space<vmem>>, vector<8x256xf32>
      %c0_11 = arith.constant 0 : index
      %c0_12 = arith.constant 0 : index
      %13 = vector.load %arg5[%c0_11, %c0_12] : memref<1x256xf32, #tpu.memory_space<vmem>>, vector<1x256xf32>
      %14 = vector.broadcast %13 : vector<1x256xf32> to vector<8x256xf32>
      %15 = arith.addf %12, %14 : vector<8x256xf32>
      %cst_13 = arith.constant 0.000000e+00 : f32
      %16 = vector.broadcast %cst_13 : f32 to vector<8x256xf32>
      %17 = arith.maximumf %15, %16 : vector<8x256xf32>
      %c0_14 = arith.constant 0 : index
      %c0_15 = arith.constant 0 : index
      %18 = vector.load %arg6[%c0_14, %c0_15] : memref<8x256xf32, #tpu.memory_space<vmem>>, vector<8x256xf32>
      tpu.vector_store %arg6[%c0_14, %c0_15], %17 {strides = array<i32>} : memref<8x256xf32, #tpu.memory_space<vmem>>, vector<8x256xf32>,
      %cst_16 = arith.constant dense<0.000000e+00> : vector<256xf32>
      %19 = vector.multi_reduction <add>, %17, %cst_16 [0] : vector<8x256xf32> to vector<256xf32>
      %20 = vector.shape_cast %19 : vector<256xf32> to vector<1x256xf32>
      %c0_17 = arith.constant 0 : index
      %c0_18 = arith.constant 0 : index
      %21 = vector.load %arg7[%c0_17, %c0_18] : memref<8x256xf32, #tpu.memory_space<vmem>>, vector<1x256xf32>
      tpu.vector_store %arg7[%c0_17, %c0_18], %20 {strides = array<i32>} : memref<8x256xf32, #tpu.memory_space<vmem>>, vector<1x256xf32>,
      %22 = arith.mulf %17, %17 : vector<8x256xf32>
      %cst_19 = arith.constant dense<0.000000e+00> : vector<256xf32>
      %23 = vector.multi_reduction <add>, %22, %cst_19 [0] : vector<8x256xf32> to vector<256xf32>
      %24 = vector.shape_cast %23 : vector<256xf32> to vector<1x256xf32>
      %c1 = arith.constant 1 : index
      %c0_20 = arith.constant 0 : index
      %25 = vector.load %arg7[%c1, %c0_20] : memref<8x256xf32, #tpu.memory_space<vmem>>, vector<1x256xf32>
      tpu.vector_store %arg7[%c1, %c0_20], %24 {strides = array<i32>} : memref<8x256xf32, #tpu.memory_space<vmem>>, vector<1x256xf32>,
    } else {
    }
    return
  }
  func.func @transform_0(%arg0: i32, %arg1: i32, %arg2: i32) -> (i32, i32) {
    %c0_i32 = arith.constant 0 : i32
    return %arg0, %arg2 : i32, i32
  }
  func.func @transform_1(%arg0: i32, %arg1: i32, %arg2: i32) -> (i32, i32) {
    %c0_i32 = arith.constant 0 : i32
    return %arg2, %arg1 : i32, i32
  }
  func.func @transform_2(%arg0: i32, %arg1: i32, %arg2: i32) -> (i32, i32) {
    %c0_i32 = arith.constant 0 : i32
    %c0_i32_0 = arith.constant 0 : i32
    return %c0_i32, %arg1 : i32, i32
  }
  func.func @transform_3(%arg0: i32, %arg1: i32, %arg2: i32) -> (i32, i32) {
    %c0_i32 = arith.constant 0 : i32
    return %arg0, %arg1 : i32, i32
  }
  func.func @transform_4(%arg0: i32, %arg1: i32, %arg2: i32) -> (i32, i32) {
    %c0_i32 = arith.constant 0 : i32
    return %arg0, %arg1 : i32, i32
  }
}

module attributes {stable_mosaic.version = 11 : i64} {
  func.func @_conv_bn_stats_kernel(%arg0: i32, %arg1: i32, %arg2: i32, %arg3: memref<8x256xbf16, #tpu.memory_space<vmem>>, %arg4: memref<256x256xbf16, #tpu.memory_space<vmem>>, %arg5: memref<1x256xf32, #tpu.memory_space<vmem>>, %arg6: memref<8x256xf32, #tpu.memory_space<vmem>>, %arg7: memref<8x256xf32, #tpu.memory_space<vmem>>) attributes {dimension_semantics = [#tpu.dimension_semantics<parallel>, #tpu.dimension_semantics<parallel>, #tpu.dimension_semantics<arbitrary>], iteration_bounds = array<i64: 1, 2, 36>, scalar_prefetch = 0 : i64, scratch_operands = 0 : i64, tpu.core_type = #tpu.core_type<tc>, window_params = [{transform_indices = @transform_0, window_bounds = array<i64: 8, 256>}, {transform_indices = @transform_1, window_bounds = array<i64: 256, 256>}, {transform_indices = @transform_2, window_bounds = array<i64: 1, 256>}, {transform_indices = @transform_3, window_bounds = array<i64: 8, 256>}, {transform_indices = @transform_4, window_bounds = array<i64: 8, 256>}]} {
    %c0_i32 = arith.constant 0 : i32
    %0 = arith.cmpi eq, %arg2, %c0_i32 : i32
    %1 = arith.extui %0 : i1 to i32
    %c0_i32_0 = arith.constant 0 : i32
    %2 = arith.cmpi ne, %1, %c0_i32_0 : i32
    scf.if %2 {
      %cst_9 = arith.constant 0.000000e+00 : f32
      %12 = vector.broadcast %cst_9 : f32 to vector<8x256xf32>
      %c0_10 = arith.constant 0 : index
      %c0_11 = arith.constant 0 : index
      %13 = vector.load %arg6[%c0_10, %c0_11] : memref<8x256xf32, #tpu.memory_space<vmem>>, vector<8x256xf32>
      tpu.vector_store %arg6[%c0_10, %c0_11], %12 {strides = array<i32>} : memref<8x256xf32, #tpu.memory_space<vmem>>, vector<8x256xf32>,
    } else {
    }
    %c0 = arith.constant 0 : index
    %c0_1 = arith.constant 0 : index
    %3 = vector.load %arg6[%c0, %c0_1] : memref<8x256xf32, #tpu.memory_space<vmem>>, vector<8x256xf32>
    %c0_2 = arith.constant 0 : index
    %c0_3 = arith.constant 0 : index
    %4 = vector.load %arg3[%c0_2, %c0_3] : memref<8x256xbf16, #tpu.memory_space<vmem>>, vector<8x256xbf16>
    %c0_4 = arith.constant 0 : index
    %c0_5 = arith.constant 0 : index
    %5 = vector.load %arg4[%c0_4, %c0_5] : memref<256x256xbf16, #tpu.memory_space<vmem>>, vector<256x256xbf16>
    %cst = arith.constant dense<0.000000e+00> : vector<8x256xf32>
    %6 = tpu.matmul %4, %5, %cst {dimension_numbers = #tpu.dot_dimension_numbers<[1], [0], [0], [1], [0, 0, 1, 1], [], []>} : vector<8x256xbf16>, vector<256x256xbf16>, vector<8x256xf32> -> vector<8x256xf32>
    %7 = arith.addf %3, %6 : vector<8x256xf32>
    %c0_6 = arith.constant 0 : index
    %c0_7 = arith.constant 0 : index
    %8 = vector.load %arg6[%c0_6, %c0_7] : memref<8x256xf32, #tpu.memory_space<vmem>>, vector<8x256xf32>
    tpu.vector_store %arg6[%c0_6, %c0_7], %7 {strides = array<i32>} : memref<8x256xf32, #tpu.memory_space<vmem>>, vector<8x256xf32>,
    %c35_i32 = arith.constant 35 : i32
    %9 = arith.cmpi eq, %arg2, %c35_i32 : i32
    %10 = arith.extui %9 : i1 to i32
    %c0_i32_8 = arith.constant 0 : i32
    %11 = arith.cmpi ne, %10, %c0_i32_8 : i32
    scf.if %11 {
      %c0_9 = arith.constant 0 : index
      %c0_10 = arith.constant 0 : index
      %12 = vector.load %arg6[%c0_9, %c0_10] : memref<8x256xf32, #tpu.memory_space<vmem>>, vector<8x256xf32>
      %c0_11 = arith.constant 0 : index
      %c0_12 = arith.constant 0 : index
      %13 = vector.load %arg5[%c0_11, %c0_12] : memref<1x256xf32, #tpu.memory_space<vmem>>, vector<1x256xf32>
      %14 = vector.broadcast %13 : vector<1x256xf32> to vector<8x256xf32>
      %15 = arith.addf %12, %14 : vector<8x256xf32>
      %cst_13 = arith.constant 0.000000e+00 : f32
      %16 = vector.broadcast %cst_13 : f32 to vector<8x256xf32>
      %17 = arith.maximumf %15, %16 : vector<8x256xf32>
      %c0_14 = arith.constant 0 : index
      %c0_15 = arith.constant 0 : index
      %18 = vector.load %arg6[%c0_14, %c0_15] : memref<8x256xf32, #tpu.memory_space<vmem>>, vector<8x256xf32>
      tpu.vector_store %arg6[%c0_14, %c0_15], %17 {strides = array<i32>} : memref<8x256xf32, #tpu.memory_space<vmem>>, vector<8x256xf32>,
      %cst_16 = arith.constant dense<0.000000e+00> : vector<256xf32>
      %19 = vector.multi_reduction <add>, %17, %cst_16 [0] : vector<8x256xf32> to vector<256xf32>
      %20 = vector.shape_cast %19 : vector<256xf32> to vector<1x256xf32>
      %c0_17 = arith.constant 0 : index
      %c0_18 = arith.constant 0 : index
      %21 = vector.load %arg7[%c0_17, %c0_18] : memref<8x256xf32, #tpu.memory_space<vmem>>, vector<1x256xf32>
      tpu.vector_store %arg7[%c0_17, %c0_18], %20 {strides = array<i32>} : memref<8x256xf32, #tpu.memory_space<vmem>>, vector<1x256xf32>,
      %22 = arith.mulf %17, %17 : vector<8x256xf32>
      %cst_19 = arith.constant dense<0.000000e+00> : vector<256xf32>
      %23 = vector.multi_reduction <add>, %22, %cst_19 [0] : vector<8x256xf32> to vector<256xf32>
      %24 = vector.shape_cast %23 : vector<256xf32> to vector<1x256xf32>
      %c1 = arith.constant 1 : index
      %c0_20 = arith.constant 0 : index
      %25 = vector.load %arg7[%c1, %c0_20] : memref<8x256xf32, #tpu.memory_space<vmem>>, vector<1x256xf32>
      tpu.vector_store %arg7[%c1, %c0_20], %24 {strides = array<i32>} : memref<8x256xf32, #tpu.memory_space<vmem>>, vector<1x256xf32>,
    } else {
    }
    return
  }
  func.func @transform_0(%arg0: i32, %arg1: i32, %arg2: i32) -> (i32, i32) {
    %c0_i32 = arith.constant 0 : i32
    return %arg0, %arg2 : i32, i32
  }
  func.func @transform_1(%arg0: i32, %arg1: i32, %arg2: i32) -> (i32, i32) {
    %c0_i32 = arith.constant 0 : i32
    return %arg2, %arg1 : i32, i32
  }
  func.func @transform_2(%arg0: i32, %arg1: i32, %arg2: i32) -> (i32, i32) {
    %c0_i32 = arith.constant 0 : i32
    %c0_i32_0 = arith.constant 0 : i32
    return %c0_i32, %arg1 : i32, i32
  }
  func.func @transform_3(%arg0: i32, %arg1: i32, %arg2: i32) -> (i32, i32) {
    %c0_i32 = arith.constant 0 : i32
    return %arg0, %arg1 : i32, i32
  }
  func.func @transform_4(%arg0: i32, %arg1: i32, %arg2: i32) -> (i32, i32) {
    %c0_i32 = arith.constant 0 : i32
    return %arg0, %arg1 : i32, i32
  }
}

module attributes {stable_mosaic.version = 11 : i64} {
  func.func @_conv_bn_stats_kernel(%arg0: i32, %arg1: i32, %arg2: i32, %arg3: memref<8x256xbf16, #tpu.memory_space<vmem>>, %arg4: memref<256x256xbf16, #tpu.memory_space<vmem>>, %arg5: memref<1x256xf32, #tpu.memory_space<vmem>>, %arg6: memref<8x256xf32, #tpu.memory_space<vmem>>, %arg7: memref<8x256xf32, #tpu.memory_space<vmem>>) attributes {dimension_semantics = [#tpu.dimension_semantics<parallel>, #tpu.dimension_semantics<parallel>, #tpu.dimension_semantics<arbitrary>], iteration_bounds = array<i64: 1, 1, 18>, scalar_prefetch = 0 : i64, scratch_operands = 0 : i64, tpu.core_type = #tpu.core_type<tc>, window_params = [{transform_indices = @transform_0, window_bounds = array<i64: 8, 256>}, {transform_indices = @transform_1, window_bounds = array<i64: 256, 256>}, {transform_indices = @transform_2, window_bounds = array<i64: 1, 256>}, {transform_indices = @transform_3, window_bounds = array<i64: 8, 256>}, {transform_indices = @transform_4, window_bounds = array<i64: 8, 256>}]} {
    %c0_i32 = arith.constant 0 : i32
    %0 = arith.cmpi eq, %arg2, %c0_i32 : i32
    %1 = arith.extui %0 : i1 to i32
    %c0_i32_0 = arith.constant 0 : i32
    %2 = arith.cmpi ne, %1, %c0_i32_0 : i32
    scf.if %2 {
      %cst_9 = arith.constant 0.000000e+00 : f32
      %12 = vector.broadcast %cst_9 : f32 to vector<8x256xf32>
      %c0_10 = arith.constant 0 : index
      %c0_11 = arith.constant 0 : index
      %13 = vector.load %arg6[%c0_10, %c0_11] : memref<8x256xf32, #tpu.memory_space<vmem>>, vector<8x256xf32>
      tpu.vector_store %arg6[%c0_10, %c0_11], %12 {strides = array<i32>} : memref<8x256xf32, #tpu.memory_space<vmem>>, vector<8x256xf32>,
    } else {
    }
    %c0 = arith.constant 0 : index
    %c0_1 = arith.constant 0 : index
    %3 = vector.load %arg6[%c0, %c0_1] : memref<8x256xf32, #tpu.memory_space<vmem>>, vector<8x256xf32>
    %c0_2 = arith.constant 0 : index
    %c0_3 = arith.constant 0 : index
    %4 = vector.load %arg3[%c0_2, %c0_3] : memref<8x256xbf16, #tpu.memory_space<vmem>>, vector<8x256xbf16>
    %c0_4 = arith.constant 0 : index
    %c0_5 = arith.constant 0 : index
    %5 = vector.load %arg4[%c0_4, %c0_5] : memref<256x256xbf16, #tpu.memory_space<vmem>>, vector<256x256xbf16>
    %cst = arith.constant dense<0.000000e+00> : vector<8x256xf32>
    %6 = tpu.matmul %4, %5, %cst {dimension_numbers = #tpu.dot_dimension_numbers<[1], [0], [0], [1], [0, 0, 1, 1], [], []>} : vector<8x256xbf16>, vector<256x256xbf16>, vector<8x256xf32> -> vector<8x256xf32>
    %7 = arith.addf %3, %6 : vector<8x256xf32>
    %c0_6 = arith.constant 0 : index
    %c0_7 = arith.constant 0 : index
    %8 = vector.load %arg6[%c0_6, %c0_7] : memref<8x256xf32, #tpu.memory_space<vmem>>, vector<8x256xf32>
    tpu.vector_store %arg6[%c0_6, %c0_7], %7 {strides = array<i32>} : memref<8x256xf32, #tpu.memory_space<vmem>>, vector<8x256xf32>,
    %c17_i32 = arith.constant 17 : i32
    %9 = arith.cmpi eq, %arg2, %c17_i32 : i32
    %10 = arith.extui %9 : i1 to i32
    %c0_i32_8 = arith.constant 0 : i32
    %11 = arith.cmpi ne, %10, %c0_i32_8 : i32
    scf.if %11 {
      %c0_9 = arith.constant 0 : index
      %c0_10 = arith.constant 0 : index
      %12 = vector.load %arg6[%c0_9, %c0_10] : memref<8x256xf32, #tpu.memory_space<vmem>>, vector<8x256xf32>
      %c0_11 = arith.constant 0 : index
      %c0_12 = arith.constant 0 : index
      %13 = vector.load %arg5[%c0_11, %c0_12] : memref<1x256xf32, #tpu.memory_space<vmem>>, vector<1x256xf32>
      %14 = vector.broadcast %13 : vector<1x256xf32> to vector<8x256xf32>
      %15 = arith.addf %12, %14 : vector<8x256xf32>
      %cst_13 = arith.constant 0.000000e+00 : f32
      %16 = vector.broadcast %cst_13 : f32 to vector<8x256xf32>
      %17 = arith.maximumf %15, %16 : vector<8x256xf32>
      %c0_14 = arith.constant 0 : index
      %c0_15 = arith.constant 0 : index
      %18 = vector.load %arg6[%c0_14, %c0_15] : memref<8x256xf32, #tpu.memory_space<vmem>>, vector<8x256xf32>
      tpu.vector_store %arg6[%c0_14, %c0_15], %17 {strides = array<i32>} : memref<8x256xf32, #tpu.memory_space<vmem>>, vector<8x256xf32>,
      %cst_16 = arith.constant dense<0.000000e+00> : vector<256xf32>
      %19 = vector.multi_reduction <add>, %17, %cst_16 [0] : vector<8x256xf32> to vector<256xf32>
      %20 = vector.shape_cast %19 : vector<256xf32> to vector<1x256xf32>
      %c0_17 = arith.constant 0 : index
      %c0_18 = arith.constant 0 : index
      %21 = vector.load %arg7[%c0_17, %c0_18] : memref<8x256xf32, #tpu.memory_space<vmem>>, vector<1x256xf32>
      tpu.vector_store %arg7[%c0_17, %c0_18], %20 {strides = array<i32>} : memref<8x256xf32, #tpu.memory_space<vmem>>, vector<1x256xf32>,
      %22 = arith.mulf %17, %17 : vector<8x256xf32>
      %cst_19 = arith.constant dense<0.000000e+00> : vector<256xf32>
      %23 = vector.multi_reduction <add>, %22, %cst_19 [0] : vector<8x256xf32> to vector<256xf32>
      %24 = vector.shape_cast %23 : vector<256xf32> to vector<1x256xf32>
      %c1 = arith.constant 1 : index
      %c0_20 = arith.constant 0 : index
      %25 = vector.load %arg7[%c1, %c0_20] : memref<8x256xf32, #tpu.memory_space<vmem>>, vector<1x256xf32>
      tpu.vector_store %arg7[%c1, %c0_20], %24 {strides = array<i32>} : memref<8x256xf32, #tpu.memory_space<vmem>>, vector<1x256xf32>,
    } else {
    }
    return
  }
  func.func @transform_0(%arg0: i32, %arg1: i32, %arg2: i32) -> (i32, i32) {
    %c0_i32 = arith.constant 0 : i32
    return %arg0, %arg2 : i32, i32
  }
  func.func @transform_1(%arg0: i32, %arg1: i32, %arg2: i32) -> (i32, i32) {
    %c0_i32 = arith.constant 0 : i32
    return %arg2, %arg1 : i32, i32
  }
  func.func @transform_2(%arg0: i32, %arg1: i32, %arg2: i32) -> (i32, i32) {
    %c0_i32 = arith.constant 0 : i32
    %c0_i32_0 = arith.constant 0 : i32
    return %c0_i32, %arg1 : i32, i32
  }
  func.func @transform_3(%arg0: i32, %arg1: i32, %arg2: i32) -> (i32, i32) {
    %c0_i32 = arith.constant 0 : i32
    return %arg0, %arg1 : i32, i32
  }
  func.func @transform_4(%arg0: i32, %arg1: i32, %arg2: i32) -> (i32, i32) {
    %c0_i32 = arith.constant 0 : i32
    return %arg0, %arg1 : i32, i32
  }
}

</mosaic_0001>

<bundles_post_ra>
// kernel: encoder_forward.14
= control target key start
LH: loop header
LB: loop body
LE: loop exit
PB: predicated region body
PF: predicated region fallthrough
CT: control target
= control target key end

     0   :  { %s716_s1 = inlined_call_operand.vmem [shape: bf16[128,128], index: 1, kind: input, shape index: {}]   ;;  %s717_s0 = inlined_call_operand.vmem [shape: bf16[128,128], index: 0, kind: input, shape index: {}]   ;;  %s718_s2 = inlined_call_operand.vmem [shape: f32[1,128], index: 2, kind: input, shape index: {}]   ;;  %s719_s3 = inlined_call_operand.vmem [shape: f32[128,128], index: 3, kind: output, shape index: {0}]   ;;  %s720_s4 = inlined_call_operand.vmem [shape: f32[8,128], index: 4, kind: output, shape index: {1}]  }
   0x1   :  { %v534_v0 = vld [vmem:[%s716_s1 + $0x38] sm:$0xff]   ;;  %v535_v1 = vld [vmem:[%s716_s1 + $0x30] sm:$0xff]   ;;  %v536_v2 = vld [vmem:[%s716_s1 + $0x28] sm:$0xff]  }
   0x2   :  { %485 = vmatprep.subr.bf16.mxu0 %v534_v0  ;;  %517 = vmatprep.subr.bf16.mxu1 %v534_v0  ;;  %v537_v3 = vld [vmem:[%s716_s1 + $0x20] sm:$0xff]   ;;  %v538_v5 = vld [vmem:[%s716_s1 + $0x18] sm:$0xff]   ;;  %v539_v7 = vld [vmem:[%s716_s1 + $0x10] sm:$0xff]  }
   0x3   :  { %486 = vmatpush3.bf16.msra.mxu0 %v534_v0  ;;  %525 = vmatpush3.bf16.msra.mxu1 %v534_v0  ;;  %v542_v4 = vld [vmem:[%s717_s0] sm:$0xff]   ;;  %v540_v8 = vld [vmem:[%s716_s1 + $0x8] sm:$0xff]   ;;  %v544_v12 = vld [vmem:[%s717_s0 + $0x10] sm:$0xff]  }
   0x4   :  { %487 = vmatprep.subr.bf16.mxu0 %v535_v1  ;;  %518 = vmatprep.subr.bf16.mxu1 %v535_v1  ;;  %v546_v6 = vld [vmem:[%s717_s0 + $0x20] sm:$0xff]   ;;  %v543_v10 = vld [vmem:[%s717_s0 + $0x8] sm:$0xff]   ;;  %v548_v13 = vld [vmem:[%s717_s0 + $0x30] sm:$0xff]  }
   0x5   :  { %501 = vmatprep.mubr.bf16.mxu0 %v542_v4  ;;  %509 = vmatprep.mubr.bf16.mxu1 %v546_v6  ;;  %v541_v9 = vld [vmem:[%s716_s1] sm:$0xff]   ;;  %v547_v11 = vld [vmem:[%s717_s0 + $0x28] sm:$0xff]   ;;  %v545_v14 = vld [vmem:[%s717_s0 + $0x18] sm:$0xff]  }
   0x6   :  { %v549_v15 = vld [vmem:[%s717_s0 + $0x38] sm:$0xff]   ;;  %v626_v17 = vld [vmem:[%s718_s2] ss:$0 sm:$0xff] }
   0x7   :  { %488 = vmatpush3.bf16.msra.mxu0 %v535_v1  ;;  %526 = vmatpush3.bf16.msra.mxu1 %v535_v1 }
   0x8   :  { %489 = vmatprep.subr.bf16.mxu0 %v536_v2  ;;  %519 = vmatprep.subr.bf16.mxu1 %v536_v2 }
   0xb   :  { %490 = vmatpush3.bf16.msra.mxu0 %v536_v2  ;;  %527 = vmatpush3.bf16.msra.mxu1 %v536_v2 }
   0xc   :  { %491 = vmatprep.subr.bf16.mxu0 %v537_v3  ;;  %520 = vmatprep.subr.bf16.mxu1 %v537_v3 }
   0xf   :  { %492 = vmatpush3.bf16.msra.mxu0 %v537_v3  ;;  %528 = vmatpush3.bf16.msra.mxu1 %v537_v3 }
  0x10   :  { %493 = vmatprep.subr.bf16.mxu0 %v538_v5  ;;  %521 = vmatprep.subr.bf16.mxu1 %v538_v5 }
  0x13   :  { %494 = vmatpush3.bf16.msra.mxu0 %v538_v5  ;;  %529 = vmatpush3.bf16.msra.mxu1 %v538_v5 }
  0x14   :  { %495 = vmatprep.subr.bf16.mxu0 %v539_v7  ;;  %522 = vmatprep.subr.bf16.mxu1 %v539_v7 }
  0x17   :  { %496 = vmatpush3.bf16.msra.mxu0 %v539_v7  ;;  %530 = vmatpush3.bf16.msra.mxu1 %v539_v7 }
  0x18   :  { %497 = vmatprep.subr.bf16.mxu0 %v540_v8  ;;  %523 = vmatprep.subr.bf16.mxu1 %v540_v8 }
  0x1b   :  { %498 = vmatpush3.bf16.msra.mxu0 %v540_v8  ;;  %531 = vmatpush3.bf16.msra.mxu1 %v540_v8 }
  0x1c   :  { %499 = vmatprep.subr.bf16.mxu0 %v541_v9  ;;  %524 = vmatprep.subr.bf16.mxu1 %v541_v9 }
  0x1f   :  { %500 = vmatpush3.bf16.msra.mxu0 %v541_v9  ;;  %532 = vmatpush3.bf16.msra.mxu1 %v541_v9 }
  0x22   :  { %502 = vmatmul.mubr.bf16.vlgmr.msra.gmra.mxu0 %v543_v10  ;;  %510 = vmatmul.mubr.bf16.vlgmr.msra.gmra.mxu1 %v547_v11 }
  0x23   :  { %505 = vmatprep.mubr.bf16.mxu0 %v544_v12  ;;  %513 = vmatprep.mubr.bf16.mxu1 %v548_v13 }
  0x2a   :  { %506 = vmatmul.mubr.bf16.gmra.mxu0 %v545_v14  ;;  %514 = vmatmul.mubr.bf16.gmra.mxu1 %v549_v15 }
  0xe2   :  { %v503_v16 = vpop.f32.mrf.mxu0  ;;  %v511_v18 = vpop.f32.mrf.mxu1 }
  0xe3   :  { %v338_v21 = vadd.f32 %v503_v16, %v626_v17  ;;  %v346_v22 = vadd.f32 %v511_v18, %v626_v17 }
  0xe4   :  { %v215_v19 = vpop.f32.mrf.mxu0  ;;  %v247_v20 = vpop.f32.mrf.mxu1 }
  0xe5   :  { %v354_v25 = vmax.f32 %v338_v21, 0.0  ;;  %v336_v26 = vadd.f32 %v626_v17, %v215_v19  ;;  %v631_v27 = vmax.f32 %v346_v22, 0.0  ;;  %v344_v29 = vadd.f32 %v626_v17, %v247_v20 }
  0xe6   :  { %v504_v23 = vpop.f32.mrf.mxu0  ;;  %v512_v24 = vpop.f32.mrf.mxu1 }
  0xe7   :  { %370 = vst [vmem:[%s719_s3 + $0x10] sm:$0xff] %v354_v25  ;;  %v352_v31 = vmax.f32 %v336_v26, 0.0  ;;  %v339_v32 = vadd.f32 %v504_v23, %v626_v17  ;;  %378 = vst [vmem:[%s719_s3 + $0x50] sm:$0xff] %v631_v27  ;;  %v642_v34 = vmax.f32 %v344_v29, 0.0  ;;  %v347_v35 = vadd.f32 %v512_v24, %v626_v17 }
  0xe8   :  { %v218_v28 = vpop.f32.mrf.mxu0  ;;  %v250_v30 = vpop.f32.mrf.mxu1  ;;  %v408_v57 = vmul.f32 %v354_v25, %v354_v25  ;;  %v416_v29 = vmul.f32 %v631_v27, %v631_v27 }
  0xe9   :  { %368 = vst [vmem:[%s719_s3] sm:$0xff] %v352_v31  ;;  %v355_v37 = vmax.f32 %v339_v32, 0.0  ;;  %v337_v38 = vadd.f32 %v626_v17, %v218_v28  ;;  %376 = vst [vmem:[%s719_s3 + $0x40] sm:$0xff] %v642_v34  ;;  %v653_v40 = vmax.f32 %v347_v35, 0.0  ;;  %v345_v41 = vadd.f32 %v626_v17, %v250_v30 }
  0xea   :  { %v507_v33 = vpop.f32.mrf.mxu0  ;;  %v515_v36 = vpop.f32.mrf.mxu1  ;;  %v406_v45 = vmul.f32 %v352_v31, %v352_v31  ;;  %v414_v22 = vmul.f32 %v642_v34, %v642_v34 }
  0xeb   :  { %371 = vst [vmem:[%s719_s3 + $0x18] sm:$0xff] %v355_v37  ;;  %v353_v43 = vmax.f32 %v337_v38, 0.0  ;;  %v342_v44 = vadd.f32 %v507_v33, %v626_v17  ;;  %379 = vst [vmem:[%s719_s3 + $0x58] sm:$0xff] %v653_v40  ;;  %v361_v47 = vmax.f32 %v345_v41, 0.0  ;;  %v350_v48 = vadd.f32 %v515_v36, %v626_v17 }
  0xec   :  { %v231_v39 = vpop.f32.mrf.mxu0  ;;  %v263_v42 = vpop.f32.mrf.mxu1  ;;  %v409_v0 = vmul.f32 %v355_v37, %v355_v37  ;;  %v417_v32 = vmul.f32 %v653_v40, %v653_v40 }
  0xed   :  { %369 = vst [vmem:[%s719_s3 + $0x8] sm:$0xff] %v353_v43  ;;  %v384_v50 = vadd.f32 %v353_v43, %v352_v31  ;;  %v407_v51 = vmul.f32 %v353_v43, %v353_v43  ;;  %v358_v52 = vmax.f32 %v342_v44, 0.0  ;;  %v340_v53 = vadd.f32 %v626_v17, %v231_v39  ;;  %377 = vst [vmem:[%s719_s3 + $0x48] sm:$0xff] %v361_v47 }
  0xee   :  { %v508_v46 = vpop.f32.mrf.mxu0  ;;  %v516_v49 = vpop.f32.mrf.mxu1  ;;  %v366_v55 = vmax.f32 %v350_v48, 0.0  ;;  %v348_v56 = vadd.f32 %v626_v17, %v263_v42  ;;  %v415_v26 = vmul.f32 %v361_v47, %v361_v47 }
  0xef   :  { %v385_v58 = vadd.f32 %v384_v50, %v354_v25  ;;  %v422_v59 = vadd.f32 %v407_v51, %v406_v45  ;;  %374 = vst [vmem:[%s719_s3 + $0x30] sm:$0xff] %v358_v52  ;;  %v356_v60 = vmax.f32 %v340_v53, 0.0  ;;  %v343_v62 = vadd.f32 %v508_v46, %v626_v17 }
  0xf0   :  { %v234_v54 = vpop.f32.mrf.mxu0  ;;  %v266_v61 = vpop.f32.mrf.mxu1  ;;  %382 = vst [vmem:[%s719_s3 + $0x70] sm:$0xff] %v366_v55  ;;  %v364_v63 = vmax.f32 %v348_v56, 0.0  ;;  %v351_v8 = vadd.f32 %v516_v49, %v626_v17  ;;  %v412_v16 = vmul.f32 %v358_v52, %v358_v52  ;;  %v420_v42 = vmul.f32 %v366_v55, %v366_v55 }
  0xf1   :  { %v423_v1 = vadd.f32 %v422_v59, %v408_v57  ;;  %372 = vst [vmem:[%s719_s3 + $0x20] sm:$0xff] %v356_v60  ;;  %v386_v2 = vadd.f32 %v385_v58, %v355_v37  ;;  %v359_v3 = vmax.f32 %v343_v62, 0.0  ;;  %v341_v4 = vadd.f32 %v626_v17, %v234_v54 }
  0xf2   :  { %380 = vst [vmem:[%s719_s3 + $0x60] sm:$0xff] %v364_v63  ;;  %v410_v6 = vmul.f32 %v356_v60, %v356_v60  ;;  %v349_v10 = vadd.f32 %v626_v17, %v266_v61  ;;  %v367_v12 = vmax.f32 %v351_v8, 0.0  ;;  %v418_v37 = vmul.f32 %v364_v63, %v364_v63 }
  0xf3   :  { %v387_v5 = vadd.f32 %v386_v2, %v356_v60  ;;  %v424_v7 = vadd.f32 %v423_v1, %v409_v0  ;;  %375 = vst [vmem:[%s719_s3 + $0x38] sm:$0xff] %v359_v3  ;;  %v357_v9 = vmax.f32 %v341_v4, 0.0  ;;  %v413_v17 = vmul.f32 %v359_v3, %v359_v3 }
  0xf4   :  { %v365_v15 = vmax.f32 %v349_v10, 0.0  ;;  %383 = vst [vmem:[%s719_s3 + $0x78] sm:$0xff] %v367_v12  ;;  %v421_v45 = vmul.f32 %v367_v12, %v367_v12 }
  0xf5   :  { %v425_v11 = vadd.f32 %v424_v7, %v410_v6  ;;  %373 = vst [vmem:[%s719_s3 + $0x28] sm:$0xff] %v357_v9  ;;  %v388_v13 = vadd.f32 %v387_v5, %v357_v9  ;;  %v411_v14 = vmul.f32 %v357_v9, %v357_v9 }
  0xf6   :  { %381 = vst [vmem:[%s719_s3 + $0x68] sm:$0xff] %v365_v15  ;;  %v419_v41 = vmul.f32 %v365_v15, %v365_v15 }
  0xf7   :  { %v389_v18 = vadd.f32 %v388_v13, %v358_v52  ;;  %v426_v19 = vadd.f32 %v425_v11, %v411_v14 }
  0xf9   :  { %v427_v20 = vadd.f32 %v426_v19, %v412_v16  ;;  %v390_v21 = vadd.f32 %v389_v18, %v359_v3 }
  0xfb   :  { %v391_v23 = vadd.f32 %v390_v21, %v642_v34  ;;  %v428_v24 = vadd.f32 %v427_v20, %v413_v17 }
  0xfd   :  { %v392_v25 = vadd.f32 %v391_v23, %v361_v47  ;;  %v429_v28 = vadd.f32 %v428_v24, %v414_v22 }
  0xff   :  { %v393_v30 = vadd.f32 %v392_v25, %v631_v27  ;;  %v430_v31 = vadd.f32 %v429_v28, %v415_v26 }
 0x101   :  { %v431_v33 = vadd.f32 %v430_v31, %v416_v29  ;;  %v394_v35 = vadd.f32 %v393_v30, %v653_v40 }
 0x103   :  { %v395_v36 = vadd.f32 %v394_v35, %v364_v63  ;;  %v432_v38 = vadd.f32 %v431_v33, %v417_v32 }
 0x105   :  { %v433_v34 = vadd.f32 %v432_v38, %v418_v37  ;;  %v396_v39 = vadd.f32 %v395_v36, %v365_v15 }
 0x107   :  { %v397_v43 = vadd.f32 %v396_v39, %v366_v55  ;;  %v434_v44 = vadd.f32 %v433_v34, %v419_v41 }
 0x109   :  { %v398_v46 = vadd.f32 %v397_v43, %v367_v12  ;;  %v435_v47 = vadd.f32 %v434_v44, %v420_v42 }
 0x10b   :  { %v399_v27 = vrot.slane %v398_v46, 4  ;;  %v436_v48 = vadd.f32 %v435_v47, %v421_v45 }
 0x10d   :  { %v400_v49 = vadd.f32 %v399_v27, %v398_v46  ;;  %v437_v50 = vrot.slane %v436_v48, 4 }
 0x10f   :  { %v401_v51 = vrot.slane %v400_v49, 2  ;;  %v438_v52 = vadd.f32 %v437_v50, %v436_v48 }
 0x111   :  { %v402_v53 = vadd.f32 %v401_v51, %v400_v49  ;;  %v439_v40 = vrot.slane %v438_v52, 2 }
 0x113   :  { %v403_v54 = vrot.slane %v402_v53, 1  ;;  %v440_v56 = vadd.f32 %v439_v40, %v438_v52 }
 0x115   :  { %v404_v57 = vadd.f32 %v403_v54, %v402_v53  ;;  %v441_v58 = vrot.slane %v440_v56, 1 }
 0x117   :  { %405 = vst [vmem:[%s720_s4] sm:$0x1] %v404_v57  ;;  %v442_v55 = vadd.f32 %v441_v58, %v440_v56 }
 0x119   :  { %443 = vst [vmem:[%s720_s4 + $0x1] sm:$0x1] %v442_v55 }

// kernel: encoder_forward.15
= control target key start
LH: loop header
LB: loop body
LE: loop exit
PB: predicated region body
PF: predicated region fallthrough
CT: control target
= control target key end

     0   :  { %10 = vsyncpa [#allocation4], 0  ;;  %s1399_s15 = smov 0   ;;  %s1401_s16 = smov 0   ;;  %s1812_s0 = inlined_call_operand.vmem [shape: bf16[128,512], index: 0, kind: input, shape index: {}]   ;;  %s1813_s1 = inlined_call_operand.vmem [shape: bf16[512,128], index: 1, kind: input, shape index: {}]   ;;  %s1814_s2 = inlined_call_operand.hbm [shape: f32[1,128], index: 2, kind: input, shape index: {}]   ;;  %s1815_s3 = inlined_call_operand.vmem [shape: f32[128,128], index: 3, kind: output, shape index: {0}]   ;;  %s1816_s4 = inlined_call_operand.vmem [shape: f32[8,128], index: 4, kind: output, shape index: {1}]  }
   0x1   :  { %s1403_s17 = smov 0   ;;  %s1405_s18 = smov 0  }
   0x2   :  { %s1407_s19 = smov 0  }
   0x3 LB: > { %s1077_s20 = sadd.s32 4294967295, %s1370_s19   ;;  %s28_s21 = sadd.s32 1, %s1366_s18  ;;  %s1370_s19 = sphi %s1407_s19, %s16_s19   ;;  %s1366_s18 = sphi %s1405_s18, %s1823_s18   ;;  %s1362_s17 = sphi %s1403_s17, %s1822_s17   ;;  %s1358_s16 = sphi %s1401_s16, %s1821_s16   ;;  %s1354_s15 = sphi %s1399_s15, %s1820_s15  }
   0x4   : > { %p29_p0 = scmp.ge.s32.totalorder %s28_s21, 2  ;;  %s44_s22 = sadd.s32 1, %s1358_s16 }
   0x5   : > { %p51_p1 = scmp.ne.s32.totalorder %s1358_s16, %s1354_s15  ;;  %p52_p2 = scmp.eq.s32.totalorder %s1370_s19, 0 }
   0x6   : > { %s1825_s21 = smov (%p29_p0, %s28_s21), 0  ;;  %p1078_p4 = scmp.ge.s32.totalorder %s1370_s19, 1 }
   0x7   : > { %p1432_p3 = por %p52_p2, %p51_p1  ;;  %s40_s24 = ssub.s32 %s1366_s18, %s1825_s21 }
   0x8   : > { %p178_p5 = scmp.lt.s32.totalorder %s1370_s19, 3  ;;  %p42_p6 = scmp.eq.s32.totalorder %s40_s24, 0 }
   0x9   : > { %p1444_p8 = scmp.eq.s32.totalorder %s1077_s20, 0  ;;  %s1372_s28 = smov [#allocation3]  }
   0xa   : > { %p1440_p7 = pnand %p1078_p4, %p178_p5  ;;  %s193_s29 = sshll.u32 %s1372_s28, 4  ;;  %s194_s29 = int_to_ptr.vmem [resolvable:$true] %s193_s29 }
   0xb   : > { %s1449_s27 = scalar_select %p42_p6, %s1358_s16, %s44_s22  }
   0xc   : > { %p1214_p9 = pneg %p1440_p7  ;;  %s1313_s30 = scalar_lea.vmem %s194_s29, 16 }
   0xd   : > { %p1314_p12 = scmp.ne.s32.totalorder %s194_s29, %s1313_s30  ;;  %s1320_s5 = scalar_lea.vmem %s194_s29, 32 }
   0xe   : > { %p1215_p10 = pnand %p1444_p8, %p1214_p9  ;;  %p1321_p1 = scmp.lt.s32.totalorder %s194_s29, %s194_s29 }
   0xf   : > { %p1322_p2 = scmp.lt.s32.totalorder %s1320_s5, %s1313_s30 }
  0x10   : > { %p1304_p11 = pneg %p1215_p10 }
  0x11   : > { %p1323_p4 = por %p1322_p2, %p1321_p1 }
  0x12   : > { %p1316_p13 = pnand %p1314_p12, %p1304_p11 }
  0x14   : > { %p1317_p0 = pneg %p1316_p13 }
  0x16   : > { %p1324_p5 = pnand %p1323_p4, %p1317_p0 }
  0x18   : > { %1327 = shalt.err (!%p1324_p5)
}
  0x19   : > { %1217 = dma.hbm_to_vmem [thread:$0]  (!%p1215_p10), %s1814_s2, 16, %s194_s29, [#allocation4]  }
  0x1a   : > { %p1080_p6 = scmp.ge.s32.totalorder %s1370_s19, 2 }
  0x1c   : > { %200 = sbr.rel (%p1080_p6) target bundleno = 45 (0x2d), region = 20 }
  0x21   : > { %203 = sbr.rel (!%p1432_p3) target bundleno = 45 (0x2d), region = 24  ;;  %s205_s8 = sand.u32 (%p1432_p3), 1, %s1358_s16  }
  0x22   : > { %s1129_s9 = sshll.u32 (%p1432_p3), %s1366_s18, 3  ;;  %s1081_s10 = sshll.u32 (%p1432_p3), %s205_s8, 7 }
  0x23   : > { %s1466_s13 = scalar_lea.vmem (%p1432_p3), %s1812_s0, %s1129_s9  ;;  %s207_s14 = scalar_lea.vmem (%p1432_p3), [#allocation2], %s1081_s10 }
  0x24   : > { %v272_v0 = vld [vmem:[%s1466_s13] sm:$0xff] (%p1432_p3)  ;;  %v274_v1 = vld [vmem:[%s1466_s13 + $0x10] sm:$0xff] (%p1432_p3) }
  0x25   : > { %v276_v2 = vld [vmem:[%s1466_s13 + $0x20] sm:$0xff] (%p1432_p3)  ;;  %273 = vst [vmem:[%s207_s14] sm:$0xff] (%p1432_p3), %v272_v0  ;;  %275 = vst [vmem:[%s207_s14 + $0x8] sm:$0xff] (%p1432_p3), %v274_v1  ;;  %v278_v3 = vld [vmem:[%s1466_s13 + $0x30] sm:$0xff] (%p1432_p3) }
  0x26   : > { %277 = vst [vmem:[%s207_s14 + $0x10] sm:$0xff] %v276_v2  ;;  %v280_v4 = vld [vmem:[%s1466_s13 + $0x40] sm:$0xff]  ;;  %v282_v5 = vld [vmem:[%s1466_s13 + $0x50] sm:$0xff]  ;;  %279 = vst [vmem:[%s207_s14 + $0x18] sm:$0xff] %v278_v3 }
  0x27   : > { %281 = vst [vmem:[%s207_s14 + $0x20] sm:$0xff] %v280_v4  ;;  %283 = vst [vmem:[%s207_s14 + $0x28] sm:$0xff] %v282_v5  ;;  %v284_v6 = vld [vmem:[%s1466_s13 + $0x60] sm:$0xff]  ;;  %v286_v7 = vld [vmem:[%s1466_s13 + $0x70] sm:$0xff] }
  0x28   : > { %v288_v8 = vld [vmem:[%s1466_s13 + $0x80] sm:$0xff]  ;;  %285 = vst [vmem:[%s207_s14 + $0x30] sm:$0xff] %v284_v6  ;;  %287 = vst [vmem:[%s207_s14 + $0x38] sm:$0xff] %v286_v7  ;;  %v290_v9 = vld [vmem:[%s1466_s13 + $0x90] sm:$0xff] }
  0x29   : > { %289 = vst [vmem:[%s207_s14 + $0x40] sm:$0xff] %v288_v8  ;;  %v292_v10 = vld [vmem:[%s1466_s13 + $0xa0] sm:$0xff]  ;;  %v294_v11 = vld [vmem:[%s1466_s13 + $0xb0] sm:$0xff]  ;;  %291 = vst [vmem:[%s207_s14 + $0x48] sm:$0xff] %v290_v9 }
  0x2a   : > { %293 = vst [vmem:[%s207_s14 + $0x50] sm:$0xff] %v292_v10  ;;  %295 = vst [vmem:[%s207_s14 + $0x58] sm:$0xff] %v294_v11  ;;  %v296_v12 = vld [vmem:[%s1466_s13 + $0xc0] sm:$0xff]  ;;  %v298_v13 = vld [vmem:[%s1466_s13 + $0xd0] sm:$0xff] }
  0x2b   : > { %v300_v14 = vld [vmem:[%s1466_s13 + $0xe0] sm:$0xff]  ;;  %297 = vst [vmem:[%s207_s14 + $0x60] sm:$0xff] %v296_v12  ;;  %299 = vst [vmem:[%s207_s14 + $0x68] sm:$0xff] %v298_v13  ;;  %v302_v15 = vld [vmem:[%s1466_s13 + $0xf0] sm:$0xff] }
  0x2c   : > { %301 = vst [vmem:[%s207_s14 + $0x70] sm:$0xff] %v300_v14  ;;  %303 = vst [vmem:[%s207_s14 + $0x78] sm:$0xff] %v302_v15 }
  0x2d PF: > { %324 = sbr.rel (%p1440_p7) target bundleno = 379 (0x17b), region = 66  ;;  %s327_s20 = sand.u32 (!%p1440_p7), 1, %s1354_s15  }
  0x2e   : > { %s1085_s22 = sshll.u32 (!%p1440_p7), %s327_s20, 7 }
  0x2f   : > { %s1487_s23 = scalar_lea.vmem (!%p1440_p7), [#allocation2], %s1085_s22 }
  0x32   : > { %1349 = dma.done.wait (%p1444_p8), [#allocation4], 16  }
  0x33   : > { %1351 = vsyncadd (%p1444_p8), [#allocation4], 4294967280  ;;  %s1087_s24 = sshll.u32 %s1362_s17, 5  ;;  %p1089_p7 = scmp.ne.s32.totalorder %s1362_s17, 0 }
  0x34   : > { %p377_p3 = scmp.lt.s32.totalorder %s1087_s24, 63 }
  0x35   : > { %405 = sbr.rel (%p1089_p7) target bundleno = 67 (0x43), region = 78 }
  0x36   : > { %s1827_s24 = smov (!%p377_p3, %s1087_s24), 63 }
  0x37   : > { %s1088_s28 = sshll.u32 %s1827_s24, 2 }
  0x38   : > { %s1497_s25 = scalar_lea.vmem %s1813_s1, %s1088_s28 }
  0x3a   : > { %v1373_v16 = vmov 0.0  }
  0x3b   : > { %406 = vst [vmem:[%s1815_s3] sm:$0xff] %v1373_v16  ;;  %407 = vst [vmem:[%s1815_s3 + $0x8] sm:$0xff] %v1373_v16 }
  0x3c   : > { %408 = vst [vmem:[%s1815_s3 + $0x10] sm:$0xff] %v1373_v16  ;;  %409 = vst [vmem:[%s1815_s3 + $0x18] sm:$0xff] %v1373_v16 }
  0x3d   : > { %410 = vst [vmem:[%s1815_s3 + $0x20] sm:$0xff] %v1373_v16  ;;  %411 = vst [vmem:[%s1815_s3 + $0x28] sm:$0xff] %v1373_v16 }
  0x3e   : > { %412 = vst [vmem:[%s1815_s3 + $0x30] sm:$0xff] %v1373_v16  ;;  %413 = vst [vmem:[%s1815_s3 + $0x38] sm:$0xff] %v1373_v16 }
  0x3f   : > { %414 = vst [vmem:[%s1815_s3 + $0x40] sm:$0xff] %v1373_v16  ;;  %415 = vst [vmem:[%s1815_s3 + $0x48] sm:$0xff] %v1373_v16 }
  0x40   : > { %416 = vst [vmem:[%s1815_s3 + $0x50] sm:$0xff] %v1373_v16  ;;  %417 = vst [vmem:[%s1815_s3 + $0x58] sm:$0xff] %v1373_v16 }
  0x41   : > { %418 = vst [vmem:[%s1815_s3 + $0x60] sm:$0xff] %v1373_v16  ;;  %419 = vst [vmem:[%s1815_s3 + $0x68] sm:$0xff] %v1373_v16 }
  0x42   : > { %420 = vst [vmem:[%s1815_s3 + $0x70] sm:$0xff] %v1373_v16  ;;  %421 = vst [vmem:[%s1815_s3 + $0x78] sm:$0xff] %v1373_v16 }
  0x43 PF: > { %v1262_v17 = vld [vmem:[%s1497_s25 + $0x78] sm:$0xff]   ;;  %v1264_v19 = vld [vmem:[%s1497_s25 + $0x70] sm:$0xff]   ;;  %v1266_v21 = vld [vmem:[%s1497_s25 + $0x68] sm:$0xff]   ;;  %p1122_p8 = scmp.ne.s32.totalorder %s1362_s17, 1 }
  0x44   : > { %v1263_v18 = vld [vmem:[%s1497_s25 + $0x38] sm:$0xff]   ;;  %1130 = vmatprep.subr.bf16.mxu0 %v1262_v17  ;;  %1194 = vmatprep.subr.bf16.mxu1 %v1262_v17  ;;  %v1265_v20 = vld [vmem:[%s1497_s25 + $0x30] sm:$0xff]   ;;  %v1267_v22 = vld [vmem:[%s1497_s25 + $0x28] sm:$0xff]  }
  0x45   : > { %1131 = vmatpush3.bf16.msra.mxu0 %v1263_v18  ;;  %1202 = vmatpush3.bf16.msra.mxu1 %v1263_v18  ;;  %v1268_v23 = vld [vmem:[%s1497_s25 + $0x60] sm:$0xff]   ;;  %v1270_v25 = vld [vmem:[%s1497_s25 + $0x58] sm:$0xff]   ;;  %v1272_v27 = vld [vmem:[%s1497_s25 + $0x50] sm:$0xff]  }
  0x46   : > { %1132 = vmatprep.subr.bf16.mxu0 %v1264_v19  ;;  %1195 = vmatprep.subr.bf16.mxu1 %v1264_v19  ;;  %v1269_v24 = vld [vmem:[%s1497_s25 + $0x20] sm:$0xff]   ;;  %v1271_v26 = vld [vmem:[%s1497_s25 + $0x18] sm:$0xff]   ;;  %v1273_v30 = vld [vmem:[%s1497_s25 + $0x10] sm:$0xff]  }
  0x47   : > { %v1280_v28 = vld [vmem:[%s1487_s23 + $0x4] ss:$8 sps:$4 sm:$0xff]   ;;  %v1278_v35 = vld [vmem:[%s1487_s23] ss:$8 sps:$4 sm:$0xff]   ;;  %v1284_v37 = vld [vmem:[%s1487_s23 + $0x14] ss:$8 sps:$4 sm:$0xff]  }
  0x48   : > { %v1283_v29 = vld [vmem:[%s1487_s23 + $0x44] ss:$8 sps:$4 sm:$0xff]   ;;  %694 = vmatprep.mubr.bf16.mxu0 %v1280_v28  ;;  %v1281_v36 = vld [vmem:[%s1487_s23 + $0x40] ss:$8 sps:$4 sm:$0xff]   ;;  %v1286_v38 = vld [vmem:[%s1487_s23 + $0x54] ss:$8 sps:$4 sm:$0xff]  }
  0x49   : > { %1133 = vmatpush3.bf16.msra.mxu0 %v1265_v20  ;;  %1203 = vmatpush3.bf16.msra.mxu1 %v1265_v20  ;;  %v1274_v31 = vld [vmem:[%s1497_s25 + $0x48] sm:$0xff]   ;;  %v1276_v33 = vld [vmem:[%s1497_s25 + $0x40] sm:$0xff]   ;;  %v1288_v39 = vld [vmem:[%s1487_s23 + $0x10] ss:$8 sps:$4 sm:$0xff]  }
  0x4a   : > { %1134 = vmatprep.subr.bf16.mxu0 %v1266_v21  ;;  %1196 = vmatprep.subr.bf16.mxu1 %v1266_v21  ;;  %v1275_v32 = vld [vmem:[%s1497_s25 + $0x8] sm:$0xff]   ;;  %v1277_v34 = vld [vmem:[%s1497_s25] sm:$0xff]   ;;  %v1289_v40 = vld [vmem:[%s1487_s23 + $0x50] ss:$8 sps:$4 sm:$0xff]  }
  0x4b   : > { %726 = vmatprep.mubr.bf16.mxu1 %v1283_v29  ;;  %v1290_v41 = vld [vmem:[%s1487_s23 + $0x24] ss:$8 sps:$4 sm:$0xff]   ;;  %v1294_v43 = vld [vmem:[%s1487_s23 + $0x20] ss:$8 sps:$4 sm:$0xff]   ;;  %v1296_v45 = vld [vmem:[%s1487_s23 + $0x34] ss:$8 sps:$4 sm:$0xff]  }
  0x4c   : > { %v1292_v42 = vld [vmem:[%s1487_s23 + $0x64] ss:$8 sps:$4 sm:$0xff]   ;;  %v1295_v44 = vld [vmem:[%s1487_s23 + $0x60] ss:$8 sps:$4 sm:$0xff]   ;;  %v1298_v46 = vld [vmem:[%s1487_s23 + $0x74] ss:$8 sps:$4 sm:$0xff]  }
  0x4d   : > { %1135 = vmatpush3.bf16.msra.mxu0 %v1267_v22  ;;  %1204 = vmatpush3.bf16.msra.mxu1 %v1267_v22  ;;  %v1300_v47 = vld [vmem:[%s1487_s23 + $0x30] ss:$8 sps:$4 sm:$0xff]   ;;  %v422_v51 = vld [vmem:[%s1815_s3] sm:$0xff]  ;;  %v423_v61 = vld [vmem:[%s1815_s3 + $0x8] sm:$0xff] }
  0x4e   : > { %1136 = vmatprep.subr.bf16.mxu0 %v1268_v23  ;;  %1197 = vmatprep.subr.bf16.mxu1 %v1268_v23  ;;  %v1301_v48 = vld [vmem:[%s1487_s23 + $0x70] ss:$8 sps:$4 sm:$0xff]   ;;  %v430_v53 = vld [vmem:[%s1815_s3 + $0x40] sm:$0xff]  ;;  %v431_v63 = vld [vmem:[%s1815_s3 + $0x48] sm:$0xff] }
  0x4f   : > { %v424_v7 = vld [vmem:[%s1815_s3 + $0x10] sm:$0xff]  ;;  %v425_v17 = vld [vmem:[%s1815_s3 + $0x18] sm:$0xff]  ;;  %v434_v29 = vld [vmem:[%s1815_s3 + $0x60] sm:$0xff] }
  0x50   : > { %v432_v9 = vld [vmem:[%s1815_s3 + $0x50] sm:$0xff]  ;;  %v433_v19 = vld [vmem:[%s1815_s3 + $0x58] sm:$0xff] }
  0x51   : > { %1137 = vmatpush3.bf16.msra.mxu0 %v1269_v24  ;;  %1205 = vmatpush3.bf16.msra.mxu1 %v1269_v24 }
  0x52   : > { %1138 = vmatprep.subr.bf16.mxu0 %v1270_v25  ;;  %1198 = vmatprep.subr.bf16.mxu1 %v1270_v25 }
  0x55   : > { %1139 = vmatpush3.bf16.msra.mxu0 %v1271_v26  ;;  %1206 = vmatpush3.bf16.msra.mxu1 %v1271_v26 }
  0x56   : > { %1140 = vmatprep.subr.bf16.mxu0 %v1272_v27  ;;  %1199 = vmatprep.subr.bf16.mxu1 %v1272_v27  ;;  %v426_v27 = vld [vmem:[%s1815_s3 + $0x20] sm:$0xff] }
  0x59   : > { %1141 = vmatpush3.bf16.msra.mxu0 %v1273_v30  ;;  %1207 = vmatpush3.bf16.msra.mxu1 %v1273_v30 }
  0x5a   : > { %1142 = vmatprep.subr.bf16.mxu0 %v1274_v31  ;;  %1200 = vmatprep.subr.bf16.mxu1 %v1274_v31 }
  0x5d   : > { %1143 = vmatpush3.bf16.msra.mxu0 %v1275_v32  ;;  %1208 = vmatpush3.bf16.msra.mxu1 %v1275_v32 }
  0x5e   : > { %1144 = vmatprep.subr.bf16.mxu0 %v1276_v33  ;;  %1201 = vmatprep.subr.bf16.mxu1 %v1276_v33 }
  0x61   : > { %1145 = vmatpush3.bf16.msra.mxu0 %v1277_v34  ;;  %1209 = vmatpush3.bf16.msra.mxu1 %v1277_v34 }
  0x64   : > { %695 = vmatmul.mubr.bf16.vlgmr.msra.gmra.mxu0 %v1278_v35  ;;  %727 = vmatmul.mubr.bf16.vlgmr.msra.gmra.mxu1 %v1281_v36 }
  0x65   : > { %702 = vmatprep.mubr.bf16.mxu0 %v1284_v37  ;;  %734 = vmatprep.mubr.bf16.mxu1 %v1286_v38  ;;  %v427_v37 = vld [vmem:[%s1815_s3 + $0x28] sm:$0xff] }
  0x6c   : > { %703 = vmatmul.mubr.bf16.gmra.mxu0 %v1288_v39  ;;  %735 = vmatmul.mubr.bf16.gmra.mxu1 %v1289_v40  ;;  %v435_v39 = vld [vmem:[%s1815_s3 + $0x68] sm:$0xff] }
  0x6d   : > { %710 = vmatprep.mubr.bf16.mxu0 %v1290_v41  ;;  %742 = vmatprep.mubr.bf16.mxu1 %v1292_v42 }
  0x74   : > { %711 = vmatmul.mubr.bf16.gmra.mxu0 %v1294_v43  ;;  %743 = vmatmul.mubr.bf16.gmra.mxu1 %v1295_v44 }
  0x75   : > { %718 = vmatprep.mubr.bf16.mxu0 %v1296_v45  ;;  %750 = vmatprep.mubr.bf16.mxu1 %v1298_v46 }
  0x7c   : > { %719 = vmatmul.mubr.bf16.gmra.mxu0 %v1300_v47  ;;  %751 = vmatmul.mubr.bf16.gmra.mxu1 %v1301_v48  ;;  %v428_v47 = vld [vmem:[%s1815_s3 + $0x30] sm:$0xff] }
 0x124   : > { %v1146_v49 = vpop.f32.mrf.mxu0  ;;  %v1170_v50 = vpop.f32.mrf.mxu1 }
 0x126   : > { %v1147_v52 = vpop.f32.mrf.mxu0  ;;  %v1171_v54 = vpop.f32.mrf.mxu1 }
 0x127   : > { %v1148_v55 = vadd.f32 %v1147_v52, %v1146_v49  ;;  %v1172_v56 = vadd.f32 %v1171_v54, %v1170_v50  ;;  %v436_v49 = vld [vmem:[%s1815_s3 + $0x70] sm:$0xff] }
 0x128   : > { %v1149_v57 = vpop.f32.mrf.mxu0  ;;  %v1173_v58 = vpop.f32.mrf.mxu1 }
 0x129   : > { %v759_v59 = vadd.f32 %v1148_v55, %v422_v51  ;;  %v767_v60 = vadd.f32 %v1172_v56, %v430_v53 }
 0x12a   : > { %v1150_v62 = vpop.f32.mrf.mxu0  ;;  %v1174_v0 = vpop.f32.mrf.mxu1 }
 0x12b   : > { %775 = vst [vmem:[%s1815_s3] sm:$0xff] %v759_v59  ;;  %783 = vst [vmem:[%s1815_s3 + $0x40] sm:$0xff] %v767_v60  ;;  %v1151_v1 = vadd.f32 %v1150_v62, %v1149_v57  ;;  %v1175_v2 = vadd.f32 %v1174_v0, %v1173_v58  ;;  %v429_v57 = vld [vmem:[%s1815_s3 + $0x38] sm:$0xff] }
 0x12c   : > { %v1152_v3 = vpop.f32.mrf.mxu0  ;;  %v1176_v4 = vpop.f32.mrf.mxu1  ;;  %v437_v59 = vld [vmem:[%s1815_s3 + $0x78] sm:$0xff] }
 0x12d   : > { %v760_v5 = vadd.f32 %v1151_v1, %v423_v61  ;;  %v768_v6 = vadd.f32 %v1175_v2, %v431_v63 }
 0x12e   : > { %v1153_v8 = vpop.f32.mrf.mxu0  ;;  %v1177_v10 = vpop.f32.mrf.mxu1 }
 0x12f   : > { %776 = vst [vmem:[%s1815_s3 + $0x8] sm:$0xff] %v760_v5  ;;  %784 = vst [vmem:[%s1815_s3 + $0x48] sm:$0xff] %v768_v6  ;;  %v1154_v11 = vadd.f32 %v1153_v8, %v1152_v3  ;;  %v1178_v12 = vadd.f32 %v1177_v10, %v1176_v4 }
 0x130   : > { %v1155_v13 = vpop.f32.mrf.mxu0  ;;  %v1179_v14 = vpop.f32.mrf.mxu1 }
 0x131   : > { %v761_v15 = vadd.f32 %v1154_v11, %v424_v7  ;;  %v769_v16 = vadd.f32 %v1178_v12, %v432_v9 }
 0x132   : > { %v1156_v18 = vpop.f32.mrf.mxu0  ;;  %v1180_v20 = vpop.f32.mrf.mxu1 }
 0x133   : > { %777 = vst [vmem:[%s1815_s3 + $0x10] sm:$0xff] %v761_v15  ;;  %785 = vst [vmem:[%s1815_s3 + $0x50] sm:$0xff] %v769_v16  ;;  %v1157_v21 = vadd.f32 %v1156_v18, %v1155_v13  ;;  %v1181_v22 = vadd.f32 %v1180_v20, %v1179_v14 }
 0x134   : > { %v1158_v23 = vpop.f32.mrf.mxu0  ;;  %v1182_v24 = vpop.f32.mrf.mxu1 }
 0x135   : > { %v762_v25 = vadd.f32 %v1157_v21, %v425_v17  ;;  %v770_v26 = vadd.f32 %v1181_v22, %v433_v19 }
 0x136   : > { %v1159_v28 = vpop.f32.mrf.mxu0  ;;  %v1183_v30 = vpop.f32.mrf.mxu1 }
 0x137   : > { %778 = vst [vmem:[%s1815_s3 + $0x18] sm:$0xff] %v762_v25  ;;  %786 = vst [vmem:[%s1815_s3 + $0x58] sm:$0xff] %v770_v26  ;;  %v1160_v31 = vadd.f32 %v1159_v28, %v1158_v23  ;;  %v1184_v32 = vadd.f32 %v1183_v30, %v1182_v24 }
 0x138   : > { %v1161_v33 = vpop.f32.mrf.mxu0  ;;  %v1185_v34 = vpop.f32.mrf.mxu1 }
 0x139   : > { %v763_v35 = vadd.f32 %v1160_v31, %v426_v27  ;;  %v771_v36 = vadd.f32 %v1184_v32, %v434_v29 }
 0x13a   : > { %v1162_v38 = vpop.f32.mrf.mxu0  ;;  %v1186_v40 = vpop.f32.mrf.mxu1 }
 0x13b   : > { %779 = vst [vmem:[%s1815_s3 + $0x20] sm:$0xff] %v763_v35  ;;  %787 = vst [vmem:[%s1815_s3 + $0x60] sm:$0xff] %v771_v36  ;;  %v1163_v41 = vadd.f32 %v1162_v38, %v1161_v33  ;;  %v1187_v42 = vadd.f32 %v1186_v40, %v1185_v34 }
 0x13c   : > { %v1164_v43 = vpop.f32.mrf.mxu0  ;;  %v1188_v44 = vpop.f32.mrf.mxu1 }
 0x13d   : > { %v764_v45 = vadd.f32 %v1163_v41, %v427_v37  ;;  %v772_v46 = vadd.f32 %v1187_v42, %v435_v39 }
 0x13e   : > { %v1165_v48 = vpop.f32.mrf.mxu0  ;;  %v1189_v50 = vpop.f32.mrf.mxu1 }
 0x13f   : > { %780 = vst [vmem:[%s1815_s3 + $0x28] sm:$0xff] %v764_v45  ;;  %788 = vst [vmem:[%s1815_s3 + $0x68] sm:$0xff] %v772_v46  ;;  %v1166_v51 = vadd.f32 %v1165_v48, %v1164_v43  ;;  %v1190_v52 = vadd.f32 %v1189_v50, %v1188_v44 }
 0x140   : > { %v1167_v53 = vpop.f32.mrf.mxu0  ;;  %v1191_v54 = vpop.f32.mrf.mxu1 }
 0x141   : > { %v765_v55 = vadd.f32 %v1166_v51, %v428_v47  ;;  %v773_v56 = vadd.f32 %v1190_v52, %v436_v49 }
 0x142   : > { %v1168_v58 = vpop.f32.mrf.mxu0  ;;  %v1192_v60 = vpop.f32.mrf.mxu1 }
 0x143   : > { %781 = vst [vmem:[%s1815_s3 + $0x30] sm:$0xff] %v765_v55  ;;  %789 = vst [vmem:[%s1815_s3 + $0x70] sm:$0xff] %v773_v56  ;;  %v1169_v61 = vadd.f32 %v1168_v58, %v1167_v53  ;;  %v1193_v62 = vadd.f32 %v1192_v60, %v1191_v54  ;;  %794 = sbr.rel (%p1122_p8) target bundleno = 379 (0x17b), region = 82 }
 0x145   : > { %v766_v63 = vadd.f32 %v1169_v61, %v429_v57  ;;  %v774_v0 = vadd.f32 %v1193_v62, %v437_v59 }
 0x147   : > { %782 = vst [vmem:[%s1815_s3 + $0x38] sm:$0xff] %v766_v63  ;;  %790 = vst [vmem:[%s1815_s3 + $0x78] sm:$0xff] %v774_v0 }
 0x148   : > { %v795_v1 = vld [vmem:[%s1815_s3] sm:$0xff]  ;;  %v796_v3 = vld [vmem:[%s1815_s3 + $0x8] sm:$0xff]  ;;  %v797_v6 = vld [vmem:[%s1815_s3 + $0x10] sm:$0xff] }
 0x149   : > { %v1680_v2 = vld [vmem:[#allocation3] ss:$0 sm:$0xff]  ;;  %v798_v7 = vld [vmem:[%s1815_s3 + $0x18] sm:$0xff]  ;;  %v800_v12 = vld [vmem:[%s1815_s3 + $0x28] sm:$0xff] }
 0x14a   : > { %v818_v4 = vadd.f32 %v1680_v2, %v795_v1  ;;  %v819_v5 = vadd.f32 %v1680_v2, %v796_v3  ;;  %v799_v8 = vld [vmem:[%s1815_s3 + $0x20] sm:$0xff]  ;;  %v820_v9 = vadd.f32 %v1680_v2, %v797_v6  ;;  %v821_v10 = vadd.f32 %v1680_v2, %v798_v7  ;;  %v801_v13 = vld [vmem:[%s1815_s3 + $0x30] sm:$0xff]  ;;  %v804_v28 = vld [vmem:[%s1815_s3 + $0x48] sm:$0xff] }
 0x14b   : > { %v822_v11 = vadd.f32 %v1680_v2, %v799_v8  ;;  %v823_v17 = vadd.f32 %v1680_v2, %v800_v12  ;;  %v824_v18 = vadd.f32 %v1680_v2, %v801_v13  ;;  %v803_v27 = vld [vmem:[%s1815_s3 + $0x40] sm:$0xff]  ;;  %v805_v29 = vld [vmem:[%s1815_s3 + $0x50] sm:$0xff]  ;;  %v806_v32 = vld [vmem:[%s1815_s3 + $0x58] sm:$0xff]  ;;  %v827_v40 = vadd.f32 %v1680_v2, %v804_v28 }
 0x14c   : > { %v834_v15 = vmax.f32 %v818_v4, 0.0  ;;  %v835_v16 = vmax.f32 %v819_v5, 0.0  ;;  %v836_v19 = vmax.f32 %v820_v9, 0.0  ;;  %v837_v20 = vmax.f32 %v821_v10, 0.0  ;;  %v807_v37 = vld [vmem:[%s1815_s3 + $0x60] sm:$0xff]  ;;  %v808_v42 = vld [vmem:[%s1815_s3 + $0x68] sm:$0xff] }
 0x14d   : > { %v838_v21 = vmax.f32 %v822_v11, 0.0  ;;  %v839_v26 = vmax.f32 %v823_v17, 0.0  ;;  %v840_v31 = vmax.f32 %v824_v18, 0.0  ;;  %v826_v39 = vadd.f32 %v1680_v2, %v803_v27  ;;  %v809_v55 = vld [vmem:[%s1815_s3 + $0x70] sm:$0xff] }
 0x14e   : > { %v802_v14 = vld [vmem:[%s1815_s3 + $0x38] sm:$0xff]  ;;  %850 = vst [vmem:[%s1815_s3] sm:$0xff] %v834_v15  ;;  %v888_v23 = vmul.f32 %v834_v15, %v834_v15  ;;  %851 = vst [vmem:[%s1815_s3 + $0x8] sm:$0xff] %v835_v16  ;;  %v866_v24 = vadd.f32 %v835_v16, %v834_v15  ;;  %v889_v25 = vmul.f32 %v835_v16, %v835_v16  ;;  %v843_v48 = vmax.f32 %v827_v40, 0.0 }
 0x14f   : > { %v825_v22 = vadd.f32 %v1680_v2, %v802_v14  ;;  %852 = vst [vmem:[%s1815_s3 + $0x10] sm:$0xff] %v836_v19  ;;  %v890_v30 = vmul.f32 %v836_v19, %v836_v19  ;;  %853 = vst [vmem:[%s1815_s3 + $0x18] sm:$0xff] %v837_v20  ;;  %v891_v35 = vmul.f32 %v837_v20, %v837_v20  ;;  %v842_v47 = vmax.f32 %v826_v39, 0.0  ;;  %v810_v56 = vld [vmem:[%s1815_s3 + $0x78] sm:$0xff] }
 0x150   : > { %854 = vst [vmem:[%s1815_s3 + $0x20] sm:$0xff] %v838_v21  ;;  %v904_v33 = vadd.f32 %v889_v25, %v888_v23  ;;  %v867_v34 = vadd.f32 %v866_v24, %v836_v19  ;;  %855 = vst [vmem:[%s1815_s3 + $0x28] sm:$0xff] %v839_v26  ;;  %v892_v38 = vmul.f32 %v838_v21, %v838_v21 }
 0x151   : > { %v841_v36 = vmax.f32 %v825_v22, 0.0  ;;  %856 = vst [vmem:[%s1815_s3 + $0x30] sm:$0xff] %v840_v31  ;;  %v828_v41 = vadd.f32 %v1680_v2, %v805_v29  ;;  %v893_v45 = vmul.f32 %v839_v26, %v839_v26  ;;  %v829_v46 = vadd.f32 %v1680_v2, %v806_v32  ;;  %858 = vst [vmem:[%s1815_s3 + $0x40] sm:$0xff] %v842_v47 }
 0x152   : > { %v905_v43 = vadd.f32 %v904_v33, %v890_v30  ;;  %v868_v44 = vadd.f32 %v867_v34, %v837_v20  ;;  %v830_v50 = vadd.f32 %v1680_v2, %v807_v37  ;;  %v831_v54 = vadd.f32 %v1680_v2, %v808_v42  ;;  %859 = vst [vmem:[%s1815_s3 + $0x48] sm:$0xff] %v843_v48 }
 0x153   : > { %857 = vst [vmem:[%s1815_s3 + $0x38] sm:$0xff] %v841_v36  ;;  %v844_v49 = vmax.f32 %v828_v41, 0.0  ;;  %v845_v53 = vmax.f32 %v829_v46, 0.0  ;;  %v894_v60 = vmul.f32 %v840_v31, %v840_v31  ;;  %v832_v62 = vadd.f32 %v1680_v2, %v809_v55 }
 0x154   : > { %v906_v51 = vadd.f32 %v905_v43, %v891_v35  ;;  %v869_v52 = vadd.f32 %v868_v44, %v838_v21  ;;  %v846_v57 = vmax.f32 %v830_v50, 0.0  ;;  %v847_v61 = vmax.f32 %v831_v54, 0.0 }
 0x155   : > { %860 = vst [vmem:[%s1815_s3 + $0x50] sm:$0xff] %v844_v49  ;;  %861 = vst [vmem:[%s1815_s3 + $0x58] sm:$0xff] %v845_v53  ;;  %v833_v63 = vadd.f32 %v1680_v2, %v810_v56  ;;  %v895_v3 = vmul.f32 %v841_v36, %v841_v36  ;;  %v848_v4 = vmax.f32 %v832_v62, 0.0  ;;  %v896_v8 = vmul.f32 %v842_v47, %v842_v47 }
 0x156   : > { %v907_v58 = vadd.f32 %v906_v51, %v892_v38  ;;  %v870_v59 = vadd.f32 %v869_v52, %v839_v26  ;;  %862 = vst [vmem:[%s1815_s3 + $0x60] sm:$0xff] %v846_v57  ;;  %863 = vst [vmem:[%s1815_s3 + $0x68] sm:$0xff] %v847_v61  ;;  %v897_v10 = vmul.f32 %v843_v48, %v843_v48 }
 0x157   : > { %v849_v5 = vmax.f32 %v833_v63, 0.0  ;;  %864 = vst [vmem:[%s1815_s3 + $0x70] sm:$0xff] %v848_v4  ;;  %v898_v13 = vmul.f32 %v844_v49, %v844_v49  ;;  %v899_v16 = vmul.f32 %v845_v53, %v845_v53  ;;  %v900_v19 = vmul.f32 %v846_v57, %v846_v57 }
 0x158   : > { %v908_v0 = vadd.f32 %v907_v58, %v893_v45  ;;  %v871_v1 = vadd.f32 %v870_v59, %v840_v31  ;;  %v901_v22 = vmul.f32 %v847_v61, %v847_v61  ;;  %v902_v25 = vmul.f32 %v848_v4, %v848_v4 }
 0x159   : > { %865 = vst [vmem:[%s1815_s3 + $0x78] sm:$0xff] %v849_v5  ;;  %v903_v28 = vmul.f32 %v849_v5, %v849_v5 }
 0x15a   : > { %v909_v6 = vadd.f32 %v908_v0, %v894_v60  ;;  %v872_v7 = vadd.f32 %v871_v1, %v841_v36 }
 0x15c   : > { %v910_v2 = vadd.f32 %v909_v6, %v895_v3  ;;  %v873_v9 = vadd.f32 %v872_v7, %v842_v47 }
 0x15e   : > { %v911_v11 = vadd.f32 %v910_v2, %v896_v8  ;;  %v874_v12 = vadd.f32 %v873_v9, %v843_v48 }
 0x160   : > { %v912_v14 = vadd.f32 %v911_v11, %v897_v10  ;;  %v875_v15 = vadd.f32 %v874_v12, %v844_v49 }
 0x162   : > { %v913_v17 = vadd.f32 %v912_v14, %v898_v13  ;;  %v876_v18 = vadd.f32 %v875_v15, %v845_v53 }
 0x164   : > { %v914_v20 = vadd.f32 %v913_v17, %v899_v16  ;;  %v877_v21 = vadd.f32 %v876_v18, %v846_v57 }
 0x166   : > { %v915_v23 = vadd.f32 %v914_v20, %v900_v19  ;;  %v878_v24 = vadd.f32 %v877_v21, %v847_v61 }
 0x168   : > { %v916_v26 = vadd.f32 %v915_v23, %v901_v22  ;;  %v879_v27 = vadd.f32 %v878_v24, %v848_v4 }
 0x16a   : > { %v880_v29 = vadd.f32 %v879_v27, %v849_v5  ;;  %v917_v30 = vadd.f32 %v916_v26, %v902_v25 }
 0x16c   : > { %v881_v31 = vrot.slane %v880_v29, 4  ;;  %v918_v32 = vadd.f32 %v917_v30, %v903_v28 }
 0x16e   : > { %v882_v33 = vadd.f32 %v881_v31, %v880_v29  ;;  %v919_v34 = vrot.slane %v918_v32, 4 }
 0x170   : > { %v883_v35 = vrot.slane %v882_v33, 2  ;;  %v920_v36 = vadd.f32 %v919_v34, %v918_v32 }
 0x172   : > { %v884_v37 = vadd.f32 %v883_v35, %v882_v33  ;;  %v921_v38 = vrot.slane %v920_v36, 2 }
 0x174   : > { %v885_v39 = vrot.slane %v884_v37, 1  ;;  %v922_v40 = vadd.f32 %v921_v38, %v920_v36 }
 0x176   : > { %v886_v41 = vadd.f32 %v885_v39, %v884_v37  ;;  %v923_v42 = vrot.slane %v922_v40, 1 }
 0x178   : > { %887 = vst [vmem:[%s1816_s4] sm:$0x1] %v886_v41  ;;  %v924_v43 = vadd.f32 %v923_v42, %v922_v40 }
 0x17a   : > { %925 = vst [vmem:[%s1816_s4 + $0x1] sm:$0x1] %v924_v43 }
 0x17b PF: > { %s16_s19 = sadd.s32 1, %s1370_s19   ;;  %s1820_s15 = smov %s1358_s16 }
 0x17c   : > { %p13_p9 = scmp.ge.s32.totalorder %s16_s19, 4   ;;  %s1821_s16 = smov %s1449_s27 }
 0x17d   : > { %s1822_s17 = smov %s1366_s18  ;;  %s1823_s18 = smov %s1825_s21 }
 0x17e   :  { %15 = sbr.rel (!%p13_p9) target bundleno = 3 (0x3), region = 134 }
 0x183   :  { %974 = vsyncpa [#allocation4], 1 }
 0x184   :  { %976 = vsyncpa [#allocation4 + $0x1], 1 }

// kernel: encoder_forward.16
= control target key start
LH: loop header
LB: loop body
LE: loop exit
PB: predicated region body
PF: predicated region fallthrough
CT: control target
= control target key end

     0   :  { %10 = vsyncpa [#allocation4], 0  ;;  %s1399_s15 = smov 0   ;;  %s1401_s16 = smov 0   ;;  %s1812_s0 = inlined_call_operand.vmem [shape: bf16[128,1280], index: 0, kind: input, shape index: {}]   ;;  %s1813_s1 = inlined_call_operand.vmem [shape: bf16[1280,128], index: 1, kind: input, shape index: {}]   ;;  %s1814_s2 = inlined_call_operand.hbm [shape: f32[1,128], index: 2, kind: input, shape index: {}]   ;;  %s1815_s3 = inlined_call_operand.vmem [shape: f32[128,128], index: 3, kind: output, shape index: {0}]   ;;  %s1816_s4 = inlined_call_operand.vmem [shape: f32[8,128], index: 4, kind: output, shape index: {1}]  }
   0x1   :  { %s1403_s17 = smov 0   ;;  %s1405_s18 = smov 0  }
   0x2   :  { %s1407_s19 = smov 0  }
   0x3 LB: > { %s1077_s20 = sadd.s32 4294967295, %s1370_s19   ;;  %s28_s21 = sadd.s32 1, %s1366_s18  ;;  %s1370_s19 = sphi %s1407_s19, %s16_s19   ;;  %s1366_s18 = sphi %s1405_s18, %s1823_s18   ;;  %s1362_s17 = sphi %s1403_s17, %s1822_s17   ;;  %s1358_s16 = sphi %s1401_s16, %s1821_s16   ;;  %s1354_s15 = sphi %s1399_s15, %s1820_s15  }
   0x4   : > { %p29_p0 = scmp.ge.s32.totalorder %s28_s21, 5  ;;  %s44_s22 = sadd.s32 1, %s1358_s16 }
   0x5   : > { %p51_p1 = scmp.ne.s32.totalorder %s1358_s16, %s1354_s15  ;;  %p52_p2 = scmp.eq.s32.totalorder %s1370_s19, 0 }
   0x6   : > { %s1825_s21 = smov (%p29_p0, %s28_s21), 0  ;;  %p1078_p4 = scmp.ge.s32.totalorder %s1370_s19, 1 }
   0x7   : > { %p1432_p3 = por %p52_p2, %p51_p1  ;;  %s40_s24 = ssub.s32 %s1366_s18, %s1825_s21 }
   0x8   : > { %p178_p5 = scmp.lt.s32.totalorder %s1370_s19, 6  ;;  %p42_p6 = scmp.eq.s32.totalorder %s40_s24, 0 }
   0x9   : > { %p1444_p8 = scmp.eq.s32.totalorder %s1077_s20, 0  ;;  %s1372_s28 = smov [#allocation3]  }
   0xa   : > { %p1440_p7 = pnand %p1078_p4, %p178_p5  ;;  %s193_s29 = sshll.u32 %s1372_s28, 4  ;;  %s194_s29 = int_to_ptr.vmem [resolvable:$true] %s193_s29 }
   0xb   : > { %s1449_s27 = scalar_select %p42_p6, %s1358_s16, %s44_s22  }
   0xc   : > { %p1214_p9 = pneg %p1440_p7  ;;  %s1313_s30 = scalar_lea.vmem %s194_s29, 16 }
   0xd   : > { %p1314_p12 = scmp.ne.s32.totalorder %s194_s29, %s1313_s30  ;;  %s1320_s5 = scalar_lea.vmem %s194_s29, 32 }
   0xe   : > { %p1215_p10 = pnand %p1444_p8, %p1214_p9  ;;  %p1321_p1 = scmp.lt.s32.totalorder %s194_s29, %s194_s29 }
   0xf   : > { %p1322_p2 = scmp.lt.s32.totalorder %s1320_s5, %s1313_s30 }
  0x10   : > { %p1304_p11 = pneg %p1215_p10 }
  0x11   : > { %p1323_p4 = por %p1322_p2, %p1321_p1 }
  0x12   : > { %p1316_p13 = pnand %p1314_p12, %p1304_p11 }
  0x14   : > { %p1317_p0 = pneg %p1316_p13 }
  0x16   : > { %p1324_p5 = pnand %p1323_p4, %p1317_p0 }
  0x18   : > { %1327 = shalt.err (!%p1324_p5)
}
  0x19   : > { %1217 = dma.hbm_to_vmem [thread:$0]  (!%p1215_p10), %s1814_s2, 16, %s194_s29, [#allocation4]  }
  0x1a   : > { %p1080_p6 = scmp.ge.s32.totalorder %s1370_s19, 5 }
  0x1c   : > { %200 = sbr.rel (%p1080_p6) target bundleno = 45 (0x2d), region = 20 }
  0x21   : > { %203 = sbr.rel (!%p1432_p3) target bundleno = 45 (0x2d), region = 24  ;;  %s205_s8 = sand.u32 (%p1432_p3), 1, %s1358_s16  }
  0x22   : > { %s1129_s9 = sshll.u32 (%p1432_p3), %s1366_s18, 3  ;;  %s1081_s10 = sshll.u32 (%p1432_p3), %s205_s8, 7 }
  0x23   : > { %s1466_s13 = scalar_lea.vmem (%p1432_p3), %s1812_s0, %s1129_s9  ;;  %s207_s14 = scalar_lea.vmem (%p1432_p3), [#allocation2], %s1081_s10 }
  0x24   : > { %v272_v0 = vld [vmem:[%s1466_s13] sm:$0xff] (%p1432_p3)  ;;  %v274_v1 = vld [vmem:[%s1466_s13 + $0x28] sm:$0xff] (%p1432_p3)  ;;  %v276_v2 = vld [vmem:[%s1466_s13 + $0x50] sm:$0xff] (%p1432_p3) }
  0x25   : > { %273 = vst [vmem:[%s207_s14] sm:$0xff] (%p1432_p3), %v272_v0  ;;  %275 = vst [vmem:[%s207_s14 + $0x8] sm:$0xff] (%p1432_p3), %v274_v1  ;;  %v278_v3 = vld [vmem:[%s1466_s13 + $0x78] sm:$0xff] (%p1432_p3)  ;;  %v280_v4 = vld [vmem:[%s1466_s13 + $0xa0] sm:$0xff] (%p1432_p3) }
  0x26   : > { %277 = vst [vmem:[%s207_s14 + $0x10] sm:$0xff] %v276_v2  ;;  %v282_v5 = vld [vmem:[%s1466_s13 + $0xc8] sm:$0xff]  ;;  %279 = vst [vmem:[%s207_s14 + $0x18] sm:$0xff] %v278_v3  ;;  %v284_v6 = vld [vmem:[%s1466_s13 + $0xf0] sm:$0xff] }
  0x27   : > { %281 = vst [vmem:[%s207_s14 + $0x20] sm:$0xff] %v280_v4  ;;  %283 = vst [vmem:[%s207_s14 + $0x28] sm:$0xff] %v282_v5  ;;  %v286_v7 = vld [vmem:[%s1466_s13 + $0x118] sm:$0xff]  ;;  %v288_v8 = vld [vmem:[%s1466_s13 + $0x140] sm:$0xff] }
  0x28   : > { %285 = vst [vmem:[%s207_s14 + $0x30] sm:$0xff] %v284_v6  ;;  %287 = vst [vmem:[%s207_s14 + $0x38] sm:$0xff] %v286_v7  ;;  %v290_v9 = vld [vmem:[%s1466_s13 + $0x168] sm:$0xff]  ;;  %v292_v10 = vld [vmem:[%s1466_s13 + $0x190] sm:$0xff] }
  0x29   : > { %289 = vst [vmem:[%s207_s14 + $0x40] sm:$0xff] %v288_v8  ;;  %v294_v11 = vld [vmem:[%s1466_s13 + $0x1b8] sm:$0xff]  ;;  %291 = vst [vmem:[%s207_s14 + $0x48] sm:$0xff] %v290_v9  ;;  %v296_v12 = vld [vmem:[%s1466_s13 + $0x1e0] sm:$0xff] }
  0x2a   : > { %293 = vst [vmem:[%s207_s14 + $0x50] sm:$0xff] %v292_v10  ;;  %295 = vst [vmem:[%s207_s14 + $0x58] sm:$0xff] %v294_v11  ;;  %v298_v13 = vld [vmem:[%s1466_s13 + $0x208] sm:$0xff]  ;;  %v300_v14 = vld [vmem:[%s1466_s13 + $0x230] sm:$0xff] }
  0x2b   : > { %297 = vst [vmem:[%s207_s14 + $0x60] sm:$0xff] %v296_v12  ;;  %299 = vst [vmem:[%s207_s14 + $0x68] sm:$0xff] %v298_v13  ;;  %v302_v15 = vld [vmem:[%s1466_s13 + $0x258] sm:$0xff] }
  0x2c   : > { %301 = vst [vmem:[%s207_s14 + $0x70] sm:$0xff] %v300_v14  ;;  %303 = vst [vmem:[%s207_s14 + $0x78] sm:$0xff] %v302_v15 }
  0x2d PF: > { %324 = sbr.rel (%p1440_p7) target bundleno = 379 (0x17b), region = 66  ;;  %s327_s20 = sand.u32 (!%p1440_p7), 1, %s1354_s15  }
  0x2e   : > { %s1085_s22 = sshll.u32 (!%p1440_p7), %s327_s20, 7 }
  0x2f   : > { %s1487_s23 = scalar_lea.vmem (!%p1440_p7), [#allocation2], %s1085_s22 }
  0x32   : > { %1349 = dma.done.wait (%p1444_p8), [#allocation4], 16  }
  0x33   : > { %1351 = vsyncadd (%p1444_p8), [#allocation4], 4294967280  ;;  %s1087_s24 = sshll.u32 %s1362_s17, 5  ;;  %p1089_p7 = scmp.ne.s32.totalorder %s1362_s17, 0 }
  0x34   : > { %p377_p3 = scmp.lt.s32.totalorder %s1087_s24, 159 }
  0x35   : > { %405 = sbr.rel (%p1089_p7) target bundleno = 67 (0x43), region = 78 }
  0x36   : > { %s1827_s24 = smov (!%p377_p3, %s1087_s24), 159 }
  0x37   : > { %s1088_s28 = sshll.u32 %s1827_s24, 2 }
  0x38   : > { %s1497_s25 = scalar_lea.vmem %s1813_s1, %s1088_s28 }
  0x3a   : > { %v1373_v16 = vmov 0.0  }
  0x3b   : > { %406 = vst [vmem:[%s1815_s3] sm:$0xff] %v1373_v16  ;;  %407 = vst [vmem:[%s1815_s3 + $0x8] sm:$0xff] %v1373_v16 }
  0x3c   : > { %408 = vst [vmem:[%s1815_s3 + $0x10] sm:$0xff] %v1373_v16  ;;  %409 = vst [vmem:[%s1815_s3 + $0x18] sm:$0xff] %v1373_v16 }
  0x3d   : > { %410 = vst [vmem:[%s1815_s3 + $0x20] sm:$0xff] %v1373_v16  ;;  %411 = vst [vmem:[%s1815_s3 + $0x28] sm:$0xff] %v1373_v16 }
  0x3e   : > { %412 = vst [vmem:[%s1815_s3 + $0x30] sm:$0xff] %v1373_v16  ;;  %413 = vst [vmem:[%s1815_s3 + $0x38] sm:$0xff] %v1373_v16 }
  0x3f   : > { %414 = vst [vmem:[%s1815_s3 + $0x40] sm:$0xff] %v1373_v16  ;;  %415 = vst [vmem:[%s1815_s3 + $0x48] sm:$0xff] %v1373_v16 }
  0x40   : > { %416 = vst [vmem:[%s1815_s3 + $0x50] sm:$0xff] %v1373_v16  ;;  %417 = vst [vmem:[%s1815_s3 + $0x58] sm:$0xff] %v1373_v16 }
  0x41   : > { %418 = vst [vmem:[%s1815_s3 + $0x60] sm:$0xff] %v1373_v16  ;;  %419 = vst [vmem:[%s1815_s3 + $0x68] sm:$0xff] %v1373_v16 }
  0x42   : > { %420 = vst [vmem:[%s1815_s3 + $0x70] sm:$0xff] %v1373_v16  ;;  %421 = vst [vmem:[%s1815_s3 + $0x78] sm:$0xff] %v1373_v16 }
  0x43 PF: > { %v1262_v17 = vld [vmem:[%s1497_s25 + $0x78] sm:$0xff]   ;;  %v1264_v19 = vld [vmem:[%s1497_s25 + $0x70] sm:$0xff]   ;;  %v1266_v21 = vld [vmem:[%s1497_s25 + $0x68] sm:$0xff]   ;;  %p1122_p8 = scmp.ne.s32.totalorder %s1362_s17, 4 }
  0x44   : > { %v1263_v18 = vld [vmem:[%s1497_s25 + $0x38] sm:$0xff]   ;;  %1130 = vmatprep.subr.bf16.mxu0 %v1262_v17  ;;  %1194 = vmatprep.subr.bf16.mxu1 %v1262_v17  ;;  %v1265_v20 = vld [vmem:[%s1497_s25 + $0x30] sm:$0xff]   ;;  %v1267_v22 = vld [vmem:[%s1497_s25 + $0x28] sm:$0xff]  }
  0x45   : > { %1131 = vmatpush3.bf16.msra.mxu0 %v1263_v18  ;;  %1202 = vmatpush3.bf16.msra.mxu1 %v1263_v18  ;;  %v1268_v23 = vld [vmem:[%s1497_s25 + $0x60] sm:$0xff]   ;;  %v1270_v25 = vld [vmem:[%s1497_s25 + $0x58] sm:$0xff]   ;;  %v1272_v27 = vld [vmem:[%s1497_s25 + $0x50] sm:$0xff]  }
  0x46   : > { %1132 = vmatprep.subr.bf16.mxu0 %v1264_v19  ;;  %1195 = vmatprep.subr.bf16.mxu1 %v1264_v19  ;;  %v1269_v24 = vld [vmem:[%s1497_s25 + $0x20] sm:$0xff]   ;;  %v1271_v26 = vld [vmem:[%s1497_s25 + $0x18] sm:$0xff]   ;;  %v1273_v30 = vld [vmem:[%s1497_s25 + $0x10] sm:$0xff]  }
  0x47   : > { %v1280_v28 = vld [vmem:[%s1487_s23 + $0x4] ss:$8 sps:$4 sm:$0xff]   ;;  %v1278_v35 = vld [vmem:[%s1487_s23] ss:$8 sps:$4 sm:$0xff]   ;;  %v1284_v37 = vld [vmem:[%s1487_s23 + $0x14] ss:$8 sps:$4 sm:$0xff]  }
  0x48   : > { %v1283_v29 = vld [vmem:[%s1487_s23 + $0x44] ss:$8 sps:$4 sm:$0xff]   ;;  %694 = vmatprep.mubr.bf16.mxu0 %v1280_v28  ;;  %v1281_v36 = vld [vmem:[%s1487_s23 + $0x40] ss:$8 sps:$4 sm:$0xff]   ;;  %v1286_v38 = vld [vmem:[%s1487_s23 + $0x54] ss:$8 sps:$4 sm:$0xff]  }
  0x49   : > { %1133 = vmatpush3.bf16.msra.mxu0 %v1265_v20  ;;  %1203 = vmatpush3.bf16.msra.mxu1 %v1265_v20  ;;  %v1274_v31 = vld [vmem:[%s1497_s25 + $0x48] sm:$0xff]   ;;  %v1276_v33 = vld [vmem:[%s1497_s25 + $0x40] sm:$0xff]   ;;  %v1288_v39 = vld [vmem:[%s1487_s23 + $0x10] ss:$8 sps:$4 sm:$0xff]  }
  0x4a   : > { %1134 = vmatprep.subr.bf16.mxu0 %v1266_v21  ;;  %1196 = vmatprep.subr.bf16.mxu1 %v1266_v21  ;;  %v1275_v32 = vld [vmem:[%s1497_s25 + $0x8] sm:$0xff]   ;;  %v1277_v34 = vld [vmem:[%s1497_s25] sm:$0xff]   ;;  %v1289_v40 = vld [vmem:[%s1487_s23 + $0x50] ss:$8 sps:$4 sm:$0xff]  }
  0x4b   : > { %726 = vmatprep.mubr.bf16.mxu1 %v1283_v29  ;;  %v1290_v41 = vld [vmem:[%s1487_s23 + $0x24] ss:$8 sps:$4 sm:$0xff]   ;;  %v1294_v43 = vld [vmem:[%s1487_s23 + $0x20] ss:$8 sps:$4 sm:$0xff]   ;;  %v1296_v45 = vld [vmem:[%s1487_s23 + $0x34] ss:$8 sps:$4 sm:$0xff]  }
  0x4c   : > { %v1292_v42 = vld [vmem:[%s1487_s23 + $0x64] ss:$8 sps:$4 sm:$0xff]   ;;  %v1295_v44 = vld [vmem:[%s1487_s23 + $0x60] ss:$8 sps:$4 sm:$0xff]   ;;  %v1298_v46 = vld [vmem:[%s1487_s23 + $0x74] ss:$8 sps:$4 sm:$0xff]  }
  0x4d   : > { %1135 = vmatpush3.bf16.msra.mxu0 %v1267_v22  ;;  %1204 = vmatpush3.bf16.msra.mxu1 %v1267_v22  ;;  %v1300_v47 = vld [vmem:[%s1487_s23 + $0x30] ss:$8 sps:$4 sm:$0xff]   ;;  %v422_v51 = vld [vmem:[%s1815_s3] sm:$0xff]  ;;  %v423_v61 = vld [vmem:[%s1815_s3 + $0x8] sm:$0xff] }
  0x4e   : > { %1136 = vmatprep.subr.bf16.mxu0 %v1268_v23  ;;  %1197 = vmatprep.subr.bf16.mxu1 %v1268_v23  ;;  %v1301_v48 = vld [vmem:[%s1487_s23 + $0x70] ss:$8 sps:$4 sm:$0xff]   ;;  %v430_v53 = vld [vmem:[%s1815_s3 + $0x40] sm:$0xff]  ;;  %v431_v63 = vld [vmem:[%s1815_s3 + $0x48] sm:$0xff] }
  0x4f   : > { %v424_v7 = vld [vmem:[%s1815_s3 + $0x10] sm:$0xff]  ;;  %v425_v17 = vld [vmem:[%s1815_s3 + $0x18] sm:$0xff]  ;;  %v434_v29 = vld [vmem:[%s1815_s3 + $0x60] sm:$0xff] }
  0x50   : > { %v432_v9 = vld [vmem:[%s1815_s3 + $0x50] sm:$0xff]  ;;  %v433_v19 = vld [vmem:[%s1815_s3 + $0x58] sm:$0xff] }
  0x51   : > { %1137 = vmatpush3.bf16.msra.mxu0 %v1269_v24  ;;  %1205 = vmatpush3.bf16.msra.mxu1 %v1269_v24 }
  0x52   : > { %1138 = vmatprep.subr.bf16.mxu0 %v1270_v25  ;;  %1198 = vmatprep.subr.bf16.mxu1 %v1270_v25 }
  0x55   : > { %1139 = vmatpush3.bf16.msra.mxu0 %v1271_v26  ;;  %1206 = vmatpush3.bf16.msra.mxu1 %v1271_v26 }
  0x56   : > { %1140 = vmatprep.subr.bf16.mxu0 %v1272_v27  ;;  %1199 = vmatprep.subr.bf16.mxu1 %v1272_v27  ;;  %v426_v27 = vld [vmem:[%s1815_s3 + $0x20] sm:$0xff] }
  0x59   : > { %1141 = vmatpush3.bf16.msra.mxu0 %v1273_v30  ;;  %1207 = vmatpush3.bf16.msra.mxu1 %v1273_v30 }
  0x5a   : > { %1142 = vmatprep.subr.bf16.mxu0 %v1274_v31  ;;  %1200 = vmatprep.subr.bf16.mxu1 %v1274_v31 }
  0x5d   : > { %1143 = vmatpush3.bf16.msra.mxu0 %v1275_v32  ;;  %1208 = vmatpush3.bf16.msra.mxu1 %v1275_v32 }
  0x5e   : > { %1144 = vmatprep.subr.bf16.mxu0 %v1276_v33  ;;  %1201 = vmatprep.subr.bf16.mxu1 %v1276_v33 }
  0x61   : > { %1145 = vmatpush3.bf16.msra.mxu0 %v1277_v34  ;;  %1209 = vmatpush3.bf16.msra.mxu1 %v1277_v34 }
  0x64   : > { %695 = vmatmul.mubr.bf16.vlgmr.msra.gmra.mxu0 %v1278_v35  ;;  %727 = vmatmul.mubr.bf16.vlgmr.msra.gmra.mxu1 %v1281_v36 }
  0x65   : > { %702 = vmatprep.mubr.bf16.mxu0 %v1284_v37  ;;  %734 = vmatprep.mubr.bf16.mxu1 %v1286_v38  ;;  %v427_v37 = vld [vmem:[%s1815_s3 + $0x28] sm:$0xff] }
  0x6c   : > { %703 = vmatmul.mubr.bf16.gmra.mxu0 %v1288_v39  ;;  %735 = vmatmul.mubr.bf16.gmra.mxu1 %v1289_v40  ;;  %v435_v39 = vld [vmem:[%s1815_s3 + $0x68] sm:$0xff] }
  0x6d   : > { %710 = vmatprep.mubr.bf16.mxu0 %v1290_v41  ;;  %742 = vmatprep.mubr.bf16.mxu1 %v1292_v42 }
  0x74   : > { %711 = vmatmul.mubr.bf16.gmra.mxu0 %v1294_v43  ;;  %743 = vmatmul.mubr.bf16.gmra.mxu1 %v1295_v44 }
  0x75   : > { %718 = vmatprep.mubr.bf16.mxu0 %v1296_v45  ;;  %750 = vmatprep.mubr.bf16.mxu1 %v1298_v46 }
  0x7c   : > { %719 = vmatmul.mubr.bf16.gmra.mxu0 %v1300_v47  ;;  %751 = vmatmul.mubr.bf16.gmra.mxu1 %v1301_v48  ;;  %v428_v47 = vld [vmem:[%s1815_s3 + $0x30] sm:$0xff] }
 0x124   : > { %v1146_v49 = vpop.f32.mrf.mxu0  ;;  %v1170_v50 = vpop.f32.mrf.mxu1 }
 0x126   : > { %v1147_v52 = vpop.f32.mrf.mxu0  ;;  %v1171_v54 = vpop.f32.mrf.mxu1 }
 0x127   : > { %v1148_v55 = vadd.f32 %v1147_v52, %v1146_v49  ;;  %v1172_v56 = vadd.f32 %v1171_v54, %v1170_v50  ;;  %v436_v49 = vld [vmem:[%s1815_s3 + $0x70] sm:$0xff] }
 0x128   : > { %v1149_v57 = vpop.f32.mrf.mxu0  ;;  %v1173_v58 = vpop.f32.mrf.mxu1 }
 0x129   : > { %v759_v59 = vadd.f32 %v1148_v55, %v422_v51  ;;  %v767_v60 = vadd.f32 %v1172_v56, %v430_v53 }
 0x12a   : > { %v1150_v62 = vpop.f32.mrf.mxu0  ;;  %v1174_v0 = vpop.f32.mrf.mxu1 }
 0x12b   : > { %775 = vst [vmem:[%s1815_s3] sm:$0xff] %v759_v59  ;;  %783 = vst [vmem:[%s1815_s3 + $0x40] sm:$0xff] %v767_v60  ;;  %v1151_v1 = vadd.f32 %v1150_v62, %v1149_v57  ;;  %v1175_v2 = vadd.f32 %v1174_v0, %v1173_v58  ;;  %v429_v57 = vld [vmem:[%s1815_s3 + $0x38] sm:$0xff] }
 0x12c   : > { %v1152_v3 = vpop.f32.mrf.mxu0  ;;  %v1176_v4 = vpop.f32.mrf.mxu1  ;;  %v437_v59 = vld [vmem:[%s1815_s3 + $0x78] sm:$0xff] }
 0x12d   : > { %v760_v5 = vadd.f32 %v1151_v1, %v423_v61  ;;  %v768_v6 = vadd.f32 %v1175_v2, %v431_v63 }
 0x12e   : > { %v1153_v8 = vpop.f32.mrf.mxu0  ;;  %v1177_v10 = vpop.f32.mrf.mxu1 }
 0x12f   : > { %776 = vst [vmem:[%s1815_s3 + $0x8] sm:$0xff] %v760_v5  ;;  %784 = vst [vmem:[%s1815_s3 + $0x48] sm:$0xff] %v768_v6  ;;  %v1154_v11 = vadd.f32 %v1153_v8, %v1152_v3  ;;  %v1178_v12 = vadd.f32 %v1177_v10, %v1176_v4 }
 0x130   : > { %v1155_v13 = vpop.f32.mrf.mxu0  ;;  %v1179_v14 = vpop.f32.mrf.mxu1 }
 0x131   : > { %v761_v15 = vadd.f32 %v1154_v11, %v424_v7  ;;  %v769_v16 = vadd.f32 %v1178_v12, %v432_v9 }
 0x132   : > { %v1156_v18 = vpop.f32.mrf.mxu0  ;;  %v1180_v20 = vpop.f32.mrf.mxu1 }
 0x133   : > { %777 = vst [vmem:[%s1815_s3 + $0x10] sm:$0xff] %v761_v15  ;;  %785 = vst [vmem:[%s1815_s3 + $0x50] sm:$0xff] %v769_v16  ;;  %v1157_v21 = vadd.f32 %v1156_v18, %v1155_v13  ;;  %v1181_v22 = vadd.f32 %v1180_v20, %v1179_v14 }
 0x134   : > { %v1158_v23 = vpop.f32.mrf.mxu0  ;;  %v1182_v24 = vpop.f32.mrf.mxu1 }
 0x135   : > { %v762_v25 = vadd.f32 %v1157_v21, %v425_v17  ;;  %v770_v26 = vadd.f32 %v1181_v22, %v433_v19 }
 0x136   : > { %v1159_v28 = vpop.f32.mrf.mxu0  ;;  %v1183_v30 = vpop.f32.mrf.mxu1 }
 0x137   : > { %778 = vst [vmem:[%s1815_s3 + $0x18] sm:$0xff] %v762_v25  ;;  %786 = vst [vmem:[%s1815_s3 + $0x58] sm:$0xff] %v770_v26  ;;  %v1160_v31 = vadd.f32 %v1159_v28, %v1158_v23  ;;  %v1184_v32 = vadd.f32 %v1183_v30, %v1182_v24 }
 0x138   : > { %v1161_v33 = vpop.f32.mrf.mxu0  ;;  %v1185_v34 = vpop.f32.mrf.mxu1 }
 0x139   : > { %v763_v35 = vadd.f32 %v1160_v31, %v426_v27  ;;  %v771_v36 = vadd.f32 %v1184_v32, %v434_v29 }
 0x13a   : > { %v1162_v38 = vpop.f32.mrf.mxu0  ;;  %v1186_v40 = vpop.f32.mrf.mxu1 }
 0x13b   : > { %779 = vst [vmem:[%s1815_s3 + $0x20] sm:$0xff] %v763_v35  ;;  %787 = vst [vmem:[%s1815_s3 + $0x60] sm:$0xff] %v771_v36  ;;  %v1163_v41 = vadd.f32 %v1162_v38, %v1161_v33  ;;  %v1187_v42 = vadd.f32 %v1186_v40, %v1185_v34 }
 0x13c   : > { %v1164_v43 = vpop.f32.mrf.mxu0  ;;  %v1188_v44 = vpop.f32.mrf.mxu1 }
 0x13d   : > { %v764_v45 = vadd.f32 %v1163_v41, %v427_v37  ;;  %v772_v46 = vadd.f32 %v1187_v42, %v435_v39 }
 0x13e   : > { %v1165_v48 = vpop.f32.mrf.mxu0  ;;  %v1189_v50 = vpop.f32.mrf.mxu1 }
 0x13f   : > { %780 = vst [vmem:[%s1815_s3 + $0x28] sm:$0xff] %v764_v45  ;;  %788 = vst [vmem:[%s1815_s3 + $0x68] sm:$0xff] %v772_v46  ;;  %v1166_v51 = vadd.f32 %v1165_v48, %v1164_v43  ;;  %v1190_v52 = vadd.f32 %v1189_v50, %v1188_v44 }
 0x140   : > { %v1167_v53 = vpop.f32.mrf.mxu0  ;;  %v1191_v54 = vpop.f32.mrf.mxu1 }
 0x141   : > { %v765_v55 = vadd.f32 %v1166_v51, %v428_v47  ;;  %v773_v56 = vadd.f32 %v1190_v52, %v436_v49 }
 0x142   : > { %v1168_v58 = vpop.f32.mrf.mxu0  ;;  %v1192_v60 = vpop.f32.mrf.mxu1 }
 0x143   : > { %781 = vst [vmem:[%s1815_s3 + $0x30] sm:$0xff] %v765_v55  ;;  %789 = vst [vmem:[%s1815_s3 + $0x70] sm:$0xff] %v773_v56  ;;  %v1169_v61 = vadd.f32 %v1168_v58, %v1167_v53  ;;  %v1193_v62 = vadd.f32 %v1192_v60, %v1191_v54  ;;  %794 = sbr.rel (%p1122_p8) target bundleno = 379 (0x17b), region = 82 }
 0x145   : > { %v766_v63 = vadd.f32 %v1169_v61, %v429_v57  ;;  %v774_v0 = vadd.f32 %v1193_v62, %v437_v59 }
 0x147   : > { %782 = vst [vmem:[%s1815_s3 + $0x38] sm:$0xff] %v766_v63  ;;  %790 = vst [vmem:[%s1815_s3 + $0x78] sm:$0xff] %v774_v0 }
 0x148   : > { %v795_v1 = vld [vmem:[%s1815_s3] sm:$0xff]  ;;  %v796_v3 = vld [vmem:[%s1815_s3 + $0x8] sm:$0xff]  ;;  %v797_v6 = vld [vmem:[%s1815_s3 + $0x10] sm:$0xff] }
 0x149   : > { %v1680_v2 = vld [vmem:[#allocation3] ss:$0 sm:$0xff]  ;;  %v798_v7 = vld [vmem:[%s1815_s3 + $0x18] sm:$0xff]  ;;  %v800_v12 = vld [vmem:[%s1815_s3 + $0x28] sm:$0xff] }
 0x14a   : > { %v818_v4 = vadd.f32 %v1680_v2, %v795_v1  ;;  %v819_v5 = vadd.f32 %v1680_v2, %v796_v3  ;;  %v799_v8 = vld [vmem:[%s1815_s3 + $0x20] sm:$0xff]  ;;  %v820_v9 = vadd.f32 %v1680_v2, %v797_v6  ;;  %v821_v10 = vadd.f32 %v1680_v2, %v798_v7  ;;  %v801_v13 = vld [vmem:[%s1815_s3 + $0x30] sm:$0xff]  ;;  %v804_v28 = vld [vmem:[%s1815_s3 + $0x48] sm:$0xff] }
 0x14b   : > { %v822_v11 = vadd.f32 %v1680_v2, %v799_v8  ;;  %v823_v17 = vadd.f32 %v1680_v2, %v800_v12  ;;  %v824_v18 = vadd.f32 %v1680_v2, %v801_v13  ;;  %v803_v27 = vld [vmem:[%s1815_s3 + $0x40] sm:$0xff]  ;;  %v805_v29 = vld [vmem:[%s1815_s3 + $0x50] sm:$0xff]  ;;  %v806_v32 = vld [vmem:[%s1815_s3 + $0x58] sm:$0xff]  ;;  %v827_v40 = vadd.f32 %v1680_v2, %v804_v28 }
 0x14c   : > { %v834_v15 = vmax.f32 %v818_v4, 0.0  ;;  %v835_v16 = vmax.f32 %v819_v5, 0.0  ;;  %v836_v19 = vmax.f32 %v820_v9, 0.0  ;;  %v837_v20 = vmax.f32 %v821_v10, 0.0  ;;  %v807_v37 = vld [vmem:[%s1815_s3 + $0x60] sm:$0xff]  ;;  %v808_v42 = vld [vmem:[%s1815_s3 + $0x68] sm:$0xff] }
 0x14d   : > { %v838_v21 = vmax.f32 %v822_v11, 0.0  ;;  %v839_v26 = vmax.f32 %v823_v17, 0.0  ;;  %v840_v31 = vmax.f32 %v824_v18, 0.0  ;;  %v826_v39 = vadd.f32 %v1680_v2, %v803_v27  ;;  %v809_v55 = vld [vmem:[%s1815_s3 + $0x70] sm:$0xff] }
 0x14e   : > { %v802_v14 = vld [vmem:[%s1815_s3 + $0x38] sm:$0xff]  ;;  %850 = vst [vmem:[%s1815_s3] sm:$0xff] %v834_v15  ;;  %v888_v23 = vmul.f32 %v834_v15, %v834_v15  ;;  %851 = vst [vmem:[%s1815_s3 + $0x8] sm:$0xff] %v835_v16  ;;  %v866_v24 = vadd.f32 %v835_v16, %v834_v15  ;;  %v889_v25 = vmul.f32 %v835_v16, %v835_v16  ;;  %v843_v48 = vmax.f32 %v827_v40, 0.0 }
 0x14f   : > { %v825_v22 = vadd.f32 %v1680_v2, %v802_v14  ;;  %852 = vst [vmem:[%s1815_s3 + $0x10] sm:$0xff] %v836_v19  ;;  %v890_v30 = vmul.f32 %v836_v19, %v836_v19  ;;  %853 = vst [vmem:[%s1815_s3 + $0x18] sm:$0xff] %v837_v20  ;;  %v891_v35 = vmul.f32 %v837_v20, %v837_v20  ;;  %v842_v47 = vmax.f32 %v826_v39, 0.0  ;;  %v810_v56 = vld [vmem:[%s1815_s3 + $0x78] sm:$0xff] }
 0x150   : > { %854 = vst [vmem:[%s1815_s3 + $0x20] sm:$0xff] %v838_v21  ;;  %v904_v33 = vadd.f32 %v889_v25, %v888_v23  ;;  %v867_v34 = vadd.f32 %v866_v24, %v836_v19  ;;  %855 = vst [vmem:[%s1815_s3 + $0x28] sm:$0xff] %v839_v26  ;;  %v892_v38 = vmul.f32 %v838_v21, %v838_v21 }
 0x151   : > { %v841_v36 = vmax.f32 %v825_v22, 0.0  ;;  %856 = vst [vmem:[%s1815_s3 + $0x30] sm:$0xff] %v840_v31  ;;  %v828_v41 = vadd.f32 %v1680_v2, %v805_v29  ;;  %v893_v45 = vmul.f32 %v839_v26, %v839_v26  ;;  %v829_v46 = vadd.f32 %v1680_v2, %v806_v32  ;;  %858 = vst [vmem:[%s1815_s3 + $0x40] sm:$0xff] %v842_v47 }
 0x152   : > { %v905_v43 = vadd.f32 %v904_v33, %v890_v30  ;;  %v868_v44 = vadd.f32 %v867_v34, %v837_v20  ;;  %v830_v50 = vadd.f32 %v1680_v2, %v807_v37  ;;  %v831_v54 = vadd.f32 %v1680_v2, %v808_v42  ;;  %859 = vst [vmem:[%s1815_s3 + $0x48] sm:$0xff] %v843_v48 }
 0x153   : > { %857 = vst [vmem:[%s1815_s3 + $0x38] sm:$0xff] %v841_v36  ;;  %v844_v49 = vmax.f32 %v828_v41, 0.0  ;;  %v845_v53 = vmax.f32 %v829_v46, 0.0  ;;  %v894_v60 = vmul.f32 %v840_v31, %v840_v31  ;;  %v832_v62 = vadd.f32 %v1680_v2, %v809_v55 }
 0x154   : > { %v906_v51 = vadd.f32 %v905_v43, %v891_v35  ;;  %v869_v52 = vadd.f32 %v868_v44, %v838_v21  ;;  %v846_v57 = vmax.f32 %v830_v50, 0.0  ;;  %v847_v61 = vmax.f32 %v831_v54, 0.0 }
 0x155   : > { %860 = vst [vmem:[%s1815_s3 + $0x50] sm:$0xff] %v844_v49  ;;  %861 = vst [vmem:[%s1815_s3 + $0x58] sm:$0xff] %v845_v53  ;;  %v833_v63 = vadd.f32 %v1680_v2, %v810_v56  ;;  %v895_v3 = vmul.f32 %v841_v36, %v841_v36  ;;  %v848_v4 = vmax.f32 %v832_v62, 0.0  ;;  %v896_v8 = vmul.f32 %v842_v47, %v842_v47 }
 0x156   : > { %v907_v58 = vadd.f32 %v906_v51, %v892_v38  ;;  %v870_v59 = vadd.f32 %v869_v52, %v839_v26  ;;  %862 = vst [vmem:[%s1815_s3 + $0x60] sm:$0xff] %v846_v57  ;;  %863 = vst [vmem:[%s1815_s3 + $0x68] sm:$0xff] %v847_v61  ;;  %v897_v10 = vmul.f32 %v843_v48, %v843_v48 }
 0x157   : > { %v849_v5 = vmax.f32 %v833_v63, 0.0  ;;  %864 = vst [vmem:[%s1815_s3 + $0x70] sm:$0xff] %v848_v4  ;;  %v898_v13 = vmul.f32 %v844_v49, %v844_v49  ;;  %v899_v16 = vmul.f32 %v845_v53, %v845_v53  ;;  %v900_v19 = vmul.f32 %v846_v57, %v846_v57 }
 0x158   : > { %v908_v0 = vadd.f32 %v907_v58, %v893_v45  ;;  %v871_v1 = vadd.f32 %v870_v59, %v840_v31  ;;  %v901_v22 = vmul.f32 %v847_v61, %v847_v61  ;;  %v902_v25 = vmul.f32 %v848_v4, %v848_v4 }
 0x159   : > { %865 = vst [vmem:[%s1815_s3 + $0x78] sm:$0xff] %v849_v5  ;;  %v903_v28 = vmul.f32 %v849_v5, %v849_v5 }
 0x15a   : > { %v909_v6 = vadd.f32 %v908_v0, %v894_v60  ;;  %v872_v7 = vadd.f32 %v871_v1, %v841_v36 }
 0x15c   : > { %v910_v2 = vadd.f32 %v909_v6, %v895_v3  ;;  %v873_v9 = vadd.f32 %v872_v7, %v842_v47 }
 0x15e   : > { %v911_v11 = vadd.f32 %v910_v2, %v896_v8  ;;  %v874_v12 = vadd.f32 %v873_v9, %v843_v48 }
 0x160   : > { %v912_v14 = vadd.f32 %v911_v11, %v897_v10  ;;  %v875_v15 = vadd.f32 %v874_v12, %v844_v49 }
 0x162   : > { %v913_v17 = vadd.f32 %v912_v14, %v898_v13  ;;  %v876_v18 = vadd.f32 %v875_v15, %v845_v53 }
 0x164   : > { %v914_v20 = vadd.f32 %v913_v17, %v899_v16  ;;  %v877_v21 = vadd.f32 %v876_v18, %v846_v57 }
 0x166   : > { %v915_v23 = vadd.f32 %v914_v20, %v900_v19  ;;  %v878_v24 = vadd.f32 %v877_v21, %v847_v61 }
 0x168   : > { %v916_v26 = vadd.f32 %v915_v23, %v901_v22  ;;  %v879_v27 = vadd.f32 %v878_v24, %v848_v4 }
 0x16a   : > { %v880_v29 = vadd.f32 %v879_v27, %v849_v5  ;;  %v917_v30 = vadd.f32 %v916_v26, %v902_v25 }
 0x16c   : > { %v881_v31 = vrot.slane %v880_v29, 4  ;;  %v918_v32 = vadd.f32 %v917_v30, %v903_v28 }
 0x16e   : > { %v882_v33 = vadd.f32 %v881_v31, %v880_v29  ;;  %v919_v34 = vrot.slane %v918_v32, 4 }
 0x170   : > { %v883_v35 = vrot.slane %v882_v33, 2  ;;  %v920_v36 = vadd.f32 %v919_v34, %v918_v32 }
 0x172   : > { %v884_v37 = vadd.f32 %v883_v35, %v882_v33  ;;  %v921_v38 = vrot.slane %v920_v36, 2 }
 0x174   : > { %v885_v39 = vrot.slane %v884_v37, 1  ;;  %v922_v40 = vadd.f32 %v921_v38, %v920_v36 }
 0x176   : > { %v886_v41 = vadd.f32 %v885_v39, %v884_v37  ;;  %v923_v42 = vrot.slane %v922_v40, 1 }
 0x178   : > { %887 = vst [vmem:[%s1816_s4] sm:$0x1] %v886_v41  ;;  %v924_v43 = vadd.f32 %v923_v42, %v922_v40 }
 0x17a   : > { %925 = vst [vmem:[%s1816_s4 + $0x1] sm:$0x1] %v924_v43 }
 0x17b PF: > { %s16_s19 = sadd.s32 1, %s1370_s19   ;;  %s1820_s15 = smov %s1358_s16 }
 0x17c   : > { %p13_p9 = scmp.ge.s32.totalorder %s16_s19, 7   ;;  %s1821_s16 = smov %s1449_s27 }
 0x17d   : > { %s1822_s17 = smov %s1366_s18  ;;  %s1823_s18 = smov %s1825_s21 }
 0x17e   :  { %15 = sbr.rel (!%p13_p9) target bundleno = 3 (0x3), region = 134 }
 0x183   :  { %974 = vsyncpa [#allocation4], 1 }
 0x184   :  { %976 = vsyncpa [#allocation4 + $0x1], 1 }

// kernel: encoder_forward.17
= control target key start
LH: loop header
LB: loop body
LE: loop exit
PB: predicated region body
PF: predicated region fallthrough
CT: control target
= control target key end

     0   :  { %s982_s15 = smov 0   ;;  %s984_s16 = smov 0   ;;  %s1142_s0 = inlined_call_operand.vmem [shape: bf16[32,1280], index: 0, kind: input, shape index: {}]   ;;  %s1143_s1 = inlined_call_operand.vmem [shape: bf16[1280,128], index: 1, kind: input, shape index: {}]   ;;  %s1144_s2 = inlined_call_operand.vmem [shape: f32[1,128], index: 2, kind: input, shape index: {}]   ;;  %s1145_s3 = inlined_call_operand.vmem [shape: f32[32,128], index: 3, kind: output, shape index: {0}]   ;;  %s1146_s4 = inlined_call_operand.vmem [shape: f32[8,128], index: 4, kind: output, shape index: {1}]  }
   0x1   :  { %s986_s17 = smov 0   ;;  %s988_s18 = smov 0  }
   0x2   :  { %s990_s19 = smov 0  }
   0x3 LB: > { %s27_s20 = sadd.s32 1, %s950_s18  ;;  %p50_p1 = scmp.ne.s32.totalorder %s942_s16, %s938_s15  ;;  %s954_s19 = sphi %s990_s19, %s15_s19   ;;  %s950_s18 = sphi %s988_s18, %s1150_s18   ;;  %s946_s17 = sphi %s986_s17, %s1149_s17   ;;  %s942_s16 = sphi %s984_s16, %s1148_s16   ;;  %s938_s15 = sphi %s982_s15, %s1147_s15  }
   0x4   : > { %p28_p0 = scmp.ge.s32.totalorder %s27_s20, 5  ;;  %p51_p2 = scmp.eq.s32.totalorder %s954_s19, 0 }
   0x5   : > { %s43_s22 = sadd.s32 1, %s942_s16  ;;  %p772_p5 = scmp.ge.s32.totalorder %s954_s19, 5 }
   0x6   : > { %s1152_s20 = smov (%p28_p0, %s27_s20), 0  ;;  %p52_p3 = por %p51_p2, %p50_p1 }
   0x7   : > { %s39_s21 = ssub.s32 %s950_s18, %s1152_s20  ;;  %192 = sbr.rel (%p772_p5) target bundleno = 18 (0x12), region = 20 }
   0x8   : > { %p41_p4 = scmp.eq.s32.totalorder %s39_s21, 0 }
   0xa   : > { %s1017_s23 = scalar_select %p41_p4, %s942_s16, %s43_s22  }
   0xc   : > { %195 = sbr.rel (!%p52_p3) target bundleno = 18 (0x12), region = 24  ;;  %s197_s24 = sand.u32 (%p52_p3), 1, %s942_s16  }
   0xd   : > { %s808_s25 = sshll.u32 (%p52_p3), %s950_s18, 3  ;;  %s773_s26 = sshll.u32 (%p52_p3), %s197_s24, 5 }
   0xe   : > { %s205_s29 = scalar_lea.vmem (%p52_p3), %s1142_s0, %s808_s25  ;;  %s199_s30 = scalar_lea.vmem (%p52_p3), [#allocation2], %s773_s26 }
   0xf   : > { %v240_v0 = vld [vmem:[%s205_s29] sm:$0xff] (%p52_p3)  ;;  %v242_v1 = vld [vmem:[%s205_s29 + $0x28] sm:$0xff] (%p52_p3)  ;;  %v244_v2 = vld [vmem:[%s205_s29 + $0x50] sm:$0xff] (%p52_p3) }
  0x10   : > { %241 = vst [vmem:[%s199_s30] sm:$0xff] (%p52_p3), %v240_v0  ;;  %243 = vst [vmem:[%s199_s30 + $0x8] sm:$0xff] (%p52_p3), %v242_v1  ;;  %v246_v3 = vld [vmem:[%s205_s29 + $0x78] sm:$0xff] (%p52_p3) }
  0x11   : > { %245 = vst [vmem:[%s199_s30 + $0x10] sm:$0xff] %v244_v2  ;;  %247 = vst [vmem:[%s199_s30 + $0x18] sm:$0xff] %v246_v3 }
  0x12 PF: > { %p776_p6 = scmp.ge.s32.totalorder %s954_s19, 1  ;;  %p264_p7 = scmp.lt.s32.totalorder %s954_s19, 6 }
  0x14   : > { %p265_p8 = pnand %p776_p6, %p264_p7 }
  0x15   : > { %s271_s5 = sand.u32 (!%p265_p8), 1, %s938_s15   ;;  %s778_s6 = sshll.u32 (!%p265_p8), %s946_s17, 5 }
  0x16   : > { %268 = sbr.rel (%p265_p8) target bundleno = 304 (0x130), region = 66  ;;  %s777_s7 = sshll.u32 (!%p265_p8), %s271_s5, 5 }
  0x17   : > { %p320_p9 = scmp.lt.s32.totalorder (!%p265_p8), %s778_s6, 159  ;;  %s1034_s12 = scalar_lea.vmem (!%p265_p8), [#allocation2], %s777_s7 }
  0x18   : > { %p780_p10 = scmp.ne.s32.totalorder (!%p265_p8), %s946_s17, 0 }
  0x1b   : > { %s1154_s6 = smov (!%p320_p9, %s778_s6), 159  ;;  %351 = sbr.rel (%p780_p10) target bundleno = 35 (0x23), region = 74 }
  0x1c   : > { %s779_s8 = sshll.u32 %s1154_s6, 2 }
  0x1d   : > { %s1032_s11 = scalar_lea.vmem %s1143_s1, %s779_s8 }
  0x20   : > { %v956_v4 = vmov 0.0  }
  0x21   : > { %352 = vst [vmem:[%s1145_s3] sm:$0xff] %v956_v4  ;;  %353 = vst [vmem:[%s1145_s3 + $0x8] sm:$0xff] %v956_v4 }
  0x22   : > { %354 = vst [vmem:[%s1145_s3 + $0x10] sm:$0xff] %v956_v4  ;;  %355 = vst [vmem:[%s1145_s3 + $0x18] sm:$0xff] %v956_v4 }
  0x23 PF: > { %v894_v5 = vld [vmem:[%s1032_s11 + $0x78] sm:$0xff]   ;;  %v896_v7 = vld [vmem:[%s1032_s11 + $0x70] sm:$0xff]   ;;  %v898_v9 = vld [vmem:[%s1032_s11 + $0x68] sm:$0xff]   ;;  %p801_p11 = scmp.ne.s32.totalorder %s946_s17, 4 }
  0x24   : > { %v895_v6 = vld [vmem:[%s1032_s11 + $0x38] sm:$0xff]   ;;  %809 = vmatprep.subr.bf16.mxu0 %v894_v5  ;;  %837 = vmatprep.subr.bf16.mxu1 %v894_v5  ;;  %v897_v8 = vld [vmem:[%s1032_s11 + $0x30] sm:$0xff]   ;;  %v899_v10 = vld [vmem:[%s1032_s11 + $0x28] sm:$0xff]  }
  0x25   : > { %810 = vmatpush3.bf16.msra.mxu0 %v895_v6  ;;  %845 = vmatpush3.bf16.msra.mxu1 %v895_v6  ;;  %v900_v11 = vld [vmem:[%s1032_s11 + $0x60] sm:$0xff]   ;;  %v902_v13 = vld [vmem:[%s1032_s11 + $0x58] sm:$0xff]   ;;  %v904_v15 = vld [vmem:[%s1032_s11 + $0x50] sm:$0xff]  }
  0x26   : > { %811 = vmatprep.subr.bf16.mxu0 %v896_v7  ;;  %838 = vmatprep.subr.bf16.mxu1 %v896_v7  ;;  %v901_v12 = vld [vmem:[%s1032_s11 + $0x20] sm:$0xff]   ;;  %v903_v14 = vld [vmem:[%s1032_s11 + $0x18] sm:$0xff]   ;;  %v905_v18 = vld [vmem:[%s1032_s11 + $0x10] sm:$0xff]  }
  0x27   : > { %v912_v16 = vld [vmem:[%s1034_s12 + $0x4] ss:$8 sps:$4 sm:$0xff]   ;;  %v915_v17 = vld [vmem:[%s1034_s12 + $0x14] ss:$8 sps:$4 sm:$0xff]   ;;  %v910_v23 = vld [vmem:[%s1034_s12] ss:$8 sps:$4 sm:$0xff]  }
  0x28   : > { %v906_v19 = vld [vmem:[%s1032_s11 + $0x48] sm:$0xff]   ;;  %544 = vmatprep.mubr.bf16.mxu0 %v912_v16  ;;  %552 = vmatprep.mubr.bf16.mxu1 %v915_v17  ;;  %v908_v21 = vld [vmem:[%s1032_s11 + $0x40] sm:$0xff]   ;;  %v913_v24 = vld [vmem:[%s1034_s12 + $0x10] ss:$8 sps:$4 sm:$0xff]  }
  0x29   : > { %812 = vmatpush3.bf16.msra.mxu0 %v897_v8  ;;  %846 = vmatpush3.bf16.msra.mxu1 %v897_v8  ;;  %v907_v20 = vld [vmem:[%s1032_s11 + $0x8] sm:$0xff]   ;;  %v909_v22 = vld [vmem:[%s1032_s11] sm:$0xff]   ;;  %v358_v29 = vld [vmem:[%s1145_s3 + $0x10] sm:$0xff] }
  0x2a   : > { %813 = vmatprep.subr.bf16.mxu0 %v898_v9  ;;  %839 = vmatprep.subr.bf16.mxu1 %v898_v9  ;;  %v356_v27 = vld [vmem:[%s1145_s3] sm:$0xff]  ;;  %v357_v37 = vld [vmem:[%s1145_s3 + $0x8] sm:$0xff]  ;;  %v359_v39 = vld [vmem:[%s1145_s3 + $0x18] sm:$0xff] }
  0x2d   : > { %814 = vmatpush3.bf16.msra.mxu0 %v899_v10  ;;  %847 = vmatpush3.bf16.msra.mxu1 %v899_v10 }
  0x2e   : > { %815 = vmatprep.subr.bf16.mxu0 %v900_v11  ;;  %840 = vmatprep.subr.bf16.mxu1 %v900_v11 }
  0x31   : > { %816 = vmatpush3.bf16.msra.mxu0 %v901_v12  ;;  %848 = vmatpush3.bf16.msra.mxu1 %v901_v12 }
  0x32   : > { %817 = vmatprep.subr.bf16.mxu0 %v902_v13  ;;  %841 = vmatprep.subr.bf16.mxu1 %v902_v13 }
  0x35   : > { %818 = vmatpush3.bf16.msra.mxu0 %v903_v14  ;;  %849 = vmatpush3.bf16.msra.mxu1 %v903_v14 }
  0x36   : > { %819 = vmatprep.subr.bf16.mxu0 %v904_v15  ;;  %842 = vmatprep.subr.bf16.mxu1 %v904_v15 }
  0x39   : > { %820 = vmatpush3.bf16.msra.mxu0 %v905_v18  ;;  %850 = vmatpush3.bf16.msra.mxu1 %v905_v18 }
  0x3a   : > { %821 = vmatprep.subr.bf16.mxu0 %v906_v19  ;;  %843 = vmatprep.subr.bf16.mxu1 %v906_v19 }
  0x3d   : > { %822 = vmatpush3.bf16.msra.mxu0 %v907_v20  ;;  %851 = vmatpush3.bf16.msra.mxu1 %v907_v20 }
  0x3e   : > { %823 = vmatprep.subr.bf16.mxu0 %v908_v21  ;;  %844 = vmatprep.subr.bf16.mxu1 %v908_v21 }
  0x41   : > { %824 = vmatpush3.bf16.msra.mxu0 %v909_v22  ;;  %852 = vmatpush3.bf16.msra.mxu1 %v909_v22 }
  0x44   : > { %545 = vmatmul.mubr.bf16.vlgmr.msra.gmra.mxu0 %v910_v23  ;;  %553 = vmatmul.mubr.bf16.vlgmr.msra.gmra.mxu1 %v913_v24 }
 0x104   : > { %v825_v25 = vpop.f32.mrf.mxu0  ;;  %v831_v26 = vpop.f32.mrf.mxu1 }
 0x106   : > { %v826_v28 = vpop.f32.mrf.mxu0  ;;  %v832_v30 = vpop.f32.mrf.mxu1 }
 0x107   : > { %v827_v31 = vadd.f32 %v826_v28, %v825_v25  ;;  %v833_v32 = vadd.f32 %v832_v30, %v831_v26 }
 0x108   : > { %v828_v33 = vpop.f32.mrf.mxu0  ;;  %v834_v34 = vpop.f32.mrf.mxu1 }
 0x109   : > { %v561_v35 = vadd.f32 %v827_v31, %v356_v27  ;;  %v563_v36 = vadd.f32 %v833_v32, %v358_v29 }
 0x10a   : > { %v829_v38 = vpop.f32.mrf.mxu0  ;;  %v835_v40 = vpop.f32.mrf.mxu1 }
 0x10b   : > { %565 = vst [vmem:[%s1145_s3] sm:$0xff] %v561_v35  ;;  %567 = vst [vmem:[%s1145_s3 + $0x10] sm:$0xff] %v563_v36  ;;  %v830_v41 = vadd.f32 %v829_v38, %v828_v33  ;;  %v836_v42 = vadd.f32 %v835_v40, %v834_v34  ;;  %572 = sbr.rel (%p801_p11) target bundleno = 304 (0x130), region = 78 }
 0x10d   : > { %v562_v43 = vadd.f32 %v830_v41, %v357_v37  ;;  %v564_v44 = vadd.f32 %v836_v42, %v359_v39 }
 0x10f   : > { %566 = vst [vmem:[%s1145_s3 + $0x8] sm:$0xff] %v562_v43  ;;  %568 = vst [vmem:[%s1145_s3 + $0x18] sm:$0xff] %v564_v44 }
 0x110   : > { %v802_v46 = vld [vmem:[%s1144_s2] ss:$0 sm:$0xff] }
 0x112   : > { %v573_v45 = vld [vmem:[%s1145_s3] sm:$0xff]  ;;  %v575_v50 = vld [vmem:[%s1145_s3 + $0x10] sm:$0xff] }
 0x113   : > { %v584_v48 = vadd.f32 %v802_v46, %v573_v45  ;;  %v586_v52 = vadd.f32 %v802_v46, %v575_v50 }
 0x115   : > { %v588_v54 = vmax.f32 %v584_v48, 0.0  ;;  %v590_v56 = vmax.f32 %v586_v52, 0.0 }
 0x116   : > { %v574_v47 = vld [vmem:[%s1145_s3 + $0x8] sm:$0xff]  ;;  %v576_v51 = vld [vmem:[%s1145_s3 + $0x18] sm:$0xff] }
 0x117   : > { %v585_v49 = vadd.f32 %v802_v46, %v574_v47  ;;  %v587_v53 = vadd.f32 %v802_v46, %v576_v51  ;;  %592 = vst [vmem:[%s1145_s3] sm:$0xff] %v588_v54  ;;  %v606_v58 = vmul.f32 %v588_v54, %v588_v54  ;;  %594 = vst [vmem:[%s1145_s3 + $0x10] sm:$0xff] %v590_v56 }
 0x118   : > { %v608_v61 = vmul.f32 %v590_v56, %v590_v56 }
 0x119   : > { %v589_v55 = vmax.f32 %v585_v49, 0.0  ;;  %v591_v57 = vmax.f32 %v587_v53, 0.0 }
 0x11b   : > { %593 = vst [vmem:[%s1145_s3 + $0x8] sm:$0xff] %v589_v55  ;;  %v596_v59 = vadd.f32 %v589_v55, %v588_v54  ;;  %v607_v60 = vmul.f32 %v589_v55, %v589_v55  ;;  %595 = vst [vmem:[%s1145_s3 + $0x18] sm:$0xff] %v591_v57  ;;  %v609_v0 = vmul.f32 %v591_v57, %v591_v57 }
 0x11d   : > { %v610_v62 = vadd.f32 %v607_v60, %v606_v58  ;;  %v597_v63 = vadd.f32 %v596_v59, %v590_v56 }
 0x11f   : > { %v598_v1 = vadd.f32 %v597_v63, %v591_v57  ;;  %v611_v2 = vadd.f32 %v610_v62, %v608_v61 }
 0x121   : > { %v599_v3 = vrot.slane %v598_v1, 4  ;;  %v612_v4 = vadd.f32 %v611_v2, %v609_v0 }
 0x123   : > { %v600_v5 = vadd.f32 %v599_v3, %v598_v1  ;;  %v613_v6 = vrot.slane %v612_v4, 4 }
 0x125   : > { %v601_v7 = vrot.slane %v600_v5, 2  ;;  %v614_v8 = vadd.f32 %v613_v6, %v612_v4 }
 0x127   : > { %v602_v9 = vadd.f32 %v601_v7, %v600_v5  ;;  %v615_v10 = vrot.slane %v614_v8, 2 }
 0x129   : > { %v603_v11 = vrot.slane %v602_v9, 1  ;;  %v616_v12 = vadd.f32 %v615_v10, %v614_v8 }
 0x12b   : > { %v604_v13 = vadd.f32 %v603_v11, %v602_v9  ;;  %v617_v14 = vrot.slane %v616_v12, 1 }
 0x12d   : > { %605 = vst [vmem:[%s1146_s4] sm:$0x1] %v604_v13  ;;  %v618_v15 = vadd.f32 %v617_v14, %v616_v12 }
 0x12f   : > { %619 = vst [vmem:[%s1146_s4 + $0x1] sm:$0x1] %v618_v15 }
 0x130 PF: > { %s15_s19 = sadd.s32 1, %s954_s19   ;;  %s1147_s15 = smov %s942_s16 }
 0x131   : > { %p12_p12 = scmp.ge.s32.totalorder %s15_s19, 7   ;;  %s1148_s16 = smov %s1017_s23 }
 0x132   : > { %s1149_s17 = smov %s950_s18  ;;  %s1150_s18 = smov %s1152_s20 }
 0x133   :  { %14 = sbr.rel (!%p12_p12) target bundleno = 3 (0x3), region = 131 }

// kernel: encoder_forward.18
= control target key start
LH: loop header
LB: loop body
LE: loop exit
PB: predicated region body
PF: predicated region fallthrough
CT: control target
= control target key end

     0   :  { %s1236_s15 = smov 0   ;;  %s1238_s16 = smov 0   ;;  %s1479_s0 = inlined_call_operand.vmem [shape: bf16[32,1280], index: 0, kind: input, shape index: {}]   ;;  %s1480_s1 = inlined_call_operand.vmem [shape: bf16[1280,256], index: 1, kind: input, shape index: {}]   ;;  %s1481_s2 = inlined_call_operand.vmem [shape: f32[1,256], index: 2, kind: input, shape index: {}]   ;;  %s1482_s3 = inlined_call_operand.vmem [shape: f32[32,256], index: 3, kind: output, shape index: {0}]   ;;  %s1483_s4 = inlined_call_operand.vmem [shape: f32[8,256], index: 4, kind: output, shape index: {1}]  }
   0x1   :  { %s1240_s17 = smov 0   ;;  %s1242_s18 = smov 0  }
   0x2   :  { %s1244_s19 = smov 0  }
   0x3 LB: > { %s27_s20 = sadd.s32 1, %s1203_s18  ;;  %p50_p1 = scmp.ne.s32.totalorder %s1195_s16, %s1191_s15  ;;  %s1207_s19 = sphi %s1244_s19, %s15_s19   ;;  %s1203_s18 = sphi %s1242_s18, %s1487_s18   ;;  %s1199_s17 = sphi %s1240_s17, %s1486_s17   ;;  %s1195_s16 = sphi %s1238_s16, %s1485_s16   ;;  %s1191_s15 = sphi %s1236_s15, %s1484_s15  }
   0x4   : > { %p28_p0 = scmp.ge.s32.totalorder %s27_s20, 5  ;;  %p51_p2 = scmp.eq.s32.totalorder %s1207_s19, 0 }
   0x5   : > { %s43_s22 = sadd.s32 1, %s1195_s16  ;;  %p985_p5 = scmp.ge.s32.totalorder %s1207_s19, 5 }
   0x6   : > { %s1489_s20 = smov (%p28_p0, %s27_s20), 0  ;;  %p52_p3 = por %p51_p2, %p50_p1 }
   0x7   : > { %s39_s21 = ssub.s32 %s1203_s18, %s1489_s20  ;;  %194 = sbr.rel (%p985_p5) target bundleno = 18 (0x12), region = 20 }
   0x8   : > { %p41_p4 = scmp.eq.s32.totalorder %s39_s21, 0 }
   0xa   : > { %s1271_s23 = scalar_select %p41_p4, %s1195_s16, %s43_s22  }
   0xc   : > { %197 = sbr.rel (!%p52_p3) target bundleno = 18 (0x12), region = 24  ;;  %s199_s24 = sand.u32 (%p52_p3), 1, %s1195_s16  }
   0xd   : > { %s1039_s25 = sshll.u32 (%p52_p3), %s1203_s18, 3  ;;  %s986_s26 = sshll.u32 (%p52_p3), %s199_s24, 5 }
   0xe   : > { %s207_s29 = scalar_lea.vmem (%p52_p3), %s1479_s0, %s1039_s25  ;;  %s201_s30 = scalar_lea.vmem (%p52_p3), [#allocation2], %s986_s26 }
   0xf   : > { %v242_v0 = vld [vmem:[%s207_s29] sm:$0xff] (%p52_p3)  ;;  %v244_v1 = vld [vmem:[%s207_s29 + $0x28] sm:$0xff] (%p52_p3)  ;;  %v246_v2 = vld [vmem:[%s207_s29 + $0x50] sm:$0xff] (%p52_p3) }
  0x10   : > { %243 = vst [vmem:[%s201_s30] sm:$0xff] (%p52_p3), %v242_v0  ;;  %245 = vst [vmem:[%s201_s30 + $0x8] sm:$0xff] (%p52_p3), %v244_v1  ;;  %v248_v3 = vld [vmem:[%s207_s29 + $0x78] sm:$0xff] (%p52_p3) }
  0x11   : > { %247 = vst [vmem:[%s201_s30 + $0x10] sm:$0xff] %v246_v2  ;;  %249 = vst [vmem:[%s201_s30 + $0x18] sm:$0xff] %v248_v3 }
  0x12 PF: > { %p989_p6 = scmp.ge.s32.totalorder %s1207_s19, 1  ;;  %p269_p7 = scmp.lt.s32.totalorder %s1207_s19, 6 }
  0x14   : > { %p270_p8 = pnand %p989_p6, %p269_p7 }
  0x15   : > { %s276_s5 = sand.u32 (!%p270_p8), 1, %s1191_s15   ;;  %s991_s6 = sshll.u32 (!%p270_p8), %s1199_s17, 5 }
  0x16   : > { %273 = sbr.rel (%p270_p8) target bundleno = 344 (0x158), region = 66  ;;  %s990_s7 = sshll.u32 (!%p270_p8), %s276_s5, 5 }
  0x17   : > { %p333_p9 = scmp.lt.s32.totalorder (!%p270_p8), %s991_s6, 159  ;;  %s1288_s12 = scalar_lea.vmem (!%p270_p8), [#allocation2], %s990_s7 }
  0x18   : > { %p994_p10 = scmp.ne.s32.totalorder (!%p270_p8), %s1199_s17, 0 }
  0x1b   : > { %s1491_s6 = smov (!%p333_p9, %s991_s6), 159  ;;  %373 = sbr.rel (%p994_p10) target bundleno = 37 (0x25), region = 74 }
  0x1c   : > { %s1040_s8 = sshll.u32 %s1491_s6, 3 }
  0x1d   : > { %s1286_s11 = scalar_lea.vmem %s1480_s1, %s1040_s8 }
  0x20   : > { %v1209_v4 = vmov 0.0  }
  0x21   : > { %374 = vst [vmem:[%s1482_s3] sm:$0xff] %v1209_v4  ;;  %375 = vst [vmem:[%s1482_s3 + $0x8] sm:$0xff] %v1209_v4 }
  0x22   : > { %376 = vst [vmem:[%s1482_s3 + $0x10] sm:$0xff] %v1209_v4  ;;  %377 = vst [vmem:[%s1482_s3 + $0x18] sm:$0xff] %v1209_v4 }
  0x23   : > { %378 = vst [vmem:[%s1482_s3 + $0x20] sm:$0xff] %v1209_v4  ;;  %379 = vst [vmem:[%s1482_s3 + $0x28] sm:$0xff] %v1209_v4 }
  0x24   : > { %380 = vst [vmem:[%s1482_s3 + $0x30] sm:$0xff] %v1209_v4  ;;  %381 = vst [vmem:[%s1482_s3 + $0x38] sm:$0xff] %v1209_v4 }
  0x25 PF: > { %v1115_v5 = vld [vmem:[%s1286_s11 + $0x74] ss:$8 sps:$4 sm:$0xff]   ;;  %v1117_v6 = vld [vmem:[%s1286_s11 + $0x70] ss:$8 sps:$4 sm:$0xff]   ;;  %v1118_v7 = vld [vmem:[%s1286_s11 + $0x64] ss:$8 sps:$4 sm:$0xff]  }
  0x26   : > { %606 = vmatprep.subr.bf16.mxu0 %v1115_v5  ;;  %1041 = vmatprep.subr.bf16.mxu1 %v1115_v5  ;;  %v1120_v8 = vld [vmem:[%s1286_s11 + $0x60] ss:$8 sps:$4 sm:$0xff]   ;;  %v1121_v9 = vld [vmem:[%s1286_s11 + $0x54] ss:$8 sps:$4 sm:$0xff]   ;;  %v1123_v10 = vld [vmem:[%s1286_s11 + $0x50] ss:$8 sps:$4 sm:$0xff]  }
  0x27   : > { %607 = vmatpush1.bf16.msra.mxu0 %v1117_v6  ;;  %1057 = vmatpush1.bf16.msra.mxu1 %v1117_v6  ;;  %v1124_v11 = vld [vmem:[%s1286_s11 + $0x44] ss:$8 sps:$4 sm:$0xff]   ;;  %v1126_v12 = vld [vmem:[%s1286_s11 + $0x40] ss:$8 sps:$4 sm:$0xff]   ;;  %v1127_v13 = vld [vmem:[%s1286_s11 + $0x34] ss:$8 sps:$4 sm:$0xff]  }
  0x28   : > { %608 = vmatprep.subr.bf16.mxu0 %v1118_v7  ;;  %1042 = vmatprep.subr.bf16.mxu1 %v1118_v7  ;;  %v1129_v14 = vld [vmem:[%s1286_s11 + $0x30] ss:$8 sps:$4 sm:$0xff]   ;;  %v1130_v15 = vld [vmem:[%s1286_s11 + $0x24] ss:$8 sps:$4 sm:$0xff]   ;;  %v1132_v16 = vld [vmem:[%s1286_s11 + $0x20] ss:$8 sps:$4 sm:$0xff]  }
  0x29   : > { %v1133_v17 = vld [vmem:[%s1286_s11 + $0x14] ss:$8 sps:$4 sm:$0xff]   ;;  %v1165_v18 = vld [vmem:[%s1288_s12 + $0x4] ss:$8 sps:$4 sm:$0xff]   ;;  %v1135_v19 = vld [vmem:[%s1286_s11 + $0x10] ss:$8 sps:$4 sm:$0xff]  }
  0x2a   : > { %v1168_v20 = vld [vmem:[%s1288_s12 + $0x14] ss:$8 sps:$4 sm:$0xff]   ;;  %v1136_v21 = vld [vmem:[%s1286_s11 + $0x4] ss:$8 sps:$4 sm:$0xff]   ;;  %638 = vmatprep.mubr.bf16.mxu0 %v1165_v18  ;;  %v1138_v22 = vld [vmem:[%s1286_s11] ss:$8 sps:$4 sm:$0xff]  }
  0x2b   : > { %609 = vmatpush1.bf16.msra.mxu0 %v1120_v8  ;;  %1058 = vmatpush1.bf16.msra.mxu1 %v1120_v8  ;;  %v1139_v23 = vld [vmem:[%s1286_s11 + $0xf4] ss:$8 sps:$4 sm:$0xff]   ;;  %v1141_v24 = vld [vmem:[%s1286_s11 + $0xf0] ss:$8 sps:$4 sm:$0xff]   ;;  %v1142_v25 = vld [vmem:[%s1286_s11 + $0xe4] ss:$8 sps:$4 sm:$0xff]  }
  0x2c   : > { %610 = vmatprep.subr.bf16.mxu0 %v1121_v9  ;;  %1043 = vmatprep.subr.bf16.mxu1 %v1121_v9  ;;  %v1144_v26 = vld [vmem:[%s1286_s11 + $0xe0] ss:$8 sps:$4 sm:$0xff]   ;;  %v1145_v27 = vld [vmem:[%s1286_s11 + $0xd4] ss:$8 sps:$4 sm:$0xff]   ;;  %v1147_v28 = vld [vmem:[%s1286_s11 + $0xd0] ss:$8 sps:$4 sm:$0xff]  }
  0x2d   : > { %648 = vmatprep.mubr.bf16.mxu1 %v1168_v20  ;;  %v1148_v29 = vld [vmem:[%s1286_s11 + $0xc4] ss:$8 sps:$4 sm:$0xff]   ;;  %v1150_v30 = vld [vmem:[%s1286_s11 + $0xc0] ss:$8 sps:$4 sm:$0xff]   ;;  %v1151_v31 = vld [vmem:[%s1286_s11 + $0xb4] ss:$8 sps:$4 sm:$0xff]  }
  0x2e   : > { %v1153_v32 = vld [vmem:[%s1286_s11 + $0xb0] ss:$8 sps:$4 sm:$0xff]   ;;  %v1154_v33 = vld [vmem:[%s1286_s11 + $0xa4] ss:$8 sps:$4 sm:$0xff]   ;;  %v1156_v34 = vld [vmem:[%s1286_s11 + $0xa0] ss:$8 sps:$4 sm:$0xff]  }
  0x2f   : > { %611 = vmatpush1.bf16.msra.mxu0 %v1123_v10  ;;  %1059 = vmatpush1.bf16.msra.mxu1 %v1123_v10  ;;  %v1157_v35 = vld [vmem:[%s1286_s11 + $0x94] ss:$8 sps:$4 sm:$0xff]   ;;  %v1159_v36 = vld [vmem:[%s1286_s11 + $0x90] ss:$8 sps:$4 sm:$0xff]   ;;  %v1160_v37 = vld [vmem:[%s1286_s11 + $0x84] ss:$8 sps:$4 sm:$0xff]  }
  0x30   : > { %612 = vmatprep.subr.bf16.mxu0 %v1124_v11  ;;  %1044 = vmatprep.subr.bf16.mxu1 %v1124_v11  ;;  %v1162_v38 = vld [vmem:[%s1286_s11 + $0x80] ss:$8 sps:$4 sm:$0xff]   ;;  %v1166_v40 = vld [vmem:[%s1288_s12 + $0x10] ss:$8 sps:$4 sm:$0xff]   ;;  %p1031_p11 = scmp.ne.s32.totalorder %s1199_s17, 4 }
  0x31   : > { %v1163_v39 = vld [vmem:[%s1288_s12] ss:$8 sps:$4 sm:$0xff]   ;;  %v384_v51 = vld [vmem:[%s1482_s3 + $0x10] sm:$0xff]  ;;  %v385_v57 = vld [vmem:[%s1482_s3 + $0x18] sm:$0xff] }
  0x32   : > { %v382_v41 = vld [vmem:[%s1482_s3] sm:$0xff]  ;;  %v383_v45 = vld [vmem:[%s1482_s3 + $0x8] sm:$0xff]  ;;  %v388_v52 = vld [vmem:[%s1482_s3 + $0x30] sm:$0xff] }
  0x33   : > { %613 = vmatpush1.bf16.msra.mxu0 %v1126_v12  ;;  %1060 = vmatpush1.bf16.msra.mxu1 %v1126_v12  ;;  %v386_v42 = vld [vmem:[%s1482_s3 + $0x20] sm:$0xff]  ;;  %v387_v46 = vld [vmem:[%s1482_s3 + $0x28] sm:$0xff]  ;;  %v389_v58 = vld [vmem:[%s1482_s3 + $0x38] sm:$0xff] }
  0x34   : > { %614 = vmatprep.subr.bf16.mxu0 %v1127_v13  ;;  %1045 = vmatprep.subr.bf16.mxu1 %v1127_v13 }
  0x37   : > { %615 = vmatpush1.bf16.msra.mxu0 %v1129_v14  ;;  %1061 = vmatpush1.bf16.msra.mxu1 %v1129_v14 }
  0x38   : > { %616 = vmatprep.subr.bf16.mxu0 %v1130_v15  ;;  %1046 = vmatprep.subr.bf16.mxu1 %v1130_v15 }
  0x3b   : > { %617 = vmatpush1.bf16.msra.mxu0 %v1132_v16  ;;  %1062 = vmatpush1.bf16.msra.mxu1 %v1132_v16 }
  0x3c   : > { %618 = vmatprep.subr.bf16.mxu0 %v1133_v17  ;;  %1047 = vmatprep.subr.bf16.mxu1 %v1133_v17 }
  0x3f   : > { %619 = vmatpush1.bf16.msra.mxu0 %v1135_v19  ;;  %1063 = vmatpush1.bf16.msra.mxu1 %v1135_v19 }
  0x40   : > { %620 = vmatprep.subr.bf16.mxu0 %v1136_v21  ;;  %1048 = vmatprep.subr.bf16.mxu1 %v1136_v21 }
  0x43   : > { %621 = vmatpush1.bf16.msra.mxu0 %v1138_v22  ;;  %1064 = vmatpush1.bf16.msra.mxu1 %v1138_v22 }
  0x44   : > { %622 = vmatprep.subr.bf16.mxu0 %v1139_v23  ;;  %1049 = vmatprep.subr.bf16.mxu1 %v1139_v23 }
  0x47   : > { %623 = vmatpush2.bf16.msra.mxu0 %v1141_v24  ;;  %1065 = vmatpush2.bf16.msra.mxu1 %v1141_v24 }
  0x48   : > { %624 = vmatprep.subr.bf16.mxu0 %v1142_v25  ;;  %1050 = vmatprep.subr.bf16.mxu1 %v1142_v25 }
  0x4b   : > { %625 = vmatpush2.bf16.msra.mxu0 %v1144_v26  ;;  %1066 = vmatpush2.bf16.msra.mxu1 %v1144_v26 }
  0x4c   : > { %626 = vmatprep.subr.bf16.mxu0 %v1145_v27  ;;  %1051 = vmatprep.subr.bf16.mxu1 %v1145_v27 }
  0x4f   : > { %627 = vmatpush2.bf16.msra.mxu0 %v1147_v28  ;;  %1067 = vmatpush2.bf16.msra.mxu1 %v1147_v28 }
  0x50   : > { %628 = vmatprep.subr.bf16.mxu0 %v1148_v29  ;;  %1052 = vmatprep.subr.bf16.mxu1 %v1148_v29 }
  0x53   : > { %629 = vmatpush2.bf16.msra.mxu0 %v1150_v30  ;;  %1068 = vmatpush2.bf16.msra.mxu1 %v1150_v30 }
  0x54   : > { %630 = vmatprep.subr.bf16.mxu0 %v1151_v31  ;;  %1053 = vmatprep.subr.bf16.mxu1 %v1151_v31 }
  0x57   : > { %631 = vmatpush2.bf16.msra.mxu0 %v1153_v32  ;;  %1069 = vmatpush2.bf16.msra.mxu1 %v1153_v32 }
  0x58   : > { %632 = vmatprep.subr.bf16.mxu0 %v1154_v33  ;;  %1054 = vmatprep.subr.bf16.mxu1 %v1154_v33 }
  0x5b   : > { %633 = vmatpush2.bf16.msra.mxu0 %v1156_v34  ;;  %1070 = vmatpush2.bf16.msra.mxu1 %v1156_v34 }
  0x5c   : > { %634 = vmatprep.subr.bf16.mxu0 %v1157_v35  ;;  %1055 = vmatprep.subr.bf16.mxu1 %v1157_v35 }
  0x5f   : > { %635 = vmatpush2.bf16.msra.mxu0 %v1159_v36  ;;  %1071 = vmatpush2.bf16.msra.mxu1 %v1159_v36 }
  0x60   : > { %636 = vmatprep.subr.bf16.mxu0 %v1160_v37  ;;  %1056 = vmatprep.subr.bf16.mxu1 %v1160_v37 }
  0x63   : > { %637 = vmatpush2.bf16.msra.mxu0 %v1162_v38  ;;  %1072 = vmatpush2.bf16.msra.mxu1 %v1162_v38 }
  0x66   : > { %639 = vmatmul.mubr.bf16.vlgmr.msra.gmra.mxu0 %v1163_v39  ;;  %649 = vmatmul.mubr.bf16.vlgmr.msra.gmra.mxu1 %v1166_v40 }
 0x126   : > { %v640_v43 = vpop.f32.mrf.mxu0  ;;  %v650_v44 = vpop.f32.mrf.mxu1 }
 0x127   : > { %v659_v47 = vadd.f32 %v640_v43, %v382_v41  ;;  %v663_v48 = vadd.f32 %v650_v44, %v386_v42 }
 0x128   : > { %v642_v49 = vpop.f32.mrf.mxu0  ;;  %v652_v50 = vpop.f32.mrf.mxu1 }
 0x129   : > { %667 = vst [vmem:[%s1482_s3] sm:$0xff] %v659_v47  ;;  %671 = vst [vmem:[%s1482_s3 + $0x20] sm:$0xff] %v663_v48  ;;  %v660_v53 = vadd.f32 %v642_v49, %v383_v45  ;;  %v664_v54 = vadd.f32 %v652_v50, %v387_v46 }
 0x12a   : > { %v644_v55 = vpop.f32.mrf.mxu0  ;;  %v654_v56 = vpop.f32.mrf.mxu1 }
 0x12b   : > { %668 = vst [vmem:[%s1482_s3 + $0x8] sm:$0xff] %v660_v53  ;;  %672 = vst [vmem:[%s1482_s3 + $0x28] sm:$0xff] %v664_v54  ;;  %v661_v59 = vadd.f32 %v644_v55, %v384_v51  ;;  %v665_v60 = vadd.f32 %v654_v56, %v388_v52  ;;  %678 = sbr.rel (%p1031_p11) target bundleno = 344 (0x158), region = 78 }
 0x12c   : > { %v646_v61 = vpop.f32.mrf.mxu0  ;;  %v656_v62 = vpop.f32.mrf.mxu1 }
 0x12d   : > { %669 = vst [vmem:[%s1482_s3 + $0x10] sm:$0xff] %v661_v59  ;;  %673 = vst [vmem:[%s1482_s3 + $0x30] sm:$0xff] %v665_v60  ;;  %v662_v63 = vadd.f32 %v646_v61, %v385_v57  ;;  %v666_v0 = vadd.f32 %v656_v62, %v389_v58 }
 0x12f   : > { %670 = vst [vmem:[%s1482_s3 + $0x18] sm:$0xff] %v662_v63  ;;  %674 = vst [vmem:[%s1482_s3 + $0x38] sm:$0xff] %v666_v0 }
 0x130   : > { %v689_v1 = vlaneseq  ;;  %v687_v3 = vld [vmem:[%s1481_s2] sm:$0x3]  ;;  %v1210_v58 = vmov 1966171168  }
 0x131   : > { %v679_v4 = vld [vmem:[%s1482_s3] sm:$0xff]  ;;  %v745_v59 = vunpack.c.l.s4 %v1210_v58 }
 0x132   : > { %v1401_v2 = vshrl.u32 %v689_v1, 7  ;;  %v680_v6 = vld [vmem:[%s1482_s3 + $0x8] sm:$0xff]  ;;  %v683_v10 = vld [vmem:[%s1482_s3 + $0x20] sm:$0xff]  ;;  %vm761_vm0 = vcmp.lt.s32.totalorder %v689_v1, 256 }
 0x133   : > { %v684_v13 = vld [vmem:[%s1482_s3 + $0x28] sm:$0xff] }
 0x134   : > { %v691_v5 = vsub.s32 0, %v1401_v2  ;;  %v695_v7 = vsub.s32 1, %v1401_v2  ;;  %v681_v8 = vld [vmem:[%s1482_s3 + $0x10] sm:$0xff] }
 0x135   : > { %v685_v14 = vld [vmem:[%s1482_s3 + $0x30] sm:$0xff] }
 0x136   : > { %v682_v9 = vld [vmem:[%s1482_s3 + $0x18] sm:$0xff]  ;;  %v692_v11 = vrot.slane %v687_v3, %v691_v5  ;;  %v696_v12 = vrot.slane %v687_v3, %v695_v7  ;;  %v746_v5 = vunpack.c.0.s8 %v745_v59 }
 0x137   : > { %v686_v15 = vld [vmem:[%s1482_s3 + $0x38] sm:$0xff] }
 0x138   : > { %v699_v16 = vadd.f32 %v692_v11, %v679_v4  ;;  %v700_v17 = vadd.f32 %v696_v12, %v680_v6  ;;  %v701_v18 = vadd.f32 %v692_v11, %v681_v8  ;;  %v702_v19 = vadd.f32 %v696_v12, %v682_v9 }
 0x139   : > { %v703_v20 = vadd.f32 %v692_v11, %v683_v10  ;;  %v704_v21 = vadd.f32 %v696_v12, %v684_v13  ;;  %v705_v22 = vadd.f32 %v692_v11, %v685_v14  ;;  %v706_v23 = vadd.f32 %v696_v12, %v686_v15 }
 0x13a   : > { %v707_v24 = vmax.f32 %v699_v16, 0.0  ;;  %v708_v25 = vmax.f32 %v700_v17, 0.0  ;;  %v709_v26 = vmax.f32 %v701_v18, 0.0  ;;  %v710_v27 = vmax.f32 %v702_v19, 0.0 }
 0x13b   : > { %v711_v28 = vmax.f32 %v703_v20, 0.0  ;;  %v712_v29 = vmax.f32 %v704_v21, 0.0  ;;  %v713_v30 = vmax.f32 %v705_v22, 0.0  ;;  %v714_v31 = vmax.f32 %v706_v23, 0.0 }
 0x13c   : > { %715 = vst [vmem:[%s1482_s3] sm:$0xff] %v707_v24  ;;  %v765_v32 = vmul.f32 %v707_v24, %v707_v24  ;;  %716 = vst [vmem:[%s1482_s3 + $0x8] sm:$0xff] %v708_v25  ;;  %v766_v33 = vmul.f32 %v708_v25, %v708_v25  ;;  %v723_v34 = vadd.f32 %v709_v26, %v707_v24 }
 0x13d   : > { %717 = vst [vmem:[%s1482_s3 + $0x10] sm:$0xff] %v709_v26  ;;  %v767_v35 = vmul.f32 %v709_v26, %v709_v26  ;;  %718 = vst [vmem:[%s1482_s3 + $0x18] sm:$0xff] %v710_v27  ;;  %v732_v36 = vadd.f32 %v710_v27, %v708_v25  ;;  %v768_v37 = vmul.f32 %v710_v27, %v710_v27 }
 0x13e   : > { %719 = vst [vmem:[%s1482_s3 + $0x20] sm:$0xff] %v711_v28  ;;  %v769_v38 = vmul.f32 %v711_v28, %v711_v28  ;;  %720 = vst [vmem:[%s1482_s3 + $0x28] sm:$0xff] %v712_v29  ;;  %v770_v39 = vmul.f32 %v712_v29, %v712_v29  ;;  %v724_v41 = vadd.f32 %v723_v34, %v711_v28 }
 0x13f   : > { %721 = vst [vmem:[%s1482_s3 + $0x30] sm:$0xff] %v713_v30  ;;  %722 = vst [vmem:[%s1482_s3 + $0x38] sm:$0xff] %v714_v31  ;;  %v773_v40 = vadd.f32 %v767_v35, %v765_v32  ;;  %v771_v42 = vmul.f32 %v713_v30, %v713_v30  ;;  %v782_v43 = vadd.f32 %v768_v37, %v766_v33 }
 0x140   : > { %v733_v44 = vadd.f32 %v732_v36, %v712_v29  ;;  %v772_v45 = vmul.f32 %v714_v31, %v714_v31  ;;  %v725_v47 = vadd.f32 %v724_v41, %v713_v30  ;;  %v749_v14 = vsub.s32 %v746_v5, %v1401_v2 }
 0x141   : > { %v774_v46 = vadd.f32 %v773_v40, %v769_v38  ;;  %v783_v48 = vadd.f32 %v782_v43, %v770_v39 }
 0x142   : > { %v734_v49 = vadd.f32 %v733_v44, %v714_v31  ;;  %v726_v50 = vrot.slane %v725_v47, 4 }
 0x143   : > { %v775_v51 = vadd.f32 %v774_v46, %v771_v42  ;;  %v784_v53 = vadd.f32 %v783_v48, %v772_v45 }
 0x144   : > { %v735_v52 = vrot.slane %v734_v49, 4  ;;  %v727_v54 = vadd.f32 %v726_v50, %v725_v47 }
 0x145   : > { %v776_v55 = vrot.slane %v775_v51, 4  ;;  %v785_v57 = vrot.slane %v784_v53, 4 }
 0x146   : > { %v736_v56 = vadd.f32 %v735_v52, %v734_v49  ;;  %v728_v60 = vrot.slane %v727_v54, 2 }
 0x147   : > { %v777_v61 = vadd.f32 %v776_v55, %v775_v51  ;;  %v786_v63 = vadd.f32 %v785_v57, %v784_v53 }
 0x148   : > { %v737_v62 = vrot.slane %v736_v56, 2  ;;  %v729_v0 = vadd.f32 %v728_v60, %v727_v54 }
 0x149   : > { %v778_v3 = vrot.slane %v777_v61, 2  ;;  %v787_v6 = vrot.slane %v786_v63, 2 }
 0x14a   : > { %v738_v4 = vadd.f32 %v737_v62, %v736_v56  ;;  %v730_v7 = vrot.slane %v729_v0, 1 }
 0x14b   : > { %v779_v8 = vadd.f32 %v778_v3, %v777_v61  ;;  %v788_v10 = vadd.f32 %v787_v6, %v786_v63 }
 0x14c   : > { %v739_v9 = vrot.slane %v738_v4, 1  ;;  %v731_v11 = vadd.f32 %v730_v7, %v729_v0 }
 0x14d   : > { %v780_v12 = vrot.slane %v779_v8, 1  ;;  %v789_v15 = vrot.slane %v788_v10, 1 }
 0x14e   : > { %v740_v13 = vadd.f32 %v739_v9, %v738_v4 }
 0x14f   : > { %v781_v16 = vadd.f32 %v780_v12, %v779_v8  ;;  %v790_v18 = vadd.f32 %v789_v15, %v788_v10 }
 0x150   : > { %v743_v17 = vcombine.low %v731_v11, %v740_v13 }
 0x151   : > { %v793_v20 = vcombine.low %v781_v16, %v790_v18 }
 0x152   : > { %v750_v19 = vrot.slane %v743_v17, %v749_v14 }
 0x153   : > { %v800_v22 = vrot.slane %v793_v20, %v749_v14 }
 0x154   : > { %v757_v21 = vrot.slane %v750_v19, %v749_v14 }
 0x155   : > { %v807_v23 = vrot.slane %v800_v22, %v749_v14 }
 0x156   : > { %763 = vst.msk [vmem:[%s1483_s4] ss:$8 sm:$0x3] %vm761_vm0, %v757_v21 }
 0x157   : > { %1032 = vst.msk [vmem:[%s1483_s4 + $0x1] ss:$8 sm:$0x3] %vm761_vm0, %v807_v23 }
 0x158 PF: > { %s15_s19 = sadd.s32 1, %s1207_s19   ;;  %s1484_s15 = smov %s1195_s16 }
 0x159   : > { %p12_p12 = scmp.ge.s32.totalorder %s15_s19, 7   ;;  %s1485_s16 = smov %s1271_s23 }
 0x15a   : > { %s1486_s17 = smov %s1203_s18  ;;  %s1487_s18 = smov %s1489_s20 }
 0x15b   :  { %14 = sbr.rel (!%p12_p12) target bundleno = 3 (0x3), region = 132 }

// kernel: encoder_forward.19
= control target key start
LH: loop header
LB: loop body
LE: loop exit
PB: predicated region body
PF: predicated region fallthrough
CT: control target
= control target key end

     0   :  { %s1236_s15 = smov 0   ;;  %s1238_s16 = smov 0   ;;  %s1479_s0 = inlined_call_operand.vmem [shape: bf16[32,2304], index: 0, kind: input, shape index: {}]   ;;  %s1480_s1 = inlined_call_operand.vmem [shape: bf16[2304,256], index: 1, kind: input, shape index: {}]   ;;  %s1481_s2 = inlined_call_operand.vmem [shape: f32[1,256], index: 2, kind: input, shape index: {}]   ;;  %s1482_s3 = inlined_call_operand.vmem [shape: f32[32,256], index: 3, kind: output, shape index: {0}]   ;;  %s1483_s4 = inlined_call_operand.vmem [shape: f32[8,256], index: 4, kind: output, shape index: {1}]  }
   0x1   :  { %s1240_s17 = smov 0   ;;  %s1242_s18 = smov 0  }
   0x2   :  { %s1244_s19 = smov 0  }
   0x3 LB: > { %s27_s20 = sadd.s32 1, %s1203_s18  ;;  %p50_p1 = scmp.ne.s32.totalorder %s1195_s16, %s1191_s15  ;;  %s1207_s19 = sphi %s1244_s19, %s15_s19   ;;  %s1203_s18 = sphi %s1242_s18, %s1487_s18   ;;  %s1199_s17 = sphi %s1240_s17, %s1486_s17   ;;  %s1195_s16 = sphi %s1238_s16, %s1485_s16   ;;  %s1191_s15 = sphi %s1236_s15, %s1484_s15  }
   0x4   : > { %p28_p0 = scmp.ge.s32.totalorder %s27_s20, 9  ;;  %p51_p2 = scmp.eq.s32.totalorder %s1207_s19, 0 }
   0x5   : > { %s43_s22 = sadd.s32 1, %s1195_s16  ;;  %p985_p5 = scmp.ge.s32.totalorder %s1207_s19, 9 }
   0x6   : > { %s1489_s20 = smov (%p28_p0, %s27_s20), 0  ;;  %p52_p3 = por %p51_p2, %p50_p1 }
   0x7   : > { %s39_s21 = ssub.s32 %s1203_s18, %s1489_s20  ;;  %194 = sbr.rel (%p985_p5) target bundleno = 18 (0x12), region = 20 }
   0x8   : > { %p41_p4 = scmp.eq.s32.totalorder %s39_s21, 0 }
   0xa   : > { %s1271_s23 = scalar_select %p41_p4, %s1195_s16, %s43_s22  }
   0xc   : > { %197 = sbr.rel (!%p52_p3) target bundleno = 18 (0x12), region = 24  ;;  %s199_s24 = sand.u32 (%p52_p3), 1, %s1195_s16  }
   0xd   : > { %s1039_s25 = sshll.u32 (%p52_p3), %s1203_s18, 3  ;;  %s986_s26 = sshll.u32 (%p52_p3), %s199_s24, 5 }
   0xe   : > { %s207_s29 = scalar_lea.vmem (%p52_p3), %s1479_s0, %s1039_s25  ;;  %s201_s30 = scalar_lea.vmem (%p52_p3), [#allocation2], %s986_s26 }
   0xf   : > { %v242_v0 = vld [vmem:[%s207_s29] sm:$0xff] (%p52_p3)  ;;  %v244_v1 = vld [vmem:[%s207_s29 + $0x48] sm:$0xff] (%p52_p3)  ;;  %v246_v2 = vld [vmem:[%s207_s29 + $0x90] sm:$0xff] (%p52_p3) }
  0x10   : > { %243 = vst [vmem:[%s201_s30] sm:$0xff] (%p52_p3), %v242_v0  ;;  %245 = vst [vmem:[%s201_s30 + $0x8] sm:$0xff] (%p52_p3), %v244_v1  ;;  %v248_v3 = vld [vmem:[%s207_s29 + $0xd8] sm:$0xff] (%p52_p3) }
  0x11   : > { %247 = vst [vmem:[%s201_s30 + $0x10] sm:$0xff] %v246_v2  ;;  %249 = vst [vmem:[%s201_s30 + $0x18] sm:$0xff] %v248_v3 }
  0x12 PF: > { %p989_p6 = scmp.ge.s32.totalorder %s1207_s19, 1  ;;  %p269_p7 = scmp.lt.s32.totalorder %s1207_s19, 10 }
  0x14   : > { %p270_p8 = pnand %p989_p6, %p269_p7 }
  0x15   : > { %s276_s5 = sand.u32 (!%p270_p8), 1, %s1191_s15   ;;  %s991_s6 = sshll.u32 (!%p270_p8), %s1199_s17, 5 }
  0x16   : > { %273 = sbr.rel (%p270_p8) target bundleno = 344 (0x158), region = 66  ;;  %s990_s7 = sshll.u32 (!%p270_p8), %s276_s5, 5 }
  0x17   : > { %p333_p9 = scmp.lt.s32.totalorder (!%p270_p8), %s991_s6, 287  ;;  %s1288_s12 = scalar_lea.vmem (!%p270_p8), [#allocation2], %s990_s7 }
  0x18   : > { %p994_p10 = scmp.ne.s32.totalorder (!%p270_p8), %s1199_s17, 0 }
  0x1b   : > { %s1491_s6 = smov (!%p333_p9, %s991_s6), 287  ;;  %373 = sbr.rel (%p994_p10) target bundleno = 37 (0x25), region = 74 }
  0x1c   : > { %s1040_s8 = sshll.u32 %s1491_s6, 3 }
  0x1d   : > { %s1286_s11 = scalar_lea.vmem %s1480_s1, %s1040_s8 }
  0x20   : > { %v1209_v4 = vmov 0.0  }
  0x21   : > { %374 = vst [vmem:[%s1482_s3] sm:$0xff] %v1209_v4  ;;  %375 = vst [vmem:[%s1482_s3 + $0x8] sm:$0xff] %v1209_v4 }
  0x22   : > { %376 = vst [vmem:[%s1482_s3 + $0x10] sm:$0xff] %v1209_v4  ;;  %377 = vst [vmem:[%s1482_s3 + $0x18] sm:$0xff] %v1209_v4 }
  0x23   : > { %378 = vst [vmem:[%s1482_s3 + $0x20] sm:$0xff] %v1209_v4  ;;  %379 = vst [vmem:[%s1482_s3 + $0x28] sm:$0xff] %v1209_v4 }
  0x24   : > { %380 = vst [vmem:[%s1482_s3 + $0x30] sm:$0xff] %v1209_v4  ;;  %381 = vst [vmem:[%s1482_s3 + $0x38] sm:$0xff] %v1209_v4 }
  0x25 PF: > { %v1115_v5 = vld [vmem:[%s1286_s11 + $0x74] ss:$8 sps:$4 sm:$0xff]   ;;  %v1117_v6 = vld [vmem:[%s1286_s11 + $0x70] ss:$8 sps:$4 sm:$0xff]   ;;  %v1118_v7 = vld [vmem:[%s1286_s11 + $0x64] ss:$8 sps:$4 sm:$0xff]  }
  0x26   : > { %606 = vmatprep.subr.bf16.mxu0 %v1115_v5  ;;  %1041 = vmatprep.subr.bf16.mxu1 %v1115_v5  ;;  %v1120_v8 = vld [vmem:[%s1286_s11 + $0x60] ss:$8 sps:$4 sm:$0xff]   ;;  %v1121_v9 = vld [vmem:[%s1286_s11 + $0x54] ss:$8 sps:$4 sm:$0xff]   ;;  %v1123_v10 = vld [vmem:[%s1286_s11 + $0x50] ss:$8 sps:$4 sm:$0xff]  }
  0x27   : > { %607 = vmatpush1.bf16.msra.mxu0 %v1117_v6  ;;  %1057 = vmatpush1.bf16.msra.mxu1 %v1117_v6  ;;  %v1124_v11 = vld [vmem:[%s1286_s11 + $0x44] ss:$8 sps:$4 sm:$0xff]   ;;  %v1126_v12 = vld [vmem:[%s1286_s11 + $0x40] ss:$8 sps:$4 sm:$0xff]   ;;  %v1127_v13 = vld [vmem:[%s1286_s11 + $0x34] ss:$8 sps:$4 sm:$0xff]  }
  0x28   : > { %608 = vmatprep.subr.bf16.mxu0 %v1118_v7  ;;  %1042 = vmatprep.subr.bf16.mxu1 %v1118_v7  ;;  %v1129_v14 = vld [vmem:[%s1286_s11 + $0x30] ss:$8 sps:$4 sm:$0xff]   ;;  %v1130_v15 = vld [vmem:[%s1286_s11 + $0x24] ss:$8 sps:$4 sm:$0xff]   ;;  %v1132_v16 = vld [vmem:[%s1286_s11 + $0x20] ss:$8 sps:$4 sm:$0xff]  }
  0x29   : > { %v1133_v17 = vld [vmem:[%s1286_s11 + $0x14] ss:$8 sps:$4 sm:$0xff]   ;;  %v1165_v18 = vld [vmem:[%s1288_s12 + $0x4] ss:$8 sps:$4 sm:$0xff]   ;;  %v1135_v19 = vld [vmem:[%s1286_s11 + $0x10] ss:$8 sps:$4 sm:$0xff]  }
  0x2a   : > { %v1168_v20 = vld [vmem:[%s1288_s12 + $0x14] ss:$8 sps:$4 sm:$0xff]   ;;  %v1136_v21 = vld [vmem:[%s1286_s11 + $0x4] ss:$8 sps:$4 sm:$0xff]   ;;  %638 = vmatprep.mubr.bf16.mxu0 %v1165_v18  ;;  %v1138_v22 = vld [vmem:[%s1286_s11] ss:$8 sps:$4 sm:$0xff]  }
  0x2b   : > { %609 = vmatpush1.bf16.msra.mxu0 %v1120_v8  ;;  %1058 = vmatpush1.bf16.msra.mxu1 %v1120_v8  ;;  %v1139_v23 = vld [vmem:[%s1286_s11 + $0xf4] ss:$8 sps:$4 sm:$0xff]   ;;  %v1141_v24 = vld [vmem:[%s1286_s11 + $0xf0] ss:$8 sps:$4 sm:$0xff]   ;;  %v1142_v25 = vld [vmem:[%s1286_s11 + $0xe4] ss:$8 sps:$4 sm:$0xff]  }
  0x2c   : > { %610 = vmatprep.subr.bf16.mxu0 %v1121_v9  ;;  %1043 = vmatprep.subr.bf16.mxu1 %v1121_v9  ;;  %v1144_v26 = vld [vmem:[%s1286_s11 + $0xe0] ss:$8 sps:$4 sm:$0xff]   ;;  %v1145_v27 = vld [vmem:[%s1286_s11 + $0xd4] ss:$8 sps:$4 sm:$0xff]   ;;  %v1147_v28 = vld [vmem:[%s1286_s11 + $0xd0] ss:$8 sps:$4 sm:$0xff]  }
  0x2d   : > { %648 = vmatprep.mubr.bf16.mxu1 %v1168_v20  ;;  %v1148_v29 = vld [vmem:[%s1286_s11 + $0xc4] ss:$8 sps:$4 sm:$0xff]   ;;  %v1150_v30 = vld [vmem:[%s1286_s11 + $0xc0] ss:$8 sps:$4 sm:$0xff]   ;;  %v1151_v31 = vld [vmem:[%s1286_s11 + $0xb4] ss:$8 sps:$4 sm:$0xff]  }
  0x2e   : > { %v1153_v32 = vld [vmem:[%s1286_s11 + $0xb0] ss:$8 sps:$4 sm:$0xff]   ;;  %v1154_v33 = vld [vmem:[%s1286_s11 + $0xa4] ss:$8 sps:$4 sm:$0xff]   ;;  %v1156_v34 = vld [vmem:[%s1286_s11 + $0xa0] ss:$8 sps:$4 sm:$0xff]  }
  0x2f   : > { %611 = vmatpush1.bf16.msra.mxu0 %v1123_v10  ;;  %1059 = vmatpush1.bf16.msra.mxu1 %v1123_v10  ;;  %v1157_v35 = vld [vmem:[%s1286_s11 + $0x94] ss:$8 sps:$4 sm:$0xff]   ;;  %v1159_v36 = vld [vmem:[%s1286_s11 + $0x90] ss:$8 sps:$4 sm:$0xff]   ;;  %v1160_v37 = vld [vmem:[%s1286_s11 + $0x84] ss:$8 sps:$4 sm:$0xff]  }
  0x30   : > { %612 = vmatprep.subr.bf16.mxu0 %v1124_v11  ;;  %1044 = vmatprep.subr.bf16.mxu1 %v1124_v11  ;;  %v1162_v38 = vld [vmem:[%s1286_s11 + $0x80] ss:$8 sps:$4 sm:$0xff]   ;;  %v1166_v40 = vld [vmem:[%s1288_s12 + $0x10] ss:$8 sps:$4 sm:$0xff]   ;;  %p1031_p11 = scmp.ne.s32.totalorder %s1199_s17, 8 }
  0x31   : > { %v1163_v39 = vld [vmem:[%s1288_s12] ss:$8 sps:$4 sm:$0xff]   ;;  %v384_v51 = vld [vmem:[%s1482_s3 + $0x10] sm:$0xff]  ;;  %v385_v57 = vld [vmem:[%s1482_s3 + $0x18] sm:$0xff] }
  0x32   : > { %v382_v41 = vld [vmem:[%s1482_s3] sm:$0xff]  ;;  %v383_v45 = vld [vmem:[%s1482_s3 + $0x8] sm:$0xff]  ;;  %v388_v52 = vld [vmem:[%s1482_s3 + $0x30] sm:$0xff] }
  0x33   : > { %613 = vmatpush1.bf16.msra.mxu0 %v1126_v12  ;;  %1060 = vmatpush1.bf16.msra.mxu1 %v1126_v12  ;;  %v386_v42 = vld [vmem:[%s1482_s3 + $0x20] sm:$0xff]  ;;  %v387_v46 = vld [vmem:[%s1482_s3 + $0x28] sm:$0xff]  ;;  %v389_v58 = vld [vmem:[%s1482_s3 + $0x38] sm:$0xff] }
  0x34   : > { %614 = vmatprep.subr.bf16.mxu0 %v1127_v13  ;;  %1045 = vmatprep.subr.bf16.mxu1 %v1127_v13 }
  0x37   : > { %615 = vmatpush1.bf16.msra.mxu0 %v1129_v14  ;;  %1061 = vmatpush1.bf16.msra.mxu1 %v1129_v14 }
  0x38   : > { %616 = vmatprep.subr.bf16.mxu0 %v1130_v15  ;;  %1046 = vmatprep.subr.bf16.mxu1 %v1130_v15 }
  0x3b   : > { %617 = vmatpush1.bf16.msra.mxu0 %v1132_v16  ;;  %1062 = vmatpush1.bf16.msra.mxu1 %v1132_v16 }
  0x3c   : > { %618 = vmatprep.subr.bf16.mxu0 %v1133_v17  ;;  %1047 = vmatprep.subr.bf16.mxu1 %v1133_v17 }
  0x3f   : > { %619 = vmatpush1.bf16.msra.mxu0 %v1135_v19  ;;  %1063 = vmatpush1.bf16.msra.mxu1 %v1135_v19 }
  0x40   : > { %620 = vmatprep.subr.bf16.mxu0 %v1136_v21  ;;  %1048 = vmatprep.subr.bf16.mxu1 %v1136_v21 }
  0x43   : > { %621 = vmatpush1.bf16.msra.mxu0 %v1138_v22  ;;  %1064 = vmatpush1.bf16.msra.mxu1 %v1138_v22 }
  0x44   : > { %622 = vmatprep.subr.bf16.mxu0 %v1139_v23  ;;  %1049 = vmatprep.subr.bf16.mxu1 %v1139_v23 }
  0x47   : > { %623 = vmatpush2.bf16.msra.mxu0 %v1141_v24  ;;  %1065 = vmatpush2.bf16.msra.mxu1 %v1141_v24 }
  0x48   : > { %624 = vmatprep.subr.bf16.mxu0 %v1142_v25  ;;  %1050 = vmatprep.subr.bf16.mxu1 %v1142_v25 }
  0x4b   : > { %625 = vmatpush2.bf16.msra.mxu0 %v1144_v26  ;;  %1066 = vmatpush2.bf16.msra.mxu1 %v1144_v26 }
  0x4c   : > { %626 = vmatprep.subr.bf16.mxu0 %v1145_v27  ;;  %1051 = vmatprep.subr.bf16.mxu1 %v1145_v27 }
  0x4f   : > { %627 = vmatpush2.bf16.msra.mxu0 %v1147_v28  ;;  %1067 = vmatpush2.bf16.msra.mxu1 %v1147_v28 }
  0x50   : > { %628 = vmatprep.subr.bf16.mxu0 %v1148_v29  ;;  %1052 = vmatprep.subr.bf16.mxu1 %v1148_v29 }
  0x53   : > { %629 = vmatpush2.bf16.msra.mxu0 %v1150_v30  ;;  %1068 = vmatpush2.bf16.msra.mxu1 %v1150_v30 }
  0x54   : > { %630 = vmatprep.subr.bf16.mxu0 %v1151_v31  ;;  %1053 = vmatprep.subr.bf16.mxu1 %v1151_v31 }
  0x57   : > { %631 = vmatpush2.bf16.msra.mxu0 %v1153_v32  ;;  %1069 = vmatpush2.bf16.msra.mxu1 %v1153_v32 }
  0x58   : > { %632 = vmatprep.subr.bf16.mxu0 %v1154_v33  ;;  %1054 = vmatprep.subr.bf16.mxu1 %v1154_v33 }
  0x5b   : > { %633 = vmatpush2.bf16.msra.mxu0 %v1156_v34  ;;  %1070 = vmatpush2.bf16.msra.mxu1 %v1156_v34 }
  0x5c   : > { %634 = vmatprep.subr.bf16.mxu0 %v1157_v35  ;;  %1055 = vmatprep.subr.bf16.mxu1 %v1157_v35 }
  0x5f   : > { %635 = vmatpush2.bf16.msra.mxu0 %v1159_v36  ;;  %1071 = vmatpush2.bf16.msra.mxu1 %v1159_v36 }
  0x60   : > { %636 = vmatprep.subr.bf16.mxu0 %v1160_v37  ;;  %1056 = vmatprep.subr.bf16.mxu1 %v1160_v37 }
  0x63   : > { %637 = vmatpush2.bf16.msra.mxu0 %v1162_v38  ;;  %1072 = vmatpush2.bf16.msra.mxu1 %v1162_v38 }
  0x66   : > { %639 = vmatmul.mubr.bf16.vlgmr.msra.gmra.mxu0 %v1163_v39  ;;  %649 = vmatmul.mubr.bf16.vlgmr.msra.gmra.mxu1 %v1166_v40 }
 0x126   : > { %v640_v43 = vpop.f32.mrf.mxu0  ;;  %v650_v44 = vpop.f32.mrf.mxu1 }
 0x127   : > { %v659_v47 = vadd.f32 %v640_v43, %v382_v41  ;;  %v663_v48 = vadd.f32 %v650_v44, %v386_v42 }
 0x128   : > { %v642_v49 = vpop.f32.mrf.mxu0  ;;  %v652_v50 = vpop.f32.mrf.mxu1 }
 0x129   : > { %667 = vst [vmem:[%s1482_s3] sm:$0xff] %v659_v47  ;;  %671 = vst [vmem:[%s1482_s3 + $0x20] sm:$0xff] %v663_v48  ;;  %v660_v53 = vadd.f32 %v642_v49, %v383_v45  ;;  %v664_v54 = vadd.f32 %v652_v50, %v387_v46 }
 0x12a   : > { %v644_v55 = vpop.f32.mrf.mxu0  ;;  %v654_v56 = vpop.f32.mrf.mxu1 }
 0x12b   : > { %668 = vst [vmem:[%s1482_s3 + $0x8] sm:$0xff] %v660_v53  ;;  %672 = vst [vmem:[%s1482_s3 + $0x28] sm:$0xff] %v664_v54  ;;  %v661_v59 = vadd.f32 %v644_v55, %v384_v51  ;;  %v665_v60 = vadd.f32 %v654_v56, %v388_v52  ;;  %678 = sbr.rel (%p1031_p11) target bundleno = 344 (0x158), region = 78 }
 0x12c   : > { %v646_v61 = vpop.f32.mrf.mxu0  ;;  %v656_v62 = vpop.f32.mrf.mxu1 }
 0x12d   : > { %669 = vst [vmem:[%s1482_s3 + $0x10] sm:$0xff] %v661_v59  ;;  %673 = vst [vmem:[%s1482_s3 + $0x30] sm:$0xff] %v665_v60  ;;  %v662_v63 = vadd.f32 %v646_v61, %v385_v57  ;;  %v666_v0 = vadd.f32 %v656_v62, %v389_v58 }
 0x12f   : > { %670 = vst [vmem:[%s1482_s3 + $0x18] sm:$0xff] %v662_v63  ;;  %674 = vst [vmem:[%s1482_s3 + $0x38] sm:$0xff] %v666_v0 }
 0x130   : > { %v689_v1 = vlaneseq  ;;  %v687_v3 = vld [vmem:[%s1481_s2] sm:$0x3]  ;;  %v1210_v58 = vmov 1966171168  }
 0x131   : > { %v679_v4 = vld [vmem:[%s1482_s3] sm:$0xff]  ;;  %v745_v59 = vunpack.c.l.s4 %v1210_v58 }
 0x132   : > { %v1401_v2 = vshrl.u32 %v689_v1, 7  ;;  %v680_v6 = vld [vmem:[%s1482_s3 + $0x8] sm:$0xff]  ;;  %v683_v10 = vld [vmem:[%s1482_s3 + $0x20] sm:$0xff]  ;;  %vm761_vm0 = vcmp.lt.s32.totalorder %v689_v1, 256 }
 0x133   : > { %v684_v13 = vld [vmem:[%s1482_s3 + $0x28] sm:$0xff] }
 0x134   : > { %v691_v5 = vsub.s32 0, %v1401_v2  ;;  %v695_v7 = vsub.s32 1, %v1401_v2  ;;  %v681_v8 = vld [vmem:[%s1482_s3 + $0x10] sm:$0xff] }
 0x135   : > { %v685_v14 = vld [vmem:[%s1482_s3 + $0x30] sm:$0xff] }
 0x136   : > { %v682_v9 = vld [vmem:[%s1482_s3 + $0x18] sm:$0xff]  ;;  %v692_v11 = vrot.slane %v687_v3, %v691_v5  ;;  %v696_v12 = vrot.slane %v687_v3, %v695_v7  ;;  %v746_v5 = vunpack.c.0.s8 %v745_v59 }
 0x137   : > { %v686_v15 = vld [vmem:[%s1482_s3 + $0x38] sm:$0xff] }
 0x138   : > { %v699_v16 = vadd.f32 %v692_v11, %v679_v4  ;;  %v700_v17 = vadd.f32 %v696_v12, %v680_v6  ;;  %v701_v18 = vadd.f32 %v692_v11, %v681_v8  ;;  %v702_v19 = vadd.f32 %v696_v12, %v682_v9 }
 0x139   : > { %v703_v20 = vadd.f32 %v692_v11, %v683_v10  ;;  %v704_v21 = vadd.f32 %v696_v12, %v684_v13  ;;  %v705_v22 = vadd.f32 %v692_v11, %v685_v14  ;;  %v706_v23 = vadd.f32 %v696_v12, %v686_v15 }
 0x13a   : > { %v707_v24 = vmax.f32 %v699_v16, 0.0  ;;  %v708_v25 = vmax.f32 %v700_v17, 0.0  ;;  %v709_v26 = vmax.f32 %v701_v18, 0.0  ;;  %v710_v27 = vmax.f32 %v702_v19, 0.0 }
 0x13b   : > { %v711_v28 = vmax.f32 %v703_v20, 0.0  ;;  %v712_v29 = vmax.f32 %v704_v21, 0.0  ;;  %v713_v30 = vmax.f32 %v705_v22, 0.0  ;;  %v714_v31 = vmax.f32 %v706_v23, 0.0 }
 0x13c   : > { %715 = vst [vmem:[%s1482_s3] sm:$0xff] %v707_v24  ;;  %v765_v32 = vmul.f32 %v707_v24, %v707_v24  ;;  %716 = vst [vmem:[%s1482_s3 + $0x8] sm:$0xff] %v708_v25  ;;  %v766_v33 = vmul.f32 %v708_v25, %v708_v25  ;;  %v723_v34 = vadd.f32 %v709_v26, %v707_v24 }
 0x13d   : > { %717 = vst [vmem:[%s1482_s3 + $0x10] sm:$0xff] %v709_v26  ;;  %v767_v35 = vmul.f32 %v709_v26, %v709_v26  ;;  %718 = vst [vmem:[%s1482_s3 + $0x18] sm:$0xff] %v710_v27  ;;  %v732_v36 = vadd.f32 %v710_v27, %v708_v25  ;;  %v768_v37 = vmul.f32 %v710_v27, %v710_v27 }
 0x13e   : > { %719 = vst [vmem:[%s1482_s3 + $0x20] sm:$0xff] %v711_v28  ;;  %v769_v38 = vmul.f32 %v711_v28, %v711_v28  ;;  %720 = vst [vmem:[%s1482_s3 + $0x28] sm:$0xff] %v712_v29  ;;  %v770_v39 = vmul.f32 %v712_v29, %v712_v29  ;;  %v724_v41 = vadd.f32 %v723_v34, %v711_v28 }
 0x13f   : > { %721 = vst [vmem:[%s1482_s3 + $0x30] sm:$0xff] %v713_v30  ;;  %722 = vst [vmem:[%s1482_s3 + $0x38] sm:$0xff] %v714_v31  ;;  %v773_v40 = vadd.f32 %v767_v35, %v765_v32  ;;  %v771_v42 = vmul.f32 %v713_v30, %v713_v30  ;;  %v782_v43 = vadd.f32 %v768_v37, %v766_v33 }
 0x140   : > { %v733_v44 = vadd.f32 %v732_v36, %v712_v29  ;;  %v772_v45 = vmul.f32 %v714_v31, %v714_v31  ;;  %v725_v47 = vadd.f32 %v724_v41, %v713_v30  ;;  %v749_v14 = vsub.s32 %v746_v5, %v1401_v2 }
 0x141   : > { %v774_v46 = vadd.f32 %v773_v40, %v769_v38  ;;  %v783_v48 = vadd.f32 %v782_v43, %v770_v39 }
 0x142   : > { %v734_v49 = vadd.f32 %v733_v44, %v714_v31  ;;  %v726_v50 = vrot.slane %v725_v47, 4 }
 0x143   : > { %v775_v51 = vadd.f32 %v774_v46, %v771_v42  ;;  %v784_v53 = vadd.f32 %v783_v48, %v772_v45 }
 0x144   : > { %v735_v52 = vrot.slane %v734_v49, 4  ;;  %v727_v54 = vadd.f32 %v726_v50, %v725_v47 }
 0x145   : > { %v776_v55 = vrot.slane %v775_v51, 4  ;;  %v785_v57 = vrot.slane %v784_v53, 4 }
 0x146   : > { %v736_v56 = vadd.f32 %v735_v52, %v734_v49  ;;  %v728_v60 = vrot.slane %v727_v54, 2 }
 0x147   : > { %v777_v61 = vadd.f32 %v776_v55, %v775_v51  ;;  %v786_v63 = vadd.f32 %v785_v57, %v784_v53 }
 0x148   : > { %v737_v62 = vrot.slane %v736_v56, 2  ;;  %v729_v0 = vadd.f32 %v728_v60, %v727_v54 }
 0x149   : > { %v778_v3 = vrot.slane %v777_v61, 2  ;;  %v787_v6 = vrot.slane %v786_v63, 2 }
 0x14a   : > { %v738_v4 = vadd.f32 %v737_v62, %v736_v56  ;;  %v730_v7 = vrot.slane %v729_v0, 1 }
 0x14b   : > { %v779_v8 = vadd.f32 %v778_v3, %v777_v61  ;;  %v788_v10 = vadd.f32 %v787_v6, %v786_v63 }
 0x14c   : > { %v739_v9 = vrot.slane %v738_v4, 1  ;;  %v731_v11 = vadd.f32 %v730_v7, %v729_v0 }
 0x14d   : > { %v780_v12 = vrot.slane %v779_v8, 1  ;;  %v789_v15 = vrot.slane %v788_v10, 1 }
 0x14e   : > { %v740_v13 = vadd.f32 %v739_v9, %v738_v4 }
 0x14f   : > { %v781_v16 = vadd.f32 %v780_v12, %v779_v8  ;;  %v790_v18 = vadd.f32 %v789_v15, %v788_v10 }
 0x150   : > { %v743_v17 = vcombine.low %v731_v11, %v740_v13 }
 0x151   : > { %v793_v20 = vcombine.low %v781_v16, %v790_v18 }
 0x152   : > { %v750_v19 = vrot.slane %v743_v17, %v749_v14 }
 0x153   : > { %v800_v22 = vrot.slane %v793_v20, %v749_v14 }
 0x154   : > { %v757_v21 = vrot.slane %v750_v19, %v749_v14 }
 0x155   : > { %v807_v23 = vrot.slane %v800_v22, %v749_v14 }
 0x156   : > { %763 = vst.msk [vmem:[%s1483_s4] ss:$8 sm:$0x3] %vm761_vm0, %v757_v21 }
 0x157   : > { %1032 = vst.msk [vmem:[%s1483_s4 + $0x1] ss:$8 sm:$0x3] %vm761_vm0, %v807_v23 }
 0x158 PF: > { %s15_s19 = sadd.s32 1, %s1207_s19   ;;  %s1484_s15 = smov %s1195_s16 }
 0x159   : > { %p12_p12 = scmp.ge.s32.totalorder %s15_s19, 11   ;;  %s1485_s16 = smov %s1271_s23 }
 0x15a   : > { %s1486_s17 = smov %s1203_s18  ;;  %s1487_s18 = smov %s1489_s20 }
 0x15b   :  { %14 = sbr.rel (!%p12_p12) target bundleno = 3 (0x3), region = 132 }

// kernel: encoder_forward.20
= control target key start
LH: loop header
LB: loop body
LE: loop exit
PB: predicated region body
PF: predicated region fallthrough
CT: control target
= control target key end

     0   :  { %s1021_s15 = smov 0   ;;  %s1023_s16 = smov 0   ;;  %s1136_s0 = inlined_call_operand.vmem [shape: bf16[8,2304], index: 0, kind: input, shape index: {}]   ;;  %s1137_s1 = inlined_call_operand.vmem [shape: bf16[2304,256], index: 1, kind: input, shape index: {}]   ;;  %s1138_s2 = inlined_call_operand.vmem [shape: f32[1,256], index: 2, kind: input, shape index: {}]   ;;  %s1139_s3 = inlined_call_operand.vmem [shape: f32[8,256], index: 3, kind: output, shape index: {0}]   ;;  %s1140_s4 = inlined_call_operand.vmem [shape: f32[8,256], index: 4, kind: output, shape index: {1}]  }
   0x1   :  { %s1025_s17 = smov 0  }
   0x2 LB: > { %s27_s18 = sadd.s32 1, %s988_s16  ;;  %p844_p0 = scmp.ge.s32.totalorder %s992_s17, 1  ;;  %s992_s17 = sphi %s1025_s17, %s15_s17   ;;  %s988_s16 = sphi %s1023_s16, %s1142_s16   ;;  %s984_s15 = sphi %s1021_s15, %s1141_s15  }
   0x3   : > { %p28_p1 = scmp.ge.s32.totalorder %s27_s18, 9  ;;  %p224_p2 = scmp.lt.s32.totalorder %s992_s17, 10 }
   0x5   : > { %s1144_s18 = smov (%p28_p1, %s27_s18), 0  ;;  %p225_p3 = pnand %p844_p0, %p224_p2 }
   0x6   : > { %s845_s19 = sshll.u32 (!%p225_p3), %s984_s15, 1  ;;  %s847_s20 = sshll.u32 (!%p225_p3), %s984_s15, 5 }
   0x7   : > { %228 = sbr.rel (%p225_p3) target bundleno = 319 (0x13f), region = 32  ;;  %p284_p4 = scmp.lt.s32.totalorder (!%p225_p3), %s845_s19, 17 }
   0x8   : > { %p293_p5 = scmp.lt.s32.totalorder (!%p225_p3), %s847_s20, 287  ;;  %p850_p6 = scmp.ne.s32.totalorder (!%p225_p3), %s984_s15, 0 }
   0xc   : > { %s1146_s19 = smov (!%p284_p4, %s845_s19), 17  ;;  %s1148_s20 = smov (!%p293_p5, %s847_s20), 287 }
   0xd   : > { %s846_s21 = sshll.u32 %s1146_s19, 2  ;;  %s893_s25 = sshll.u32 %s1148_s20, 3 }
   0xe   : > { %s1046_s24 = scalar_lea.vmem %s1136_s0, %s846_s21  ;;  %s1051_s28 = scalar_lea.vmem %s1137_s1, %s893_s25 }
   0xf   : > { %331 = sbr.rel (%p850_p6) target bundleno = 22 (0x16), region = 36 }
  0x14   : > { %v994_v0 = vmov 0.0  }
  0x15   : > { %332 = vst [vmem:[%s1139_s3] sm:$0xff] %v994_v0  ;;  %333 = vst [vmem:[%s1139_s3 + $0x8] sm:$0xff] %v994_v0 }
  0x16 PF: > { %v920_v1 = vld [vmem:[%s1051_s28 + $0x74] ss:$8 sps:$4 sm:$0xff]   ;;  %v922_v2 = vld [vmem:[%s1051_s28 + $0x70] ss:$8 sps:$4 sm:$0xff]   ;;  %v923_v3 = vld [vmem:[%s1051_s28 + $0x64] ss:$8 sps:$4 sm:$0xff]  }
  0x17   : > { %536 = vmatprep.subr.bf16.mxu0 %v920_v1  ;;  %v925_v4 = vld [vmem:[%s1051_s28 + $0x60] ss:$8 sps:$4 sm:$0xff]   ;;  %v926_v5 = vld [vmem:[%s1051_s28 + $0x54] ss:$8 sps:$4 sm:$0xff]   ;;  %v928_v6 = vld [vmem:[%s1051_s28 + $0x50] ss:$8 sps:$4 sm:$0xff]  }
  0x18   : > { %537 = vmatpush1.bf16.msra.mxu0 %v922_v2  ;;  %v929_v7 = vld [vmem:[%s1051_s28 + $0x44] ss:$8 sps:$4 sm:$0xff]   ;;  %v931_v8 = vld [vmem:[%s1051_s28 + $0x40] ss:$8 sps:$4 sm:$0xff]   ;;  %v932_v9 = vld [vmem:[%s1051_s28 + $0x34] ss:$8 sps:$4 sm:$0xff]  }
  0x19   : > { %538 = vmatprep.subr.bf16.mxu0 %v923_v3  ;;  %v934_v10 = vld [vmem:[%s1051_s28 + $0x30] ss:$8 sps:$4 sm:$0xff]   ;;  %v935_v11 = vld [vmem:[%s1051_s28 + $0x24] ss:$8 sps:$4 sm:$0xff]   ;;  %v937_v12 = vld [vmem:[%s1051_s28 + $0x20] ss:$8 sps:$4 sm:$0xff]  }
  0x1a   : > { %v938_v13 = vld [vmem:[%s1051_s28 + $0x14] ss:$8 sps:$4 sm:$0xff]   ;;  %v336_v14 = vld [vmem:[%s1046_s24] sm:$0xff]  ;;  %v940_v16 = vld [vmem:[%s1051_s28 + $0x10] ss:$8 sps:$4 sm:$0xff]   ;;  %p885_p7 = scmp.ne.s32.totalorder %s984_s15, 8 }
  0x1b   : > { %v852_v15 = vcombine.high %v336_v14, %v336_v14  ;;  %v941_v17 = vld [vmem:[%s1051_s28 + $0x4] ss:$8 sps:$4 sm:$0xff]   ;;  %v943_v18 = vld [vmem:[%s1051_s28] ss:$8 sps:$4 sm:$0xff]   ;;  %v944_v19 = vld [vmem:[%s1051_s28 + $0xf4] ss:$8 sps:$4 sm:$0xff]   ;;  %v851_v35 = vcombine.low %v336_v14, %v336_v14 }
  0x1c   : > { %539 = vmatpush1.bf16.msra.mxu0 %v925_v4  ;;  %v946_v20 = vld [vmem:[%s1051_s28 + $0xf0] ss:$8 sps:$4 sm:$0xff]   ;;  %v947_v21 = vld [vmem:[%s1051_s28 + $0xe4] ss:$8 sps:$4 sm:$0xff]   ;;  %v949_v22 = vld [vmem:[%s1051_s28 + $0xe0] ss:$8 sps:$4 sm:$0xff]  }
  0x1d   : > { %540 = vmatprep.subr.bf16.mxu0 %v926_v5  ;;  %568 = vmatprep.mubr.bf16.mxu0 %v852_v15  ;;  %v950_v23 = vld [vmem:[%s1051_s28 + $0xd4] ss:$8 sps:$4 sm:$0xff]   ;;  %v952_v24 = vld [vmem:[%s1051_s28 + $0xd0] ss:$8 sps:$4 sm:$0xff]   ;;  %v953_v25 = vld [vmem:[%s1051_s28 + $0xc4] ss:$8 sps:$4 sm:$0xff]  }
  0x1e   : > { %v955_v26 = vld [vmem:[%s1051_s28 + $0xc0] ss:$8 sps:$4 sm:$0xff]   ;;  %v956_v27 = vld [vmem:[%s1051_s28 + $0xb4] ss:$8 sps:$4 sm:$0xff]   ;;  %v958_v28 = vld [vmem:[%s1051_s28 + $0xb0] ss:$8 sps:$4 sm:$0xff]  }
  0x1f   : > { %v959_v29 = vld [vmem:[%s1051_s28 + $0xa4] ss:$8 sps:$4 sm:$0xff]   ;;  %v961_v30 = vld [vmem:[%s1051_s28 + $0xa0] ss:$8 sps:$4 sm:$0xff]   ;;  %v962_v31 = vld [vmem:[%s1051_s28 + $0x94] ss:$8 sps:$4 sm:$0xff]  }
  0x20   : > { %541 = vmatpush1.bf16.msra.mxu0 %v928_v6  ;;  %v964_v32 = vld [vmem:[%s1051_s28 + $0x90] ss:$8 sps:$4 sm:$0xff]   ;;  %v965_v33 = vld [vmem:[%s1051_s28 + $0x84] ss:$8 sps:$4 sm:$0xff]   ;;  %v967_v34 = vld [vmem:[%s1051_s28 + $0x80] ss:$8 sps:$4 sm:$0xff]  }
  0x21   : > { %542 = vmatprep.subr.bf16.mxu0 %v929_v7  ;;  %v334_v36 = vld [vmem:[%s1139_s3] sm:$0xff]  ;;  %v335_v38 = vld [vmem:[%s1139_s3 + $0x8] sm:$0xff] }
  0x24   : > { %543 = vmatpush1.bf16.msra.mxu0 %v931_v8 }
  0x25   : > { %544 = vmatprep.subr.bf16.mxu0 %v932_v9 }
  0x28   : > { %545 = vmatpush1.bf16.msra.mxu0 %v934_v10 }
  0x29   : > { %546 = vmatprep.subr.bf16.mxu0 %v935_v11 }
  0x2c   : > { %547 = vmatpush1.bf16.msra.mxu0 %v937_v12 }
  0x2d   : > { %548 = vmatprep.subr.bf16.mxu0 %v938_v13 }
  0x30   : > { %549 = vmatpush1.bf16.msra.mxu0 %v940_v16 }
  0x31   : > { %550 = vmatprep.subr.bf16.mxu0 %v941_v17 }
  0x34   : > { %551 = vmatpush1.bf16.msra.mxu0 %v943_v18 }
  0x35   : > { %552 = vmatprep.subr.bf16.mxu0 %v944_v19 }
  0x38   : > { %553 = vmatpush2.bf16.msra.mxu0 %v946_v20 }
  0x39   : > { %554 = vmatprep.subr.bf16.mxu0 %v947_v21 }
  0x3c   : > { %555 = vmatpush2.bf16.msra.mxu0 %v949_v22 }
  0x3d   : > { %556 = vmatprep.subr.bf16.mxu0 %v950_v23 }
  0x40   : > { %557 = vmatpush2.bf16.msra.mxu0 %v952_v24 }
  0x41   : > { %558 = vmatprep.subr.bf16.mxu0 %v953_v25 }
  0x44   : > { %559 = vmatpush2.bf16.msra.mxu0 %v955_v26 }
  0x45   : > { %560 = vmatprep.subr.bf16.mxu0 %v956_v27 }
  0x48   : > { %561 = vmatpush2.bf16.msra.mxu0 %v958_v28 }
  0x49   : > { %562 = vmatprep.subr.bf16.mxu0 %v959_v29 }
  0x4c   : > { %563 = vmatpush2.bf16.msra.mxu0 %v961_v30 }
  0x4d   : > { %564 = vmatprep.subr.bf16.mxu0 %v962_v31 }
  0x50   : > { %565 = vmatpush2.bf16.msra.mxu0 %v964_v32 }
  0x51   : > { %566 = vmatprep.subr.bf16.mxu0 %v965_v33 }
  0x54   : > { %567 = vmatpush2.bf16.msra.mxu0 %v967_v34 }
  0x57   : > { %569 = vmatmul.mubr.bf16.vlgmr.msra.gmra.mxu0 %v851_v35 }
 0x117   : > { %v570_v37 = vpop.f32.mrf.mxu0 }
 0x118   : > { %v577_v39 = vadd.f32 %v570_v37, %v334_v36 }
 0x119   : > { %v572_v40 = vpop.f32.mrf.mxu0  ;;  %584 = sbr.rel (%p885_p7) target bundleno = 319 (0x13f), region = 40 }
 0x11a   : > { %579 = vst [vmem:[%s1139_s3] sm:$0xff] %v577_v39  ;;  %v578_v41 = vadd.f32 %v572_v40, %v335_v38 }
 0x11b   : > { %v574_v42 = vpop.f32.mrf.mxu0 }
 0x11c   : > { %580 = vst [vmem:[%s1139_s3 + $0x8] sm:$0xff] %v578_v41 }
 0x11d   : > { %v575_v43 = vpop.f32.mrf.mxu0 }
 0x11e   : > { %v589_v44 = vlaneseq  ;;  %v587_v46 = vld [vmem:[%s1138_s2] sm:$0x3]  ;;  %v995_v61 = vmov 1966171168  }
 0x11f   : > { %v621_v62 = vunpack.c.l.s4 %v995_v61 }
 0x120   : > { %v590_v45 = vshrl.u32 %v589_v44, 7  ;;  %vm637_vm0 = vcmp.lt.s32.totalorder %v589_v44, 256 }
 0x121   : > { %v585_v49 = vld [vmem:[%s1139_s3] sm:$0xff]  ;;  %v622_v7 = vunpack.c.0.s8 %v621_v62 }
 0x122   : > { %v591_v47 = vsub.s32 0, %v590_v45  ;;  %v595_v48 = vsub.s32 1, %v590_v45 }
 0x123   : > { %v586_v50 = vld [vmem:[%s1139_s3 + $0x8] sm:$0xff]  ;;  %v625_v16 = vsub.s32 %v622_v7, %v590_v45 }
 0x124   : > { %v592_v51 = vrot.slane %v587_v46, %v591_v47  ;;  %v596_v52 = vrot.slane %v587_v46, %v595_v48 }
 0x126   : > { %v599_v53 = vadd.f32 %v592_v51, %v585_v49  ;;  %v600_v54 = vadd.f32 %v596_v52, %v586_v50 }
 0x128   : > { %v601_v55 = vmax.f32 %v599_v53, 0.0  ;;  %v602_v56 = vmax.f32 %v600_v54, 0.0 }
 0x12a   : > { %603 = vst [vmem:[%s1139_s3] sm:$0xff] %v601_v55  ;;  %v605_v57 = vrot.slane %v601_v55, 4  ;;  %v641_v58 = vmul.f32 %v601_v55, %v601_v55  ;;  %604 = vst [vmem:[%s1139_s3 + $0x8] sm:$0xff] %v602_v56  ;;  %v611_v59 = vrot.slane %v602_v56, 4  ;;  %v642_v60 = vmul.f32 %v602_v56, %v602_v56 }
 0x12c   : > { %v606_v63 = vadd.f32 %v605_v57, %v601_v55  ;;  %v643_v0 = vrot.slane %v641_v58, 4  ;;  %v612_v1 = vadd.f32 %v611_v59, %v602_v56  ;;  %v649_v2 = vrot.slane %v642_v60, 4 }
 0x12e   : > { %v607_v3 = vrot.slane %v606_v63, 2  ;;  %v613_v4 = vrot.slane %v612_v1, 2  ;;  %v644_v5 = vadd.f32 %v643_v0, %v641_v58  ;;  %v650_v6 = vadd.f32 %v649_v2, %v642_v60 }
 0x130   : > { %v608_v8 = vadd.f32 %v607_v3, %v606_v63  ;;  %v614_v9 = vadd.f32 %v613_v4, %v612_v1  ;;  %v645_v10 = vrot.slane %v644_v5, 2  ;;  %v651_v11 = vrot.slane %v650_v6, 2 }
 0x132   : > { %v609_v12 = vrot.slane %v608_v8, 1  ;;  %v615_v13 = vrot.slane %v614_v9, 1  ;;  %v646_v14 = vadd.f32 %v645_v10, %v644_v5  ;;  %v652_v15 = vadd.f32 %v651_v11, %v650_v6 }
 0x134   : > { %v610_v17 = vadd.f32 %v609_v12, %v608_v8  ;;  %v616_v18 = vadd.f32 %v615_v13, %v614_v9  ;;  %v647_v19 = vrot.slane %v646_v14, 1  ;;  %v653_v20 = vrot.slane %v652_v15, 1 }
 0x136   : > { %v619_v21 = vcombine.low %v610_v17, %v616_v18  ;;  %v648_v22 = vadd.f32 %v647_v19, %v646_v14  ;;  %v654_v23 = vadd.f32 %v653_v20, %v652_v15 }
 0x138   : > { %v626_v24 = vrot.slane %v619_v21, %v625_v16  ;;  %v657_v25 = vcombine.low %v648_v22, %v654_v23 }
 0x13a   : > { %v633_v26 = vrot.slane %v626_v24, %v625_v16  ;;  %v664_v27 = vrot.slane %v657_v25, %v625_v16 }
 0x13c   : > { %639 = vst.msk [vmem:[%s1140_s4] ss:$8 sm:$0x3] %vm637_vm0, %v633_v26  ;;  %v671_v28 = vrot.slane %v664_v27, %v625_v16 }
 0x13e   : > { %886 = vst.msk [vmem:[%s1140_s4 + $0x1] ss:$8 sm:$0x3] %vm637_vm0, %v671_v28 }
 0x13f PF: > { %s15_s17 = sadd.s32 1, %s992_s17   ;;  %s1141_s15 = smov %s988_s16 }
 0x140   : > { %p12_p8 = scmp.ge.s32.totalorder %s15_s17, 11   ;;  %s1142_s16 = smov %s1144_s18 }
 0x142   :  { %14 = sbr.rel (!%p12_p8) target bundleno = 2 (0x2), region = 89 }

// kernel: encoder_forward.21
= control target key start
LH: loop header
LB: loop body
LE: loop exit
PB: predicated region body
PF: predicated region fallthrough
CT: control target
= control target key end

     0   :  { %s1244_s15 = smov 0   ;;  %s1246_s16 = smov 0   ;;  %s1474_s0 = inlined_call_operand.vmem [shape: bf16[8,2304], index: 0, kind: input, shape index: {}]   ;;  %s1475_s1 = inlined_call_operand.vmem [shape: bf16[2304,512], index: 1, kind: input, shape index: {}]   ;;  %s1476_s2 = inlined_call_operand.vmem [shape: f32[1,512], index: 2, kind: input, shape index: {}]   ;;  %s1477_s3 = inlined_call_operand.vmem [shape: f32[8,512], index: 3, kind: output, shape index: {0}]   ;;  %s1478_s4 = inlined_call_operand.vmem [shape: f32[8,512], index: 4, kind: output, shape index: {1}]  }
   0x1   :  { %s1248_s17 = smov 0   ;;  %s1250_s18 = smov 0  }
   0x2   :  { %s1252_s19 = smov 0   ;;  %s1254_s20 = smov 0  }
   0x3   :  { %s1256_s21 = smov 0  }
   0x4 LB: > { %s27_s22 = sadd.s32 1, %s1207_s19  ;;  %s30_s23 = sadd.s32 1, %s1211_s20  ;;  %s1215_s21 = sphi %s1256_s21, %s15_s21   ;;  %s1211_s20 = sphi %s1254_s20, %s1484_s20   ;;  %s1207_s19 = sphi %s1252_s19, %s1483_s19   ;;  %s1203_s18 = sphi %s1250_s18, %s1482_s18   ;;  %s1199_s17 = sphi %s1248_s17, %s1481_s17   ;;  %s1195_s16 = sphi %s1246_s16, %s1480_s16   ;;  %s1191_s15 = sphi %s1244_s15, %s1479_s15  }
   0x5   : > { %p28_p0 = scmp.ge.s32.totalorder %s27_s22, 9  ;;  %p78_p1 = scmp.ne.s32.totalorder %s1195_s16, %s1191_s15 }
   0x6   : > { %p79_p2 = scmp.eq.s32.totalorder %s1215_s21, 0  ;;  %s71_s27 = sadd.s32 1, %s1195_s16 }
   0x7   : > { %s1486_s22 = smov (%p28_p0, %s27_s22), 0  ;;  %s1488_s23 = smov (!%p28_p0, %s30_s23), %s1211_s20 }
   0x8   : > { %p80_p3 = por %p79_p2, %p78_p1  ;;  %p32_p4 = scmp.ge.s32.totalorder %s1488_s23, 2 }
   0x9   : > { %s66_s24 = ssub.s32 %s1207_s19, %s1486_s22  ;;  %p998_p6 = scmp.ge.s32.totalorder %s1215_s21, 18 }
   0xa   : > { %s1490_s23 = smov (%p32_p4, %s1488_s23), 0 }
   0xb   : > { %s67_s25 = ssub.s32 %s1211_s20, %s1490_s23  ;;  %186 = sbr.rel (%p998_p6) target bundleno = 39 (0x27), region = 16 }
   0xc   : > { %s68_s26 = sor.u32 %s67_s25, %s66_s24 }
   0xd   : > { %p69_p5 = scmp.eq.s32.totalorder %s68_s26, 0 }
   0xf   : > { %s1295_s28 = scalar_select %p69_p5, %s1195_s16, %s71_s27  }
  0x10   : > { %202 = sbr.rel (!%p80_p3) target bundleno = 39 (0x27), region = 24  ;;  %s204_s29 = sand.u32 (%p80_p3), 1, %s1195_s16  }
  0x11   : > { %s1001_s30 = sshll.u32 (%p80_p3), %s1211_s20, 1  ;;  %s999_s5 = sshll.u32 (%p80_p3), %s204_s29, 8 }
  0x12   : > { %s1052_s6 = sshll.u32 (%p80_p3), %s1207_s19, 7  ;;  %s1309_s12 = scalar_lea.vmem (%p80_p3), [#allocation2], %s999_s5 }
  0x13   : > { %s210_s7 = sadd.s32 (%p80_p3), %s1052_s6, %s1001_s30 }
  0x14   : > { %s1003_s8 = sshll.u32 (%p80_p3), %s210_s7, 2 }
  0x15   : > { %s1304_s11 = scalar_lea.vmem %s1475_s1, %s1003_s8 }
  0x16   : > { %v303_v0 = vld [vmem:[%s1304_s11] sm:$0xff]  ;;  %v305_v1 = vld [vmem:[%s1304_s11 + $0x10] sm:$0xff] }
  0x17   : > { %v307_v2 = vld [vmem:[%s1304_s11 + $0x20] sm:$0xff]  ;;  %304 = vst [vmem:[%s1309_s12] sm:$0xff] %v303_v0  ;;  %306 = vst [vmem:[%s1309_s12 + $0x8] sm:$0xff] %v305_v1  ;;  %v309_v3 = vld [vmem:[%s1304_s11 + $0x30] sm:$0xff] }
  0x18   : > { %308 = vst [vmem:[%s1309_s12 + $0x10] sm:$0xff] %v307_v2  ;;  %v311_v4 = vld [vmem:[%s1304_s11 + $0x40] sm:$0xff]  ;;  %v313_v5 = vld [vmem:[%s1304_s11 + $0x50] sm:$0xff]  ;;  %310 = vst [vmem:[%s1309_s12 + $0x18] sm:$0xff] %v309_v3 }
  0x19   : > { %312 = vst [vmem:[%s1309_s12 + $0x20] sm:$0xff] %v311_v4  ;;  %314 = vst [vmem:[%s1309_s12 + $0x28] sm:$0xff] %v313_v5  ;;  %v315_v6 = vld [vmem:[%s1304_s11 + $0x60] sm:$0xff]  ;;  %v317_v7 = vld [vmem:[%s1304_s11 + $0x70] sm:$0xff] }
  0x1a   : > { %v319_v8 = vld [vmem:[%s1304_s11 + $0x80] sm:$0xff]  ;;  %316 = vst [vmem:[%s1309_s12 + $0x30] sm:$0xff] %v315_v6  ;;  %318 = vst [vmem:[%s1309_s12 + $0x38] sm:$0xff] %v317_v7  ;;  %v321_v9 = vld [vmem:[%s1304_s11 + $0x90] sm:$0xff] }
  0x1b   : > { %320 = vst [vmem:[%s1309_s12 + $0x40] sm:$0xff] %v319_v8  ;;  %v323_v10 = vld [vmem:[%s1304_s11 + $0xa0] sm:$0xff]  ;;  %v325_v11 = vld [vmem:[%s1304_s11 + $0xb0] sm:$0xff]  ;;  %322 = vst [vmem:[%s1309_s12 + $0x48] sm:$0xff] %v321_v9 }
  0x1c   : > { %324 = vst [vmem:[%s1309_s12 + $0x50] sm:$0xff] %v323_v10  ;;  %326 = vst [vmem:[%s1309_s12 + $0x58] sm:$0xff] %v325_v11  ;;  %v327_v12 = vld [vmem:[%s1304_s11 + $0xc0] sm:$0xff]  ;;  %v329_v13 = vld [vmem:[%s1304_s11 + $0xd0] sm:$0xff] }
  0x1d   : > { %v331_v14 = vld [vmem:[%s1304_s11 + $0xe0] sm:$0xff]  ;;  %328 = vst [vmem:[%s1309_s12 + $0x60] sm:$0xff] %v327_v12  ;;  %330 = vst [vmem:[%s1309_s12 + $0x68] sm:$0xff] %v329_v13  ;;  %v333_v15 = vld [vmem:[%s1304_s11 + $0xf0] sm:$0xff] }
  0x1e   : > { %332 = vst [vmem:[%s1309_s12 + $0x70] sm:$0xff] %v331_v14  ;;  %v335_v16 = vld [vmem:[%s1304_s11 + $0x100] sm:$0xff]  ;;  %v337_v17 = vld [vmem:[%s1304_s11 + $0x110] sm:$0xff]  ;;  %334 = vst [vmem:[%s1309_s12 + $0x78] sm:$0xff] %v333_v15 }
  0x1f   : > { %336 = vst [vmem:[%s1309_s12 + $0x80] sm:$0xff] %v335_v16  ;;  %338 = vst [vmem:[%s1309_s12 + $0x88] sm:$0xff] %v337_v17  ;;  %v339_v18 = vld [vmem:[%s1304_s11 + $0x120] sm:$0xff]  ;;  %v341_v19 = vld [vmem:[%s1304_s11 + $0x130] sm:$0xff] }
  0x20   : > { %v343_v20 = vld [vmem:[%s1304_s11 + $0x140] sm:$0xff]  ;;  %340 = vst [vmem:[%s1309_s12 + $0x90] sm:$0xff] %v339_v18  ;;  %342 = vst [vmem:[%s1309_s12 + $0x98] sm:$0xff] %v341_v19  ;;  %v345_v21 = vld [vmem:[%s1304_s11 + $0x150] sm:$0xff] }
  0x21   : > { %344 = vst [vmem:[%s1309_s12 + $0xa0] sm:$0xff] %v343_v20  ;;  %v347_v22 = vld [vmem:[%s1304_s11 + $0x160] sm:$0xff]  ;;  %v349_v23 = vld [vmem:[%s1304_s11 + $0x170] sm:$0xff]  ;;  %346 = vst [vmem:[%s1309_s12 + $0xa8] sm:$0xff] %v345_v21 }
  0x22   : > { %348 = vst [vmem:[%s1309_s12 + $0xb0] sm:$0xff] %v347_v22  ;;  %350 = vst [vmem:[%s1309_s12 + $0xb8] sm:$0xff] %v349_v23  ;;  %v351_v24 = vld [vmem:[%s1304_s11 + $0x180] sm:$0xff]  ;;  %v353_v25 = vld [vmem:[%s1304_s11 + $0x190] sm:$0xff] }
  0x23   : > { %v355_v26 = vld [vmem:[%s1304_s11 + $0x1a0] sm:$0xff]  ;;  %352 = vst [vmem:[%s1309_s12 + $0xc0] sm:$0xff] %v351_v24  ;;  %354 = vst [vmem:[%s1309_s12 + $0xc8] sm:$0xff] %v353_v25  ;;  %v357_v27 = vld [vmem:[%s1304_s11 + $0x1b0] sm:$0xff] }
  0x24   : > { %356 = vst [vmem:[%s1309_s12 + $0xd0] sm:$0xff] %v355_v26  ;;  %v359_v28 = vld [vmem:[%s1304_s11 + $0x1c0] sm:$0xff]  ;;  %v361_v29 = vld [vmem:[%s1304_s11 + $0x1d0] sm:$0xff]  ;;  %358 = vst [vmem:[%s1309_s12 + $0xd8] sm:$0xff] %v357_v27 }
  0x25   : > { %360 = vst [vmem:[%s1309_s12 + $0xe0] sm:$0xff] %v359_v28  ;;  %362 = vst [vmem:[%s1309_s12 + $0xe8] sm:$0xff] %v361_v29  ;;  %v363_v30 = vld [vmem:[%s1304_s11 + $0x1e0] sm:$0xff]  ;;  %v365_v31 = vld [vmem:[%s1304_s11 + $0x1f0] sm:$0xff] }
  0x26   : > { %364 = vst [vmem:[%s1309_s12 + $0xf0] sm:$0xff] %v363_v30  ;;  %366 = vst [vmem:[%s1309_s12 + $0xf8] sm:$0xff] %v365_v31 }
  0x27 PF: > { %p1004_p7 = scmp.ge.s32.totalorder %s1215_s21, 1  ;;  %p379_p8 = scmp.lt.s32.totalorder %s1215_s21, 19 }
  0x29   : > { %p380_p9 = pnand %p1004_p7, %p379_p8 }
  0x2a   : > { %s386_s13 = sand.u32 (!%p380_p9), 1, %s1191_s15   ;;  %s1006_s14 = sshll.u32 (!%p380_p9), %s1199_s17, 1 }
  0x2b   : > { %383 = sbr.rel (%p380_p9) target bundleno = 356 (0x164), region = 66  ;;  %s1005_s24 = sshll.u32 (!%p380_p9), %s386_s13, 8 }
  0x2c   : > { %p440_p10 = scmp.lt.s32.totalorder (!%p380_p9), %s1006_s14, 17  ;;  %s1008_s25 = sshll.u32 (!%p380_p9), %s1203_s18, 1 }
  0x2d   : > { %p450_p11 = scmp.lt.s32.totalorder (!%p380_p9), %s1008_s25, 3  ;;  %s1399_s13 = scalar_lea.vmem (!%p380_p9), [#allocation2], %s1005_s24 }
  0x2e   : > { %p1013_p12 = scmp.ne.s32.totalorder (!%p380_p9), %s1199_s17, 0 }
  0x30   : > { %s1492_s14 = smov (!%p440_p10, %s1006_s14), 17  ;;  %s1494_s25 = smov (!%p450_p11, %s1008_s25), 3 }
  0x31   : > { %s1007_s26 = sshll.u32 %s1492_s14, 2  ;;  %s452_s15 = scalar_lea.vmem %s1476_s2, %s1494_s25 }
  0x32   : > { %s1380_s30 = scalar_lea.vmem %s1474_s0, %s1007_s26  ;;  %s1010_s7 = sshll.u32 %s1494_s25, 3 }
  0x33   : > { %s1392_s18 = scalar_lea.vmem %s1477_s3, %s1010_s7  ;;  %s1397_s12 = scalar_lea.vmem %s1478_s4, %s1010_s7 }
  0x34   : > { %477 = sbr.rel (%p1013_p12) target bundleno = 59 (0x3b), region = 74 }
  0x39   : > { %v1217_v32 = vmov 0.0  }
  0x3a   : > { %478 = vst [vmem:[%s1392_s18] sm:$0xff] %v1217_v32  ;;  %479 = vst [vmem:[%s1392_s18 + $0x8] sm:$0xff] %v1217_v32 }
  0x3b PF: > { %v1111_v33 = vld [vmem:[%s1399_s13 + $0x74] ss:$8 sps:$4 sm:$0xff]   ;;  %v1113_v34 = vld [vmem:[%s1399_s13 + $0x70] ss:$8 sps:$4 sm:$0xff]   ;;  %v1114_v35 = vld [vmem:[%s1399_s13 + $0x64] ss:$8 sps:$4 sm:$0xff]  }
  0x3c   : > { %682 = vmatprep.subr.bf16.mxu0 %v1111_v33  ;;  %v1116_v36 = vld [vmem:[%s1399_s13 + $0x60] ss:$8 sps:$4 sm:$0xff]   ;;  %v1117_v37 = vld [vmem:[%s1399_s13 + $0x54] ss:$8 sps:$4 sm:$0xff]   ;;  %v1119_v38 = vld [vmem:[%s1399_s13 + $0x50] ss:$8 sps:$4 sm:$0xff]  }
  0x3d   : > { %683 = vmatpush1.bf16.msra.mxu0 %v1113_v34  ;;  %v1120_v39 = vld [vmem:[%s1399_s13 + $0x44] ss:$8 sps:$4 sm:$0xff]   ;;  %v1122_v40 = vld [vmem:[%s1399_s13 + $0x40] ss:$8 sps:$4 sm:$0xff]   ;;  %v1123_v41 = vld [vmem:[%s1399_s13 + $0x34] ss:$8 sps:$4 sm:$0xff]  }
  0x3e   : > { %684 = vmatprep.subr.bf16.mxu0 %v1114_v35  ;;  %v1125_v42 = vld [vmem:[%s1399_s13 + $0x30] ss:$8 sps:$4 sm:$0xff]   ;;  %v1126_v43 = vld [vmem:[%s1399_s13 + $0x24] ss:$8 sps:$4 sm:$0xff]   ;;  %v1128_v44 = vld [vmem:[%s1399_s13 + $0x20] ss:$8 sps:$4 sm:$0xff]  }
  0x3f   : > { %v1129_v45 = vld [vmem:[%s1399_s13 + $0x14] ss:$8 sps:$4 sm:$0xff]   ;;  %v482_v46 = vld [vmem:[%s1380_s30] sm:$0xff]  ;;  %v1131_v48 = vld [vmem:[%s1399_s13 + $0x10] ss:$8 sps:$4 sm:$0xff]   ;;  %p1048_p13 = scmp.ne.s32.totalorder %s1199_s17, 8 }
  0x40   : > { %v1015_v47 = vcombine.high %v482_v46, %v482_v46  ;;  %v1132_v49 = vld [vmem:[%s1399_s13 + $0x4] ss:$8 sps:$4 sm:$0xff]   ;;  %v1134_v50 = vld [vmem:[%s1399_s13] ss:$8 sps:$4 sm:$0xff]   ;;  %v1135_v51 = vld [vmem:[%s1399_s13 + $0xf4] ss:$8 sps:$4 sm:$0xff]   ;;  %v1014_v3 = vcombine.low %v482_v46, %v482_v46 }
  0x41   : > { %685 = vmatpush1.bf16.msra.mxu0 %v1116_v36  ;;  %v1137_v52 = vld [vmem:[%s1399_s13 + $0xf0] ss:$8 sps:$4 sm:$0xff]   ;;  %v1138_v53 = vld [vmem:[%s1399_s13 + $0xe4] ss:$8 sps:$4 sm:$0xff]   ;;  %v1140_v54 = vld [vmem:[%s1399_s13 + $0xe0] ss:$8 sps:$4 sm:$0xff]  }
  0x42   : > { %686 = vmatprep.subr.bf16.mxu0 %v1117_v37  ;;  %714 = vmatprep.mubr.bf16.mxu0 %v1015_v47  ;;  %v1141_v55 = vld [vmem:[%s1399_s13 + $0xd4] ss:$8 sps:$4 sm:$0xff]   ;;  %v1143_v56 = vld [vmem:[%s1399_s13 + $0xd0] ss:$8 sps:$4 sm:$0xff]   ;;  %v1144_v57 = vld [vmem:[%s1399_s13 + $0xc4] ss:$8 sps:$4 sm:$0xff]  }
  0x43   : > { %v1146_v58 = vld [vmem:[%s1399_s13 + $0xc0] ss:$8 sps:$4 sm:$0xff]   ;;  %v1147_v59 = vld [vmem:[%s1399_s13 + $0xb4] ss:$8 sps:$4 sm:$0xff]   ;;  %v1149_v60 = vld [vmem:[%s1399_s13 + $0xb0] ss:$8 sps:$4 sm:$0xff]  }
  0x44   : > { %v1150_v61 = vld [vmem:[%s1399_s13 + $0xa4] ss:$8 sps:$4 sm:$0xff]   ;;  %v1152_v62 = vld [vmem:[%s1399_s13 + $0xa0] ss:$8 sps:$4 sm:$0xff]   ;;  %v1153_v63 = vld [vmem:[%s1399_s13 + $0x94] ss:$8 sps:$4 sm:$0xff]  }
  0x45   : > { %687 = vmatpush1.bf16.msra.mxu0 %v1119_v38  ;;  %v1155_v0 = vld [vmem:[%s1399_s13 + $0x90] ss:$8 sps:$4 sm:$0xff]   ;;  %v1156_v1 = vld [vmem:[%s1399_s13 + $0x84] ss:$8 sps:$4 sm:$0xff]   ;;  %v1158_v2 = vld [vmem:[%s1399_s13 + $0x80] ss:$8 sps:$4 sm:$0xff]  }
  0x46   : > { %688 = vmatprep.subr.bf16.mxu0 %v1120_v39  ;;  %v480_v4 = vld [vmem:[%s1392_s18] sm:$0xff]  ;;  %v481_v6 = vld [vmem:[%s1392_s18 + $0x8] sm:$0xff] }
  0x49   : > { %689 = vmatpush1.bf16.msra.mxu0 %v1122_v40 }
  0x4a   : > { %690 = vmatprep.subr.bf16.mxu0 %v1123_v41 }
  0x4d   : > { %691 = vmatpush1.bf16.msra.mxu0 %v1125_v42 }
  0x4e   : > { %692 = vmatprep.subr.bf16.mxu0 %v1126_v43 }
  0x51   : > { %693 = vmatpush1.bf16.msra.mxu0 %v1128_v44 }
  0x52   : > { %694 = vmatprep.subr.bf16.mxu0 %v1129_v45 }
  0x55   : > { %695 = vmatpush1.bf16.msra.mxu0 %v1131_v48 }
  0x56   : > { %696 = vmatprep.subr.bf16.mxu0 %v1132_v49 }
  0x59   : > { %697 = vmatpush1.bf16.msra.mxu0 %v1134_v50 }
  0x5a   : > { %698 = vmatprep.subr.bf16.mxu0 %v1135_v51 }
  0x5d   : > { %699 = vmatpush2.bf16.msra.mxu0 %v1137_v52 }
  0x5e   : > { %700 = vmatprep.subr.bf16.mxu0 %v1138_v53 }
  0x61   : > { %701 = vmatpush2.bf16.msra.mxu0 %v1140_v54 }
  0x62   : > { %702 = vmatprep.subr.bf16.mxu0 %v1141_v55 }
  0x65   : > { %703 = vmatpush2.bf16.msra.mxu0 %v1143_v56 }
  0x66   : > { %704 = vmatprep.subr.bf16.mxu0 %v1144_v57 }
  0x69   : > { %705 = vmatpush2.bf16.msra.mxu0 %v1146_v58 }
  0x6a   : > { %706 = vmatprep.subr.bf16.mxu0 %v1147_v59 }
  0x6d   : > { %707 = vmatpush2.bf16.msra.mxu0 %v1149_v60 }
  0x6e   : > { %708 = vmatprep.subr.bf16.mxu0 %v1150_v61 }
  0x71   : > { %709 = vmatpush2.bf16.msra.mxu0 %v1152_v62 }
  0x72   : > { %710 = vmatprep.subr.bf16.mxu0 %v1153_v63 }
  0x75   : > { %711 = vmatpush2.bf16.msra.mxu0 %v1155_v0 }
  0x76   : > { %712 = vmatprep.subr.bf16.mxu0 %v1156_v1 }
  0x79   : > { %713 = vmatpush2.bf16.msra.mxu0 %v1158_v2 }
  0x7c   : > { %715 = vmatmul.mubr.bf16.vlgmr.msra.gmra.mxu0 %v1014_v3 }
 0x13c   : > { %v716_v5 = vpop.f32.mrf.mxu0 }
 0x13d   : > { %v723_v7 = vadd.f32 %v716_v5, %v480_v4 }
 0x13e   : > { %v718_v8 = vpop.f32.mrf.mxu0  ;;  %730 = sbr.rel (%p1048_p13) target bundleno = 356 (0x164), region = 78 }
 0x13f   : > { %v724_v9 = vadd.f32 %v718_v8, %v481_v6  ;;  %725 = vst [vmem:[%s1392_s18] sm:$0xff] %v723_v7 }
 0x140   : > { %v720_v10 = vpop.f32.mrf.mxu0 }
 0x141   : > { %726 = vst [vmem:[%s1392_s18 + $0x8] sm:$0xff] %v724_v9 }
 0x142   : > { %v721_v11 = vpop.f32.mrf.mxu0 }
 0x143   : > { %v735_v12 = vlaneseq  ;;  %v733_v14 = vld [vmem:[%s452_s15] sm:$0x3]  ;;  %v1218_v29 = vmov 1966171168  }
 0x144   : > { %v767_v30 = vunpack.c.l.s4 %v1218_v29 }
 0x145   : > { %v736_v13 = vshrl.u32 %v735_v12, 7  ;;  %vm783_vm0 = vcmp.lt.s32.totalorder %v735_v12, 256 }
 0x146   : > { %v731_v17 = vld [vmem:[%s1392_s18] sm:$0xff]  ;;  %v768_v39 = vunpack.c.0.s8 %v767_v30 }
 0x147   : > { %v737_v15 = vsub.s32 0, %v736_v13  ;;  %v741_v16 = vsub.s32 1, %v736_v13 }
 0x148   : > { %v732_v18 = vld [vmem:[%s1392_s18 + $0x8] sm:$0xff]  ;;  %v771_v48 = vsub.s32 %v768_v39, %v736_v13 }
 0x149   : > { %v738_v19 = vrot.slane %v733_v14, %v737_v15  ;;  %v742_v20 = vrot.slane %v733_v14, %v741_v16 }
 0x14b   : > { %v745_v21 = vadd.f32 %v738_v19, %v731_v17  ;;  %v746_v22 = vadd.f32 %v742_v20, %v732_v18 }
 0x14d   : > { %v747_v23 = vmax.f32 %v745_v21, 0.0  ;;  %v748_v24 = vmax.f32 %v746_v22, 0.0 }
 0x14f   : > { %749 = vst [vmem:[%s1392_s18] sm:$0xff] %v747_v23  ;;  %v751_v25 = vrot.slane %v747_v23, 4  ;;  %v757_v26 = vrot.slane %v748_v24, 4  ;;  %v787_v27 = vmul.f32 %v747_v23, %v747_v23  ;;  %v788_v28 = vmul.f32 %v748_v24, %v748_v24  ;;  %750 = vst [vmem:[%s1392_s18 + $0x8] sm:$0xff] %v748_v24 }
 0x151   : > { %v752_v31 = vadd.f32 %v751_v25, %v747_v23  ;;  %v789_v32 = vrot.slane %v787_v27, 4  ;;  %v758_v33 = vadd.f32 %v757_v26, %v748_v24  ;;  %v795_v34 = vrot.slane %v788_v28, 4 }
 0x153   : > { %v753_v35 = vrot.slane %v752_v31, 2  ;;  %v759_v36 = vrot.slane %v758_v33, 2  ;;  %v790_v37 = vadd.f32 %v789_v32, %v787_v27  ;;  %v796_v38 = vadd.f32 %v795_v34, %v788_v28 }
 0x155   : > { %v754_v40 = vadd.f32 %v753_v35, %v752_v31  ;;  %v760_v41 = vadd.f32 %v759_v36, %v758_v33  ;;  %v791_v42 = vrot.slane %v790_v37, 2  ;;  %v797_v43 = vrot.slane %v796_v38, 2 }
 0x157   : > { %v755_v44 = vrot.slane %v754_v40, 1  ;;  %v761_v45 = vrot.slane %v760_v41, 1  ;;  %v792_v46 = vadd.f32 %v791_v42, %v790_v37  ;;  %v798_v47 = vadd.f32 %v797_v43, %v796_v38 }
 0x159   : > { %v756_v49 = vadd.f32 %v755_v44, %v754_v40  ;;  %v762_v50 = vadd.f32 %v761_v45, %v760_v41  ;;  %v793_v51 = vrot.slane %v792_v46, 1  ;;  %v799_v52 = vrot.slane %v798_v47, 1 }
 0x15b   : > { %v765_v53 = vcombine.low %v756_v49, %v762_v50  ;;  %v794_v54 = vadd.f32 %v793_v51, %v792_v46  ;;  %v800_v55 = vadd.f32 %v799_v52, %v798_v47 }
 0x15d   : > { %v772_v56 = vrot.slane %v765_v53, %v771_v48  ;;  %v803_v57 = vcombine.low %v794_v54, %v800_v55 }
 0x15f   : > { %v779_v58 = vrot.slane %v772_v56, %v771_v48  ;;  %v810_v59 = vrot.slane %v803_v57, %v771_v48 }
 0x161   : > { %785 = vst.msk [vmem:[%s1397_s12] ss:$8 sm:$0x3] %vm783_vm0, %v779_v58  ;;  %v817_v60 = vrot.slane %v810_v59, %v771_v48 }
 0x163   : > { %1049 = vst.msk [vmem:[%s1397_s12 + $0x1] ss:$8 sm:$0x3] %vm783_vm0, %v817_v60 }
 0x164 PF: > { %s15_s21 = sadd.s32 1, %s1215_s21   ;;  %s1479_s15 = smov %s1195_s16 }
 0x165   : > { %p12_p0 = scmp.ge.s32.totalorder %s15_s21, 20   ;;  %s1480_s16 = smov %s1295_s28 }
 0x166   : > { %s1481_s17 = smov %s1207_s19  ;;  %s1482_s18 = smov %s1211_s20 }
 0x167   : > { %s1483_s19 = smov %s1486_s22  ;;  %s1484_s20 = smov %s1490_s23 }
 0x168   :  { %14 = sbr.rel (!%p12_p0) target bundleno = 4 (0x4), region = 132 }

// kernel: encoder_forward.22
= control target key start
LH: loop header
LB: loop body
LE: loop exit
PB: predicated region body
PF: predicated region fallthrough
CT: control target
= control target key end

     0   :  { %s1244_s15 = smov 0   ;;  %s1246_s16 = smov 0   ;;  %s1474_s0 = inlined_call_operand.vmem [shape: bf16[8,4608], index: 0, kind: input, shape index: {}]   ;;  %s1475_s1 = inlined_call_operand.vmem [shape: bf16[4608,1024], index: 1, kind: input, shape index: {}]   ;;  %s1476_s2 = inlined_call_operand.vmem [shape: f32[1,1024], index: 2, kind: input, shape index: {}]   ;;  %s1477_s3 = inlined_call_operand.vmem [shape: f32[8,1024], index: 3, kind: output, shape index: {0}]   ;;  %s1478_s4 = inlined_call_operand.vmem [shape: f32[8,1024], index: 4, kind: output, shape index: {1}]  }
   0x1   :  { %s1248_s17 = smov 0   ;;  %s1250_s18 = smov 0  }
   0x2   :  { %s1252_s19 = smov 0   ;;  %s1254_s20 = smov 0  }
   0x3   :  { %s1256_s21 = smov 0  }
   0x4 LB: > { %s27_s22 = sadd.s32 1, %s1207_s19  ;;  %s30_s23 = sadd.s32 1, %s1211_s20  ;;  %s1215_s21 = sphi %s1256_s21, %s15_s21   ;;  %s1211_s20 = sphi %s1254_s20, %s1484_s20   ;;  %s1207_s19 = sphi %s1252_s19, %s1483_s19   ;;  %s1203_s18 = sphi %s1250_s18, %s1482_s18   ;;  %s1199_s17 = sphi %s1248_s17, %s1481_s17   ;;  %s1195_s16 = sphi %s1246_s16, %s1480_s16   ;;  %s1191_s15 = sphi %s1244_s15, %s1479_s15  }
   0x5   : > { %p28_p0 = scmp.ge.s32.totalorder %s27_s22, 18  ;;  %p78_p1 = scmp.ne.s32.totalorder %s1195_s16, %s1191_s15 }
   0x6   : > { %p79_p2 = scmp.eq.s32.totalorder %s1215_s21, 0  ;;  %s71_s27 = sadd.s32 1, %s1195_s16 }
   0x7   : > { %s1486_s22 = smov (%p28_p0, %s27_s22), 0  ;;  %s1488_s23 = smov (!%p28_p0, %s30_s23), %s1211_s20 }
   0x8   : > { %p80_p3 = por %p79_p2, %p78_p1  ;;  %p32_p4 = scmp.ge.s32.totalorder %s1488_s23, 4 }
   0x9   : > { %s66_s24 = ssub.s32 %s1207_s19, %s1486_s22  ;;  %p998_p6 = scmp.ge.s32.totalorder %s1215_s21, 72 }
   0xa   : > { %s1490_s23 = smov (%p32_p4, %s1488_s23), 0 }
   0xb   : > { %s67_s25 = ssub.s32 %s1211_s20, %s1490_s23  ;;  %186 = sbr.rel (%p998_p6) target bundleno = 55 (0x37), region = 16 }
   0xc   : > { %s68_s26 = sor.u32 %s67_s25, %s66_s24 }
   0xd   : > { %p69_p5 = scmp.eq.s32.totalorder %s68_s26, 0 }
   0xf   : > { %s1295_s28 = scalar_select %p69_p5, %s1195_s16, %s71_s27  }
  0x10   : > { %202 = sbr.rel (!%p80_p3) target bundleno = 55 (0x37), region = 24  ;;  %s204_s29 = sand.u32 (%p80_p3), 1, %s1195_s16  }
  0x11   : > { %s1001_s30 = sshll.u32 (%p80_p3), %s1211_s20, 1  ;;  %s999_s5 = sshll.u32 (%p80_p3), %s204_s29, 8 }
  0x12   : > { %s1052_s6 = sshll.u32 (%p80_p3), %s1207_s19, 8  ;;  %s1309_s12 = scalar_lea.vmem (%p80_p3), [#allocation2], %s999_s5 }
  0x13   : > { %s210_s7 = sadd.s32 (%p80_p3), %s1052_s6, %s1001_s30 }
  0x14   : > { %s1003_s8 = sshll.u32 (%p80_p3), %s210_s7, 2 }
  0x15   : > { %s1304_s11 = scalar_lea.vmem %s1475_s1, %s1003_s8 }
  0x16   : > { %v303_v0 = vld [vmem:[%s1304_s11] sm:$0xff] }
  0x17   : > { %v305_v1 = vld [vmem:[%s1304_s11 + $0x20] sm:$0xff]  ;;  %304 = vst [vmem:[%s1309_s12] sm:$0xff] %v303_v0 }
  0x18   : > { %v307_v2 = vld [vmem:[%s1304_s11 + $0x40] sm:$0xff]  ;;  %306 = vst [vmem:[%s1309_s12 + $0x8] sm:$0xff] %v305_v1 }
  0x19   : > { %308 = vst [vmem:[%s1309_s12 + $0x10] sm:$0xff] %v307_v2  ;;  %v309_v3 = vld [vmem:[%s1304_s11 + $0x60] sm:$0xff] }
  0x1a   : > { %v311_v4 = vld [vmem:[%s1304_s11 + $0x80] sm:$0xff]  ;;  %310 = vst [vmem:[%s1309_s12 + $0x18] sm:$0xff] %v309_v3 }
  0x1b   : > { %v313_v5 = vld [vmem:[%s1304_s11 + $0xa0] sm:$0xff]  ;;  %312 = vst [vmem:[%s1309_s12 + $0x20] sm:$0xff] %v311_v4 }
  0x1c   : > { %314 = vst [vmem:[%s1309_s12 + $0x28] sm:$0xff] %v313_v5  ;;  %v315_v6 = vld [vmem:[%s1304_s11 + $0xc0] sm:$0xff] }
  0x1d   : > { %v317_v7 = vld [vmem:[%s1304_s11 + $0xe0] sm:$0xff]  ;;  %316 = vst [vmem:[%s1309_s12 + $0x30] sm:$0xff] %v315_v6 }
  0x1e   : > { %v319_v8 = vld [vmem:[%s1304_s11 + $0x100] sm:$0xff]  ;;  %318 = vst [vmem:[%s1309_s12 + $0x38] sm:$0xff] %v317_v7 }
  0x1f   : > { %320 = vst [vmem:[%s1309_s12 + $0x40] sm:$0xff] %v319_v8  ;;  %v321_v9 = vld [vmem:[%s1304_s11 + $0x120] sm:$0xff] }
  0x20   : > { %v323_v10 = vld [vmem:[%s1304_s11 + $0x140] sm:$0xff]  ;;  %322 = vst [vmem:[%s1309_s12 + $0x48] sm:$0xff] %v321_v9 }
  0x21   : > { %v325_v11 = vld [vmem:[%s1304_s11 + $0x160] sm:$0xff]  ;;  %324 = vst [vmem:[%s1309_s12 + $0x50] sm:$0xff] %v323_v10 }
  0x22   : > { %326 = vst [vmem:[%s1309_s12 + $0x58] sm:$0xff] %v325_v11  ;;  %v327_v12 = vld [vmem:[%s1304_s11 + $0x180] sm:$0xff] }
  0x23   : > { %v329_v13 = vld [vmem:[%s1304_s11 + $0x1a0] sm:$0xff]  ;;  %328 = vst [vmem:[%s1309_s12 + $0x60] sm:$0xff] %v327_v12 }
  0x24   : > { %v331_v14 = vld [vmem:[%s1304_s11 + $0x1c0] sm:$0xff]  ;;  %330 = vst [vmem:[%s1309_s12 + $0x68] sm:$0xff] %v329_v13 }
  0x25   : > { %332 = vst [vmem:[%s1309_s12 + $0x70] sm:$0xff] %v331_v14  ;;  %v333_v15 = vld [vmem:[%s1304_s11 + $0x1e0] sm:$0xff] }
  0x26   : > { %v335_v16 = vld [vmem:[%s1304_s11 + $0x200] sm:$0xff]  ;;  %334 = vst [vmem:[%s1309_s12 + $0x78] sm:$0xff] %v333_v15 }
  0x27   : > { %v337_v17 = vld [vmem:[%s1304_s11 + $0x220] sm:$0xff]  ;;  %336 = vst [vmem:[%s1309_s12 + $0x80] sm:$0xff] %v335_v16 }
  0x28   : > { %338 = vst [vmem:[%s1309_s12 + $0x88] sm:$0xff] %v337_v17  ;;  %v339_v18 = vld [vmem:[%s1304_s11 + $0x240] sm:$0xff] }
  0x29   : > { %v341_v19 = vld [vmem:[%s1304_s11 + $0x260] sm:$0xff]  ;;  %340 = vst [vmem:[%s1309_s12 + $0x90] sm:$0xff] %v339_v18 }
  0x2a   : > { %v343_v20 = vld [vmem:[%s1304_s11 + $0x280] sm:$0xff]  ;;  %342 = vst [vmem:[%s1309_s12 + $0x98] sm:$0xff] %v341_v19 }
  0x2b   : > { %344 = vst [vmem:[%s1309_s12 + $0xa0] sm:$0xff] %v343_v20  ;;  %v345_v21 = vld [vmem:[%s1304_s11 + $0x2a0] sm:$0xff] }
  0x2c   : > { %v347_v22 = vld [vmem:[%s1304_s11 + $0x2c0] sm:$0xff]  ;;  %346 = vst [vmem:[%s1309_s12 + $0xa8] sm:$0xff] %v345_v21 }
  0x2d   : > { %v349_v23 = vld [vmem:[%s1304_s11 + $0x2e0] sm:$0xff]  ;;  %348 = vst [vmem:[%s1309_s12 + $0xb0] sm:$0xff] %v347_v22 }
  0x2e   : > { %350 = vst [vmem:[%s1309_s12 + $0xb8] sm:$0xff] %v349_v23  ;;  %v351_v24 = vld [vmem:[%s1304_s11 + $0x300] sm:$0xff] }
  0x2f   : > { %v353_v25 = vld [vmem:[%s1304_s11 + $0x320] sm:$0xff]  ;;  %352 = vst [vmem:[%s1309_s12 + $0xc0] sm:$0xff] %v351_v24 }
  0x30   : > { %v355_v26 = vld [vmem:[%s1304_s11 + $0x340] sm:$0xff]  ;;  %354 = vst [vmem:[%s1309_s12 + $0xc8] sm:$0xff] %v353_v25 }
  0x31   : > { %356 = vst [vmem:[%s1309_s12 + $0xd0] sm:$0xff] %v355_v26  ;;  %v357_v27 = vld [vmem:[%s1304_s11 + $0x360] sm:$0xff] }
  0x32   : > { %v359_v28 = vld [vmem:[%s1304_s11 + $0x380] sm:$0xff]  ;;  %358 = vst [vmem:[%s1309_s12 + $0xd8] sm:$0xff] %v357_v27 }
  0x33   : > { %v361_v29 = vld [vmem:[%s1304_s11 + $0x3a0] sm:$0xff]  ;;  %360 = vst [vmem:[%s1309_s12 + $0xe0] sm:$0xff] %v359_v28 }
  0x34   : > { %362 = vst [vmem:[%s1309_s12 + $0xe8] sm:$0xff] %v361_v29  ;;  %v363_v30 = vld [vmem:[%s1304_s11 + $0x3c0] sm:$0xff] }
  0x35   : > { %v365_v31 = vld [vmem:[%s1304_s11 + $0x3e0] sm:$0xff]  ;;  %364 = vst [vmem:[%s1309_s12 + $0xf0] sm:$0xff] %v363_v30 }
  0x36   : > { %366 = vst [vmem:[%s1309_s12 + $0xf8] sm:$0xff] %v365_v31 }
  0x37 PF: > { %p1004_p7 = scmp.ge.s32.totalorder %s1215_s21, 1  ;;  %p379_p8 = scmp.lt.s32.totalorder %s1215_s21, 73 }
  0x39   : > { %p380_p9 = pnand %p1004_p7, %p379_p8 }
  0x3a   : > { %s386_s13 = sand.u32 (!%p380_p9), 1, %s1191_s15   ;;  %s1006_s14 = sshll.u32 (!%p380_p9), %s1199_s17, 1 }
  0x3b   : > { %383 = sbr.rel (%p380_p9) target bundleno = 372 (0x174), region = 66  ;;  %s1005_s24 = sshll.u32 (!%p380_p9), %s386_s13, 8 }
  0x3c   : > { %p440_p10 = scmp.lt.s32.totalorder (!%p380_p9), %s1006_s14, 35  ;;  %s1008_s25 = sshll.u32 (!%p380_p9), %s1203_s18, 1 }
  0x3d   : > { %p450_p11 = scmp.lt.s32.totalorder (!%p380_p9), %s1008_s25, 7  ;;  %s1399_s13 = scalar_lea.vmem (!%p380_p9), [#allocation2], %s1005_s24 }
  0x3e   : > { %p1013_p12 = scmp.ne.s32.totalorder (!%p380_p9), %s1199_s17, 0 }
  0x40   : > { %s1492_s14 = smov (!%p440_p10, %s1006_s14), 35  ;;  %s1494_s25 = smov (!%p450_p11, %s1008_s25), 7 }
  0x41   : > { %s1007_s26 = sshll.u32 %s1492_s14, 2  ;;  %s452_s15 = scalar_lea.vmem %s1476_s2, %s1494_s25 }
  0x42   : > { %s1380_s30 = scalar_lea.vmem %s1474_s0, %s1007_s26  ;;  %s1010_s7 = sshll.u32 %s1494_s25, 3 }
  0x43   : > { %s1392_s18 = scalar_lea.vmem %s1477_s3, %s1010_s7  ;;  %s1397_s12 = scalar_lea.vmem %s1478_s4, %s1010_s7 }
  0x44   : > { %477 = sbr.rel (%p1013_p12) target bundleno = 75 (0x4b), region = 74 }
  0x49   : > { %v1217_v32 = vmov 0.0  }
  0x4a   : > { %478 = vst [vmem:[%s1392_s18] sm:$0xff] %v1217_v32  ;;  %479 = vst [vmem:[%s1392_s18 + $0x8] sm:$0xff] %v1217_v32 }
  0x4b PF: > { %v1111_v33 = vld [vmem:[%s1399_s13 + $0x74] ss:$8 sps:$4 sm:$0xff]   ;;  %v1113_v34 = vld [vmem:[%s1399_s13 + $0x70] ss:$8 sps:$4 sm:$0xff]   ;;  %v1114_v35 = vld [vmem:[%s1399_s13 + $0x64] ss:$8 sps:$4 sm:$0xff]  }
  0x4c   : > { %682 = vmatprep.subr.bf16.mxu0 %v1111_v33  ;;  %v1116_v36 = vld [vmem:[%s1399_s13 + $0x60] ss:$8 sps:$4 sm:$0xff]   ;;  %v1117_v37 = vld [vmem:[%s1399_s13 + $0x54] ss:$8 sps:$4 sm:$0xff]   ;;  %v1119_v38 = vld [vmem:[%s1399_s13 + $0x50] ss:$8 sps:$4 sm:$0xff]  }
  0x4d   : > { %683 = vmatpush1.bf16.msra.mxu0 %v1113_v34  ;;  %v1120_v39 = vld [vmem:[%s1399_s13 + $0x44] ss:$8 sps:$4 sm:$0xff]   ;;  %v1122_v40 = vld [vmem:[%s1399_s13 + $0x40] ss:$8 sps:$4 sm:$0xff]   ;;  %v1123_v41 = vld [vmem:[%s1399_s13 + $0x34] ss:$8 sps:$4 sm:$0xff]  }
  0x4e   : > { %684 = vmatprep.subr.bf16.mxu0 %v1114_v35  ;;  %v1125_v42 = vld [vmem:[%s1399_s13 + $0x30] ss:$8 sps:$4 sm:$0xff]   ;;  %v1126_v43 = vld [vmem:[%s1399_s13 + $0x24] ss:$8 sps:$4 sm:$0xff]   ;;  %v1128_v44 = vld [vmem:[%s1399_s13 + $0x20] ss:$8 sps:$4 sm:$0xff]  }
  0x4f   : > { %v1129_v45 = vld [vmem:[%s1399_s13 + $0x14] ss:$8 sps:$4 sm:$0xff]   ;;  %v482_v46 = vld [vmem:[%s1380_s30] sm:$0xff]  ;;  %v1131_v48 = vld [vmem:[%s1399_s13 + $0x10] ss:$8 sps:$4 sm:$0xff]   ;;  %p1048_p13 = scmp.ne.s32.totalorder %s1199_s17, 17 }
  0x50   : > { %v1015_v47 = vcombine.high %v482_v46, %v482_v46  ;;  %v1132_v49 = vld [vmem:[%s1399_s13 + $0x4] ss:$8 sps:$4 sm:$0xff]   ;;  %v1134_v50 = vld [vmem:[%s1399_s13] ss:$8 sps:$4 sm:$0xff]   ;;  %v1135_v51 = vld [vmem:[%s1399_s13 + $0xf4] ss:$8 sps:$4 sm:$0xff]   ;;  %v1014_v3 = vcombine.low %v482_v46, %v482_v46 }
  0x51   : > { %685 = vmatpush1.bf16.msra.mxu0 %v1116_v36  ;;  %v1137_v52 = vld [vmem:[%s1399_s13 + $0xf0] ss:$8 sps:$4 sm:$0xff]   ;;  %v1138_v53 = vld [vmem:[%s1399_s13 + $0xe4] ss:$8 sps:$4 sm:$0xff]   ;;  %v1140_v54 = vld [vmem:[%s1399_s13 + $0xe0] ss:$8 sps:$4 sm:$0xff]  }
  0x52   : > { %686 = vmatprep.subr.bf16.mxu0 %v1117_v37  ;;  %714 = vmatprep.mubr.bf16.mxu0 %v1015_v47  ;;  %v1141_v55 = vld [vmem:[%s1399_s13 + $0xd4] ss:$8 sps:$4 sm:$0xff]   ;;  %v1143_v56 = vld [vmem:[%s1399_s13 + $0xd0] ss:$8 sps:$4 sm:$0xff]   ;;  %v1144_v57 = vld [vmem:[%s1399_s13 + $0xc4] ss:$8 sps:$4 sm:$0xff]  }
  0x53   : > { %v1146_v58 = vld [vmem:[%s1399_s13 + $0xc0] ss:$8 sps:$4 sm:$0xff]   ;;  %v1147_v59 = vld [vmem:[%s1399_s13 + $0xb4] ss:$8 sps:$4 sm:$0xff]   ;;  %v1149_v60 = vld [vmem:[%s1399_s13 + $0xb0] ss:$8 sps:$4 sm:$0xff]  }
  0x54   : > { %v1150_v61 = vld [vmem:[%s1399_s13 + $0xa4] ss:$8 sps:$4 sm:$0xff]   ;;  %v1152_v62 = vld [vmem:[%s1399_s13 + $0xa0] ss:$8 sps:$4 sm:$0xff]   ;;  %v1153_v63 = vld [vmem:[%s1399_s13 + $0x94] ss:$8 sps:$4 sm:$0xff]  }
  0x55   : > { %687 = vmatpush1.bf16.msra.mxu0 %v1119_v38  ;;  %v1155_v0 = vld [vmem:[%s1399_s13 + $0x90] ss:$8 sps:$4 sm:$0xff]   ;;  %v1156_v1 = vld [vmem:[%s1399_s13 + $0x84] ss:$8 sps:$4 sm:$0xff]   ;;  %v1158_v2 = vld [vmem:[%s1399_s13 + $0x80] ss:$8 sps:$4 sm:$0xff]  }
  0x56   : > { %688 = vmatprep.subr.bf16.mxu0 %v1120_v39  ;;  %v480_v4 = vld [vmem:[%s1392_s18] sm:$0xff]  ;;  %v481_v6 = vld [vmem:[%s1392_s18 + $0x8] sm:$0xff] }
  0x59   : > { %689 = vmatpush1.bf16.msra.mxu0 %v1122_v40 }
  0x5a   : > { %690 = vmatprep.subr.bf16.mxu0 %v1123_v41 }
  0x5d   : > { %691 = vmatpush1.bf16.msra.mxu0 %v1125_v42 }
  0x5e   : > { %692 = vmatprep.subr.bf16.mxu0 %v1126_v43 }
  0x61   : > { %693 = vmatpush1.bf16.msra.mxu0 %v1128_v44 }
  0x62   : > { %694 = vmatprep.subr.bf16.mxu0 %v1129_v45 }
  0x65   : > { %695 = vmatpush1.bf16.msra.mxu0 %v1131_v48 }
  0x66   : > { %696 = vmatprep.subr.bf16.mxu0 %v1132_v49 }
  0x69   : > { %697 = vmatpush1.bf16.msra.mxu0 %v1134_v50 }
  0x6a   : > { %698 = vmatprep.subr.bf16.mxu0 %v1135_v51 }
  0x6d   : > { %699 = vmatpush2.bf16.msra.mxu0 %v1137_v52 }
  0x6e   : > { %700 = vmatprep.subr.bf16.mxu0 %v1138_v53 }
  0x71   : > { %701 = vmatpush2.bf16.msra.mxu0 %v1140_v54 }
  0x72   : > { %702 = vmatprep.subr.bf16.mxu0 %v1141_v55 }
  0x75   : > { %703 = vmatpush2.bf16.msra.mxu0 %v1143_v56 }
  0x76   : > { %704 = vmatprep.subr.bf16.mxu0 %v1144_v57 }
  0x79   : > { %705 = vmatpush2.bf16.msra.mxu0 %v1146_v58 }
  0x7a   : > { %706 = vmatprep.subr.bf16.mxu0 %v1147_v59 }
  0x7d   : > { %707 = vmatpush2.bf16.msra.mxu0 %v1149_v60 }
  0x7e   : > { %708 = vmatprep.subr.bf16.mxu0 %v1150_v61 }
  0x81   : > { %709 = vmatpush2.bf16.msra.mxu0 %v1152_v62 }
  0x82   : > { %710 = vmatprep.subr.bf16.mxu0 %v1153_v63 }
  0x85   : > { %711 = vmatpush2.bf16.msra.mxu0 %v1155_v0 }
  0x86   : > { %712 = vmatprep.subr.bf16.mxu0 %v1156_v1 }
  0x89   : > { %713 = vmatpush2.bf16.msra.mxu0 %v1158_v2 }
  0x8c   : > { %715 = vmatmul.mubr.bf16.vlgmr.msra.gmra.mxu0 %v1014_v3 }
 0x14c   : > { %v716_v5 = vpop.f32.mrf.mxu0 }
 0x14d   : > { %v723_v7 = vadd.f32 %v716_v5, %v480_v4 }
 0x14e   : > { %v718_v8 = vpop.f32.mrf.mxu0  ;;  %730 = sbr.rel (%p1048_p13) target bundleno = 372 (0x174), region = 78 }
 0x14f   : > { %v724_v9 = vadd.f32 %v718_v8, %v481_v6  ;;  %725 = vst [vmem:[%s1392_s18] sm:$0xff] %v723_v7 }
 0x150   : > { %v720_v10 = vpop.f32.mrf.mxu0 }
 0x151   : > { %726 = vst [vmem:[%s1392_s18 + $0x8] sm:$0xff] %v724_v9 }
 0x152   : > { %v721_v11 = vpop.f32.mrf.mxu0 }
 0x153   : > { %v735_v12 = vlaneseq  ;;  %v733_v14 = vld [vmem:[%s452_s15] sm:$0x3]  ;;  %v1218_v29 = vmov 1966171168  }
 0x154   : > { %v767_v30 = vunpack.c.l.s4 %v1218_v29 }
 0x155   : > { %v736_v13 = vshrl.u32 %v735_v12, 7  ;;  %vm783_vm0 = vcmp.lt.s32.totalorder %v735_v12, 256 }
 0x156   : > { %v731_v17 = vld [vmem:[%s1392_s18] sm:$0xff]  ;;  %v768_v39 = vunpack.c.0.s8 %v767_v30 }
 0x157   : > { %v737_v15 = vsub.s32 0, %v736_v13  ;;  %v741_v16 = vsub.s32 1, %v736_v13 }
 0x158   : > { %v732_v18 = vld [vmem:[%s1392_s18 + $0x8] sm:$0xff]  ;;  %v771_v48 = vsub.s32 %v768_v39, %v736_v13 }
 0x159   : > { %v738_v19 = vrot.slane %v733_v14, %v737_v15  ;;  %v742_v20 = vrot.slane %v733_v14, %v741_v16 }
 0x15b   : > { %v745_v21 = vadd.f32 %v738_v19, %v731_v17  ;;  %v746_v22 = vadd.f32 %v742_v20, %v732_v18 }
 0x15d   : > { %v747_v23 = vmax.f32 %v745_v21, 0.0  ;;  %v748_v24 = vmax.f32 %v746_v22, 0.0 }
 0x15f   : > { %749 = vst [vmem:[%s1392_s18] sm:$0xff] %v747_v23  ;;  %v751_v25 = vrot.slane %v747_v23, 4  ;;  %v757_v26 = vrot.slane %v748_v24, 4  ;;  %v787_v27 = vmul.f32 %v747_v23, %v747_v23  ;;  %v788_v28 = vmul.f32 %v748_v24, %v748_v24  ;;  %750 = vst [vmem:[%s1392_s18 + $0x8] sm:$0xff] %v748_v24 }
 0x161   : > { %v752_v31 = vadd.f32 %v751_v25, %v747_v23  ;;  %v789_v32 = vrot.slane %v787_v27, 4  ;;  %v758_v33 = vadd.f32 %v757_v26, %v748_v24  ;;  %v795_v34 = vrot.slane %v788_v28, 4 }
 0x163   : > { %v753_v35 = vrot.slane %v752_v31, 2  ;;  %v759_v36 = vrot.slane %v758_v33, 2  ;;  %v790_v37 = vadd.f32 %v789_v32, %v787_v27  ;;  %v796_v38 = vadd.f32 %v795_v34, %v788_v28 }
 0x165   : > { %v754_v40 = vadd.f32 %v753_v35, %v752_v31  ;;  %v760_v41 = vadd.f32 %v759_v36, %v758_v33  ;;  %v791_v42 = vrot.slane %v790_v37, 2  ;;  %v797_v43 = vrot.slane %v796_v38, 2 }
 0x167   : > { %v755_v44 = vrot.slane %v754_v40, 1  ;;  %v761_v45 = vrot.slane %v760_v41, 1  ;;  %v792_v46 = vadd.f32 %v791_v42, %v790_v37  ;;  %v798_v47 = vadd.f32 %v797_v43, %v796_v38 }
 0x169   : > { %v756_v49 = vadd.f32 %v755_v44, %v754_v40  ;;  %v762_v50 = vadd.f32 %v761_v45, %v760_v41  ;;  %v793_v51 = vrot.slane %v792_v46, 1  ;;  %v799_v52 = vrot.slane %v798_v47, 1 }
 0x16b   : > { %v765_v53 = vcombine.low %v756_v49, %v762_v50  ;;  %v794_v54 = vadd.f32 %v793_v51, %v792_v46  ;;  %v800_v55 = vadd.f32 %v799_v52, %v798_v47 }
 0x16d   : > { %v772_v56 = vrot.slane %v765_v53, %v771_v48  ;;  %v803_v57 = vcombine.low %v794_v54, %v800_v55 }
 0x16f   : > { %v779_v58 = vrot.slane %v772_v56, %v771_v48  ;;  %v810_v59 = vrot.slane %v803_v57, %v771_v48 }
 0x171   : > { %785 = vst.msk [vmem:[%s1397_s12] ss:$8 sm:$0x3] %vm783_vm0, %v779_v58  ;;  %v817_v60 = vrot.slane %v810_v59, %v771_v48 }
 0x173   : > { %1049 = vst.msk [vmem:[%s1397_s12 + $0x1] ss:$8 sm:$0x3] %vm783_vm0, %v817_v60 }
 0x174 PF: > { %s15_s21 = sadd.s32 1, %s1215_s21   ;;  %s1479_s15 = smov %s1195_s16 }
 0x175   : > { %p12_p0 = scmp.ge.s32.totalorder %s15_s21, 74   ;;  %s1480_s16 = smov %s1295_s28 }
 0x176   : > { %s1481_s17 = smov %s1207_s19  ;;  %s1482_s18 = smov %s1211_s20 }
 0x177   : > { %s1483_s19 = smov %s1486_s22  ;;  %s1484_s20 = smov %s1490_s23 }
 0x178   :  { %14 = sbr.rel (!%p12_p0) target bundleno = 4 (0x4), region = 132 }

// kernel: encoder_forward.23
= control target key start
LH: loop header
LB: loop body
LE: loop exit
PB: predicated region body
PF: predicated region fallthrough
CT: control target
= control target key end

     0   :  { %s1244_s15 = smov 0   ;;  %s1246_s16 = smov 0   ;;  %s1474_s0 = inlined_call_operand.vmem [shape: bf16[8,9216], index: 0, kind: input, shape index: {}]   ;;  %s1475_s1 = inlined_call_operand.vmem [shape: bf16[9216,1024], index: 1, kind: input, shape index: {}]   ;;  %s1476_s2 = inlined_call_operand.vmem [shape: f32[1,1024], index: 2, kind: input, shape index: {}]   ;;  %s1477_s3 = inlined_call_operand.vmem [shape: f32[8,1024], index: 3, kind: output, shape index: {0}]   ;;  %s1478_s4 = inlined_call_operand.vmem [shape: f32[8,1024], index: 4, kind: output, shape index: {1}]  }
   0x1   :  { %s1248_s17 = smov 0   ;;  %s1250_s18 = smov 0  }
   0x2   :  { %s1252_s19 = smov 0   ;;  %s1254_s20 = smov 0  }
   0x3   :  { %s1256_s21 = smov 0  }
   0x4 LB: > { %s27_s22 = sadd.s32 1, %s1207_s19  ;;  %s30_s23 = sadd.s32 1, %s1211_s20  ;;  %s1215_s21 = sphi %s1256_s21, %s15_s21   ;;  %s1211_s20 = sphi %s1254_s20, %s1484_s20   ;;  %s1207_s19 = sphi %s1252_s19, %s1483_s19   ;;  %s1203_s18 = sphi %s1250_s18, %s1482_s18   ;;  %s1199_s17 = sphi %s1248_s17, %s1481_s17   ;;  %s1195_s16 = sphi %s1246_s16, %s1480_s16   ;;  %s1191_s15 = sphi %s1244_s15, %s1479_s15  }
   0x5   : > { %p28_p0 = scmp.ge.s32.totalorder %s27_s22, 36  ;;  %p78_p1 = scmp.ne.s32.totalorder %s1195_s16, %s1191_s15 }
   0x6   : > { %p79_p2 = scmp.eq.s32.totalorder %s1215_s21, 0  ;;  %s71_s27 = sadd.s32 1, %s1195_s16 }
   0x7   : > { %s1486_s22 = smov (%p28_p0, %s27_s22), 0  ;;  %s1488_s23 = smov (!%p28_p0, %s30_s23), %s1211_s20 }
   0x8   : > { %p80_p3 = por %p79_p2, %p78_p1  ;;  %p32_p4 = scmp.ge.s32.totalorder %s1488_s23, 4 }
   0x9   : > { %s66_s24 = ssub.s32 %s1207_s19, %s1486_s22  ;;  %p998_p6 = scmp.ge.s32.totalorder %s1215_s21, 144 }
   0xa   : > { %s1490_s23 = smov (%p32_p4, %s1488_s23), 0 }
   0xb   : > { %s67_s25 = ssub.s32 %s1211_s20, %s1490_s23  ;;  %186 = sbr.rel (%p998_p6) target bundleno = 55 (0x37), region = 16 }
   0xc   : > { %s68_s26 = sor.u32 %s67_s25, %s66_s24 }
   0xd   : > { %p69_p5 = scmp.eq.s32.totalorder %s68_s26, 0 }
   0xf   : > { %s1295_s28 = scalar_select %p69_p5, %s1195_s16, %s71_s27  }
  0x10   : > { %202 = sbr.rel (!%p80_p3) target bundleno = 55 (0x37), region = 24  ;;  %s204_s29 = sand.u32 (%p80_p3), 1, %s1195_s16  }
  0x11   : > { %s1001_s30 = sshll.u32 (%p80_p3), %s1211_s20, 1  ;;  %s999_s5 = sshll.u32 (%p80_p3), %s204_s29, 8 }
  0x12   : > { %s1052_s6 = sshll.u32 (%p80_p3), %s1207_s19, 8  ;;  %s1309_s12 = scalar_lea.vmem (%p80_p3), [#allocation2], %s999_s5 }
  0x13   : > { %s210_s7 = sadd.s32 (%p80_p3), %s1052_s6, %s1001_s30 }
  0x14   : > { %s1003_s8 = sshll.u32 (%p80_p3), %s210_s7, 2 }
  0x15   : > { %s1304_s11 = scalar_lea.vmem %s1475_s1, %s1003_s8 }
  0x16   : > { %v303_v0 = vld [vmem:[%s1304_s11] sm:$0xff] }
  0x17   : > { %v305_v1 = vld [vmem:[%s1304_s11 + $0x20] sm:$0xff]  ;;  %304 = vst [vmem:[%s1309_s12] sm:$0xff] %v303_v0 }
  0x18   : > { %v307_v2 = vld [vmem:[%s1304_s11 + $0x40] sm:$0xff]  ;;  %306 = vst [vmem:[%s1309_s12 + $0x8] sm:$0xff] %v305_v1 }
  0x19   : > { %308 = vst [vmem:[%s1309_s12 + $0x10] sm:$0xff] %v307_v2  ;;  %v309_v3 = vld [vmem:[%s1304_s11 + $0x60] sm:$0xff] }
  0x1a   : > { %v311_v4 = vld [vmem:[%s1304_s11 + $0x80] sm:$0xff]  ;;  %310 = vst [vmem:[%s1309_s12 + $0x18] sm:$0xff] %v309_v3 }
  0x1b   : > { %v313_v5 = vld [vmem:[%s1304_s11 + $0xa0] sm:$0xff]  ;;  %312 = vst [vmem:[%s1309_s12 + $0x20] sm:$0xff] %v311_v4 }
  0x1c   : > { %314 = vst [vmem:[%s1309_s12 + $0x28] sm:$0xff] %v313_v5  ;;  %v315_v6 = vld [vmem:[%s1304_s11 + $0xc0] sm:$0xff] }
  0x1d   : > { %v317_v7 = vld [vmem:[%s1304_s11 + $0xe0] sm:$0xff]  ;;  %316 = vst [vmem:[%s1309_s12 + $0x30] sm:$0xff] %v315_v6 }
  0x1e   : > { %v319_v8 = vld [vmem:[%s1304_s11 + $0x100] sm:$0xff]  ;;  %318 = vst [vmem:[%s1309_s12 + $0x38] sm:$0xff] %v317_v7 }
  0x1f   : > { %320 = vst [vmem:[%s1309_s12 + $0x40] sm:$0xff] %v319_v8  ;;  %v321_v9 = vld [vmem:[%s1304_s11 + $0x120] sm:$0xff] }
  0x20   : > { %v323_v10 = vld [vmem:[%s1304_s11 + $0x140] sm:$0xff]  ;;  %322 = vst [vmem:[%s1309_s12 + $0x48] sm:$0xff] %v321_v9 }
  0x21   : > { %v325_v11 = vld [vmem:[%s1304_s11 + $0x160] sm:$0xff]  ;;  %324 = vst [vmem:[%s1309_s12 + $0x50] sm:$0xff] %v323_v10 }
  0x22   : > { %326 = vst [vmem:[%s1309_s12 + $0x58] sm:$0xff] %v325_v11  ;;  %v327_v12 = vld [vmem:[%s1304_s11 + $0x180] sm:$0xff] }
  0x23   : > { %v329_v13 = vld [vmem:[%s1304_s11 + $0x1a0] sm:$0xff]  ;;  %328 = vst [vmem:[%s1309_s12 + $0x60] sm:$0xff] %v327_v12 }
  0x24   : > { %v331_v14 = vld [vmem:[%s1304_s11 + $0x1c0] sm:$0xff]  ;;  %330 = vst [vmem:[%s1309_s12 + $0x68] sm:$0xff] %v329_v13 }
  0x25   : > { %332 = vst [vmem:[%s1309_s12 + $0x70] sm:$0xff] %v331_v14  ;;  %v333_v15 = vld [vmem:[%s1304_s11 + $0x1e0] sm:$0xff] }
  0x26   : > { %v335_v16 = vld [vmem:[%s1304_s11 + $0x200] sm:$0xff]  ;;  %334 = vst [vmem:[%s1309_s12 + $0x78] sm:$0xff] %v333_v15 }
  0x27   : > { %v337_v17 = vld [vmem:[%s1304_s11 + $0x220] sm:$0xff]  ;;  %336 = vst [vmem:[%s1309_s12 + $0x80] sm:$0xff] %v335_v16 }
  0x28   : > { %338 = vst [vmem:[%s1309_s12 + $0x88] sm:$0xff] %v337_v17  ;;  %v339_v18 = vld [vmem:[%s1304_s11 + $0x240] sm:$0xff] }
  0x29   : > { %v341_v19 = vld [vmem:[%s1304_s11 + $0x260] sm:$0xff]  ;;  %340 = vst [vmem:[%s1309_s12 + $0x90] sm:$0xff] %v339_v18 }
  0x2a   : > { %v343_v20 = vld [vmem:[%s1304_s11 + $0x280] sm:$0xff]  ;;  %342 = vst [vmem:[%s1309_s12 + $0x98] sm:$0xff] %v341_v19 }
  0x2b   : > { %344 = vst [vmem:[%s1309_s12 + $0xa0] sm:$0xff] %v343_v20  ;;  %v345_v21 = vld [vmem:[%s1304_s11 + $0x2a0] sm:$0xff] }
  0x2c   : > { %v347_v22 = vld [vmem:[%s1304_s11 + $0x2c0] sm:$0xff]  ;;  %346 = vst [vmem:[%s1309_s12 + $0xa8] sm:$0xff] %v345_v21 }
  0x2d   : > { %v349_v23 = vld [vmem:[%s1304_s11 + $0x2e0] sm:$0xff]  ;;  %348 = vst [vmem:[%s1309_s12 + $0xb0] sm:$0xff] %v347_v22 }
  0x2e   : > { %350 = vst [vmem:[%s1309_s12 + $0xb8] sm:$0xff] %v349_v23  ;;  %v351_v24 = vld [vmem:[%s1304_s11 + $0x300] sm:$0xff] }
  0x2f   : > { %v353_v25 = vld [vmem:[%s1304_s11 + $0x320] sm:$0xff]  ;;  %352 = vst [vmem:[%s1309_s12 + $0xc0] sm:$0xff] %v351_v24 }
  0x30   : > { %v355_v26 = vld [vmem:[%s1304_s11 + $0x340] sm:$0xff]  ;;  %354 = vst [vmem:[%s1309_s12 + $0xc8] sm:$0xff] %v353_v25 }
  0x31   : > { %356 = vst [vmem:[%s1309_s12 + $0xd0] sm:$0xff] %v355_v26  ;;  %v357_v27 = vld [vmem:[%s1304_s11 + $0x360] sm:$0xff] }
  0x32   : > { %v359_v28 = vld [vmem:[%s1304_s11 + $0x380] sm:$0xff]  ;;  %358 = vst [vmem:[%s1309_s12 + $0xd8] sm:$0xff] %v357_v27 }
  0x33   : > { %v361_v29 = vld [vmem:[%s1304_s11 + $0x3a0] sm:$0xff]  ;;  %360 = vst [vmem:[%s1309_s12 + $0xe0] sm:$0xff] %v359_v28 }
  0x34   : > { %362 = vst [vmem:[%s1309_s12 + $0xe8] sm:$0xff] %v361_v29  ;;  %v363_v30 = vld [vmem:[%s1304_s11 + $0x3c0] sm:$0xff] }
  0x35   : > { %v365_v31 = vld [vmem:[%s1304_s11 + $0x3e0] sm:$0xff]  ;;  %364 = vst [vmem:[%s1309_s12 + $0xf0] sm:$0xff] %v363_v30 }
  0x36   : > { %366 = vst [vmem:[%s1309_s12 + $0xf8] sm:$0xff] %v365_v31 }
  0x37 PF: > { %p1004_p7 = scmp.ge.s32.totalorder %s1215_s21, 1  ;;  %p379_p8 = scmp.lt.s32.totalorder %s1215_s21, 145 }
  0x39   : > { %p380_p9 = pnand %p1004_p7, %p379_p8 }
  0x3a   : > { %s386_s13 = sand.u32 (!%p380_p9), 1, %s1191_s15   ;;  %s1006_s14 = sshll.u32 (!%p380_p9), %s1199_s17, 1 }
  0x3b   : > { %383 = sbr.rel (%p380_p9) target bundleno = 372 (0x174), region = 66  ;;  %s1005_s24 = sshll.u32 (!%p380_p9), %s386_s13, 8 }
  0x3c   : > { %p440_p10 = scmp.lt.s32.totalorder (!%p380_p9), %s1006_s14, 71  ;;  %s1008_s25 = sshll.u32 (!%p380_p9), %s1203_s18, 1 }
  0x3d   : > { %p450_p11 = scmp.lt.s32.totalorder (!%p380_p9), %s1008_s25, 7  ;;  %s1399_s13 = scalar_lea.vmem (!%p380_p9), [#allocation2], %s1005_s24 }
  0x3e   : > { %p1013_p12 = scmp.ne.s32.totalorder (!%p380_p9), %s1199_s17, 0 }
  0x40   : > { %s1492_s14 = smov (!%p440_p10, %s1006_s14), 71  ;;  %s1494_s25 = smov (!%p450_p11, %s1008_s25), 7 }
  0x41   : > { %s1007_s26 = sshll.u32 %s1492_s14, 2  ;;  %s452_s15 = scalar_lea.vmem %s1476_s2, %s1494_s25 }
  0x42   : > { %s1380_s30 = scalar_lea.vmem %s1474_s0, %s1007_s26  ;;  %s1010_s7 = sshll.u32 %s1494_s25, 3 }
  0x43   : > { %s1392_s18 = scalar_lea.vmem %s1477_s3, %s1010_s7  ;;  %s1397_s12 = scalar_lea.vmem %s1478_s4, %s1010_s7 }
  0x44   : > { %477 = sbr.rel (%p1013_p12) target bundleno = 75 (0x4b), region = 74 }
  0x49   : > { %v1217_v32 = vmov 0.0  }
  0x4a   : > { %478 = vst [vmem:[%s1392_s18] sm:$0xff] %v1217_v32  ;;  %479 = vst [vmem:[%s1392_s18 + $0x8] sm:$0xff] %v1217_v32 }
  0x4b PF: > { %v1111_v33 = vld [vmem:[%s1399_s13 + $0x74] ss:$8 sps:$4 sm:$0xff]   ;;  %v1113_v34 = vld [vmem:[%s1399_s13 + $0x70] ss:$8 sps:$4 sm:$0xff]   ;;  %v1114_v35 = vld [vmem:[%s1399_s13 + $0x64] ss:$8 sps:$4 sm:$0xff]  }
  0x4c   : > { %682 = vmatprep.subr.bf16.mxu0 %v1111_v33  ;;  %v1116_v36 = vld [vmem:[%s1399_s13 + $0x60] ss:$8 sps:$4 sm:$0xff]   ;;  %v1117_v37 = vld [vmem:[%s1399_s13 + $0x54] ss:$8 sps:$4 sm:$0xff]   ;;  %v1119_v38 = vld [vmem:[%s1399_s13 + $0x50] ss:$8 sps:$4 sm:$0xff]  }
  0x4d   : > { %683 = vmatpush1.bf16.msra.mxu0 %v1113_v34  ;;  %v1120_v39 = vld [vmem:[%s1399_s13 + $0x44] ss:$8 sps:$4 sm:$0xff]   ;;  %v1122_v40 = vld [vmem:[%s1399_s13 + $0x40] ss:$8 sps:$4 sm:$0xff]   ;;  %v1123_v41 = vld [vmem:[%s1399_s13 + $0x34] ss:$8 sps:$4 sm:$0xff]  }
  0x4e   : > { %684 = vmatprep.subr.bf16.mxu0 %v1114_v35  ;;  %v1125_v42 = vld [vmem:[%s1399_s13 + $0x30] ss:$8 sps:$4 sm:$0xff]   ;;  %v1126_v43 = vld [vmem:[%s1399_s13 + $0x24] ss:$8 sps:$4 sm:$0xff]   ;;  %v1128_v44 = vld [vmem:[%s1399_s13 + $0x20] ss:$8 sps:$4 sm:$0xff]  }
  0x4f   : > { %v1129_v45 = vld [vmem:[%s1399_s13 + $0x14] ss:$8 sps:$4 sm:$0xff]   ;;  %v482_v46 = vld [vmem:[%s1380_s30] sm:$0xff]  ;;  %v1131_v48 = vld [vmem:[%s1399_s13 + $0x10] ss:$8 sps:$4 sm:$0xff]   ;;  %p1048_p13 = scmp.ne.s32.totalorder %s1199_s17, 35 }
  0x50   : > { %v1015_v47 = vcombine.high %v482_v46, %v482_v46  ;;  %v1132_v49 = vld [vmem:[%s1399_s13 + $0x4] ss:$8 sps:$4 sm:$0xff]   ;;  %v1134_v50 = vld [vmem:[%s1399_s13] ss:$8 sps:$4 sm:$0xff]   ;;  %v1135_v51 = vld [vmem:[%s1399_s13 + $0xf4] ss:$8 sps:$4 sm:$0xff]   ;;  %v1014_v3 = vcombine.low %v482_v46, %v482_v46 }
  0x51   : > { %685 = vmatpush1.bf16.msra.mxu0 %v1116_v36  ;;  %v1137_v52 = vld [vmem:[%s1399_s13 + $0xf0] ss:$8 sps:$4 sm:$0xff]   ;;  %v1138_v53 = vld [vmem:[%s1399_s13 + $0xe4] ss:$8 sps:$4 sm:$0xff]   ;;  %v1140_v54 = vld [vmem:[%s1399_s13 + $0xe0] ss:$8 sps:$4 sm:$0xff]  }
  0x52   : > { %686 = vmatprep.subr.bf16.mxu0 %v1117_v37  ;;  %714 = vmatprep.mubr.bf16.mxu0 %v1015_v47  ;;  %v1141_v55 = vld [vmem:[%s1399_s13 + $0xd4] ss:$8 sps:$4 sm:$0xff]   ;;  %v1143_v56 = vld [vmem:[%s1399_s13 + $0xd0] ss:$8 sps:$4 sm:$0xff]   ;;  %v1144_v57 = vld [vmem:[%s1399_s13 + $0xc4] ss:$8 sps:$4 sm:$0xff]  }
  0x53   : > { %v1146_v58 = vld [vmem:[%s1399_s13 + $0xc0] ss:$8 sps:$4 sm:$0xff]   ;;  %v1147_v59 = vld [vmem:[%s1399_s13 + $0xb4] ss:$8 sps:$4 sm:$0xff]   ;;  %v1149_v60 = vld [vmem:[%s1399_s13 + $0xb0] ss:$8 sps:$4 sm:$0xff]  }
  0x54   : > { %v1150_v61 = vld [vmem:[%s1399_s13 + $0xa4] ss:$8 sps:$4 sm:$0xff]   ;;  %v1152_v62 = vld [vmem:[%s1399_s13 + $0xa0] ss:$8 sps:$4 sm:$0xff]   ;;  %v1153_v63 = vld [vmem:[%s1399_s13 + $0x94] ss:$8 sps:$4 sm:$0xff]  }
  0x55   : > { %687 = vmatpush1.bf16.msra.mxu0 %v1119_v38  ;;  %v1155_v0 = vld [vmem:[%s1399_s13 + $0x90] ss:$8 sps:$4 sm:$0xff]   ;;  %v1156_v1 = vld [vmem:[%s1399_s13 + $0x84] ss:$8 sps:$4 sm:$0xff]   ;;  %v1158_v2 = vld [vmem:[%s1399_s13 + $0x80] ss:$8 sps:$4 sm:$0xff]  }
  0x56   : > { %688 = vmatprep.subr.bf16.mxu0 %v1120_v39  ;;  %v480_v4 = vld [vmem:[%s1392_s18] sm:$0xff]  ;;  %v481_v6 = vld [vmem:[%s1392_s18 + $0x8] sm:$0xff] }
  0x59   : > { %689 = vmatpush1.bf16.msra.mxu0 %v1122_v40 }
  0x5a   : > { %690 = vmatprep.subr.bf16.mxu0 %v1123_v41 }
  0x5d   : > { %691 = vmatpush1.bf16.msra.mxu0 %v1125_v42 }
  0x5e   : > { %692 = vmatprep.subr.bf16.mxu0 %v1126_v43 }
  0x61   : > { %693 = vmatpush1.bf16.msra.mxu0 %v1128_v44 }
  0x62   : > { %694 = vmatprep.subr.bf16.mxu0 %v1129_v45 }
  0x65   : > { %695 = vmatpush1.bf16.msra.mxu0 %v1131_v48 }
  0x66   : > { %696 = vmatprep.subr.bf16.mxu0 %v1132_v49 }
  0x69   : > { %697 = vmatpush1.bf16.msra.mxu0 %v1134_v50 }
  0x6a   : > { %698 = vmatprep.subr.bf16.mxu0 %v1135_v51 }
  0x6d   : > { %699 = vmatpush2.bf16.msra.mxu0 %v1137_v52 }
  0x6e   : > { %700 = vmatprep.subr.bf16.mxu0 %v1138_v53 }
  0x71   : > { %701 = vmatpush2.bf16.msra.mxu0 %v1140_v54 }
  0x72   : > { %702 = vmatprep.subr.bf16.mxu0 %v1141_v55 }
  0x75   : > { %703 = vmatpush2.bf16.msra.mxu0 %v1143_v56 }
  0x76   : > { %704 = vmatprep.subr.bf16.mxu0 %v1144_v57 }
  0x79   : > { %705 = vmatpush2.bf16.msra.mxu0 %v1146_v58 }
  0x7a   : > { %706 = vmatprep.subr.bf16.mxu0 %v1147_v59 }
  0x7d   : > { %707 = vmatpush2.bf16.msra.mxu0 %v1149_v60 }
  0x7e   : > { %708 = vmatprep.subr.bf16.mxu0 %v1150_v61 }
  0x81   : > { %709 = vmatpush2.bf16.msra.mxu0 %v1152_v62 }
  0x82   : > { %710 = vmatprep.subr.bf16.mxu0 %v1153_v63 }
  0x85   : > { %711 = vmatpush2.bf16.msra.mxu0 %v1155_v0 }
  0x86   : > { %712 = vmatprep.subr.bf16.mxu0 %v1156_v1 }
  0x89   : > { %713 = vmatpush2.bf16.msra.mxu0 %v1158_v2 }
  0x8c   : > { %715 = vmatmul.mubr.bf16.vlgmr.msra.gmra.mxu0 %v1014_v3 }
 0x14c   : > { %v716_v5 = vpop.f32.mrf.mxu0 }
 0x14d   : > { %v723_v7 = vadd.f32 %v716_v5, %v480_v4 }
 0x14e   : > { %v718_v8 = vpop.f32.mrf.mxu0  ;;  %730 = sbr.rel (%p1048_p13) target bundleno = 372 (0x174), region = 78 }
 0x14f   : > { %v724_v9 = vadd.f32 %v718_v8, %v481_v6  ;;  %725 = vst [vmem:[%s1392_s18] sm:$0xff] %v723_v7 }
 0x150   : > { %v720_v10 = vpop.f32.mrf.mxu0 }
 0x151   : > { %726 = vst [vmem:[%s1392_s18 + $0x8] sm:$0xff] %v724_v9 }
 0x152   : > { %v721_v11 = vpop.f32.mrf.mxu0 }
 0x153   : > { %v735_v12 = vlaneseq  ;;  %v733_v14 = vld [vmem:[%s452_s15] sm:$0x3]  ;;  %v1218_v29 = vmov 1966171168  }
 0x154   : > { %v767_v30 = vunpack.c.l.s4 %v1218_v29 }
 0x155   : > { %v736_v13 = vshrl.u32 %v735_v12, 7  ;;  %vm783_vm0 = vcmp.lt.s32.totalorder %v735_v12, 256 }
 0x156   : > { %v731_v17 = vld [vmem:[%s1392_s18] sm:$0xff]  ;;  %v768_v39 = vunpack.c.0.s8 %v767_v30 }
 0x157   : > { %v737_v15 = vsub.s32 0, %v736_v13  ;;  %v741_v16 = vsub.s32 1, %v736_v13 }
 0x158   : > { %v732_v18 = vld [vmem:[%s1392_s18 + $0x8] sm:$0xff]  ;;  %v771_v48 = vsub.s32 %v768_v39, %v736_v13 }
 0x159   : > { %v738_v19 = vrot.slane %v733_v14, %v737_v15  ;;  %v742_v20 = vrot.slane %v733_v14, %v741_v16 }
 0x15b   : > { %v745_v21 = vadd.f32 %v738_v19, %v731_v17  ;;  %v746_v22 = vadd.f32 %v742_v20, %v732_v18 }
 0x15d   : > { %v747_v23 = vmax.f32 %v745_v21, 0.0  ;;  %v748_v24 = vmax.f32 %v746_v22, 0.0 }
 0x15f   : > { %749 = vst [vmem:[%s1392_s18] sm:$0xff] %v747_v23  ;;  %v751_v25 = vrot.slane %v747_v23, 4  ;;  %v757_v26 = vrot.slane %v748_v24, 4  ;;  %v787_v27 = vmul.f32 %v747_v23, %v747_v23  ;;  %v788_v28 = vmul.f32 %v748_v24, %v748_v24  ;;  %750 = vst [vmem:[%s1392_s18 + $0x8] sm:$0xff] %v748_v24 }
 0x161   : > { %v752_v31 = vadd.f32 %v751_v25, %v747_v23  ;;  %v789_v32 = vrot.slane %v787_v27, 4  ;;  %v758_v33 = vadd.f32 %v757_v26, %v748_v24  ;;  %v795_v34 = vrot.slane %v788_v28, 4 }
 0x163   : > { %v753_v35 = vrot.slane %v752_v31, 2  ;;  %v759_v36 = vrot.slane %v758_v33, 2  ;;  %v790_v37 = vadd.f32 %v789_v32, %v787_v27  ;;  %v796_v38 = vadd.f32 %v795_v34, %v788_v28 }
 0x165   : > { %v754_v40 = vadd.f32 %v753_v35, %v752_v31  ;;  %v760_v41 = vadd.f32 %v759_v36, %v758_v33  ;;  %v791_v42 = vrot.slane %v790_v37, 2  ;;  %v797_v43 = vrot.slane %v796_v38, 2 }
 0x167   : > { %v755_v44 = vrot.slane %v754_v40, 1  ;;  %v761_v45 = vrot.slane %v760_v41, 1  ;;  %v792_v46 = vadd.f32 %v791_v42, %v790_v37  ;;  %v798_v47 = vadd.f32 %v797_v43, %v796_v38 }
 0x169   : > { %v756_v49 = vadd.f32 %v755_v44, %v754_v40  ;;  %v762_v50 = vadd.f32 %v761_v45, %v760_v41  ;;  %v793_v51 = vrot.slane %v792_v46, 1  ;;  %v799_v52 = vrot.slane %v798_v47, 1 }
 0x16b   : > { %v765_v53 = vcombine.low %v756_v49, %v762_v50  ;;  %v794_v54 = vadd.f32 %v793_v51, %v792_v46  ;;  %v800_v55 = vadd.f32 %v799_v52, %v798_v47 }
 0x16d   : > { %v772_v56 = vrot.slane %v765_v53, %v771_v48  ;;  %v803_v57 = vcombine.low %v794_v54, %v800_v55 }
 0x16f   : > { %v779_v58 = vrot.slane %v772_v56, %v771_v48  ;;  %v810_v59 = vrot.slane %v803_v57, %v771_v48 }
 0x171   : > { %785 = vst.msk [vmem:[%s1397_s12] ss:$8 sm:$0x3] %vm783_vm0, %v779_v58  ;;  %v817_v60 = vrot.slane %v810_v59, %v771_v48 }
 0x173   : > { %1049 = vst.msk [vmem:[%s1397_s12 + $0x1] ss:$8 sm:$0x3] %vm783_vm0, %v817_v60 }
 0x174 PF: > { %s15_s21 = sadd.s32 1, %s1215_s21   ;;  %s1479_s15 = smov %s1195_s16 }
 0x175   : > { %p12_p0 = scmp.ge.s32.totalorder %s15_s21, 146   ;;  %s1480_s16 = smov %s1295_s28 }
 0x176   : > { %s1481_s17 = smov %s1207_s19  ;;  %s1482_s18 = smov %s1211_s20 }
 0x177   : > { %s1483_s19 = smov %s1486_s22  ;;  %s1484_s20 = smov %s1490_s23 }
 0x178   :  { %14 = sbr.rel (!%p12_p0) target bundleno = 4 (0x4), region = 132 }

// kernel: encoder_forward.26
= control target key start
LH: loop header
LB: loop body
LE: loop exit
PB: predicated region body
PF: predicated region fallthrough
CT: control target
= control target key end

     0   :  { %s1244_s15 = smov 0   ;;  %s1246_s16 = smov 0   ;;  %s1474_s0 = inlined_call_operand.vmem [shape: bf16[8,9216], index: 0, kind: input, shape index: {}]   ;;  %s1475_s1 = inlined_call_operand.vmem [shape: bf16[9216,512], index: 1, kind: input, shape index: {}]   ;;  %s1476_s2 = inlined_call_operand.vmem [shape: f32[1,512], index: 2, kind: input, shape index: {}]   ;;  %s1477_s3 = inlined_call_operand.vmem [shape: f32[8,512], index: 3, kind: output, shape index: {0}]   ;;  %s1478_s4 = inlined_call_operand.vmem [shape: f32[8,512], index: 4, kind: output, shape index: {1}]  }
   0x1   :  { %s1248_s17 = smov 0   ;;  %s1250_s18 = smov 0  }
   0x2   :  { %s1252_s19 = smov 0   ;;  %s1254_s20 = smov 0  }
   0x3   :  { %s1256_s21 = smov 0  }
   0x4 LB: > { %s27_s22 = sadd.s32 1, %s1207_s19  ;;  %s30_s23 = sadd.s32 1, %s1211_s20  ;;  %s1215_s21 = sphi %s1256_s21, %s15_s21   ;;  %s1211_s20 = sphi %s1254_s20, %s1484_s20   ;;  %s1207_s19 = sphi %s1252_s19, %s1483_s19   ;;  %s1203_s18 = sphi %s1250_s18, %s1482_s18   ;;  %s1199_s17 = sphi %s1248_s17, %s1481_s17   ;;  %s1195_s16 = sphi %s1246_s16, %s1480_s16   ;;  %s1191_s15 = sphi %s1244_s15, %s1479_s15  }
   0x5   : > { %p28_p0 = scmp.ge.s32.totalorder %s27_s22, 36  ;;  %p78_p1 = scmp.ne.s32.totalorder %s1195_s16, %s1191_s15 }
   0x6   : > { %p79_p2 = scmp.eq.s32.totalorder %s1215_s21, 0  ;;  %s71_s27 = sadd.s32 1, %s1195_s16 }
   0x7   : > { %s1486_s22 = smov (%p28_p0, %s27_s22), 0  ;;  %s1488_s23 = smov (!%p28_p0, %s30_s23), %s1211_s20 }
   0x8   : > { %p80_p3 = por %p79_p2, %p78_p1  ;;  %p32_p4 = scmp.ge.s32.totalorder %s1488_s23, 2 }
   0x9   : > { %s66_s24 = ssub.s32 %s1207_s19, %s1486_s22  ;;  %p998_p6 = scmp.ge.s32.totalorder %s1215_s21, 72 }
   0xa   : > { %s1490_s23 = smov (%p32_p4, %s1488_s23), 0 }
   0xb   : > { %s67_s25 = ssub.s32 %s1211_s20, %s1490_s23  ;;  %186 = sbr.rel (%p998_p6) target bundleno = 39 (0x27), region = 16 }
   0xc   : > { %s68_s26 = sor.u32 %s67_s25, %s66_s24 }
   0xd   : > { %p69_p5 = scmp.eq.s32.totalorder %s68_s26, 0 }
   0xf   : > { %s1295_s28 = scalar_select %p69_p5, %s1195_s16, %s71_s27  }
  0x10   : > { %202 = sbr.rel (!%p80_p3) target bundleno = 39 (0x27), region = 24  ;;  %s204_s29 = sand.u32 (%p80_p3), 1, %s1195_s16  }
  0x11   : > { %s1001_s30 = sshll.u32 (%p80_p3), %s1211_s20, 1  ;;  %s999_s5 = sshll.u32 (%p80_p3), %s204_s29, 8 }
  0x12   : > { %s1052_s6 = sshll.u32 (%p80_p3), %s1207_s19, 7  ;;  %s1309_s12 = scalar_lea.vmem (%p80_p3), [#allocation2], %s999_s5 }
  0x13   : > { %s210_s7 = sadd.s32 (%p80_p3), %s1052_s6, %s1001_s30 }
  0x14   : > { %s1003_s8 = sshll.u32 (%p80_p3), %s210_s7, 2 }
  0x15   : > { %s1304_s11 = scalar_lea.vmem %s1475_s1, %s1003_s8 }
  0x16   : > { %v303_v0 = vld [vmem:[%s1304_s11] sm:$0xff]  ;;  %v305_v1 = vld [vmem:[%s1304_s11 + $0x10] sm:$0xff] }
  0x17   : > { %v307_v2 = vld [vmem:[%s1304_s11 + $0x20] sm:$0xff]  ;;  %304 = vst [vmem:[%s1309_s12] sm:$0xff] %v303_v0  ;;  %306 = vst [vmem:[%s1309_s12 + $0x8] sm:$0xff] %v305_v1  ;;  %v309_v3 = vld [vmem:[%s1304_s11 + $0x30] sm:$0xff] }
  0x18   : > { %308 = vst [vmem:[%s1309_s12 + $0x10] sm:$0xff] %v307_v2  ;;  %v311_v4 = vld [vmem:[%s1304_s11 + $0x40] sm:$0xff]  ;;  %v313_v5 = vld [vmem:[%s1304_s11 + $0x50] sm:$0xff]  ;;  %310 = vst [vmem:[%s1309_s12 + $0x18] sm:$0xff] %v309_v3 }
  0x19   : > { %312 = vst [vmem:[%s1309_s12 + $0x20] sm:$0xff] %v311_v4  ;;  %314 = vst [vmem:[%s1309_s12 + $0x28] sm:$0xff] %v313_v5  ;;  %v315_v6 = vld [vmem:[%s1304_s11 + $0x60] sm:$0xff]  ;;  %v317_v7 = vld [vmem:[%s1304_s11 + $0x70] sm:$0xff] }
  0x1a   : > { %v319_v8 = vld [vmem:[%s1304_s11 + $0x80] sm:$0xff]  ;;  %316 = vst [vmem:[%s1309_s12 + $0x30] sm:$0xff] %v315_v6  ;;  %318 = vst [vmem:[%s1309_s12 + $0x38] sm:$0xff] %v317_v7  ;;  %v321_v9 = vld [vmem:[%s1304_s11 + $0x90] sm:$0xff] }
  0x1b   : > { %320 = vst [vmem:[%s1309_s12 + $0x40] sm:$0xff] %v319_v8  ;;  %v323_v10 = vld [vmem:[%s1304_s11 + $0xa0] sm:$0xff]  ;;  %v325_v11 = vld [vmem:[%s1304_s11 + $0xb0] sm:$0xff]  ;;  %322 = vst [vmem:[%s1309_s12 + $0x48] sm:$0xff] %v321_v9 }
  0x1c   : > { %324 = vst [vmem:[%s1309_s12 + $0x50] sm:$0xff] %v323_v10  ;;  %326 = vst [vmem:[%s1309_s12 + $0x58] sm:$0xff] %v325_v11  ;;  %v327_v12 = vld [vmem:[%s1304_s11 + $0xc0] sm:$0xff]  ;;  %v329_v13 = vld [vmem:[%s1304_s11 + $0xd0] sm:$0xff] }
  0x1d   : > { %v331_v14 = vld [vmem:[%s1304_s11 + $0xe0] sm:$0xff]  ;;  %328 = vst [vmem:[%s1309_s12 + $0x60] sm:$0xff] %v327_v12  ;;  %330 = vst [vmem:[%s1309_s12 + $0x68] sm:$0xff] %v329_v13  ;;  %v333_v15 = vld [vmem:[%s1304_s11 + $0xf0] sm:$0xff] }
  0x1e   : > { %332 = vst [vmem:[%s1309_s12 + $0x70] sm:$0xff] %v331_v14  ;;  %v335_v16 = vld [vmem:[%s1304_s11 + $0x100] sm:$0xff]  ;;  %v337_v17 = vld [vmem:[%s1304_s11 + $0x110] sm:$0xff]  ;;  %334 = vst [vmem:[%s1309_s12 + $0x78] sm:$0xff] %v333_v15 }
  0x1f   : > { %336 = vst [vmem:[%s1309_s12 + $0x80] sm:$0xff] %v335_v16  ;;  %338 = vst [vmem:[%s1309_s12 + $0x88] sm:$0xff] %v337_v17  ;;  %v339_v18 = vld [vmem:[%s1304_s11 + $0x120] sm:$0xff]  ;;  %v341_v19 = vld [vmem:[%s1304_s11 + $0x130] sm:$0xff] }
  0x20   : > { %v343_v20 = vld [vmem:[%s1304_s11 + $0x140] sm:$0xff]  ;;  %340 = vst [vmem:[%s1309_s12 + $0x90] sm:$0xff] %v339_v18  ;;  %342 = vst [vmem:[%s1309_s12 + $0x98] sm:$0xff] %v341_v19  ;;  %v345_v21 = vld [vmem:[%s1304_s11 + $0x150] sm:$0xff] }
  0x21   : > { %344 = vst [vmem:[%s1309_s12 + $0xa0] sm:$0xff] %v343_v20  ;;  %v347_v22 = vld [vmem:[%s1304_s11 + $0x160] sm:$0xff]  ;;  %v349_v23 = vld [vmem:[%s1304_s11 + $0x170] sm:$0xff]  ;;  %346 = vst [vmem:[%s1309_s12 + $0xa8] sm:$0xff] %v345_v21 }
  0x22   : > { %348 = vst [vmem:[%s1309_s12 + $0xb0] sm:$0xff] %v347_v22  ;;  %350 = vst [vmem:[%s1309_s12 + $0xb8] sm:$0xff] %v349_v23  ;;  %v351_v24 = vld [vmem:[%s1304_s11 + $0x180] sm:$0xff]  ;;  %v353_v25 = vld [vmem:[%s1304_s11 + $0x190] sm:$0xff] }
  0x23   : > { %v355_v26 = vld [vmem:[%s1304_s11 + $0x1a0] sm:$0xff]  ;;  %352 = vst [vmem:[%s1309_s12 + $0xc0] sm:$0xff] %v351_v24  ;;  %354 = vst [vmem:[%s1309_s12 + $0xc8] sm:$0xff] %v353_v25  ;;  %v357_v27 = vld [vmem:[%s1304_s11 + $0x1b0] sm:$0xff] }
  0x24   : > { %356 = vst [vmem:[%s1309_s12 + $0xd0] sm:$0xff] %v355_v26  ;;  %v359_v28 = vld [vmem:[%s1304_s11 + $0x1c0] sm:$0xff]  ;;  %v361_v29 = vld [vmem:[%s1304_s11 + $0x1d0] sm:$0xff]  ;;  %358 = vst [vmem:[%s1309_s12 + $0xd8] sm:$0xff] %v357_v27 }
  0x25   : > { %360 = vst [vmem:[%s1309_s12 + $0xe0] sm:$0xff] %v359_v28  ;;  %362 = vst [vmem:[%s1309_s12 + $0xe8] sm:$0xff] %v361_v29  ;;  %v363_v30 = vld [vmem:[%s1304_s11 + $0x1e0] sm:$0xff]  ;;  %v365_v31 = vld [vmem:[%s1304_s11 + $0x1f0] sm:$0xff] }
  0x26   : > { %364 = vst [vmem:[%s1309_s12 + $0xf0] sm:$0xff] %v363_v30  ;;  %366 = vst [vmem:[%s1309_s12 + $0xf8] sm:$0xff] %v365_v31 }
  0x27 PF: > { %p1004_p7 = scmp.ge.s32.totalorder %s1215_s21, 1  ;;  %p379_p8 = scmp.lt.s32.totalorder %s1215_s21, 73 }
  0x29   : > { %p380_p9 = pnand %p1004_p7, %p379_p8 }
  0x2a   : > { %s386_s13 = sand.u32 (!%p380_p9), 1, %s1191_s15   ;;  %s1006_s14 = sshll.u32 (!%p380_p9), %s1199_s17, 1 }
  0x2b   : > { %383 = sbr.rel (%p380_p9) target bundleno = 356 (0x164), region = 66  ;;  %s1005_s24 = sshll.u32 (!%p380_p9), %s386_s13, 8 }
  0x2c   : > { %p440_p10 = scmp.lt.s32.totalorder (!%p380_p9), %s1006_s14, 71  ;;  %s1008_s25 = sshll.u32 (!%p380_p9), %s1203_s18, 1 }
  0x2d   : > { %p450_p11 = scmp.lt.s32.totalorder (!%p380_p9), %s1008_s25, 3  ;;  %s1399_s13 = scalar_lea.vmem (!%p380_p9), [#allocation2], %s1005_s24 }
  0x2e   : > { %p1013_p12 = scmp.ne.s32.totalorder (!%p380_p9), %s1199_s17, 0 }
  0x30   : > { %s1492_s14 = smov (!%p440_p10, %s1006_s14), 71  ;;  %s1494_s25 = smov (!%p450_p11, %s1008_s25), 3 }
  0x31   : > { %s1007_s26 = sshll.u32 %s1492_s14, 2  ;;  %s452_s15 = scalar_lea.vmem %s1476_s2, %s1494_s25 }
  0x32   : > { %s1380_s30 = scalar_lea.vmem %s1474_s0, %s1007_s26  ;;  %s1010_s7 = sshll.u32 %s1494_s25, 3 }
  0x33   : > { %s1392_s18 = scalar_lea.vmem %s1477_s3, %s1010_s7  ;;  %s1397_s12 = scalar_lea.vmem %s1478_s4, %s1010_s7 }
  0x34   : > { %477 = sbr.rel (%p1013_p12) target bundleno = 59 (0x3b), region = 74 }
  0x39   : > { %v1217_v32 = vmov 0.0  }
  0x3a   : > { %478 = vst [vmem:[%s1392_s18] sm:$0xff] %v1217_v32  ;;  %479 = vst [vmem:[%s1392_s18 + $0x8] sm:$0xff] %v1217_v32 }
  0x3b PF: > { %v1111_v33 = vld [vmem:[%s1399_s13 + $0x74] ss:$8 sps:$4 sm:$0xff]   ;;  %v1113_v34 = vld [vmem:[%s1399_s13 + $0x70] ss:$8 sps:$4 sm:$0xff]   ;;  %v1114_v35 = vld [vmem:[%s1399_s13 + $0x64] ss:$8 sps:$4 sm:$0xff]  }
  0x3c   : > { %682 = vmatprep.subr.bf16.mxu0 %v1111_v33  ;;  %v1116_v36 = vld [vmem:[%s1399_s13 + $0x60] ss:$8 sps:$4 sm:$0xff]   ;;  %v1117_v37 = vld [vmem:[%s1399_s13 + $0x54] ss:$8 sps:$4 sm:$0xff]   ;;  %v1119_v38 = vld [vmem:[%s1399_s13 + $0x50] ss:$8 sps:$4 sm:$0xff]  }
  0x3d   : > { %683 = vmatpush1.bf16.msra.mxu0 %v1113_v34  ;;  %v1120_v39 = vld [vmem:[%s1399_s13 + $0x44] ss:$8 sps:$4 sm:$0xff]   ;;  %v1122_v40 = vld [vmem:[%s1399_s13 + $0x40] ss:$8 sps:$4 sm:$0xff]   ;;  %v1123_v41 = vld [vmem:[%s1399_s13 + $0x34] ss:$8 sps:$4 sm:$0xff]  }
  0x3e   : > { %684 = vmatprep.subr.bf16.mxu0 %v1114_v35  ;;  %v1125_v42 = vld [vmem:[%s1399_s13 + $0x30] ss:$8 sps:$4 sm:$0xff]   ;;  %v1126_v43 = vld [vmem:[%s1399_s13 + $0x24] ss:$8 sps:$4 sm:$0xff]   ;;  %v1128_v44 = vld [vmem:[%s1399_s13 + $0x20] ss:$8 sps:$4 sm:$0xff]  }
  0x3f   : > { %v1129_v45 = vld [vmem:[%s1399_s13 + $0x14] ss:$8 sps:$4 sm:$0xff]   ;;  %v482_v46 = vld [vmem:[%s1380_s30] sm:$0xff]  ;;  %v1131_v48 = vld [vmem:[%s1399_s13 + $0x10] ss:$8 sps:$4 sm:$0xff]   ;;  %p1048_p13 = scmp.ne.s32.totalorder %s1199_s17, 35 }
  0x40   : > { %v1015_v47 = vcombine.high %v482_v46, %v482_v46  ;;  %v1132_v49 = vld [vmem:[%s1399_s13 + $0x4] ss:$8 sps:$4 sm:$0xff]   ;;  %v1134_v50 = vld [vmem:[%s1399_s13] ss:$8 sps:$4 sm:$0xff]   ;;  %v1135_v51 = vld [vmem:[%s1399_s13 + $0xf4] ss:$8 sps:$4 sm:$0xff]   ;;  %v1014_v3 = vcombine.low %v482_v46, %v482_v46 }
  0x41   : > { %685 = vmatpush1.bf16.msra.mxu0 %v1116_v36  ;;  %v1137_v52 = vld [vmem:[%s1399_s13 + $0xf0] ss:$8 sps:$4 sm:$0xff]   ;;  %v1138_v53 = vld [vmem:[%s1399_s13 + $0xe4] ss:$8 sps:$4 sm:$0xff]   ;;  %v1140_v54 = vld [vmem:[%s1399_s13 + $0xe0] ss:$8 sps:$4 sm:$0xff]  }
  0x42   : > { %686 = vmatprep.subr.bf16.mxu0 %v1117_v37  ;;  %714 = vmatprep.mubr.bf16.mxu0 %v1015_v47  ;;  %v1141_v55 = vld [vmem:[%s1399_s13 + $0xd4] ss:$8 sps:$4 sm:$0xff]   ;;  %v1143_v56 = vld [vmem:[%s1399_s13 + $0xd0] ss:$8 sps:$4 sm:$0xff]   ;;  %v1144_v57 = vld [vmem:[%s1399_s13 + $0xc4] ss:$8 sps:$4 sm:$0xff]  }
  0x43   : > { %v1146_v58 = vld [vmem:[%s1399_s13 + $0xc0] ss:$8 sps:$4 sm:$0xff]   ;;  %v1147_v59 = vld [vmem:[%s1399_s13 + $0xb4] ss:$8 sps:$4 sm:$0xff]   ;;  %v1149_v60 = vld [vmem:[%s1399_s13 + $0xb0] ss:$8 sps:$4 sm:$0xff]  }
  0x44   : > { %v1150_v61 = vld [vmem:[%s1399_s13 + $0xa4] ss:$8 sps:$4 sm:$0xff]   ;;  %v1152_v62 = vld [vmem:[%s1399_s13 + $0xa0] ss:$8 sps:$4 sm:$0xff]   ;;  %v1153_v63 = vld [vmem:[%s1399_s13 + $0x94] ss:$8 sps:$4 sm:$0xff]  }
  0x45   : > { %687 = vmatpush1.bf16.msra.mxu0 %v1119_v38  ;;  %v1155_v0 = vld [vmem:[%s1399_s13 + $0x90] ss:$8 sps:$4 sm:$0xff]   ;;  %v1156_v1 = vld [vmem:[%s1399_s13 + $0x84] ss:$8 sps:$4 sm:$0xff]   ;;  %v1158_v2 = vld [vmem:[%s1399_s13 + $0x80] ss:$8 sps:$4 sm:$0xff]  }
  0x46   : > { %688 = vmatprep.subr.bf16.mxu0 %v1120_v39  ;;  %v480_v4 = vld [vmem:[%s1392_s18] sm:$0xff]  ;;  %v481_v6 = vld [vmem:[%s1392_s18 + $0x8] sm:$0xff] }
  0x49   : > { %689 = vmatpush1.bf16.msra.mxu0 %v1122_v40 }
  0x4a   : > { %690 = vmatprep.subr.bf16.mxu0 %v1123_v41 }
  0x4d   : > { %691 = vmatpush1.bf16.msra.mxu0 %v1125_v42 }
  0x4e   : > { %692 = vmatprep.subr.bf16.mxu0 %v1126_v43 }
  0x51   : > { %693 = vmatpush1.bf16.msra.mxu0 %v1128_v44 }
  0x52   : > { %694 = vmatprep.subr.bf16.mxu0 %v1129_v45 }
  0x55   : > { %695 = vmatpush1.bf16.msra.mxu0 %v1131_v48 }
  0x56   : > { %696 = vmatprep.subr.bf16.mxu0 %v1132_v49 }
  0x59   : > { %697 = vmatpush1.bf16.msra.mxu0 %v1134_v50 }
  0x5a   : > { %698 = vmatprep.subr.bf16.mxu0 %v1135_v51 }
  0x5d   : > { %699 = vmatpush2.bf16.msra.mxu0 %v1137_v52 }
  0x5e   : > { %700 = vmatprep.subr.bf16.mxu0 %v1138_v53 }
  0x61   : > { %701 = vmatpush2.bf16.msra.mxu0 %v1140_v54 }
  0x62   : > { %702 = vmatprep.subr.bf16.mxu0 %v1141_v55 }
  0x65   : > { %703 = vmatpush2.bf16.msra.mxu0 %v1143_v56 }
  0x66   : > { %704 = vmatprep.subr.bf16.mxu0 %v1144_v57 }
  0x69   : > { %705 = vmatpush2.bf16.msra.mxu0 %v1146_v58 }
  0x6a   : > { %706 = vmatprep.subr.bf16.mxu0 %v1147_v59 }
  0x6d   : > { %707 = vmatpush2.bf16.msra.mxu0 %v1149_v60 }
  0x6e   : > { %708 = vmatprep.subr.bf16.mxu0 %v1150_v61 }
  0x71   : > { %709 = vmatpush2.bf16.msra.mxu0 %v1152_v62 }
  0x72   : > { %710 = vmatprep.subr.bf16.mxu0 %v1153_v63 }
  0x75   : > { %711 = vmatpush2.bf16.msra.mxu0 %v1155_v0 }
  0x76   : > { %712 = vmatprep.subr.bf16.mxu0 %v1156_v1 }
  0x79   : > { %713 = vmatpush2.bf16.msra.mxu0 %v1158_v2 }
  0x7c   : > { %715 = vmatmul.mubr.bf16.vlgmr.msra.gmra.mxu0 %v1014_v3 }
 0x13c   : > { %v716_v5 = vpop.f32.mrf.mxu0 }
 0x13d   : > { %v723_v7 = vadd.f32 %v716_v5, %v480_v4 }
 0x13e   : > { %v718_v8 = vpop.f32.mrf.mxu0  ;;  %730 = sbr.rel (%p1048_p13) target bundleno = 356 (0x164), region = 78 }
 0x13f   : > { %v724_v9 = vadd.f32 %v718_v8, %v481_v6  ;;  %725 = vst [vmem:[%s1392_s18] sm:$0xff] %v723_v7 }
 0x140   : > { %v720_v10 = vpop.f32.mrf.mxu0 }
 0x141   : > { %726 = vst [vmem:[%s1392_s18 + $0x8] sm:$0xff] %v724_v9 }
 0x142   : > { %v721_v11 = vpop.f32.mrf.mxu0 }
 0x143   : > { %v735_v12 = vlaneseq  ;;  %v733_v14 = vld [vmem:[%s452_s15] sm:$0x3]  ;;  %v1218_v29 = vmov 1966171168  }
 0x144   : > { %v767_v30 = vunpack.c.l.s4 %v1218_v29 }
 0x145   : > { %v736_v13 = vshrl.u32 %v735_v12, 7  ;;  %vm783_vm0 = vcmp.lt.s32.totalorder %v735_v12, 256 }
 0x146   : > { %v731_v17 = vld [vmem:[%s1392_s18] sm:$0xff]  ;;  %v768_v39 = vunpack.c.0.s8 %v767_v30 }
 0x147   : > { %v737_v15 = vsub.s32 0, %v736_v13  ;;  %v741_v16 = vsub.s32 1, %v736_v13 }
 0x148   : > { %v732_v18 = vld [vmem:[%s1392_s18 + $0x8] sm:$0xff]  ;;  %v771_v48 = vsub.s32 %v768_v39, %v736_v13 }
 0x149   : > { %v738_v19 = vrot.slane %v733_v14, %v737_v15  ;;  %v742_v20 = vrot.slane %v733_v14, %v741_v16 }
 0x14b   : > { %v745_v21 = vadd.f32 %v738_v19, %v731_v17  ;;  %v746_v22 = vadd.f32 %v742_v20, %v732_v18 }
 0x14d   : > { %v747_v23 = vmax.f32 %v745_v21, 0.0  ;;  %v748_v24 = vmax.f32 %v746_v22, 0.0 }
 0x14f   : > { %749 = vst [vmem:[%s1392_s18] sm:$0xff] %v747_v23  ;;  %v751_v25 = vrot.slane %v747_v23, 4  ;;  %v757_v26 = vrot.slane %v748_v24, 4  ;;  %v787_v27 = vmul.f32 %v747_v23, %v747_v23  ;;  %v788_v28 = vmul.f32 %v748_v24, %v748_v24  ;;  %750 = vst [vmem:[%s1392_s18 + $0x8] sm:$0xff] %v748_v24 }
 0x151   : > { %v752_v31 = vadd.f32 %v751_v25, %v747_v23  ;;  %v789_v32 = vrot.slane %v787_v27, 4  ;;  %v758_v33 = vadd.f32 %v757_v26, %v748_v24  ;;  %v795_v34 = vrot.slane %v788_v28, 4 }
 0x153   : > { %v753_v35 = vrot.slane %v752_v31, 2  ;;  %v759_v36 = vrot.slane %v758_v33, 2  ;;  %v790_v37 = vadd.f32 %v789_v32, %v787_v27  ;;  %v796_v38 = vadd.f32 %v795_v34, %v788_v28 }
 0x155   : > { %v754_v40 = vadd.f32 %v753_v35, %v752_v31  ;;  %v760_v41 = vadd.f32 %v759_v36, %v758_v33  ;;  %v791_v42 = vrot.slane %v790_v37, 2  ;;  %v797_v43 = vrot.slane %v796_v38, 2 }
 0x157   : > { %v755_v44 = vrot.slane %v754_v40, 1  ;;  %v761_v45 = vrot.slane %v760_v41, 1  ;;  %v792_v46 = vadd.f32 %v791_v42, %v790_v37  ;;  %v798_v47 = vadd.f32 %v797_v43, %v796_v38 }
 0x159   : > { %v756_v49 = vadd.f32 %v755_v44, %v754_v40  ;;  %v762_v50 = vadd.f32 %v761_v45, %v760_v41  ;;  %v793_v51 = vrot.slane %v792_v46, 1  ;;  %v799_v52 = vrot.slane %v798_v47, 1 }
 0x15b   : > { %v765_v53 = vcombine.low %v756_v49, %v762_v50  ;;  %v794_v54 = vadd.f32 %v793_v51, %v792_v46  ;;  %v800_v55 = vadd.f32 %v799_v52, %v798_v47 }
 0x15d   : > { %v772_v56 = vrot.slane %v765_v53, %v771_v48  ;;  %v803_v57 = vcombine.low %v794_v54, %v800_v55 }
 0x15f   : > { %v779_v58 = vrot.slane %v772_v56, %v771_v48  ;;  %v810_v59 = vrot.slane %v803_v57, %v771_v48 }
 0x161   : > { %785 = vst.msk [vmem:[%s1397_s12] ss:$8 sm:$0x3] %vm783_vm0, %v779_v58  ;;  %v817_v60 = vrot.slane %v810_v59, %v771_v48 }
 0x163   : > { %1049 = vst.msk [vmem:[%s1397_s12 + $0x1] ss:$8 sm:$0x3] %vm783_vm0, %v817_v60 }
 0x164 PF: > { %s15_s21 = sadd.s32 1, %s1215_s21   ;;  %s1479_s15 = smov %s1195_s16 }
 0x165   : > { %p12_p0 = scmp.ge.s32.totalorder %s15_s21, 74   ;;  %s1480_s16 = smov %s1295_s28 }
 0x166   : > { %s1481_s17 = smov %s1207_s19  ;;  %s1482_s18 = smov %s1211_s20 }
 0x167   : > { %s1483_s19 = smov %s1486_s22  ;;  %s1484_s20 = smov %s1490_s23 }
 0x168   :  { %14 = sbr.rel (!%p12_p0) target bundleno = 4 (0x4), region = 132 }

// kernel: encoder_forward.27
= control target key start
LH: loop header
LB: loop body
LE: loop exit
PB: predicated region body
PF: predicated region fallthrough
CT: control target
= control target key end

     0   :  { %s1021_s15 = smov 0   ;;  %s1023_s16 = smov 0   ;;  %s1136_s0 = inlined_call_operand.vmem [shape: bf16[8,4608], index: 0, kind: input, shape index: {}]   ;;  %s1137_s1 = inlined_call_operand.vmem [shape: bf16[4608,256], index: 1, kind: input, shape index: {}]   ;;  %s1138_s2 = inlined_call_operand.vmem [shape: f32[1,256], index: 2, kind: input, shape index: {}]   ;;  %s1139_s3 = inlined_call_operand.vmem [shape: f32[8,256], index: 3, kind: output, shape index: {0}]   ;;  %s1140_s4 = inlined_call_operand.vmem [shape: f32[8,256], index: 4, kind: output, shape index: {1}]  }
   0x1   :  { %s1025_s17 = smov 0  }
   0x2 LB: > { %s27_s18 = sadd.s32 1, %s988_s16  ;;  %p844_p0 = scmp.ge.s32.totalorder %s992_s17, 1  ;;  %s992_s17 = sphi %s1025_s17, %s15_s17   ;;  %s988_s16 = sphi %s1023_s16, %s1142_s16   ;;  %s984_s15 = sphi %s1021_s15, %s1141_s15  }
   0x3   : > { %p28_p1 = scmp.ge.s32.totalorder %s27_s18, 18  ;;  %p224_p2 = scmp.lt.s32.totalorder %s992_s17, 19 }
   0x5   : > { %s1144_s18 = smov (%p28_p1, %s27_s18), 0  ;;  %p225_p3 = pnand %p844_p0, %p224_p2 }
   0x6   : > { %s845_s19 = sshll.u32 (!%p225_p3), %s984_s15, 1  ;;  %s847_s20 = sshll.u32 (!%p225_p3), %s984_s15, 5 }
   0x7   : > { %228 = sbr.rel (%p225_p3) target bundleno = 319 (0x13f), region = 32  ;;  %p284_p4 = scmp.lt.s32.totalorder (!%p225_p3), %s845_s19, 35 }
   0x8   : > { %p293_p5 = scmp.lt.s32.totalorder (!%p225_p3), %s847_s20, 575  ;;  %p850_p6 = scmp.ne.s32.totalorder (!%p225_p3), %s984_s15, 0 }
   0xc   : > { %s1146_s19 = smov (!%p284_p4, %s845_s19), 35  ;;  %s1148_s20 = smov (!%p293_p5, %s847_s20), 575 }
   0xd   : > { %s846_s21 = sshll.u32 %s1146_s19, 2  ;;  %s893_s25 = sshll.u32 %s1148_s20, 3 }
   0xe   : > { %s1046_s24 = scalar_lea.vmem %s1136_s0, %s846_s21  ;;  %s1051_s28 = scalar_lea.vmem %s1137_s1, %s893_s25 }
   0xf   : > { %331 = sbr.rel (%p850_p6) target bundleno = 22 (0x16), region = 36 }
  0x14   : > { %v994_v0 = vmov 0.0  }
  0x15   : > { %332 = vst [vmem:[%s1139_s3] sm:$0xff] %v994_v0  ;;  %333 = vst [vmem:[%s1139_s3 + $0x8] sm:$0xff] %v994_v0 }
  0x16 PF: > { %v920_v1 = vld [vmem:[%s1051_s28 + $0x74] ss:$8 sps:$4 sm:$0xff]   ;;  %v922_v2 = vld [vmem:[%s1051_s28 + $0x70] ss:$8 sps:$4 sm:$0xff]   ;;  %v923_v3 = vld [vmem:[%s1051_s28 + $0x64] ss:$8 sps:$4 sm:$0xff]  }
  0x17   : > { %536 = vmatprep.subr.bf16.mxu0 %v920_v1  ;;  %v925_v4 = vld [vmem:[%s1051_s28 + $0x60] ss:$8 sps:$4 sm:$0xff]   ;;  %v926_v5 = vld [vmem:[%s1051_s28 + $0x54] ss:$8 sps:$4 sm:$0xff]   ;;  %v928_v6 = vld [vmem:[%s1051_s28 + $0x50] ss:$8 sps:$4 sm:$0xff]  }
  0x18   : > { %537 = vmatpush1.bf16.msra.mxu0 %v922_v2  ;;  %v929_v7 = vld [vmem:[%s1051_s28 + $0x44] ss:$8 sps:$4 sm:$0xff]   ;;  %v931_v8 = vld [vmem:[%s1051_s28 + $0x40] ss:$8 sps:$4 sm:$0xff]   ;;  %v932_v9 = vld [vmem:[%s1051_s28 + $0x34] ss:$8 sps:$4 sm:$0xff]  }
  0x19   : > { %538 = vmatprep.subr.bf16.mxu0 %v923_v3  ;;  %v934_v10 = vld [vmem:[%s1051_s28 + $0x30] ss:$8 sps:$4 sm:$0xff]   ;;  %v935_v11 = vld [vmem:[%s1051_s28 + $0x24] ss:$8 sps:$4 sm:$0xff]   ;;  %v937_v12 = vld [vmem:[%s1051_s28 + $0x20] ss:$8 sps:$4 sm:$0xff]  }
  0x1a   : > { %v938_v13 = vld [vmem:[%s1051_s28 + $0x14] ss:$8 sps:$4 sm:$0xff]   ;;  %v336_v14 = vld [vmem:[%s1046_s24] sm:$0xff]  ;;  %v940_v16 = vld [vmem:[%s1051_s28 + $0x10] ss:$8 sps:$4 sm:$0xff]   ;;  %p885_p7 = scmp.ne.s32.totalorder %s984_s15, 17 }
  0x1b   : > { %v852_v15 = vcombine.high %v336_v14, %v336_v14  ;;  %v941_v17 = vld [vmem:[%s1051_s28 + $0x4] ss:$8 sps:$4 sm:$0xff]   ;;  %v943_v18 = vld [vmem:[%s1051_s28] ss:$8 sps:$4 sm:$0xff]   ;;  %v944_v19 = vld [vmem:[%s1051_s28 + $0xf4] ss:$8 sps:$4 sm:$0xff]   ;;  %v851_v35 = vcombine.low %v336_v14, %v336_v14 }
  0x1c   : > { %539 = vmatpush1.bf16.msra.mxu0 %v925_v4  ;;  %v946_v20 = vld [vmem:[%s1051_s28 + $0xf0] ss:$8 sps:$4 sm:$0xff]   ;;  %v947_v21 = vld [vmem:[%s1051_s28 + $0xe4] ss:$8 sps:$4 sm:$0xff]   ;;  %v949_v22 = vld [vmem:[%s1051_s28 + $0xe0] ss:$8 sps:$4 sm:$0xff]  }
  0x1d   : > { %540 = vmatprep.subr.bf16.mxu0 %v926_v5  ;;  %568 = vmatprep.mubr.bf16.mxu0 %v852_v15  ;;  %v950_v23 = vld [vmem:[%s1051_s28 + $0xd4] ss:$8 sps:$4 sm:$0xff]   ;;  %v952_v24 = vld [vmem:[%s1051_s28 + $0xd0] ss:$8 sps:$4 sm:$0xff]   ;;  %v953_v25 = vld [vmem:[%s1051_s28 + $0xc4] ss:$8 sps:$4 sm:$0xff]  }
  0x1e   : > { %v955_v26 = vld [vmem:[%s1051_s28 + $0xc0] ss:$8 sps:$4 sm:$0xff]   ;;  %v956_v27 = vld [vmem:[%s1051_s28 + $0xb4] ss:$8 sps:$4 sm:$0xff]   ;;  %v958_v28 = vld [vmem:[%s1051_s28 + $0xb0] ss:$8 sps:$4 sm:$0xff]  }
  0x1f   : > { %v959_v29 = vld [vmem:[%s1051_s28 + $0xa4] ss:$8 sps:$4 sm:$0xff]   ;;  %v961_v30 = vld [vmem:[%s1051_s28 + $0xa0] ss:$8 sps:$4 sm:$0xff]   ;;  %v962_v31 = vld [vmem:[%s1051_s28 + $0x94] ss:$8 sps:$4 sm:$0xff]  }
  0x20   : > { %541 = vmatpush1.bf16.msra.mxu0 %v928_v6  ;;  %v964_v32 = vld [vmem:[%s1051_s28 + $0x90] ss:$8 sps:$4 sm:$0xff]   ;;  %v965_v33 = vld [vmem:[%s1051_s28 + $0x84] ss:$8 sps:$4 sm:$0xff]   ;;  %v967_v34 = vld [vmem:[%s1051_s28 + $0x80] ss:$8 sps:$4 sm:$0xff]  }
  0x21   : > { %542 = vmatprep.subr.bf16.mxu0 %v929_v7  ;;  %v334_v36 = vld [vmem:[%s1139_s3] sm:$0xff]  ;;  %v335_v38 = vld [vmem:[%s1139_s3 + $0x8] sm:$0xff] }
  0x24   : > { %543 = vmatpush1.bf16.msra.mxu0 %v931_v8 }
  0x25   : > { %544 = vmatprep.subr.bf16.mxu0 %v932_v9 }
  0x28   : > { %545 = vmatpush1.bf16.msra.mxu0 %v934_v10 }
  0x29   : > { %546 = vmatprep.subr.bf16.mxu0 %v935_v11 }
  0x2c   : > { %547 = vmatpush1.bf16.msra.mxu0 %v937_v12 }
  0x2d   : > { %548 = vmatprep.subr.bf16.mxu0 %v938_v13 }
  0x30   : > { %549 = vmatpush1.bf16.msra.mxu0 %v940_v16 }
  0x31   : > { %550 = vmatprep.subr.bf16.mxu0 %v941_v17 }
  0x34   : > { %551 = vmatpush1.bf16.msra.mxu0 %v943_v18 }
  0x35   : > { %552 = vmatprep.subr.bf16.mxu0 %v944_v19 }
  0x38   : > { %553 = vmatpush2.bf16.msra.mxu0 %v946_v20 }
  0x39   : > { %554 = vmatprep.subr.bf16.mxu0 %v947_v21 }
  0x3c   : > { %555 = vmatpush2.bf16.msra.mxu0 %v949_v22 }
  0x3d   : > { %556 = vmatprep.subr.bf16.mxu0 %v950_v23 }
  0x40   : > { %557 = vmatpush2.bf16.msra.mxu0 %v952_v24 }
  0x41   : > { %558 = vmatprep.subr.bf16.mxu0 %v953_v25 }
  0x44   : > { %559 = vmatpush2.bf16.msra.mxu0 %v955_v26 }
  0x45   : > { %560 = vmatprep.subr.bf16.mxu0 %v956_v27 }
  0x48   : > { %561 = vmatpush2.bf16.msra.mxu0 %v958_v28 }
  0x49   : > { %562 = vmatprep.subr.bf16.mxu0 %v959_v29 }
  0x4c   : > { %563 = vmatpush2.bf16.msra.mxu0 %v961_v30 }
  0x4d   : > { %564 = vmatprep.subr.bf16.mxu0 %v962_v31 }
  0x50   : > { %565 = vmatpush2.bf16.msra.mxu0 %v964_v32 }
  0x51   : > { %566 = vmatprep.subr.bf16.mxu0 %v965_v33 }
  0x54   : > { %567 = vmatpush2.bf16.msra.mxu0 %v967_v34 }
  0x57   : > { %569 = vmatmul.mubr.bf16.vlgmr.msra.gmra.mxu0 %v851_v35 }
 0x117   : > { %v570_v37 = vpop.f32.mrf.mxu0 }
 0x118   : > { %v577_v39 = vadd.f32 %v570_v37, %v334_v36 }
 0x119   : > { %v572_v40 = vpop.f32.mrf.mxu0  ;;  %584 = sbr.rel (%p885_p7) target bundleno = 319 (0x13f), region = 40 }
 0x11a   : > { %579 = vst [vmem:[%s1139_s3] sm:$0xff] %v577_v39  ;;  %v578_v41 = vadd.f32 %v572_v40, %v335_v38 }
 0x11b   : > { %v574_v42 = vpop.f32.mrf.mxu0 }
 0x11c   : > { %580 = vst [vmem:[%s1139_s3 + $0x8] sm:$0xff] %v578_v41 }
 0x11d   : > { %v575_v43 = vpop.f32.mrf.mxu0 }
 0x11e   : > { %v589_v44 = vlaneseq  ;;  %v587_v46 = vld [vmem:[%s1138_s2] sm:$0x3]  ;;  %v995_v61 = vmov 1966171168  }
 0x11f   : > { %v621_v62 = vunpack.c.l.s4 %v995_v61 }
 0x120   : > { %v590_v45 = vshrl.u32 %v589_v44, 7  ;;  %vm637_vm0 = vcmp.lt.s32.totalorder %v589_v44, 256 }
 0x121   : > { %v585_v49 = vld [vmem:[%s1139_s3] sm:$0xff]  ;;  %v622_v7 = vunpack.c.0.s8 %v621_v62 }
 0x122   : > { %v591_v47 = vsub.s32 0, %v590_v45  ;;  %v595_v48 = vsub.s32 1, %v590_v45 }
 0x123   : > { %v586_v50 = vld [vmem:[%s1139_s3 + $0x8] sm:$0xff]  ;;  %v625_v16 = vsub.s32 %v622_v7, %v590_v45 }
 0x124   : > { %v592_v51 = vrot.slane %v587_v46, %v591_v47  ;;  %v596_v52 = vrot.slane %v587_v46, %v595_v48 }
 0x126   : > { %v599_v53 = vadd.f32 %v592_v51, %v585_v49  ;;  %v600_v54 = vadd.f32 %v596_v52, %v586_v50 }
 0x128   : > { %v601_v55 = vmax.f32 %v599_v53, 0.0  ;;  %v602_v56 = vmax.f32 %v600_v54, 0.0 }
 0x12a   : > { %603 = vst [vmem:[%s1139_s3] sm:$0xff] %v601_v55  ;;  %v605_v57 = vrot.slane %v601_v55, 4  ;;  %v641_v58 = vmul.f32 %v601_v55, %v601_v55  ;;  %604 = vst [vmem:[%s1139_s3 + $0x8] sm:$0xff] %v602_v56  ;;  %v611_v59 = vrot.slane %v602_v56, 4  ;;  %v642_v60 = vmul.f32 %v602_v56, %v602_v56 }
 0x12c   : > { %v606_v63 = vadd.f32 %v605_v57, %v601_v55  ;;  %v643_v0 = vrot.slane %v641_v58, 4  ;;  %v612_v1 = vadd.f32 %v611_v59, %v602_v56  ;;  %v649_v2 = vrot.slane %v642_v60, 4 }
 0x12e   : > { %v607_v3 = vrot.slane %v606_v63, 2  ;;  %v613_v4 = vrot.slane %v612_v1, 2  ;;  %v644_v5 = vadd.f32 %v643_v0, %v641_v58  ;;  %v650_v6 = vadd.f32 %v649_v2, %v642_v60 }
 0x130   : > { %v608_v8 = vadd.f32 %v607_v3, %v606_v63  ;;  %v614_v9 = vadd.f32 %v613_v4, %v612_v1  ;;  %v645_v10 = vrot.slane %v644_v5, 2  ;;  %v651_v11 = vrot.slane %v650_v6, 2 }
 0x132   : > { %v609_v12 = vrot.slane %v608_v8, 1  ;;  %v615_v13 = vrot.slane %v614_v9, 1  ;;  %v646_v14 = vadd.f32 %v645_v10, %v644_v5  ;;  %v652_v15 = vadd.f32 %v651_v11, %v650_v6 }
 0x134   : > { %v610_v17 = vadd.f32 %v609_v12, %v608_v8  ;;  %v616_v18 = vadd.f32 %v615_v13, %v614_v9  ;;  %v647_v19 = vrot.slane %v646_v14, 1  ;;  %v653_v20 = vrot.slane %v652_v15, 1 }
 0x136   : > { %v619_v21 = vcombine.low %v610_v17, %v616_v18  ;;  %v648_v22 = vadd.f32 %v647_v19, %v646_v14  ;;  %v654_v23 = vadd.f32 %v653_v20, %v652_v15 }
 0x138   : > { %v626_v24 = vrot.slane %v619_v21, %v625_v16  ;;  %v657_v25 = vcombine.low %v648_v22, %v654_v23 }
 0x13a   : > { %v633_v26 = vrot.slane %v626_v24, %v625_v16  ;;  %v664_v27 = vrot.slane %v657_v25, %v625_v16 }
 0x13c   : > { %639 = vst.msk [vmem:[%s1140_s4] ss:$8 sm:$0x3] %vm637_vm0, %v633_v26  ;;  %v671_v28 = vrot.slane %v664_v27, %v625_v16 }
 0x13e   : > { %886 = vst.msk [vmem:[%s1140_s4 + $0x1] ss:$8 sm:$0x3] %vm637_vm0, %v671_v28 }
 0x13f PF: > { %s15_s17 = sadd.s32 1, %s992_s17   ;;  %s1141_s15 = smov %s988_s16 }
 0x140   : > { %p12_p8 = scmp.ge.s32.totalorder %s15_s17, 20   ;;  %s1142_s16 = smov %s1144_s18 }
 0x142   :  { %14 = sbr.rel (!%p12_p8) target bundleno = 2 (0x2), region = 89 }

</bundles_post_ra>
